<compile_context>
chip_gen: v5e
topology: v5e:2x2
jax: 0.10.0
libtpu: 0.0.40
codegen_flags: <defaults>
</compile_context>

<pallas_src>
import math

import jax
import jax.numpy as jnp
from jax.experimental import pallas as pl
from jax.experimental.pallas import tpu as pltpu

# ----------------------------- configuration --------------------------------
B = 8
VIS_IN, VIS_D = 256, 128
AUD_IN, AUD_D = 128, 128
TXT_IN, TXT_D = 128, 256
TOTAL = VIS_D + AUD_D + TXT_D          # 512
FUSION = 256
NUM_HEADS = 8
HEAD_DIM = FUSION // NUM_HEADS         # 32
FF = 512
TEMPORAL_DECAY = 0.1
LN_EPS = 1e-5

# Row layout of the packed 256-lane weight slab (all matrices with 256 columns).
_W256_ROWS = (
    ("tw", TXT_IN),      # text encoder weight            (128, 256)
    ("pwv", VIS_D),      # fusion proj, visual block      (128, 256)
    ("pwa", AUD_D),      # fusion proj, audio block       (128, 256)
    ("pwt", TXT_D),      # fusion proj, text block        (256, 256)
    ("xwv", FUSION),     # cross-modal MHA value weight   (256, 256)
    ("xwo", FUSION),     # cross-modal MHA out weight     (256, 256)
    ("wvf", FUSION),     # shared layer value weight      (256, 256)
    ("wof", FUSION),     # shared layer out weight        (256, 256)
    ("w2", FF),          # shared layer FFN down weight   (512, 256)
)


def _w256_offsets():
    offs, o = {}, 0
    for name, rows in _W256_ROWS:
        offs[name] = (o, o + rows)
        o += rows
    return offs, o


_W256_OFF, _W256_TOTAL = _w256_offsets()   # total rows = 2176 (multiple of 8)


# --------------------------- in-kernel helpers -------------------------------
def _dot(a, b):
    return jnp.dot(a, b, preferred_element_type=jnp.float32)


def _ln(x, g, b, eps=LN_EPS):
    mu = jnp.mean(x, axis=-1, keepdims=True)
    xc = x - mu
    var = jnp.mean(xc * xc, axis=-1, keepdims=True)
    return xc * jax.lax.rsqrt(var + eps) * g + b


# ------------------------------ fused kernel ---------------------------------
def mee_fused_kernel(
    # data
    vis_ref, aud_ref, txt_ref, pe_ref,
    # packed weights
    w256_ref,     # (2176, 256): tw|pwv|pwa|pwt|xwv|xwo|wvf|wof|w2
    w128_ref,     # (384, 128):  vw|aw
    w1_ref,       # (256, 512):  shared-layer FFN up weight
    # packed small vectors
    vec256_ref,   # (13, 256): tb,tg,tbe,pb,xbv,xbo,bvf,bo,b2,g1,be1,g2,be2
    vec128_ref,   # (6, 128):  vb,vg,vbe,ab,ag,abe
    b1_ref,       # (1, 512)
    # outputs
    tau_ref, lvl1_ref, lvl2_ref, lvl3_ref,
):
    def w256(name):
        lo, hi = _W256_OFF[name]
        return w256_ref[lo:hi, :]          # static, 8-aligned slice of the slab

    # -- unpack small-vector slabs (static slices on loaded values; free) -----
    v256 = vec256_ref[...]
    tb, tg, tbe, pb = v256[0:1], v256[1:2], v256[2:3], v256[3:4]
    xbv, xbo = v256[4:5], v256[5:6]
    bvf, bo, b2 = v256[6:7], v256[7:8], v256[8:9]
    g1, be1, g2, be2 = v256[9:10], v256[10:11], v256[11:12], v256[12:13]
    v128 = vec128_ref[...]
    vb, vg, vbe = v128[0:1], v128[1:2], v128[2:3]
    ab, ag, abe = v128[3:4], v128[4:5], v128[5:6]
    b1 = b1_ref[...]

    def layer_s1(x):
        # Post-norm TransformerEncoderLayer (ReLU, eval) acting on a sequence of
        # identical tokens (S==1 or exact replication): softmax over identical
        # keys is uniform, so SA(x) = (x @ Wv + bv) @ Wo + bo exactly.
        sa = _dot(_dot(x, w256("wvf")) + bvf, w256("wof")) + bo
        x = _ln(x + sa, g1, be1)
        h = jnp.maximum(_dot(x, w1_ref[...]) + b1, 0.0)
        return _ln(x + _dot(h, w256("w2")) + b2, g2, be2)

    # ---- Stage A: modality encoders + fused cross-modal projection ----------
    # (the concat over modalities is folded algebraically into per-block matmuls)
    v = _ln(jnp.maximum(_dot(vis_ref[...], w128_ref[0:VIS_IN, :]) + vb, 0.0), vg, vbe)
    a = _ln(jnp.maximum(_dot(aud_ref[...], w128_ref[VIS_IN:VIS_IN + AUD_IN, :]) + ab, 0.0),
            ag, abe)
    t = _ln(jnp.maximum(_dot(txt_ref[...], w256("tw")) + tb, 0.0), tg, tbe)
    fused = _dot(v, w256("pwv")) + _dot(a, w256("pwa")) + _dot(t, w256("pwt")) + pb

    # ---- Stage B: cross-modal self-attention on the single fused token ------
    tau = _dot(_dot(fused, w256("xwv")) + xbv, w256("xwo")) + xbo + pe_ref[...]
    tau_ref[...] = tau

    # ---- Stages C/D/E: transformer1/2/3 (2 shared layers each) --------------
    # The x5 repeats before transformer2/3 are exact copies with no per-position
    # encoding added, so every layer collapses to the S==1 path and the sequence
    # means equal the single token.
    e1 = layer_s1(layer_s1(tau))
    lvl1_ref[...] = e1
    e2 = layer_s1(layer_s1(e1))
    lvl2_ref[...] = e2
    e3 = layer_s1(layer_s1(e2))
    lvl3_ref[...] = e3


# ------------------------------ model glue -----------------------------------
def temporal_position_encoding(seq_len, d, decay_rate, elapsed_time):
    position = jnp.arange(seq_len, dtype=jnp.float32)[:, None]
    div_term = jnp.exp(jnp.arange(0, d, 2, dtype=jnp.float32) * (-math.log(10000.0) / d))
    pe = jnp.zeros((seq_len, d), jnp.float32)
    pe = pe.at[:, 0::2].set(jnp.sin(position * div_term))
    pe = pe.at[:, 1::2].set(jnp.cos(position * div_term))
    pe = pe * math.exp(-decay_rate * elapsed_time)
    return pe[None]                               # (1, S, D)


def pack_params(params):
    """One-time weight preparation (call OUTSIDE the jitted forward)."""
    vw, vb, vg, vbe = params["vis"]
    aw, ab, ag, abe = params["aud"]
    tw, tb, tg, tbe = params["txt"]
    pw, pb = params["proj_w"], params["proj_b"]
    xa, lp = params["xattn"], params["layer"]
    pwv, pwa, pwt = pw[:VIS_D], pw[VIS_D:VIS_D + AUD_D], pw[VIS_D + AUD_D:]

    w256 = jnp.concatenate(
        [tw, pwv, pwa, pwt, xa["wv"], xa["wo"], lp["wv"], lp["wo"], lp["w2"]], axis=0)
    assert w256.shape == (_W256_TOTAL, FUSION)
    w128 = jnp.concatenate([vw, aw], axis=0)                          # (384, 128)
    vec256 = jnp.concatenate(
        [tb, tg, tbe, pb, xa["bv"], xa["bo"], lp["bv"], lp["bo"], lp["b2"],
         lp["g1"], lp["beta1"], lp["g2"], lp["beta2"]], axis=0)       # (13, 256)
    vec128 = jnp.concatenate([vb, vg, vbe, ab, ag, abe], axis=0)      # (6, 128)
    return dict(w256=w256, w128=w128, w1=lp["w1"], b1=lp["b1"],
                vec256=vec256, vec128=vec128)


def forward(packed, visual, audio, text, elapsed_time=0.0):
    pe = temporal_position_encoding(1, FUSION, TEMPORAL_DECAY, elapsed_time)[0]  # (1, 256)
    bsz = visual.shape[0]
    out_shape = tuple(jax.ShapeDtypeStruct((bsz, FUSION), jnp.float32) for _ in range(4))
    tau, lvl1, lvl2, lvl3 = pl.pallas_call(
        mee_fused_kernel,
        out_shape=out_shape,
        # working set ~3.2 MB; 16 MiB leaves headroom and fits v7x's 64 MiB VMEM
        compiler_params=pltpu.CompilerParams(vmem_limit_bytes=16 * 1024 * 1024),
    )(visual, audio, text, pe,
      packed["w256"], packed["w128"], packed["w1"],
      packed["vec256"], packed["vec128"], packed["b1"])
    return {
        "episode_embedding": lvl3,
        "level1": lvl1,
        "level2": lvl2,
        "level3": lvl3,
        "temporal_tokens": tau,
    }


# -------------------------- deterministic params ------------------------------
def init_params(key):
    scale = 0.05
    keys = iter(jax.random.split(key, 64))

    def W(din, dout):
        return jax.random.normal(next(keys), (din, dout), jnp.float32) * scale

    def bvec(d):
        return jax.random.normal(next(keys), (1, d), jnp.float32) * scale

    def enc(din, dout):
        return (W(din, dout), bvec(dout),
                jnp.ones((1, dout), jnp.float32), jnp.zeros((1, dout), jnp.float32))

    def mha_params():
        return dict(wq=W(FUSION, FUSION), wk=W(FUSION, FUSION), wv=W(FUSION, FUSION),
                    bq=bvec(FUSION), bk=bvec(FUSION), bv=bvec(FUSION),
                    wo=W(FUSION, FUSION), bo=bvec(FUSION))

    layer = mha_params()
    layer.update(dict(
        w1=W(FUSION, FF), b1=bvec(FF), w2=W(FF, FUSION), b2=bvec(FUSION),
        g1=jnp.ones((1, FUSION), jnp.float32), beta1=jnp.zeros((1, FUSION), jnp.float32),
        g2=jnp.ones((1, FUSION), jnp.float32), beta2=jnp.zeros((1, FUSION), jnp.float32)))

    return dict(vis=enc(VIS_IN, VIS_D), aud=enc(AUD_IN, AUD_D), txt=enc(TXT_IN, TXT_D),
                proj_w=W(TOTAL, FUSION), proj_b=bvec(FUSION),
                xattn=mha_params(), layer=layer)


# ------------------------ pure-JAX reference (check) ---------------------------
# The reference runs the FULL attention path (tiled S=5 / S=25 sequences, all
# heads, real softmax), so it independently validates the replicated-token
# collapse used inside the kernel.
_HI = jax.lax.Precision.HIGHEST


def _rdot(a, b):
    return jnp.dot(a, b, precision=_HI)


def _ref_ln(x, g, b, eps=LN_EPS):
    mu = x.mean(-1, keepdims=True)
    var = ((x - mu) ** 2).mean(-1, keepdims=True)
    return (x - mu) * jax.lax.rsqrt(var + eps) * g + b


def _ref_mha(x, p):
    Bx, S, D = x.shape
    hd = D // NUM_HEADS

    def proj(w, b):
        return jnp.einsum("bsd,de->bse", x, w, precision=_HI) + b

    q = proj(p["wq"], p["bq"]).reshape(Bx, S, NUM_HEADS, hd)
    k = proj(p["wk"], p["bk"]).reshape(Bx, S, NUM_HEADS, hd)
    v = proj(p["wv"], p["bv"]).reshape(Bx, S, NUM_HEADS, hd)
    s = jnp.einsum("bqhd,bkhd->bhqk", q, k, precision=_HI) / math.sqrt(hd)
    a = jax.nn.softmax(s, axis=-1)
    ctx = jnp.einsum("bhqk,bkhd->bqhd", a, v, precision=_HI).reshape(Bx, S, D)
    return jnp.einsum("bsd,de->bse", ctx, p["wo"], precision=_HI) + p["bo"]


def _ref_layer(x, p):
    x = _ref_ln(x + _ref_mha(x, p), p["g1"], p["beta1"])
    h = jnp.maximum(jnp.einsum("bsd,df->bsf", x, p["w1"], precision=_HI) + p["b1"], 0.0)
    ff = jnp.einsum("bsf,fd->bsd", h, p["w2"], precision=_HI) + p["b2"]
    return _ref_ln(x + ff, p["g2"], p["beta2"])


def ref_forward(params, visual, audio, text, elapsed_time=0.0):
    def enc(x, pr):
        w, b, g, beta = pr
        return _ref_ln(jnp.maximum(_rdot(x, w) + b, 0.0), g, beta)

    v, a, t = enc(visual, params["vis"]), enc(audio, params["aud"]), enc(text, params["txt"])
    fused = _rdot(jnp.concatenate([v, a, t], -1), params["proj_w"]) + params["proj_b"]
    fused = fused[:, None, :]
    tau = _ref_mha(fused, params["xattn"])
    tau = tau + temporal_position_encoding(1, FUSION, TEMPORAL_DECAY, elapsed_time)
    lp = params["layer"]
    e1 = _ref_layer(_ref_layer(tau, lp), lp)
    e2 = _ref_layer(_ref_layer(jnp.tile(e1, (1, 5, 1)), lp), lp)
    e3 = _ref_layer(_ref_layer(jnp.tile(e2, (1, 5, 1)), lp), lp)
    lvl3 = e3.mean(1)
    return {"episode_embedding": lvl3, "level1": e1[:, 0, :], "level2": e2.mean(1),
            "level3": lvl3, "temporal_tokens": tau[:, 0, :]}


# --------------------------------- main ---------------------------------------
if __name__ == "__main__":
    key = jax.random.PRNGKey(0)
    kv, ka, kt, kp = jax.random.split(key, 4)
    visual = jax.random.normal(kv, (B, VIS_IN), jnp.float32)
    audio = jax.random.normal(ka, (B, AUD_IN), jnp.float32)
    text = jax.random.normal(kt, (B, TXT_IN), jnp.float32)
    params = init_params(kp)
    packed = pack_params(params)          # one-time weight prep, outside jit

    out = jax.jit(forward)(packed, visual, audio, text)
    out = jax.block_until_ready(out)

    ref = jax.block_until_ready(ref_forward(params, visual, audio, text))
    for name in out:
        if not bool(jnp.allclose(out[name], ref[name], atol=5e-3, rtol=5e-3)):
            raise AssertionError(f"mismatch vs reference for output '{name}'")

    print("KERNEL_OK")
</pallas_src>

<mosaic_0001>
module attributes {stable_mosaic.version = 11 : i64} {
  func.func @mee_fused_kernel(%arg0: memref<8x256xf32, #tpu.memory_space<vmem>>, %arg1: memref<8x128xf32, #tpu.memory_space<vmem>>, %arg2: memref<8x128xf32, #tpu.memory_space<vmem>>, %arg3: memref<1x256xf32, #tpu.memory_space<vmem>>, %arg4: memref<2176x256xf32, #tpu.memory_space<vmem>>, %arg5: memref<384x128xf32, #tpu.memory_space<vmem>>, %arg6: memref<256x512xf32, #tpu.memory_space<vmem>>, %arg7: memref<13x256xf32, #tpu.memory_space<vmem>>, %arg8: memref<6x128xf32, #tpu.memory_space<vmem>>, %arg9: memref<1x512xf32, #tpu.memory_space<vmem>>, %arg10: memref<8x256xf32, #tpu.memory_space<vmem>>, %arg11: memref<8x256xf32, #tpu.memory_space<vmem>>, %arg12: memref<8x256xf32, #tpu.memory_space<vmem>>, %arg13: memref<8x256xf32, #tpu.memory_space<vmem>>) attributes {dimension_semantics = [], scalar_prefetch = 0 : i64, scratch_operands = 0 : i64, tpu.core_type = #tpu.core_type<tc>} {
    %c0 = arith.constant 0 : index
    %c0_0 = arith.constant 0 : index
    %0 = vector.load %arg7[%c0, %c0_0] : memref<13x256xf32, #tpu.memory_space<vmem>>, vector<13x256xf32>
    %1 = vector.extract_strided_slice %0 {offsets = [0, 0], sizes = [1, 256], strides = [1, 1]} : vector<13x256xf32> to vector<1x256xf32>
    %2 = vector.extract_strided_slice %0 {offsets = [1, 0], sizes = [1, 256], strides = [1, 1]} : vector<13x256xf32> to vector<1x256xf32>
    %3 = vector.extract_strided_slice %0 {offsets = [2, 0], sizes = [1, 256], strides = [1, 1]} : vector<13x256xf32> to vector<1x256xf32>
    %4 = vector.extract_strided_slice %0 {offsets = [3, 0], sizes = [1, 256], strides = [1, 1]} : vector<13x256xf32> to vector<1x256xf32>
    %5 = vector.extract_strided_slice %0 {offsets = [4, 0], sizes = [1, 256], strides = [1, 1]} : vector<13x256xf32> to vector<1x256xf32>
    %6 = vector.extract_strided_slice %0 {offsets = [5, 0], sizes = [1, 256], strides = [1, 1]} : vector<13x256xf32> to vector<1x256xf32>
    %7 = vector.extract_strided_slice %0 {offsets = [6, 0], sizes = [1, 256], strides = [1, 1]} : vector<13x256xf32> to vector<1x256xf32>
    %8 = vector.extract_strided_slice %0 {offsets = [7, 0], sizes = [1, 256], strides = [1, 1]} : vector<13x256xf32> to vector<1x256xf32>
    %9 = vector.extract_strided_slice %0 {offsets = [8, 0], sizes = [1, 256], strides = [1, 1]} : vector<13x256xf32> to vector<1x256xf32>
    %10 = vector.extract_strided_slice %0 {offsets = [9, 0], sizes = [1, 256], strides = [1, 1]} : vector<13x256xf32> to vector<1x256xf32>
    %11 = vector.extract_strided_slice %0 {offsets = [10, 0], sizes = [1, 256], strides = [1, 1]} : vector<13x256xf32> to vector<1x256xf32>
    %12 = vector.extract_strided_slice %0 {offsets = [11, 0], sizes = [1, 256], strides = [1, 1]} : vector<13x256xf32> to vector<1x256xf32>
    %13 = vector.extract_strided_slice %0 {offsets = [12, 0], sizes = [1, 256], strides = [1, 1]} : vector<13x256xf32> to vector<1x256xf32>
    %c0_1 = arith.constant 0 : index
    %c0_2 = arith.constant 0 : index
    %14 = vector.load %arg8[%c0_1, %c0_2] : memref<6x128xf32, #tpu.memory_space<vmem>>, vector<6x128xf32>
    %15 = vector.extract_strided_slice %14 {offsets = [0, 0], sizes = [1, 128], strides = [1, 1]} : vector<6x128xf32> to vector<1x128xf32>
    %16 = vector.extract_strided_slice %14 {offsets = [1, 0], sizes = [1, 128], strides = [1, 1]} : vector<6x128xf32> to vector<1x128xf32>
    %17 = vector.extract_strided_slice %14 {offsets = [2, 0], sizes = [1, 128], strides = [1, 1]} : vector<6x128xf32> to vector<1x128xf32>
    %18 = vector.extract_strided_slice %14 {offsets = [3, 0], sizes = [1, 128], strides = [1, 1]} : vector<6x128xf32> to vector<1x128xf32>
    %19 = vector.extract_strided_slice %14 {offsets = [4, 0], sizes = [1, 128], strides = [1, 1]} : vector<6x128xf32> to vector<1x128xf32>
    %20 = vector.extract_strided_slice %14 {offsets = [5, 0], sizes = [1, 128], strides = [1, 1]} : vector<6x128xf32> to vector<1x128xf32>
    %c0_3 = arith.constant 0 : index
    %c0_4 = arith.constant 0 : index
    %21 = vector.load %arg9[%c0_3, %c0_4] : memref<1x512xf32, #tpu.memory_space<vmem>>, vector<1x512xf32>
    %c0_5 = arith.constant 0 : index
    %c0_6 = arith.constant 0 : index
    %22 = vector.load %arg0[%c0_5, %c0_6] : memref<8x256xf32, #tpu.memory_space<vmem>>, vector<8x256xf32>
    %c0_7 = arith.constant 0 : index
    %c0_8 = arith.constant 0 : index
    %23 = vector.load %arg5[%c0_7, %c0_8] : memref<384x128xf32, #tpu.memory_space<vmem>>, vector<256x128xf32>
    %cst = arith.constant dense<0.000000e+00> : vector<8x128xf32>
    %24 = tpu.matmul %22, %23, %cst {dimension_numbers = #tpu.dot_dimension_numbers<[1], [0], [0], [1], [0, 0, 1, 1], [], []>} : vector<8x256xf32>, vector<256x128xf32>, vector<8x128xf32> -> vector<8x128xf32>
    %25 = vector.broadcast %15 : vector<1x128xf32> to vector<8x128xf32>
    %26 = arith.addf %24, %25 : vector<8x128xf32>
    %cst_9 = arith.constant 0.000000e+00 : f32
    %27 = vector.broadcast %cst_9 : f32 to vector<8x128xf32>
    %28 = arith.maximumf %26, %27 : vector<8x128xf32>
    %cst_10 = arith.constant dense<0.000000e+00> : vector<8xf32>
    %29 = vector.multi_reduction <add>, %28, %cst_10 [1] : vector<8x128xf32> to vector<8xf32>
    %30 = vector.shape_cast %29 : vector<8xf32> to vector<8x1xf32>
    %cst_11 = arith.constant 1.280000e+02 : f32
    %31 = vector.broadcast %cst_11 : f32 to vector<8x1xf32>
    %32 = arith.divf %30, %31 : vector<8x1xf32>
    %33 = vector.broadcast %32 : vector<8x1xf32> to vector<8x128xf32>
    %34 = arith.subf %28, %33 : vector<8x128xf32>
    %35 = arith.mulf %34, %34 : vector<8x128xf32>
    %cst_12 = arith.constant dense<0.000000e+00> : vector<8xf32>
    %36 = vector.multi_reduction <add>, %35, %cst_12 [1] : vector<8x128xf32> to vector<8xf32>
    %37 = vector.shape_cast %36 : vector<8xf32> to vector<8x1xf32>
    %cst_13 = arith.constant 1.280000e+02 : f32
    %38 = vector.broadcast %cst_13 : f32 to vector<8x1xf32>
    %39 = arith.divf %37, %38 : vector<8x1xf32>
    %cst_14 = arith.constant 9.99999974E-6 : f32
    %40 = vector.broadcast %cst_14 : f32 to vector<8x1xf32>
    %41 = arith.addf %39, %40 : vector<8x1xf32>
    %42 = math.rsqrt %41 : vector<8x1xf32>
    %43 = vector.broadcast %42 : vector<8x1xf32> to vector<8x128xf32>
    %44 = arith.mulf %34, %43 : vector<8x128xf32>
    %45 = vector.broadcast %16 : vector<1x128xf32> to vector<8x128xf32>
    %46 = arith.mulf %44, %45 : vector<8x128xf32>
    %47 = vector.broadcast %17 : vector<1x128xf32> to vector<8x128xf32>
    %48 = arith.addf %46, %47 : vector<8x128xf32>
    %c0_15 = arith.constant 0 : index
    %c0_16 = arith.constant 0 : index
    %49 = vector.load %arg1[%c0_15, %c0_16] : memref<8x128xf32, #tpu.memory_space<vmem>>, vector<8x128xf32>
    %c256 = arith.constant 256 : index
    %c0_17 = arith.constant 0 : index
    %50 = vector.load %arg5[%c256, %c0_17] : memref<384x128xf32, #tpu.memory_space<vmem>>, vector<128x128xf32>
    %cst_18 = arith.constant dense<0.000000e+00> : vector<8x128xf32>
    %51 = tpu.matmul %49, %50, %cst_18 {dimension_numbers = #tpu.dot_dimension_numbers<[1], [0], [0], [1], [0, 0, 1, 1], [], []>} : vector<8x128xf32>, vector<128x128xf32>, vector<8x128xf32> -> vector<8x128xf32>
    %52 = vector.broadcast %18 : vector<1x128xf32> to vector<8x128xf32>
    %53 = arith.addf %51, %52 : vector<8x128xf32>
    %cst_19 = arith.constant 0.000000e+00 : f32
    %54 = vector.broadcast %cst_19 : f32 to vector<8x128xf32>
    %55 = arith.maximumf %53, %54 : vector<8x128xf32>
    %cst_20 = arith.constant dense<0.000000e+00> : vector<8xf32>
    %56 = vector.multi_reduction <add>, %55, %cst_20 [1] : vector<8x128xf32> to vector<8xf32>
    %57 = vector.shape_cast %56 : vector<8xf32> to vector<8x1xf32>
    %cst_21 = arith.constant 1.280000e+02 : f32
    %58 = vector.broadcast %cst_21 : f32 to vector<8x1xf32>
    %59 = arith.divf %57, %58 : vector<8x1xf32>
    %60 = vector.broadcast %59 : vector<8x1xf32> to vector<8x128xf32>
    %61 = arith.subf %55, %60 : vector<8x128xf32>
    %62 = arith.mulf %61, %61 : vector<8x128xf32>
    %cst_22 = arith.constant dense<0.000000e+00> : vector<8xf32>
    %63 = vector.multi_reduction <add>, %62, %cst_22 [1] : vector<8x128xf32> to vector<8xf32>
    %64 = vector.shape_cast %63 : vector<8xf32> to vector<8x1xf32>
    %cst_23 = arith.constant 1.280000e+02 : f32
    %65 = vector.broadcast %cst_23 : f32 to vector<8x1xf32>
    %66 = arith.divf %64, %65 : vector<8x1xf32>
    %cst_24 = arith.constant 9.99999974E-6 : f32
    %67 = vector.broadcast %cst_24 : f32 to vector<8x1xf32>
    %68 = arith.addf %66, %67 : vector<8x1xf32>
    %69 = math.rsqrt %68 : vector<8x1xf32>
    %70 = vector.broadcast %69 : vector<8x1xf32> to vector<8x128xf32>
    %71 = arith.mulf %61, %70 : vector<8x128xf32>
    %72 = vector.broadcast %19 : vector<1x128xf32> to vector<8x128xf32>
    %73 = arith.mulf %71, %72 : vector<8x128xf32>
    %74 = vector.broadcast %20 : vector<1x128xf32> to vector<8x128xf32>
    %75 = arith.addf %73, %74 : vector<8x128xf32>
    %c0_25 = arith.constant 0 : index
    %c0_26 = arith.constant 0 : index
    %76 = vector.load %arg2[%c0_25, %c0_26] : memref<8x128xf32, #tpu.memory_space<vmem>>, vector<8x128xf32>
    %c0_27 = arith.constant 0 : index
    %c0_28 = arith.constant 0 : index
    %77 = vector.load %arg4[%c0_27, %c0_28] : memref<2176x256xf32, #tpu.memory_space<vmem>>, vector<128x256xf32>
    %cst_29 = arith.constant dense<0.000000e+00> : vector<8x256xf32>
    %78 = tpu.matmul %76, %77, %cst_29 {dimension_numbers = #tpu.dot_dimension_numbers<[1], [0], [0], [1], [0, 0, 1, 1], [], []>} : vector<8x128xf32>, vector<128x256xf32>, vector<8x256xf32> -> vector<8x256xf32>
    %79 = vector.broadcast %1 : vector<1x256xf32> to vector<8x256xf32>
    %80 = arith.addf %78, %79 : vector<8x256xf32>
    %cst_30 = arith.constant 0.000000e+00 : f32
    %81 = vector.broadcast %cst_30 : f32 to vector<8x256xf32>
    %82 = arith.maximumf %80, %81 : vector<8x256xf32>
    %cst_31 = arith.constant dense<0.000000e+00> : vector<8xf32>
    %83 = vector.multi_reduction <add>, %82, %cst_31 [1] : vector<8x256xf32> to vector<8xf32>
    %84 = vector.shape_cast %83 : vector<8xf32> to vector<8x1xf32>
    %cst_32 = arith.constant 2.560000e+02 : f32
    %85 = vector.broadcast %cst_32 : f32 to vector<8x1xf32>
    %86 = arith.divf %84, %85 : vector<8x1xf32>
    %87 = vector.broadcast %86 : vector<8x1xf32> to vector<8x256xf32>
    %88 = arith.subf %82, %87 : vector<8x256xf32>
    %89 = arith.mulf %88, %88 : vector<8x256xf32>
    %cst_33 = arith.constant dense<0.000000e+00> : vector<8xf32>
    %90 = vector.multi_reduction <add>, %89, %cst_33 [1] : vector<8x256xf32> to vector<8xf32>
    %91 = vector.shape_cast %90 : vector<8xf32> to vector<8x1xf32>
    %cst_34 = arith.constant 2.560000e+02 : f32
    %92 = vector.broadcast %cst_34 : f32 to vector<8x1xf32>
    %93 = arith.divf %91, %92 : vector<8x1xf32>
    %cst_35 = arith.constant 9.99999974E-6 : f32
    %94 = vector.broadcast %cst_35 : f32 to vector<8x1xf32>
    %95 = arith.addf %93, %94 : vector<8x1xf32>
    %96 = math.rsqrt %95 : vector<8x1xf32>
    %97 = vector.broadcast %96 : vector<8x1xf32> to vector<8x256xf32>
    %98 = arith.mulf %88, %97 : vector<8x256xf32>
    %99 = vector.broadcast %2 : vector<1x256xf32> to vector<8x256xf32>
    %100 = arith.mulf %98, %99 : vector<8x256xf32>
    %101 = vector.broadcast %3 : vector<1x256xf32> to vector<8x256xf32>
    %102 = arith.addf %100, %101 : vector<8x256xf32>
    %c128 = arith.constant 128 : index
    %c0_36 = arith.constant 0 : index
    %103 = vector.load %arg4[%c128, %c0_36] : memref<2176x256xf32, #tpu.memory_space<vmem>>, vector<128x256xf32>
    %cst_37 = arith.constant dense<0.000000e+00> : vector<8x256xf32>
    %104 = tpu.matmul %48, %103, %cst_37 {dimension_numbers = #tpu.dot_dimension_numbers<[1], [0], [0], [1], [0, 0, 1, 1], [], []>} : vector<8x128xf32>, vector<128x256xf32>, vector<8x256xf32> -> vector<8x256xf32>
    %c256_38 = arith.constant 256 : index
    %c0_39 = arith.constant 0 : index
    %105 = vector.load %arg4[%c256_38, %c0_39] : memref<2176x256xf32, #tpu.memory_space<vmem>>, vector<128x256xf32>
    %cst_40 = arith.constant dense<0.000000e+00> : vector<8x256xf32>
    %106 = tpu.matmul %75, %105, %cst_40 {dimension_numbers = #tpu.dot_dimension_numbers<[1], [0], [0], [1], [0, 0, 1, 1], [], []>} : vector<8x128xf32>, vector<128x256xf32>, vector<8x256xf32> -> vector<8x256xf32>
    %107 = arith.addf %104, %106 : vector<8x256xf32>
    %c384 = arith.constant 384 : index
    %c0_41 = arith.constant 0 : index
    %108 = vector.load %arg4[%c384, %c0_41] : memref<2176x256xf32, #tpu.memory_space<vmem>>, vector<256x256xf32>
    %cst_42 = arith.constant dense<0.000000e+00> : vector<8x256xf32>
    %109 = tpu.matmul %102, %108, %cst_42 {dimension_numbers = #tpu.dot_dimension_numbers<[1], [0], [0], [1], [0, 0, 1, 1], [], []>} : vector<8x256xf32>, vector<256x256xf32>, vector<8x256xf32> -> vector<8x256xf32>
    %110 = arith.addf %107, %109 : vector<8x256xf32>
    %111 = vector.broadcast %4 : vector<1x256xf32> to vector<8x256xf32>
    %112 = arith.addf %110, %111 : vector<8x256xf32>
    %c640 = arith.constant 640 : index
    %c0_43 = arith.constant 0 : index
    %113 = vector.load %arg4[%c640, %c0_43] : memref<2176x256xf32, #tpu.memory_space<vmem>>, vector<256x256xf32>
    %cst_44 = arith.constant dense<0.000000e+00> : vector<8x256xf32>
    %114 = tpu.matmul %112, %113, %cst_44 {dimension_numbers = #tpu.dot_dimension_numbers<[1], [0], [0], [1], [0, 0, 1, 1], [], []>} : vector<8x256xf32>, vector<256x256xf32>, vector<8x256xf32> -> vector<8x256xf32>
    %115 = vector.broadcast %5 : vector<1x256xf32> to vector<8x256xf32>
    %116 = arith.addf %114, %115 : vector<8x256xf32>
    %c896 = arith.constant 896 : index
    %c0_45 = arith.constant 0 : index
    %117 = vector.load %arg4[%c896, %c0_45] : memref<2176x256xf32, #tpu.memory_space<vmem>>, vector<256x256xf32>
    %cst_46 = arith.constant dense<0.000000e+00> : vector<8x256xf32>
    %118 = tpu.matmul %116, %117, %cst_46 {dimension_numbers = #tpu.dot_dimension_numbers<[1], [0], [0], [1], [0, 0, 1, 1], [], []>} : vector<8x256xf32>, vector<256x256xf32>, vector<8x256xf32> -> vector<8x256xf32>
    %119 = vector.broadcast %6 : vector<1x256xf32> to vector<8x256xf32>
    %120 = arith.addf %118, %119 : vector<8x256xf32>
    %c0_47 = arith.constant 0 : index
    %c0_48 = arith.constant 0 : index
    %121 = vector.load %arg3[%c0_47, %c0_48] : memref<1x256xf32, #tpu.memory_space<vmem>>, vector<1x256xf32>
    %122 = vector.broadcast %121 : vector<1x256xf32> to vector<8x256xf32>
    %123 = arith.addf %120, %122 : vector<8x256xf32>
    %c0_49 = arith.constant 0 : index
    %c0_50 = arith.constant 0 : index
    %124 = vector.load %arg10[%c0_49, %c0_50] : memref<8x256xf32, #tpu.memory_space<vmem>>, vector<8x256xf32>
    tpu.vector_store %arg10[%c0_49, %c0_50], %123 {strides = array<i32>} : memref<8x256xf32, #tpu.memory_space<vmem>>, vector<8x256xf32>,
    %c1152 = arith.constant 1152 : index
    %c0_51 = arith.constant 0 : index
    %125 = vector.load %arg4[%c1152, %c0_51] : memref<2176x256xf32, #tpu.memory_space<vmem>>, vector<256x256xf32>
    %cst_52 = arith.constant dense<0.000000e+00> : vector<8x256xf32>
    %126 = tpu.matmul %123, %125, %cst_52 {dimension_numbers = #tpu.dot_dimension_numbers<[1], [0], [0], [1], [0, 0, 1, 1], [], []>} : vector<8x256xf32>, vector<256x256xf32>, vector<8x256xf32> -> vector<8x256xf32>
    %127 = vector.broadcast %7 : vector<1x256xf32> to vector<8x256xf32>
    %128 = arith.addf %126, %127 : vector<8x256xf32>
    %c1408 = arith.constant 1408 : index
    %c0_53 = arith.constant 0 : index
    %129 = vector.load %arg4[%c1408, %c0_53] : memref<2176x256xf32, #tpu.memory_space<vmem>>, vector<256x256xf32>
    %cst_54 = arith.constant dense<0.000000e+00> : vector<8x256xf32>
    %130 = tpu.matmul %128, %129, %cst_54 {dimension_numbers = #tpu.dot_dimension_numbers<[1], [0], [0], [1], [0, 0, 1, 1], [], []>} : vector<8x256xf32>, vector<256x256xf32>, vector<8x256xf32> -> vector<8x256xf32>
    %131 = vector.broadcast %8 : vector<1x256xf32> to vector<8x256xf32>
    %132 = arith.addf %130, %131 : vector<8x256xf32>
    %133 = arith.addf %123, %132 : vector<8x256xf32>
    %cst_55 = arith.constant dense<0.000000e+00> : vector<8xf32>
    %134 = vector.multi_reduction <add>, %133, %cst_55 [1] : vector<8x256xf32> to vector<8xf32>
    %135 = vector.shape_cast %134 : vector<8xf32> to vector<8x1xf32>
    %cst_56 = arith.constant 2.560000e+02 : f32
    %136 = vector.broadcast %cst_56 : f32 to vector<8x1xf32>
    %137 = arith.divf %135, %136 : vector<8x1xf32>
    %138 = vector.broadcast %137 : vector<8x1xf32> to vector<8x256xf32>
    %139 = arith.subf %133, %138 : vector<8x256xf32>
    %140 = arith.mulf %139, %139 : vector<8x256xf32>
    %cst_57 = arith.constant dense<0.000000e+00> : vector<8xf32>
    %141 = vector.multi_reduction <add>, %140, %cst_57 [1] : vector<8x256xf32> to vector<8xf32>
    %142 = vector.shape_cast %141 : vector<8xf32> to vector<8x1xf32>
    %cst_58 = arith.constant 2.560000e+02 : f32
    %143 = vector.broadcast %cst_58 : f32 to vector<8x1xf32>
    %144 = arith.divf %142, %143 : vector<8x1xf32>
    %cst_59 = arith.constant 9.99999974E-6 : f32
    %145 = vector.broadcast %cst_59 : f32 to vector<8x1xf32>
    %146 = arith.addf %144, %145 : vector<8x1xf32>
    %147 = math.rsqrt %146 : vector<8x1xf32>
    %148 = vector.broadcast %147 : vector<8x1xf32> to vector<8x256xf32>
    %149 = arith.mulf %139, %148 : vector<8x256xf32>
    %150 = vector.broadcast %10 : vector<1x256xf32> to vector<8x256xf32>
    %151 = arith.mulf %149, %150 : vector<8x256xf32>
    %152 = vector.broadcast %11 : vector<1x256xf32> to vector<8x256xf32>
    %153 = arith.addf %151, %152 : vector<8x256xf32>
    %c0_60 = arith.constant 0 : index
    %c0_61 = arith.constant 0 : index
    %154 = vector.load %arg6[%c0_60, %c0_61] : memref<256x512xf32, #tpu.memory_space<vmem>>, vector<256x512xf32>
    %cst_62 = arith.constant dense<0.000000e+00> : vector<8x512xf32>
    %155 = tpu.matmul %153, %154, %cst_62 {dimension_numbers = #tpu.dot_dimension_numbers<[1], [0], [0], [1], [0, 0, 1, 1], [], []>} : vector<8x256xf32>, vector<256x512xf32>, vector<8x512xf32> -> vector<8x512xf32>
    %156 = vector.broadcast %21 : vector<1x512xf32> to vector<8x512xf32>
    %157 = arith.addf %155, %156 : vector<8x512xf32>
    %cst_63 = arith.constant 0.000000e+00 : f32
    %158 = vector.broadcast %cst_63 : f32 to vector<8x512xf32>
    %159 = arith.maximumf %157, %158 : vector<8x512xf32>
    %c1664 = arith.constant 1664 : index
    %c0_64 = arith.constant 0 : index
    %160 = vector.load %arg4[%c1664, %c0_64] : memref<2176x256xf32, #tpu.memory_space<vmem>>, vector<512x256xf32>
    %cst_65 = arith.constant dense<0.000000e+00> : vector<8x256xf32>
    %161 = tpu.matmul %159, %160, %cst_65 {dimension_numbers = #tpu.dot_dimension_numbers<[1], [0], [0], [1], [0, 0, 1, 1], [], []>} : vector<8x512xf32>, vector<512x256xf32>, vector<8x256xf32> -> vector<8x256xf32>
    %162 = arith.addf %153, %161 : vector<8x256xf32>
    %163 = vector.broadcast %9 : vector<1x256xf32> to vector<8x256xf32>
    %164 = arith.addf %162, %163 : vector<8x256xf32>
    %cst_66 = arith.constant dense<0.000000e+00> : vector<8xf32>
    %165 = vector.multi_reduction <add>, %164, %cst_66 [1] : vector<8x256xf32> to vector<8xf32>
    %166 = vector.shape_cast %165 : vector<8xf32> to vector<8x1xf32>
    %cst_67 = arith.constant 2.560000e+02 : f32
    %167 = vector.broadcast %cst_67 : f32 to vector<8x1xf32>
    %168 = arith.divf %166, %167 : vector<8x1xf32>
    %169 = vector.broadcast %168 : vector<8x1xf32> to vector<8x256xf32>
    %170 = arith.subf %164, %169 : vector<8x256xf32>
    %171 = arith.mulf %170, %170 : vector<8x256xf32>
    %cst_68 = arith.constant dense<0.000000e+00> : vector<8xf32>
    %172 = vector.multi_reduction <add>, %171, %cst_68 [1] : vector<8x256xf32> to vector<8xf32>
    %173 = vector.shape_cast %172 : vector<8xf32> to vector<8x1xf32>
    %cst_69 = arith.constant 2.560000e+02 : f32
    %174 = vector.broadcast %cst_69 : f32 to vector<8x1xf32>
    %175 = arith.divf %173, %174 : vector<8x1xf32>
    %cst_70 = arith.constant 9.99999974E-6 : f32
    %176 = vector.broadcast %cst_70 : f32 to vector<8x1xf32>
    %177 = arith.addf %175, %176 : vector<8x1xf32>
    %178 = math.rsqrt %177 : vector<8x1xf32>
    %179 = vector.broadcast %178 : vector<8x1xf32> to vector<8x256xf32>
    %180 = arith.mulf %170, %179 : vector<8x256xf32>
    %181 = vector.broadcast %12 : vector<1x256xf32> to vector<8x256xf32>
    %182 = arith.mulf %180, %181 : vector<8x256xf32>
    %183 = vector.broadcast %13 : vector<1x256xf32> to vector<8x256xf32>
    %184 = arith.addf %182, %183 : vector<8x256xf32>
    %c1152_71 = arith.constant 1152 : index
    %c0_72 = arith.constant 0 : index
    %185 = vector.load %arg4[%c1152_71, %c0_72] : memref<2176x256xf32, #tpu.memory_space<vmem>>, vector<256x256xf32>
    %cst_73 = arith.constant dense<0.000000e+00> : vector<8x256xf32>
    %186 = tpu.matmul %184, %185, %cst_73 {dimension_numbers = #tpu.dot_dimension_numbers<[1], [0], [0], [1], [0, 0, 1, 1], [], []>} : vector<8x256xf32>, vector<256x256xf32>, vector<8x256xf32> -> vector<8x256xf32>
    %187 = vector.broadcast %7 : vector<1x256xf32> to vector<8x256xf32>
    %188 = arith.addf %186, %187 : vector<8x256xf32>
    %c1408_74 = arith.constant 1408 : index
    %c0_75 = arith.constant 0 : index
    %189 = vector.load %arg4[%c1408_74, %c0_75] : memref<2176x256xf32, #tpu.memory_space<vmem>>, vector<256x256xf32>
    %cst_76 = arith.constant dense<0.000000e+00> : vector<8x256xf32>
    %190 = tpu.matmul %188, %189, %cst_76 {dimension_numbers = #tpu.dot_dimension_numbers<[1], [0], [0], [1], [0, 0, 1, 1], [], []>} : vector<8x256xf32>, vector<256x256xf32>, vector<8x256xf32> -> vector<8x256xf32>
    %191 = vector.broadcast %8 : vector<1x256xf32> to vector<8x256xf32>
    %192 = arith.addf %190, %191 : vector<8x256xf32>
    %193 = arith.addf %184, %192 : vector<8x256xf32>
    %cst_77 = arith.constant dense<0.000000e+00> : vector<8xf32>
    %194 = vector.multi_reduction <add>, %193, %cst_77 [1] : vector<8x256xf32> to vector<8xf32>
    %195 = vector.shape_cast %194 : vector<8xf32> to vector<8x1xf32>
    %cst_78 = arith.constant 2.560000e+02 : f32
    %196 = vector.broadcast %cst_78 : f32 to vector<8x1xf32>
    %197 = arith.divf %195, %196 : vector<8x1xf32>
    %198 = vector.broadcast %197 : vector<8x1xf32> to vector<8x256xf32>
    %199 = arith.subf %193, %198 : vector<8x256xf32>
    %200 = arith.mulf %199, %199 : vector<8x256xf32>
    %cst_79 = arith.constant dense<0.000000e+00> : vector<8xf32>
    %201 = vector.multi_reduction <add>, %200, %cst_79 [1] : vector<8x256xf32> to vector<8xf32>
    %202 = vector.shape_cast %201 : vector<8xf32> to vector<8x1xf32>
    %cst_80 = arith.constant 2.560000e+02 : f32
    %203 = vector.broadcast %cst_80 : f32 to vector<8x1xf32>
    %204 = arith.divf %202, %203 : vector<8x1xf32>
    %cst_81 = arith.constant 9.99999974E-6 : f32
    %205 = vector.broadcast %cst_81 : f32 to vector<8x1xf32>
    %206 = arith.addf %204, %205 : vector<8x1xf32>
    %207 = math.rsqrt %206 : vector<8x1xf32>
    %208 = vector.broadcast %207 : vector<8x1xf32> to vector<8x256xf32>
    %209 = arith.mulf %199, %208 : vector<8x256xf32>
    %210 = vector.broadcast %10 : vector<1x256xf32> to vector<8x256xf32>
    %211 = arith.mulf %209, %210 : vector<8x256xf32>
    %212 = vector.broadcast %11 : vector<1x256xf32> to vector<8x256xf32>
    %213 = arith.addf %211, %212 : vector<8x256xf32>
    %c0_82 = arith.constant 0 : index
    %c0_83 = arith.constant 0 : index
    %214 = vector.load %arg6[%c0_82, %c0_83] : memref<256x512xf32, #tpu.memory_space<vmem>>, vector<256x512xf32>
    %cst_84 = arith.constant dense<0.000000e+00> : vector<8x512xf32>
    %215 = tpu.matmul %213, %214, %cst_84 {dimension_numbers = #tpu.dot_dimension_numbers<[1], [0], [0], [1], [0, 0, 1, 1], [], []>} : vector<8x256xf32>, vector<256x512xf32>, vector<8x512xf32> -> vector<8x512xf32>
    %216 = vector.broadcast %21 : vector<1x512xf32> to vector<8x512xf32>
    %217 = arith.addf %215, %216 : vector<8x512xf32>
    %cst_85 = arith.constant 0.000000e+00 : f32
    %218 = vector.broadcast %cst_85 : f32 to vector<8x512xf32>
    %219 = arith.maximumf %217, %218 : vector<8x512xf32>
    %c1664_86 = arith.constant 1664 : index
    %c0_87 = arith.constant 0 : index
    %220 = vector.load %arg4[%c1664_86, %c0_87] : memref<2176x256xf32, #tpu.memory_space<vmem>>, vector<512x256xf32>
    %cst_88 = arith.constant dense<0.000000e+00> : vector<8x256xf32>
    %221 = tpu.matmul %219, %220, %cst_88 {dimension_numbers = #tpu.dot_dimension_numbers<[1], [0], [0], [1], [0, 0, 1, 1], [], []>} : vector<8x512xf32>, vector<512x256xf32>, vector<8x256xf32> -> vector<8x256xf32>
    %222 = arith.addf %213, %221 : vector<8x256xf32>
    %223 = vector.broadcast %9 : vector<1x256xf32> to vector<8x256xf32>
    %224 = arith.addf %222, %223 : vector<8x256xf32>
    %cst_89 = arith.constant dense<0.000000e+00> : vector<8xf32>
    %225 = vector.multi_reduction <add>, %224, %cst_89 [1] : vector<8x256xf32> to vector<8xf32>
    %226 = vector.shape_cast %225 : vector<8xf32> to vector<8x1xf32>
    %cst_90 = arith.constant 2.560000e+02 : f32
    %227 = vector.broadcast %cst_90 : f32 to vector<8x1xf32>
    %228 = arith.divf %226, %227 : vector<8x1xf32>
    %229 = vector.broadcast %228 : vector<8x1xf32> to vector<8x256xf32>
    %230 = arith.subf %224, %229 : vector<8x256xf32>
    %231 = arith.mulf %230, %230 : vector<8x256xf32>
    %cst_91 = arith.constant dense<0.000000e+00> : vector<8xf32>
    %232 = vector.multi_reduction <add>, %231, %cst_91 [1] : vector<8x256xf32> to vector<8xf32>
    %233 = vector.shape_cast %232 : vector<8xf32> to vector<8x1xf32>
    %cst_92 = arith.constant 2.560000e+02 : f32
    %234 = vector.broadcast %cst_92 : f32 to vector<8x1xf32>
    %235 = arith.divf %233, %234 : vector<8x1xf32>
    %cst_93 = arith.constant 9.99999974E-6 : f32
    %236 = vector.broadcast %cst_93 : f32 to vector<8x1xf32>
    %237 = arith.addf %235, %236 : vector<8x1xf32>
    %238 = math.rsqrt %237 : vector<8x1xf32>
    %239 = vector.broadcast %238 : vector<8x1xf32> to vector<8x256xf32>
    %240 = arith.mulf %230, %239 : vector<8x256xf32>
    %241 = vector.broadcast %12 : vector<1x256xf32> to vector<8x256xf32>
    %242 = arith.mulf %240, %241 : vector<8x256xf32>
    %243 = vector.broadcast %13 : vector<1x256xf32> to vector<8x256xf32>
    %244 = arith.addf %242, %243 : vector<8x256xf32>
    %c0_94 = arith.constant 0 : index
    %c0_95 = arith.constant 0 : index
    %245 = vector.load %arg11[%c0_94, %c0_95] : memref<8x256xf32, #tpu.memory_space<vmem>>, vector<8x256xf32>
    tpu.vector_store %arg11[%c0_94, %c0_95], %244 {strides = array<i32>} : memref<8x256xf32, #tpu.memory_space<vmem>>, vector<8x256xf32>,
    %c1152_96 = arith.constant 1152 : index
    %c0_97 = arith.constant 0 : index
    %246 = vector.load %arg4[%c1152_96, %c0_97] : memref<2176x256xf32, #tpu.memory_space<vmem>>, vector<256x256xf32>
    %cst_98 = arith.constant dense<0.000000e+00> : vector<8x256xf32>
    %247 = tpu.matmul %244, %246, %cst_98 {dimension_numbers = #tpu.dot_dimension_numbers<[1], [0], [0], [1], [0, 0, 1, 1], [], []>} : vector<8x256xf32>, vector<256x256xf32>, vector<8x256xf32> -> vector<8x256xf32>
    %248 = vector.broadcast %7 : vector<1x256xf32> to vector<8x256xf32>
    %249 = arith.addf %247, %248 : vector<8x256xf32>
    %c1408_99 = arith.constant 1408 : index
    %c0_100 = arith.constant 0 : index
    %250 = vector.load %arg4[%c1408_99, %c0_100] : memref<2176x256xf32, #tpu.memory_space<vmem>>, vector<256x256xf32>
    %cst_101 = arith.constant dense<0.000000e+00> : vector<8x256xf32>
    %251 = tpu.matmul %249, %250, %cst_101 {dimension_numbers = #tpu.dot_dimension_numbers<[1], [0], [0], [1], [0, 0, 1, 1], [], []>} : vector<8x256xf32>, vector<256x256xf32>, vector<8x256xf32> -> vector<8x256xf32>
    %252 = vector.broadcast %8 : vector<1x256xf32> to vector<8x256xf32>
    %253 = arith.addf %251, %252 : vector<8x256xf32>
    %254 = arith.addf %244, %253 : vector<8x256xf32>
    %cst_102 = arith.constant dense<0.000000e+00> : vector<8xf32>
    %255 = vector.multi_reduction <add>, %254, %cst_102 [1] : vector<8x256xf32> to vector<8xf32>
    %256 = vector.shape_cast %255 : vector<8xf32> to vector<8x1xf32>
    %cst_103 = arith.constant 2.560000e+02 : f32
    %257 = vector.broadcast %cst_103 : f32 to vector<8x1xf32>
    %258 = arith.divf %256, %257 : vector<8x1xf32>
    %259 = vector.broadcast %258 : vector<8x1xf32> to vector<8x256xf32>
    %260 = arith.subf %254, %259 : vector<8x256xf32>
    %261 = arith.mulf %260, %260 : vector<8x256xf32>
    %cst_104 = arith.constant dense<0.000000e+00> : vector<8xf32>
    %262 = vector.multi_reduction <add>, %261, %cst_104 [1] : vector<8x256xf32> to vector<8xf32>
    %263 = vector.shape_cast %262 : vector<8xf32> to vector<8x1xf32>
    %cst_105 = arith.constant 2.560000e+02 : f32
    %264 = vector.broadcast %cst_105 : f32 to vector<8x1xf32>
    %265 = arith.divf %263, %264 : vector<8x1xf32>
    %cst_106 = arith.constant 9.99999974E-6 : f32
    %266 = vector.broadcast %cst_106 : f32 to vector<8x1xf32>
    %267 = arith.addf %265, %266 : vector<8x1xf32>
    %268 = math.rsqrt %267 : vector<8x1xf32>
    %269 = vector.broadcast %268 : vector<8x1xf32> to vector<8x256xf32>
    %270 = arith.mulf %260, %269 : vector<8x256xf32>
    %271 = vector.broadcast %10 : vector<1x256xf32> to vector<8x256xf32>
    %272 = arith.mulf %270, %271 : vector<8x256xf32>
    %273 = vector.broadcast %11 : vector<1x256xf32> to vector<8x256xf32>
    %274 = arith.addf %272, %273 : vector<8x256xf32>
    %c0_107 = arith.constant 0 : index
    %c0_108 = arith.constant 0 : index
    %275 = vector.load %arg6[%c0_107, %c0_108] : memref<256x512xf32, #tpu.memory_space<vmem>>, vector<256x512xf32>
    %cst_109 = arith.constant dense<0.000000e+00> : vector<8x512xf32>
    %276 = tpu.matmul %274, %275, %cst_109 {dimension_numbers = #tpu.dot_dimension_numbers<[1], [0], [0], [1], [0, 0, 1, 1], [], []>} : vector<8x256xf32>, vector<256x512xf32>, vector<8x512xf32> -> vector<8x512xf32>
    %277 = vector.broadcast %21 : vector<1x512xf32> to vector<8x512xf32>
    %278 = arith.addf %276, %277 : vector<8x512xf32>
    %cst_110 = arith.constant 0.000000e+00 : f32
    %279 = vector.broadcast %cst_110 : f32 to vector<8x512xf32>
    %280 = arith.maximumf %278, %279 : vector<8x512xf32>
    %c1664_111 = arith.constant 1664 : index
    %c0_112 = arith.constant 0 : index
    %281 = vector.load %arg4[%c1664_111, %c0_112] : memref<2176x256xf32, #tpu.memory_space<vmem>>, vector<512x256xf32>
    %cst_113 = arith.constant dense<0.000000e+00> : vector<8x256xf32>
    %282 = tpu.matmul %280, %281, %cst_113 {dimension_numbers = #tpu.dot_dimension_numbers<[1], [0], [0], [1], [0, 0, 1, 1], [], []>} : vector<8x512xf32>, vector<512x256xf32>, vector<8x256xf32> -> vector<8x256xf32>
    %283 = arith.addf %274, %282 : vector<8x256xf32>
    %284 = vector.broadcast %9 : vector<1x256xf32> to vector<8x256xf32>
    %285 = arith.addf %283, %284 : vector<8x256xf32>
    %cst_114 = arith.constant dense<0.000000e+00> : vector<8xf32>
    %286 = vector.multi_reduction <add>, %285, %cst_114 [1] : vector<8x256xf32> to vector<8xf32>
    %287 = vector.shape_cast %286 : vector<8xf32> to vector<8x1xf32>
    %cst_115 = arith.constant 2.560000e+02 : f32
    %288 = vector.broadcast %cst_115 : f32 to vector<8x1xf32>
    %289 = arith.divf %287, %288 : vector<8x1xf32>
    %290 = vector.broadcast %289 : vector<8x1xf32> to vector<8x256xf32>
    %291 = arith.subf %285, %290 : vector<8x256xf32>
    %292 = arith.mulf %291, %291 : vector<8x256xf32>
    %cst_116 = arith.constant dense<0.000000e+00> : vector<8xf32>
    %293 = vector.multi_reduction <add>, %292, %cst_116 [1] : vector<8x256xf32> to vector<8xf32>
    %294 = vector.shape_cast %293 : vector<8xf32> to vector<8x1xf32>
    %cst_117 = arith.constant 2.560000e+02 : f32
    %295 = vector.broadcast %cst_117 : f32 to vector<8x1xf32>
    %296 = arith.divf %294, %295 : vector<8x1xf32>
    %cst_118 = arith.constant 9.99999974E-6 : f32
    %297 = vector.broadcast %cst_118 : f32 to vector<8x1xf32>
    %298 = arith.addf %296, %297 : vector<8x1xf32>
    %299 = math.rsqrt %298 : vector<8x1xf32>
    %300 = vector.broadcast %299 : vector<8x1xf32> to vector<8x256xf32>
    %301 = arith.mulf %291, %300 : vector<8x256xf32>
    %302 = vector.broadcast %12 : vector<1x256xf32> to vector<8x256xf32>
    %303 = arith.mulf %301, %302 : vector<8x256xf32>
    %304 = vector.broadcast %13 : vector<1x256xf32> to vector<8x256xf32>
    %305 = arith.addf %303, %304 : vector<8x256xf32>
    %c1152_119 = arith.constant 1152 : index
    %c0_120 = arith.constant 0 : index
    %306 = vector.load %arg4[%c1152_119, %c0_120] : memref<2176x256xf32, #tpu.memory_space<vmem>>, vector<256x256xf32>
    %cst_121 = arith.constant dense<0.000000e+00> : vector<8x256xf32>
    %307 = tpu.matmul %305, %306, %cst_121 {dimension_numbers = #tpu.dot_dimension_numbers<[1], [0], [0], [1], [0, 0, 1, 1], [], []>} : vector<8x256xf32>, vector<256x256xf32>, vector<8x256xf32> -> vector<8x256xf32>
    %308 = vector.broadcast %7 : vector<1x256xf32> to vector<8x256xf32>
    %309 = arith.addf %307, %308 : vector<8x256xf32>
    %c1408_122 = arith.constant 1408 : index
    %c0_123 = arith.constant 0 : index
    %310 = vector.load %arg4[%c1408_122, %c0_123] : memref<2176x256xf32, #tpu.memory_space<vmem>>, vector<256x256xf32>
    %cst_124 = arith.constant dense<0.000000e+00> : vector<8x256xf32>
    %311 = tpu.matmul %309, %310, %cst_124 {dimension_numbers = #tpu.dot_dimension_numbers<[1], [0], [0], [1], [0, 0, 1, 1], [], []>} : vector<8x256xf32>, vector<256x256xf32>, vector<8x256xf32> -> vector<8x256xf32>
    %312 = vector.broadcast %8 : vector<1x256xf32> to vector<8x256xf32>
    %313 = arith.addf %311, %312 : vector<8x256xf32>
    %314 = arith.addf %305, %313 : vector<8x256xf32>
    %cst_125 = arith.constant dense<0.000000e+00> : vector<8xf32>
    %315 = vector.multi_reduction <add>, %314, %cst_125 [1] : vector<8x256xf32> to vector<8xf32>
    %316 = vector.shape_cast %315 : vector<8xf32> to vector<8x1xf32>
    %cst_126 = arith.constant 2.560000e+02 : f32
    %317 = vector.broadcast %cst_126 : f32 to vector<8x1xf32>
    %318 = arith.divf %316, %317 : vector<8x1xf32>
    %319 = vector.broadcast %318 : vector<8x1xf32> to vector<8x256xf32>
    %320 = arith.subf %314, %319 : vector<8x256xf32>
    %321 = arith.mulf %320, %320 : vector<8x256xf32>
    %cst_127 = arith.constant dense<0.000000e+00> : vector<8xf32>
    %322 = vector.multi_reduction <add>, %321, %cst_127 [1] : vector<8x256xf32> to vector<8xf32>
    %323 = vector.shape_cast %322 : vector<8xf32> to vector<8x1xf32>
    %cst_128 = arith.constant 2.560000e+02 : f32
    %324 = vector.broadcast %cst_128 : f32 to vector<8x1xf32>
    %325 = arith.divf %323, %324 : vector<8x1xf32>
    %cst_129 = arith.constant 9.99999974E-6 : f32
    %326 = vector.broadcast %cst_129 : f32 to vector<8x1xf32>
    %327 = arith.addf %325, %326 : vector<8x1xf32>
    %328 = math.rsqrt %327 : vector<8x1xf32>
    %329 = vector.broadcast %328 : vector<8x1xf32> to vector<8x256xf32>
    %330 = arith.mulf %320, %329 : vector<8x256xf32>
    %331 = vector.broadcast %10 : vector<1x256xf32> to vector<8x256xf32>
    %332 = arith.mulf %330, %331 : vector<8x256xf32>
    %333 = vector.broadcast %11 : vector<1x256xf32> to vector<8x256xf32>
    %334 = arith.addf %332, %333 : vector<8x256xf32>
    %c0_130 = arith.constant 0 : index
    %c0_131 = arith.constant 0 : index
    %335 = vector.load %arg6[%c0_130, %c0_131] : memref<256x512xf32, #tpu.memory_space<vmem>>, vector<256x512xf32>
    %cst_132 = arith.constant dense<0.000000e+00> : vector<8x512xf32>
    %336 = tpu.matmul %334, %335, %cst_132 {dimension_numbers = #tpu.dot_dimension_numbers<[1], [0], [0], [1], [0, 0, 1, 1], [], []>} : vector<8x256xf32>, vector<256x512xf32>, vector<8x512xf32> -> vector<8x512xf32>
    %337 = vector.broadcast %21 : vector<1x512xf32> to vector<8x512xf32>
    %338 = arith.addf %336, %337 : vector<8x512xf32>
    %cst_133 = arith.constant 0.000000e+00 : f32
    %339 = vector.broadcast %cst_133 : f32 to vector<8x512xf32>
    %340 = arith.maximumf %338, %339 : vector<8x512xf32>
    %c1664_134 = arith.constant 1664 : index
    %c0_135 = arith.constant 0 : index
    %341 = vector.load %arg4[%c1664_134, %c0_135] : memref<2176x256xf32, #tpu.memory_space<vmem>>, vector<512x256xf32>
    %cst_136 = arith.constant dense<0.000000e+00> : vector<8x256xf32>
    %342 = tpu.matmul %340, %341, %cst_136 {dimension_numbers = #tpu.dot_dimension_numbers<[1], [0], [0], [1], [0, 0, 1, 1], [], []>} : vector<8x512xf32>, vector<512x256xf32>, vector<8x256xf32> -> vector<8x256xf32>
    %343 = arith.addf %334, %342 : vector<8x256xf32>
    %344 = vector.broadcast %9 : vector<1x256xf32> to vector<8x256xf32>
    %345 = arith.addf %343, %344 : vector<8x256xf32>
    %cst_137 = arith.constant dense<0.000000e+00> : vector<8xf32>
    %346 = vector.multi_reduction <add>, %345, %cst_137 [1] : vector<8x256xf32> to vector<8xf32>
    %347 = vector.shape_cast %346 : vector<8xf32> to vector<8x1xf32>
    %cst_138 = arith.constant 2.560000e+02 : f32
    %348 = vector.broadcast %cst_138 : f32 to vector<8x1xf32>
    %349 = arith.divf %347, %348 : vector<8x1xf32>
    %350 = vector.broadcast %349 : vector<8x1xf32> to vector<8x256xf32>
    %351 = arith.subf %345, %350 : vector<8x256xf32>
    %352 = arith.mulf %351, %351 : vector<8x256xf32>
    %cst_139 = arith.constant dense<0.000000e+00> : vector<8xf32>
    %353 = vector.multi_reduction <add>, %352, %cst_139 [1] : vector<8x256xf32> to vector<8xf32>
    %354 = vector.shape_cast %353 : vector<8xf32> to vector<8x1xf32>
    %cst_140 = arith.constant 2.560000e+02 : f32
    %355 = vector.broadcast %cst_140 : f32 to vector<8x1xf32>
    %356 = arith.divf %354, %355 : vector<8x1xf32>
    %cst_141 = arith.constant 9.99999974E-6 : f32
    %357 = vector.broadcast %cst_141 : f32 to vector<8x1xf32>
    %358 = arith.addf %356, %357 : vector<8x1xf32>
    %359 = math.rsqrt %358 : vector<8x1xf32>
    %360 = vector.broadcast %359 : vector<8x1xf32> to vector<8x256xf32>
    %361 = arith.mulf %351, %360 : vector<8x256xf32>
    %362 = vector.broadcast %12 : vector<1x256xf32> to vector<8x256xf32>
    %363 = arith.mulf %361, %362 : vector<8x256xf32>
    %364 = vector.broadcast %13 : vector<1x256xf32> to vector<8x256xf32>
    %365 = arith.addf %363, %364 : vector<8x256xf32>
    %c0_142 = arith.constant 0 : index
    %c0_143 = arith.constant 0 : index
    %366 = vector.load %arg12[%c0_142, %c0_143] : memref<8x256xf32, #tpu.memory_space<vmem>>, vector<8x256xf32>
    tpu.vector_store %arg12[%c0_142, %c0_143], %365 {strides = array<i32>} : memref<8x256xf32, #tpu.memory_space<vmem>>, vector<8x256xf32>,
    %c1152_144 = arith.constant 1152 : index
    %c0_145 = arith.constant 0 : index
    %367 = vector.load %arg4[%c1152_144, %c0_145] : memref<2176x256xf32, #tpu.memory_space<vmem>>, vector<256x256xf32>
    %cst_146 = arith.constant dense<0.000000e+00> : vector<8x256xf32>
    %368 = tpu.matmul %365, %367, %cst_146 {dimension_numbers = #tpu.dot_dimension_numbers<[1], [0], [0], [1], [0, 0, 1, 1], [], []>} : vector<8x256xf32>, vector<256x256xf32>, vector<8x256xf32> -> vector<8x256xf32>
    %369 = vector.broadcast %7 : vector<1x256xf32> to vector<8x256xf32>
    %370 = arith.addf %368, %369 : vector<8x256xf32>
    %c1408_147 = arith.constant 1408 : index
    %c0_148 = arith.constant 0 : index
    %371 = vector.load %arg4[%c1408_147, %c0_148] : memref<2176x256xf32, #tpu.memory_space<vmem>>, vector<256x256xf32>
    %cst_149 = arith.constant dense<0.000000e+00> : vector<8x256xf32>
    %372 = tpu.matmul %370, %371, %cst_149 {dimension_numbers = #tpu.dot_dimension_numbers<[1], [0], [0], [1], [0, 0, 1, 1], [], []>} : vector<8x256xf32>, vector<256x256xf32>, vector<8x256xf32> -> vector<8x256xf32>
    %373 = vector.broadcast %8 : vector<1x256xf32> to vector<8x256xf32>
    %374 = arith.addf %372, %373 : vector<8x256xf32>
    %375 = arith.addf %365, %374 : vector<8x256xf32>
    %cst_150 = arith.constant dense<0.000000e+00> : vector<8xf32>
    %376 = vector.multi_reduction <add>, %375, %cst_150 [1] : vector<8x256xf32> to vector<8xf32>
    %377 = vector.shape_cast %376 : vector<8xf32> to vector<8x1xf32>
    %cst_151 = arith.constant 2.560000e+02 : f32
    %378 = vector.broadcast %cst_151 : f32 to vector<8x1xf32>
    %379 = arith.divf %377, %378 : vector<8x1xf32>
    %380 = vector.broadcast %379 : vector<8x1xf32> to vector<8x256xf32>
    %381 = arith.subf %375, %380 : vector<8x256xf32>
    %382 = arith.mulf %381, %381 : vector<8x256xf32>
    %cst_152 = arith.constant dense<0.000000e+00> : vector<8xf32>
    %383 = vector.multi_reduction <add>, %382, %cst_152 [1] : vector<8x256xf32> to vector<8xf32>
    %384 = vector.shape_cast %383 : vector<8xf32> to vector<8x1xf32>
    %cst_153 = arith.constant 2.560000e+02 : f32
    %385 = vector.broadcast %cst_153 : f32 to vector<8x1xf32>
    %386 = arith.divf %384, %385 : vector<8x1xf32>
    %cst_154 = arith.constant 9.99999974E-6 : f32
    %387 = vector.broadcast %cst_154 : f32 to vector<8x1xf32>
    %388 = arith.addf %386, %387 : vector<8x1xf32>
    %389 = math.rsqrt %388 : vector<8x1xf32>
    %390 = vector.broadcast %389 : vector<8x1xf32> to vector<8x256xf32>
    %391 = arith.mulf %381, %390 : vector<8x256xf32>
    %392 = vector.broadcast %10 : vector<1x256xf32> to vector<8x256xf32>
    %393 = arith.mulf %391, %392 : vector<8x256xf32>
    %394 = vector.broadcast %11 : vector<1x256xf32> to vector<8x256xf32>
    %395 = arith.addf %393, %394 : vector<8x256xf32>
    %c0_155 = arith.constant 0 : index
    %c0_156 = arith.constant 0 : index
    %396 = vector.load %arg6[%c0_155, %c0_156] : memref<256x512xf32, #tpu.memory_space<vmem>>, vector<256x512xf32>
    %cst_157 = arith.constant dense<0.000000e+00> : vector<8x512xf32>
    %397 = tpu.matmul %395, %396, %cst_157 {dimension_numbers = #tpu.dot_dimension_numbers<[1], [0], [0], [1], [0, 0, 1, 1], [], []>} : vector<8x256xf32>, vector<256x512xf32>, vector<8x512xf32> -> vector<8x512xf32>
    %398 = vector.broadcast %21 : vector<1x512xf32> to vector<8x512xf32>
    %399 = arith.addf %397, %398 : vector<8x512xf32>
    %cst_158 = arith.constant 0.000000e+00 : f32
    %400 = vector.broadcast %cst_158 : f32 to vector<8x512xf32>
    %401 = arith.maximumf %399, %400 : vector<8x512xf32>
    %c1664_159 = arith.constant 1664 : index
    %c0_160 = arith.constant 0 : index
    %402 = vector.load %arg4[%c1664_159, %c0_160] : memref<2176x256xf32, #tpu.memory_space<vmem>>, vector<512x256xf32>
    %cst_161 = arith.constant dense<0.000000e+00> : vector<8x256xf32>
    %403 = tpu.matmul %401, %402, %cst_161 {dimension_numbers = #tpu.dot_dimension_numbers<[1], [0], [0], [1], [0, 0, 1, 1], [], []>} : vector<8x512xf32>, vector<512x256xf32>, vector<8x256xf32> -> vector<8x256xf32>
    %404 = arith.addf %395, %403 : vector<8x256xf32>
    %405 = vector.broadcast %9 : vector<1x256xf32> to vector<8x256xf32>
    %406 = arith.addf %404, %405 : vector<8x256xf32>
    %cst_162 = arith.constant dense<0.000000e+00> : vector<8xf32>
    %407 = vector.multi_reduction <add>, %406, %cst_162 [1] : vector<8x256xf32> to vector<8xf32>
    %408 = vector.shape_cast %407 : vector<8xf32> to vector<8x1xf32>
    %cst_163 = arith.constant 2.560000e+02 : f32
    %409 = vector.broadcast %cst_163 : f32 to vector<8x1xf32>
    %410 = arith.divf %408, %409 : vector<8x1xf32>
    %411 = vector.broadcast %410 : vector<8x1xf32> to vector<8x256xf32>
    %412 = arith.subf %406, %411 : vector<8x256xf32>
    %413 = arith.mulf %412, %412 : vector<8x256xf32>
    %cst_164 = arith.constant dense<0.000000e+00> : vector<8xf32>
    %414 = vector.multi_reduction <add>, %413, %cst_164 [1] : vector<8x256xf32> to vector<8xf32>
    %415 = vector.shape_cast %414 : vector<8xf32> to vector<8x1xf32>
    %cst_165 = arith.constant 2.560000e+02 : f32
    %416 = vector.broadcast %cst_165 : f32 to vector<8x1xf32>
    %417 = arith.divf %415, %416 : vector<8x1xf32>
    %cst_166 = arith.constant 9.99999974E-6 : f32
    %418 = vector.broadcast %cst_166 : f32 to vector<8x1xf32>
    %419 = arith.addf %417, %418 : vector<8x1xf32>
    %420 = math.rsqrt %419 : vector<8x1xf32>
    %421 = vector.broadcast %420 : vector<8x1xf32> to vector<8x256xf32>
    %422 = arith.mulf %412, %421 : vector<8x256xf32>
    %423 = vector.broadcast %12 : vector<1x256xf32> to vector<8x256xf32>
    %424 = arith.mulf %422, %423 : vector<8x256xf32>
    %425 = vector.broadcast %13 : vector<1x256xf32> to vector<8x256xf32>
    %426 = arith.addf %424, %425 : vector<8x256xf32>
    %c1152_167 = arith.constant 1152 : index
    %c0_168 = arith.constant 0 : index
    %427 = vector.load %arg4[%c1152_167, %c0_168] : memref<2176x256xf32, #tpu.memory_space<vmem>>, vector<256x256xf32>
    %cst_169 = arith.constant dense<0.000000e+00> : vector<8x256xf32>
    %428 = tpu.matmul %426, %427, %cst_169 {dimension_numbers = #tpu.dot_dimension_numbers<[1], [0], [0], [1], [0, 0, 1, 1], [], []>} : vector<8x256xf32>, vector<256x256xf32>, vector<8x256xf32> -> vector<8x256xf32>
    %429 = vector.broadcast %7 : vector<1x256xf32> to vector<8x256xf32>
    %430 = arith.addf %428, %429 : vector<8x256xf32>
    %c1408_170 = arith.constant 1408 : index
    %c0_171 = arith.constant 0 : index
    %431 = vector.load %arg4[%c1408_170, %c0_171] : memref<2176x256xf32, #tpu.memory_space<vmem>>, vector<256x256xf32>
    %cst_172 = arith.constant dense<0.000000e+00> : vector<8x256xf32>
    %432 = tpu.matmul %430, %431, %cst_172 {dimension_numbers = #tpu.dot_dimension_numbers<[1], [0], [0], [1], [0, 0, 1, 1], [], []>} : vector<8x256xf32>, vector<256x256xf32>, vector<8x256xf32> -> vector<8x256xf32>
    %433 = vector.broadcast %8 : vector<1x256xf32> to vector<8x256xf32>
    %434 = arith.addf %432, %433 : vector<8x256xf32>
    %435 = arith.addf %426, %434 : vector<8x256xf32>
    %cst_173 = arith.constant dense<0.000000e+00> : vector<8xf32>
    %436 = vector.multi_reduction <add>, %435, %cst_173 [1] : vector<8x256xf32> to vector<8xf32>
    %437 = vector.shape_cast %436 : vector<8xf32> to vector<8x1xf32>
    %cst_174 = arith.constant 2.560000e+02 : f32
    %438 = vector.broadcast %cst_174 : f32 to vector<8x1xf32>
    %439 = arith.divf %437, %438 : vector<8x1xf32>
    %440 = vector.broadcast %439 : vector<8x1xf32> to vector<8x256xf32>
    %441 = arith.subf %435, %440 : vector<8x256xf32>
    %442 = arith.mulf %441, %441 : vector<8x256xf32>
    %cst_175 = arith.constant dense<0.000000e+00> : vector<8xf32>
    %443 = vector.multi_reduction <add>, %442, %cst_175 [1] : vector<8x256xf32> to vector<8xf32>
    %444 = vector.shape_cast %443 : vector<8xf32> to vector<8x1xf32>
    %cst_176 = arith.constant 2.560000e+02 : f32
    %445 = vector.broadcast %cst_176 : f32 to vector<8x1xf32>
    %446 = arith.divf %444, %445 : vector<8x1xf32>
    %cst_177 = arith.constant 9.99999974E-6 : f32
    %447 = vector.broadcast %cst_177 : f32 to vector<8x1xf32>
    %448 = arith.addf %446, %447 : vector<8x1xf32>
    %449 = math.rsqrt %448 : vector<8x1xf32>
    %450 = vector.broadcast %449 : vector<8x1xf32> to vector<8x256xf32>
    %451 = arith.mulf %441, %450 : vector<8x256xf32>
    %452 = vector.broadcast %10 : vector<1x256xf32> to vector<8x256xf32>
    %453 = arith.mulf %451, %452 : vector<8x256xf32>
    %454 = vector.broadcast %11 : vector<1x256xf32> to vector<8x256xf32>
    %455 = arith.addf %453, %454 : vector<8x256xf32>
    %c0_178 = arith.constant 0 : index
    %c0_179 = arith.constant 0 : index
    %456 = vector.load %arg6[%c0_178, %c0_179] : memref<256x512xf32, #tpu.memory_space<vmem>>, vector<256x512xf32>
    %cst_180 = arith.constant dense<0.000000e+00> : vector<8x512xf32>
    %457 = tpu.matmul %455, %456, %cst_180 {dimension_numbers = #tpu.dot_dimension_numbers<[1], [0], [0], [1], [0, 0, 1, 1], [], []>} : vector<8x256xf32>, vector<256x512xf32>, vector<8x512xf32> -> vector<8x512xf32>
    %458 = vector.broadcast %21 : vector<1x512xf32> to vector<8x512xf32>
    %459 = arith.addf %457, %458 : vector<8x512xf32>
    %cst_181 = arith.constant 0.000000e+00 : f32
    %460 = vector.broadcast %cst_181 : f32 to vector<8x512xf32>
    %461 = arith.maximumf %459, %460 : vector<8x512xf32>
    %c1664_182 = arith.constant 1664 : index
    %c0_183 = arith.constant 0 : index
    %462 = vector.load %arg4[%c1664_182, %c0_183] : memref<2176x256xf32, #tpu.memory_space<vmem>>, vector<512x256xf32>
    %cst_184 = arith.constant dense<0.000000e+00> : vector<8x256xf32>
    %463 = tpu.matmul %461, %462, %cst_184 {dimension_numbers = #tpu.dot_dimension_numbers<[1], [0], [0], [1], [0, 0, 1, 1], [], []>} : vector<8x512xf32>, vector<512x256xf32>, vector<8x256xf32> -> vector<8x256xf32>
    %464 = arith.addf %455, %463 : vector<8x256xf32>
    %465 = vector.broadcast %9 : vector<1x256xf32> to vector<8x256xf32>
    %466 = arith.addf %464, %465 : vector<8x256xf32>
    %cst_185 = arith.constant dense<0.000000e+00> : vector<8xf32>
    %467 = vector.multi_reduction <add>, %466, %cst_185 [1] : vector<8x256xf32> to vector<8xf32>
    %468 = vector.shape_cast %467 : vector<8xf32> to vector<8x1xf32>
    %cst_186 = arith.constant 2.560000e+02 : f32
    %469 = vector.broadcast %cst_186 : f32 to vector<8x1xf32>
    %470 = arith.divf %468, %469 : vector<8x1xf32>
    %471 = vector.broadcast %470 : vector<8x1xf32> to vector<8x256xf32>
    %472 = arith.subf %466, %471 : vector<8x256xf32>
    %473 = arith.mulf %472, %472 : vector<8x256xf32>
    %cst_187 = arith.constant dense<0.000000e+00> : vector<8xf32>
    %474 = vector.multi_reduction <add>, %473, %cst_187 [1] : vector<8x256xf32> to vector<8xf32>
    %475 = vector.shape_cast %474 : vector<8xf32> to vector<8x1xf32>
    %cst_188 = arith.constant 2.560000e+02 : f32
    %476 = vector.broadcast %cst_188 : f32 to vector<8x1xf32>
    %477 = arith.divf %475, %476 : vector<8x1xf32>
    %cst_189 = arith.constant 9.99999974E-6 : f32
    %478 = vector.broadcast %cst_189 : f32 to vector<8x1xf32>
    %479 = arith.addf %477, %478 : vector<8x1xf32>
    %480 = math.rsqrt %479 : vector<8x1xf32>
    %481 = vector.broadcast %480 : vector<8x1xf32> to vector<8x256xf32>
    %482 = arith.mulf %472, %481 : vector<8x256xf32>
    %483 = vector.broadcast %12 : vector<1x256xf32> to vector<8x256xf32>
    %484 = arith.mulf %482, %483 : vector<8x256xf32>
    %485 = vector.broadcast %13 : vector<1x256xf32> to vector<8x256xf32>
    %486 = arith.addf %484, %485 : vector<8x256xf32>
    %c0_190 = arith.constant 0 : index
    %c0_191 = arith.constant 0 : index
    %487 = vector.load %arg13[%c0_190, %c0_191] : memref<8x256xf32, #tpu.memory_space<vmem>>, vector<8x256xf32>
    tpu.vector_store %arg13[%c0_190, %c0_191], %486 {strides = array<i32>} : memref<8x256xf32, #tpu.memory_space<vmem>>, vector<8x256xf32>,
    return
  }
}

</mosaic_0001>

<bundles_post_ra>
// kernel: forward.1
= control target key start
LH: loop header
LB: loop body
LE: loop exit
PB: predicated region body
PF: predicated region fallthrough
CT: control target
= control target key end

     0   :  { %19 = vsyncpa [#allocation3], 0  ;;  %s7742_s0 = inlined_call_operand.hbm [shape: f32[8,256], index: 0, kind: input, shape index: {}]   ;;  %s7743_s1 = inlined_call_operand.hbm [shape: f32[8,128], index: 1, kind: input, shape index: {}]   ;;  %s7744_s2 = inlined_call_operand.hbm [shape: f32[8,128], index: 2, kind: input, shape index: {}]   ;;  %s7745_s3 = inlined_call_operand.vmem [shape: f32[1,256], index: 3, kind: input, shape index: {}]   ;;  %s7746_s4 = inlined_call_operand.hbm [shape: f32[2176,256], index: 4, kind: input, shape index: {}]   ;;  %s7747_s5 = inlined_call_operand.hbm [shape: f32[384,128], index: 5, kind: input, shape index: {}]   ;;  %s7748_s6 = inlined_call_operand.hbm [shape: f32[256,512], index: 6, kind: input, shape index: {}]   ;;  %s7749_s7 = inlined_call_operand.hbm [shape: f32[13,256], index: 7, kind: input, shape index: {}]   ;;  %s7750_s8 = inlined_call_operand.hbm [shape: f32[6,128], index: 8, kind: input, shape index: {}]   ;;  %s7751_s9 = inlined_call_operand.hbm [shape: f32[1,512], index: 9, kind: input, shape index: {}]   ;;  %s7752_s10 = inlined_call_operand.hbm [shape: f32[8,256], index: 10, kind: output, shape index: {0}]   ;;  %s7753_s11 = inlined_call_operand.hbm [shape: f32[8,256], index: 11, kind: output, shape index: {1}]   ;;  %s7754_s12 = inlined_call_operand.hbm [shape: f32[8,256], index: 12, kind: output, shape index: {2}]   ;;  %s7755_s13 = inlined_call_operand.vmem [shape: f32[8,256], index: 13, kind: output, shape index: {3}]  }
   0x1   :  { %20 = vsyncpa [#allocation6], 0 }
   0x2   :  { %21 = vsyncpa [#allocation9], 0 }
   0x3   :  { %22 = vsyncpa [#allocation12], 0 }
   0x4   :  { %23 = vsyncpa [#allocation15], 0 }
   0x5   :  { %24 = vsyncpa [#allocation4], 0  ;;  %s42_s27 = sshll.u32 %s7743_s1, 4  ;;  %s43_s27 = int_to_ptr.hbm [resolvable:$true] %s42_s27 }
   0x6   :  { %25 = vsyncpa [#allocation19], 0  ;;  %s7095_s28 = smov [#allocation5]   ;;  %s65_s15 = sshll.u32 %s7746_s4, 4  ;;  %s66_s15 = int_to_ptr.hbm [resolvable:$true] %s65_s15 }
   0x7   :  { %s44_s29 = sshll.u32 %s7095_s28, 4  ;;  %s7096_s16 = smov [#allocation8]   ;;  %s45_s29 = int_to_ptr.vmem [resolvable:$true] %s44_s29 }
   0x8   :  { %47 = dma.hbm_to_vmem [thread:$0]  %s43_s27, 128, %s45_s29, [#allocation6]  }
   0x9   :  { %s67_s17 = sshll.u32 %s7096_s16, 4  ;;  %s7097_s18 = smov 256   ;;  %s68_s17 = int_to_ptr.vmem [resolvable:$true] %s67_s17 }
   0xa   :  { %s7098_s19 = smov 16   ;;  %s91_s21 = sshll.u32 %s7748_s6, 4  ;;  %s92_s21 = int_to_ptr.hbm [resolvable:$true] %s91_s21 }
   0xb   :  { %73 = dma.hbm_to_vmem [thread:$0]  %s66_s15, 69632, %s68_s17, [#allocation9], %s7097_s18, %s7097_s18, %s7098_s19  }
   0xc   :  { %s7099_s22 = smov [#allocation11]   ;;  %s118_s25 = sshll.u32 %s7750_s8, 4  ;;  %s119_s25 = int_to_ptr.hbm [resolvable:$true] %s118_s25 }
   0xd   :  { %s93_s23 = sshll.u32 %s7099_s22, 4  ;;  %s7100_s26 = smov 512   ;;  %s94_s23 = int_to_ptr.vmem [resolvable:$true] %s93_s23 }
   0xe   :  { %s7101_s27 = smov 32   ;;  %s7102_s28 = smov [#allocation14]  }
   0xf   :  { %99 = dma.hbm_to_vmem [thread:$0]  %s92_s21, 16384, %s94_s23, [#allocation12], %s7100_s26, %s7100_s26, %s7101_s27  }
  0x10   :  { %s120_s29 = sshll.u32 %s7102_s28, 4  ;;  %s31_s15 = sshll.u32 %s7742_s0, 4  ;;  %s121_s29 = int_to_ptr.vmem [resolvable:$true] %s120_s29  ;;  %s32_s15 = int_to_ptr.hbm [resolvable:$true] %s31_s15 }
  0x11   :  { %123 = dma.hbm_to_vmem [thread:$0]  %s119_s25, 128, %s121_s29, [#allocation15]  }
  0x12   :  { %s53_s17 = sshll.u32 %s7744_s2, 4  ;;  %s7103_s1 = smov [#allocation2]   ;;  %s54_s17 = int_to_ptr.hbm [resolvable:$true] %s53_s17 }
  0x13   :  { %s33_s20 = sshll.u32 %s7103_s1, 4  ;;  %s7104_s8 = smov [#allocation7]   ;;  %s34_s20 = int_to_ptr.vmem [resolvable:$true] %s33_s20 }
  0x14   :  { %36 = dma.hbm_to_vmem [thread:$0]  %s32_s15, 256, %s34_s20, [#allocation3]  }
  0x15   :  { %s55_s21 = sshll.u32 %s7104_s8, 4  ;;  %s78_s4 = sshll.u32 %s7747_s5, 4  ;;  %s56_s21 = int_to_ptr.vmem [resolvable:$true] %s55_s21  ;;  %s79_s4 = int_to_ptr.hbm [resolvable:$true] %s78_s4 }
  0x16   :  { %58 = dma.hbm_to_vmem [thread:$0]  %s54_s17, 128, %s56_s21, [#allocation6]  }
  0x17   :  { %s7105_s0 = smov [#allocation10]   ;;  %s104_s2 = sshll.u32 %s7749_s7, 4  ;;  %s105_s2 = int_to_ptr.hbm [resolvable:$true] %s104_s2 }
  0x18   :  { %s80_s24 = sshll.u32 %s7105_s0, 4  ;;  %s7106_s27 = smov 128   ;;  %s81_s24 = int_to_ptr.vmem [resolvable:$true] %s80_s24 }
  0x19   :  { %s7107_s28 = smov 8   ;;  %s7108_s29 = smov [#allocation13]  }
  0x1a   :  { %86 = dma.hbm_to_vmem [thread:$0]  %s79_s4, 6144, %s81_s24, [#allocation9], %s7106_s27, %s7106_s27, %s7107_s28  }
  0x1b   :  { %s106_s30 = sshll.u32 %s7108_s29, 4  ;;  %s129_s5 = sshll.u32 %s7751_s9, 4  ;;  %s107_s30 = int_to_ptr.vmem [resolvable:$true] %s106_s30  ;;  %s130_s5 = int_to_ptr.hbm [resolvable:$true] %s129_s5 }
  0x1c   :  { %112 = dma.hbm_to_vmem [thread:$0]  %s105_s2, 512, %s107_s30, [#allocation12], %s7097_s18, %s7097_s18, %s7098_s19  }
  0x1d   :  { %s7109_s6 = smov [#allocation16]  }
  0x1e   :  { %s131_s16 = sshll.u32 %s7109_s6, 4  ;;  %s132_s16 = int_to_ptr.vmem [resolvable:$true] %s131_s16 }
  0x1f   :  { %134 = dma.hbm_to_vmem [thread:$0]  %s130_s5, 64, %s132_s16, [#allocation15]  }
  0x20   :  { %7081 = dma.done.wait [#allocation3], 256  }
  0x21   :  { %7082 = vsyncadd [#allocation3], 4294967040 }
  0x22   :  { %7083 = dma.done.wait [#allocation6], 256  }
  0x23   :  { %7084 = vsyncadd [#allocation6], 4294967040 }
  0x24   :  { %7085 = dma.done.wait [#allocation9], 75776  }
  0x25   :  { %7086 = vsyncadd [#allocation9], 4294891520 }
  0x26   :  { %7087 = dma.done.wait [#allocation12], 16896  }
  0x27   :  { %7088 = vsyncadd [#allocation12], 4294950400 }
  0x28   :  { %7089 = dma.done.wait [#allocation15], 192  }
  0x29   :  { %7090 = vsyncadd [#allocation15], 4294967104  ;;  %v194_v0 = vld [vmem:[#allocation10 + $0x78] sm:$0xff]  ;;  %v193_v1 = vld [vmem:[#allocation10 + $0x70] sm:$0xff]  ;;  %s5547_s1 = sshll.u32 %s7753_s11, 4  ;;  %s5536_s21 = sshll.u32 %s7752_s10, 4  ;;  %s5548_s1 = int_to_ptr.hbm [resolvable:$true] %s5547_s1  ;;  %s5537_s21 = int_to_ptr.hbm [resolvable:$true] %s5536_s21 }
  0x2a   :  { %v210_v2 = vld [vmem:[#allocation10 + $0xf8] sm:$0xff]  ;;  %212 = vmatpush.msra.mxu0 %v194_v0  ;;  %v209_v3 = vld [vmem:[#allocation10 + $0xf0] sm:$0xff]  ;;  %v192_v5 = vld [vmem:[#allocation10 + $0x68] sm:$0xff]  ;;  %s7113_s22 = smov [#allocation17]   ;;  %s7114_s4 = smov [#allocation20]  }
  0x2b   :  { %232 = vmatpush.msra.mxu1 %v210_v2  ;;  %v300_v4 = vld [vmem:[#allocation10 + $0x178] sm:$0xff]  ;;  %v208_v6 = vld [vmem:[#allocation10 + $0xe8] sm:$0xff]  ;;  %v299_v7 = vld [vmem:[#allocation10 + $0x170] sm:$0xff]  ;;  %s5534_s23 = sshll.u32 %s7113_s22, 4  ;;  %s5556_s0 = sshll.u32 %s7114_s4, 4  ;;  %s5535_s23 = int_to_ptr.vmem [resolvable:$true] %s5534_s23  ;;  %s5557_s0 = int_to_ptr.vmem [resolvable:$true] %s5556_s0 }
  0x2c   :  { %302 = vmatpush.msra.mxu2 %v300_v4  ;;  %213 = vmatpush.msra.mxu0 %v193_v1  ;;  %v298_v8 = vld [vmem:[#allocation10 + $0x168] sm:$0xff]  ;;  %v191_v9 = vld [vmem:[#allocation10 + $0x60] sm:$0xff]  ;;  %v190_v12 = vld [vmem:[#allocation10 + $0x58] sm:$0xff]  ;;  %s5558_s26 = sshll.u32 %s7754_s12, 4  ;;  %s5559_s26 = int_to_ptr.hbm [resolvable:$true] %s5558_s26 }
  0x2d   :  { %233 = vmatpush.msra.mxu1 %v209_v3  ;;  %v207_v10 = vld [vmem:[#allocation10 + $0xe0] sm:$0xff]  ;;  %v206_v13 = vld [vmem:[#allocation10 + $0xd8] sm:$0xff]  ;;  %v189_v15 = vld [vmem:[#allocation10 + $0x50] sm:$0xff] }
  0x2e   :  { %303 = vmatpush.msra.mxu2 %v299_v7  ;;  %214 = vmatpush.msra.mxu0 %v192_v5  ;;  %v297_v11 = vld [vmem:[#allocation10 + $0x160] sm:$0xff]  ;;  %v296_v14 = vld [vmem:[#allocation10 + $0x158] sm:$0xff]  ;;  %v205_v16 = vld [vmem:[#allocation10 + $0xd0] sm:$0xff] }
  0x2f   :  { %234 = vmatpush.msra.mxu1 %v208_v6  ;;  %v295_v17 = vld [vmem:[#allocation10 + $0x150] sm:$0xff]  ;;  %v188_v18 = vld [vmem:[#allocation10 + $0x48] sm:$0xff]  ;;  %v187_v21 = vld [vmem:[#allocation10 + $0x40] sm:$0xff] }
  0x30   :  { %304 = vmatpush.msra.mxu2 %v298_v8  ;;  %215 = vmatpush.msra.mxu0 %v191_v9  ;;  %v204_v19 = vld [vmem:[#allocation10 + $0xc8] sm:$0xff]  ;;  %v203_v22 = vld [vmem:[#allocation10 + $0xc0] sm:$0xff]  ;;  %v378_v23 = vld [vmem:[#allocation8 + $0xf0] sm:$0xff] }
  0x31   :  { %235 = vmatpush.msra.mxu1 %v207_v10  ;;  %v294_v20 = vld [vmem:[#allocation10 + $0x148] sm:$0xff]  ;;  %v293_v24 = vld [vmem:[#allocation10 + $0x140] sm:$0xff]  ;;  %v186_v26 = vld [vmem:[#allocation10 + $0x38] sm:$0xff]  ;;  %382 = vmatpush.msra.mxu3 %v378_v23 }
  0x32   :  { %305 = vmatpush.msra.mxu2 %v297_v11  ;;  %216 = vmatpush.msra.mxu0 %v190_v12  ;;  %v376_v25 = vld [vmem:[#allocation8 + $0xe0] sm:$0xff]  ;;  %v202_v27 = vld [vmem:[#allocation10 + $0xb8] sm:$0xff]  ;;  %v374_v29 = vld [vmem:[#allocation8 + $0xd0] sm:$0xff] }
  0x33   :  { %236 = vmatpush.msra.mxu1 %v206_v13  ;;  %v292_v28 = vld [vmem:[#allocation10 + $0x138] sm:$0xff]  ;;  %v185_v30 = vld [vmem:[#allocation10 + $0x30] sm:$0xff]  ;;  %383 = vmatpush.msra.mxu3 %v376_v25  ;;  %v372_v33 = vld [vmem:[#allocation8 + $0xc0] sm:$0xff] }
  0x34   :  { %306 = vmatpush.msra.mxu2 %v296_v14  ;;  %217 = vmatpush.msra.mxu0 %v189_v15  ;;  %v201_v31 = vld [vmem:[#allocation10 + $0xb0] sm:$0xff]  ;;  %v184_v34 = vld [vmem:[#allocation10 + $0x28] sm:$0xff]  ;;  %v183_v38 = vld [vmem:[#allocation10 + $0x20] sm:$0xff] }
  0x35   :  { %237 = vmatpush.msra.mxu1 %v205_v16  ;;  %v291_v32 = vld [vmem:[#allocation10 + $0x130] sm:$0xff]  ;;  %v200_v35 = vld [vmem:[#allocation10 + $0xa8] sm:$0xff]  ;;  %384 = vmatpush.msra.mxu3 %v374_v29  ;;  %v199_v39 = vld [vmem:[#allocation10 + $0xa0] sm:$0xff] }
  0x36   :  { %307 = vmatpush.msra.mxu2 %v295_v17  ;;  %218 = vmatpush.msra.mxu0 %v188_v18  ;;  %v290_v36 = vld [vmem:[#allocation10 + $0x128] sm:$0xff]  ;;  %v370_v37 = vld [vmem:[#allocation8 + $0xb0] sm:$0xff]  ;;  %v289_v40 = vld [vmem:[#allocation10 + $0x120] sm:$0xff] }
  0x37   :  { %238 = vmatpush.msra.mxu1 %v204_v19  ;;  %385 = vmatpush.msra.mxu3 %v372_v33  ;;  %v368_v41 = vld [vmem:[#allocation8 + $0xa0] sm:$0xff]  ;;  %v182_v42 = vld [vmem:[#allocation10 + $0x18] sm:$0xff]  ;;  %v366_v45 = vld [vmem:[#allocation8 + $0x90] sm:$0xff] }
  0x38   :  { %308 = vmatpush.msra.mxu2 %v294_v20  ;;  %219 = vmatpush.msra.mxu0 %v187_v21  ;;  %v198_v43 = vld [vmem:[#allocation10 + $0x98] sm:$0xff]  ;;  %v181_v46 = vld [vmem:[#allocation10 + $0x10] sm:$0xff]  ;;  %v364_v49 = vld [vmem:[#allocation8 + $0x80] sm:$0xff] }
  0x39   :  { %239 = vmatpush.msra.mxu1 %v203_v22  ;;  %386 = vmatpush.msra.mxu3 %v370_v37  ;;  %v288_v44 = vld [vmem:[#allocation10 + $0x118] sm:$0xff]  ;;  %v197_v47 = vld [vmem:[#allocation10 + $0x90] sm:$0xff]  ;;  %v180_v50 = vld [vmem:[#allocation10 + $0x8] sm:$0xff] }
  0x3a   :  { %309 = vmatpush.msra.mxu2 %v293_v24  ;;  %220 = vmatpush.msra.mxu0 %v186_v26  ;;  %v287_v48 = vld [vmem:[#allocation10 + $0x110] sm:$0xff]  ;;  %v196_v51 = vld [vmem:[#allocation10 + $0x88] sm:$0xff]  ;;  %v179_v54 = vld [vmem:[#allocation10] sm:$0xff] }
  0x3b   :  { %240 = vmatpush.msra.mxu1 %v202_v27  ;;  %387 = vmatpush.msra.mxu3 %v368_v41  ;;  %v286_v52 = vld [vmem:[#allocation10 + $0x108] sm:$0xff]  ;;  %v362_v53 = vld [vmem:[#allocation8 + $0x70] sm:$0xff]  ;;  %v195_v55 = vld [vmem:[#allocation10 + $0x80] sm:$0xff] }
  0x3c   :  { %310 = vmatpush.msra.mxu2 %v292_v28  ;;  %221 = vmatpush.msra.mxu0 %v185_v30  ;;  %v177_v56 = vld [vmem:[#allocation2] sm:$0xff]  ;;  %v178_v57 = vld [vmem:[#allocation2 + $0x8] sm:$0xff]  ;;  %v379_v58 = vld [vmem:[#allocation8 + $0xf8] sm:$0xff] }
  0x3d   :  { %241 = vmatpush.msra.mxu1 %v201_v31  ;;  %388 = vmatpush.msra.mxu3 %v366_v45  ;;  %v285_v59 = vld [vmem:[#allocation10 + $0x100] sm:$0xff]  ;;  %v284_v60 = vld [vmem:[#allocation5] sm:$0xff]  ;;  %v377_v62 = vld [vmem:[#allocation8 + $0xe8] sm:$0xff] }
  0x3e   :  { %311 = vmatpush.msra.mxu2 %v291_v32  ;;  %222 = vmatpush.msra.mxu0 %v184_v34  ;;  %v360_v61 = vld [vmem:[#allocation8 + $0x60] sm:$0xff]  ;;  %v358_v63 = vld [vmem:[#allocation8 + $0x50] sm:$0xff]  ;;  %v375_v0 = vld [vmem:[#allocation8 + $0xd8] sm:$0xff] }
  0x3f   :  { %242 = vmatpush.msra.mxu1 %v200_v35  ;;  %389 = vmatpush.msra.mxu3 %v364_v49  ;;  %v356_v1 = vld [vmem:[#allocation8 + $0x40] sm:$0xff]  ;;  %v373_v2 = vld [vmem:[#allocation8 + $0xc8] sm:$0xff]  ;;  %v354_v3 = vld [vmem:[#allocation8 + $0x30] sm:$0xff] }
  0x40   :  { %312 = vmatpush.msra.mxu2 %v290_v36  ;;  %223 = vmatpush.msra.mxu0 %v183_v38  ;;  %v371_v4 = vld [vmem:[#allocation8 + $0xb8] sm:$0xff]  ;;  %v352_v5 = vld [vmem:[#allocation8 + $0x20] sm:$0xff]  ;;  %v369_v6 = vld [vmem:[#allocation8 + $0xa8] sm:$0xff] }
  0x41   :  { %243 = vmatpush.msra.mxu1 %v199_v39  ;;  %390 = vmatpush.msra.mxu3 %v362_v53  ;;  %v350_v7 = vld [vmem:[#allocation8 + $0x10] sm:$0xff]  ;;  %v367_v8 = vld [vmem:[#allocation8 + $0x98] sm:$0xff]  ;;  %v348_v9 = vld [vmem:[#allocation8] sm:$0xff]  ;;  %v7111_v53 = vmov 256.0  }
  0x42   :  { %313 = vmatpush.msra.mxu2 %v289_v40  ;;  %224 = vmatpush.msra.mxu0 %v182_v42  ;;  %v365_v10 = vld [vmem:[#allocation8 + $0x88] sm:$0xff]  ;;  %v347_v11 = vld [vmem:[#allocation7] sm:$0xff]  ;;  %v7218_v20 = vld [vmem:[#allocation14] sm:$0x3f]  ;;  %v7110_v42 = vmov 128.0  }
  0x43   :  { %244 = vmatpush.msra.mxu1 %v198_v43  ;;  %391 = vmatpush.msra.mxu3 %v360_v61  ;;  %v363_v12 = vld [vmem:[#allocation8 + $0x78] sm:$0xff]  ;;  %v361_v13 = vld [vmem:[#allocation8 + $0x68] sm:$0xff]  ;;  %v211_v21 = vperm.slane %v7218_v20, 0  ;;  %v301_v27 = vperm.slane %v7218_v20, 3  ;;  %v7222_v31 = vld [vmem:[#allocation13] sm:$0xff]  ;;  %5605 = vrcp.f32 %v7110_v42 }
  0x44   :  { %314 = vmatpush.msra.mxu2 %v288_v44  ;;  %225 = vmatpush.msra.mxu0 %v181_v46  ;;  %v359_v14 = vld [vmem:[#allocation8 + $0x58] sm:$0xff]  ;;  %v357_v15 = vld [vmem:[#allocation8 + $0x48] sm:$0xff]  ;;  %v380_v32 = vperm.slane %v7222_v31, 0  ;;  %5607 = vrcp.f32 %v7111_v53  ;;  %v478_v42 = vld [vmem:[#allocation8 + $0x170] sm:$0xff] }
  0x45   :  { %245 = vmatpush.msra.mxu1 %v197_v47  ;;  %392 = vmatpush.msra.mxu3 %v358_v63  ;;  %v355_v16 = vld [vmem:[#allocation8 + $0x38] sm:$0xff]  ;;  %v353_v17 = vld [vmem:[#allocation8 + $0x28] sm:$0xff] }
  0x46   :  { %315 = vmatpush.msra.mxu2 %v287_v48  ;;  %226 = vmatpush.msra.mxu0 %v180_v50  ;;  %v351_v18 = vld [vmem:[#allocation8 + $0x18] sm:$0xff]  ;;  %v349_v19 = vld [vmem:[#allocation8 + $0x8] sm:$0xff] }
  0x47   :  { %246 = vmatpush.msra.mxu1 %v196_v51  ;;  %393 = vmatpush.msra.mxu3 %v356_v1  ;;  %v7225_v34 = vld [vmem:[#allocation13 + $0x8] sm:$0xff]  ;;  %v475_v53 = vld [vmem:[#allocation8 + $0x158] sm:$0xff] }
  0x48   :  { %316 = vmatpush.msra.mxu2 %v286_v52  ;;  %227 = vmatpush.msra.mxu0 %v179_v54  ;;  %v381_v36 = vperm.slane %v7225_v34, 0  ;;  %v493_v61 = vld [vmem:[#allocation8 + $0x1e8] sm:$0xff] }
  0x49   :  { %247 = vmatpush.msra.mxu1 %v195_v55  ;;  %228 = vmatmul.f32.vlgmr.msra.gmra.mxu0 %v177_v56  ;;  %v5606_v43 = vpop.eup %5605  ;;  %v494_v56 = vld [vmem:[#allocation8 + $0x1f0] sm:$0xff] }
  0x4a   :  { %248 = vmatmul.f32.vlgmr.msra.gmra.mxu1 %v178_v57  ;;  %402 = vmatpush.msrb.mxu0 %v379_v58  ;;  %v256_v44 = vmul.f32 128.0, %v5606_v43  ;;  %vm260_vm0 = vweird.f32 %v5606_v43  ;;  %v495_v57 = vld [vmem:[#allocation8 + $0x1f8] sm:$0xff]  ;;  %v526_v58 = vld [vmem:[#allocation8 + $0x2f0] sm:$0xff] }
  0x4b   :  { %317 = vmatpush.msra.mxu2 %v285_v59  ;;  %394 = vmatpush.msra.mxu3 %v354_v3  ;;  %v527_v59 = vld [vmem:[#allocation8 + $0x2f8] sm:$0xff] }
  0x4c   :  { %318 = vmatmul.f32.vlgmr.msra.gmra.mxu2 %v284_v60  ;;  %403 = vmatpush.msrb.mxu0 %v377_v62  ;;  %v257_v45 = vsub.f32 1.0, %v256_v44  ;;  %v492_v60 = vld [vmem:[#allocation8 + $0x1e0] sm:$0xff]  ;;  %v5608_v62 = vpop.eup %5607  ;;  %v510_v44 = vld [vmem:[#allocation8 + $0x270] sm:$0xff] }
  0x4d   :  { %395 = vmatpush.msra.mxu3 %v352_v5  ;;  %528 = vmatpush.msrb.mxu1 %v526_v58  ;;  %v428_v1 = vmul.f32 256.0, %v5608_v62  ;;  %vm432_vm1 = vweird.f32 %v5608_v62  ;;  %v504_v58 = vld [vmem:[#allocation8 + $0x240] sm:$0xff] }
  0x4e   :  { %404 = vmatpush.msrb.mxu0 %v375_v0  ;;  %v258_v46 = vmul.f32 %v5606_v43, %v257_v45  ;;  %548 = vmatpush.msrb.mxu2 %v527_v59  ;;  %v511_v45 = vld [vmem:[#allocation8 + $0x278] sm:$0xff]  ;;  %v505_v59 = vld [vmem:[#allocation8 + $0x248] sm:$0xff] }
  0x4f   :  { %396 = vmatpush.msra.mxu3 %v350_v7 }
  0x50   :  { %405 = vmatpush.msrb.mxu0 %v373_v2  ;;  %v259_v47 = vadd.f32 %v5606_v43, %v258_v46  ;;  %v429_v2 = vsub.f32 1.0, %v428_v1  ;;  %v476_v46 = vld [vmem:[#allocation8 + $0x160] sm:$0xff] }
  0x51   :  { %397 = vmatpush.msra.mxu3 %v348_v9  ;;  %v468_v1 = vld [vmem:[#allocation8 + $0x120] sm:$0xff] }
  0x52   :  { %406 = vmatpush.msrb.mxu0 %v371_v4  ;;  %398 = vmatmul.f32.vlgmr.msra.gmra.mxu3 %v347_v11  ;;  %v7228_v48 = vsel %vm260_vm0, %v5606_v43, %v259_v47  ;;  %v430_v3 = vmul.f32 %v5608_v62, %v429_v2  ;;  %v479_v43 = vld [vmem:[#allocation8 + $0x178] sm:$0xff]  ;;  %v477_v47 = vld [vmem:[#allocation8 + $0x168] sm:$0xff] }
  0x53   :  { %568 = vmatpush.msrb.mxu3 %v494_v56  ;;  %v472_v56 = vld [vmem:[#allocation8 + $0x140] sm:$0xff]  ;;  %v469_v2 = vld [vmem:[#allocation8 + $0x128] sm:$0xff] }
  0x54   :  { %407 = vmatpush.msrb.mxu0 %v369_v6  ;;  %v431_v4 = vadd.f32 %v5608_v62, %v430_v3  ;;  %v500_v3 = vld [vmem:[#allocation8 + $0x220] sm:$0xff] }
  0x55   :  { %569 = vmatpush.msrb.mxu3 %v492_v60  ;;  %v470_v60 = vld [vmem:[#allocation8 + $0x130] sm:$0xff] }
  0x56   :  { %408 = vmatpush.msrb.mxu0 %v367_v8  ;;  %v7240_v5 = vsel %vm432_vm1, %v5608_v62, %v431_v4  ;;  %v502_v62 = vld [vmem:[#allocation8 + $0x230] sm:$0xff]  ;;  %v501_v4 = vld [vmem:[#allocation8 + $0x228] sm:$0xff] }
  0x58   :  { %409 = vmatpush.msrb.mxu0 %v365_v10 }
  0x5a   :  { %410 = vmatpush.msrb.mxu0 %v363_v12 }
  0x5c   :  { %411 = vmatpush.msrb.mxu0 %v361_v13  ;;  %v524_v13 = vld [vmem:[#allocation8 + $0x2e0] sm:$0xff] }
  0x5d   :  { %529 = vmatpush.msrb.mxu1 %v524_v13  ;;  %v465_v13 = vld [vmem:[#allocation8 + $0x108] sm:$0xff] }
  0x5e   :  { %412 = vmatpush.msrb.mxu0 %v359_v14  ;;  %v525_v14 = vld [vmem:[#allocation8 + $0x2e8] sm:$0xff] }
  0x5f   :  { %549 = vmatpush.msrb.mxu2 %v525_v14  ;;  %v496_v14 = vld [vmem:[#allocation8 + $0x200] sm:$0xff] }
  0x60   :  { %413 = vmatpush.msrb.mxu0 %v357_v15  ;;  %v490_v15 = vld [vmem:[#allocation8 + $0x1d0] sm:$0xff] }
  0x61   :  { %570 = vmatpush.msrb.mxu3 %v490_v15  ;;  %v497_v15 = vld [vmem:[#allocation8 + $0x208] sm:$0xff] }
  0x62   :  { %414 = vmatpush.msrb.mxu0 %v355_v16  ;;  %v491_v16 = vld [vmem:[#allocation8 + $0x1d8] sm:$0xff] }
  0x64   :  { %415 = vmatpush.msrb.mxu0 %v353_v17  ;;  %v522_v17 = vld [vmem:[#allocation8 + $0x2d0] sm:$0xff] }
  0x65   :  { %530 = vmatpush.msrb.mxu1 %v522_v17  ;;  %v670_v17 = vld [vmem:[#allocation8 + $0x4f0] sm:$0xff] }
  0x66   :  { %416 = vmatpush.msrb.mxu0 %v351_v18  ;;  %v523_v18 = vld [vmem:[#allocation8 + $0x2d8] sm:$0xff] }
  0x67   :  { %550 = vmatpush.msrb.mxu2 %v523_v18  ;;  %v639_v18 = vld [vmem:[#allocation8 + $0x3f8] sm:$0xff] }
  0x68   :  { %417 = vmatpush.msrb.mxu0 %v349_v19  ;;  %v488_v19 = vld [vmem:[#allocation8 + $0x1c0] sm:$0xff] }
  0x69   :  { %418 = vmatmul.f32.vlgmr.msrb.gmra.mxu0 %v347_v11  ;;  %571 = vmatpush.msrb.mxu3 %v488_v19  ;;  %v671_v19 = vld [vmem:[#allocation8 + $0x4f8] sm:$0xff] }
  0x6a   :  { %588 = vmatpush.msra.mxu0 %v495_v57  ;;  %v473_v57 = vld [vmem:[#allocation8 + $0x148] sm:$0xff] }
  0x6c   :  { %589 = vmatpush.msra.mxu0 %v493_v61  ;;  %v471_v61 = vld [vmem:[#allocation8 + $0x138] sm:$0xff] }
  0x6e   :  { %590 = vmatpush.msra.mxu0 %v491_v16  ;;  %v638_v16 = vld [vmem:[#allocation8 + $0x3f0] sm:$0xff] }
  0xc6   :  { %v229_v22 = vpop.f32.mrf.mxu0 }
  0xc7   :  { %v249_v23 = vpop.f32.mrf.mxu1  ;;  %v230_v24 = vadd.f32 %v229_v22, %v211_v21  ;;  %v489_v21 = vld [vmem:[#allocation8 + $0x1c8] sm:$0xff]  ;;  %v520_v22 = vld [vmem:[#allocation8 + $0x2c0] sm:$0xff] }
  0xc8   :  { %591 = vmatpush.msra.mxu0 %v489_v21  ;;  %531 = vmatpush.msrb.mxu1 %v520_v22  ;;  %v636_v22 = vld [vmem:[#allocation8 + $0x3e0] sm:$0xff] }
  0xc9   :  { %v250_v25 = vadd.f32 %v249_v23, %v230_v24  ;;  %v521_v23 = vld [vmem:[#allocation8 + $0x2c8] sm:$0xff]  ;;  %v486_v24 = vld [vmem:[#allocation8 + $0x1b0] sm:$0xff] }
  0xca   :  { %551 = vmatpush.msrb.mxu2 %v521_v23  ;;  %572 = vmatpush.msrb.mxu3 %v486_v24  ;;  %v668_v23 = vld [vmem:[#allocation8 + $0x4e0] sm:$0xff]  ;;  %v637_v24 = vld [vmem:[#allocation8 + $0x3e8] sm:$0xff] }
  0xcb   :  { %v252_v26 = vmax.f32 %v250_v25, 0.0  ;;  %v487_v25 = vld [vmem:[#allocation8 + $0x1b8] sm:$0xff] }
  0xcc   :  { %592 = vmatpush.msra.mxu0 %v487_v25 }
  0xcd   :  { %253 = vadd.xlane.f32.xlu0 %v252_v26 }
  0xcf   :  { %v319_v28 = vpop.f32.mrf.mxu2 }
  0xd0   :  { %v320_v29 = vadd.f32 %v319_v28, %v301_v27  ;;  %v519_v27 = vld [vmem:[#allocation8 + $0x2b8] sm:$0xff]  ;;  %v484_v28 = vld [vmem:[#allocation8 + $0x1a0] sm:$0xff] }
  0xd1   :  { %552 = vmatpush.msrb.mxu2 %v519_v27  ;;  %573 = vmatpush.msrb.mxu3 %v484_v28  ;;  %v634_v28 = vld [vmem:[#allocation8 + $0x3d0] sm:$0xff] }
  0xd2   :  { %v322_v30 = vmax.f32 %v320_v29, 0.0  ;;  %v485_v29 = vld [vmem:[#allocation8 + $0x1a8] sm:$0xff] }
  0xd3   :  { %593 = vmatpush.msra.mxu0 %v485_v29  ;;  %v666_v29 = vld [vmem:[#allocation8 + $0x4d0] sm:$0xff] }
  0xd5   :  { %323 = vadd.xlane.f32.xlu0 %v322_v30  ;;  %v399_v33 = vpop.f32.mrf.mxu3 }
  0xd6   :  { %v400_v35 = vadd.f32 %v399_v33, %v380_v32  ;;  %v517_v32 = vld [vmem:[#allocation8 + $0x2a8] sm:$0xff]  ;;  %v482_v33 = vld [vmem:[#allocation8 + $0x190] sm:$0xff] }
  0xd7   :  { %553 = vmatpush.msrb.mxu2 %v517_v32  ;;  %574 = vmatpush.msrb.mxu3 %v482_v33  ;;  %v667_v32 = vld [vmem:[#allocation8 + $0x4d8] sm:$0xff]  ;;  %v632_v33 = vld [vmem:[#allocation8 + $0x3c0] sm:$0xff] }
  0xd8   :  { %v422_v39 = vmax.f32 %v400_v35, 0.0  ;;  %v483_v35 = vld [vmem:[#allocation8 + $0x198] sm:$0xff] }
  0xd9   :  { %594 = vmatpush.msra.mxu0 %v483_v35  ;;  %v664_v35 = vld [vmem:[#allocation8 + $0x4c0] sm:$0xff] }
  0xe6   :  { %v419_v37 = vpop.f32.mrf.mxu0 }
  0xe7   :  { %v420_v38 = vadd.f32 %v419_v37, %v381_v36  ;;  %v514_v36 = vld [vmem:[#allocation8 + $0x290] sm:$0xff]  ;;  %v515_v37 = vld [vmem:[#allocation8 + $0x298] sm:$0xff] }
  0xe8   :  { %554 = vmatpush.msrb.mxu2 %v515_v37  ;;  %v665_v37 = vld [vmem:[#allocation8 + $0x4c8] sm:$0xff] }
  0xe9   :  { %v423_v40 = vmax.f32 %v420_v38, 0.0  ;;  %v480_v38 = vld [vmem:[#allocation8 + $0x180] sm:$0xff] }
  0xea   :  { %575 = vmatpush.msrb.mxu3 %v480_v38  ;;  %v630_v38 = vld [vmem:[#allocation8 + $0x3b0] sm:$0xff] }
  0xeb   :  { %v424_v41 = vadd.f32 %v423_v40, %v422_v39 }
  0xec   :  { %576 = vmatpush.msrb.mxu3 %v478_v42  ;;  %v663_v42 = vld [vmem:[#allocation8 + $0x4b8] sm:$0xff] }
  0xed   :  { %425 = vadd.xlane.f32.xlu1 %v424_v41  ;;  %v513_v41 = vld [vmem:[#allocation8 + $0x288] sm:$0xff] }
  0xee   :  { %555 = vmatpush.msrb.mxu2 %v513_v41  ;;  %577 = vmatpush.msrb.mxu3 %v476_v46  ;;  %v629_v46 = vld [vmem:[#allocation8 + $0x3a8] sm:$0xff] }
  0xf0   :  { %556 = vmatpush.msrb.mxu2 %v511_v45  ;;  %v660_v45 = vld [vmem:[#allocation8 + $0x4a0] sm:$0xff] }
 0x140   :  { %v254_v49 = vpop.xlane.xlu0 %253 }
 0x141   :  { %v262_v50 = vmul.f32 %v7228_v48, %v254_v49  ;;  %v508_v49 = vld [vmem:[#allocation8 + $0x260] sm:$0xff] }
 0x143   :  { %v7231_v51 = vsub.f32 %v252_v26, %v262_v50  ;;  %v518_v26 = vld [vmem:[#allocation8 + $0x2b0] sm:$0xff]  ;;  %v509_v50 = vld [vmem:[#allocation8 + $0x268] sm:$0xff] }
 0x144   :  { %532 = vmatpush.msrb.mxu1 %v518_v26  ;;  %557 = vmatpush.msrb.mxu2 %v509_v50  ;;  %v669_v26 = vld [vmem:[#allocation8 + $0x4e8] sm:$0xff] }
 0x145   :  { %v264_v52 = vmul.f32 %v7231_v51, %v7231_v51 }
 0x147   :  { %265 = vadd.xlane.f32.xlu1 %v264_v52  ;;  %v474_v52 = vld [vmem:[#allocation8 + $0x150] sm:$0xff] }
 0x148   :  { %v324_v54 = vpop.xlane.xlu0 %323  ;;  %578 = vmatpush.msrb.mxu3 %v474_v52  ;;  %v626_v52 = vld [vmem:[#allocation8 + $0x390] sm:$0xff] }
 0x149   :  { %v325_v55 = vmul.f32 %v324_v54, %v7228_v48  ;;  %v506_v54 = vld [vmem:[#allocation8 + $0x250] sm:$0xff] }
 0x14a   :  { %579 = vmatpush.msrb.mxu3 %v472_v56  ;;  %v624_v56 = vld [vmem:[#allocation8 + $0x380] sm:$0xff] }
 0x14b   :  { %v7236_v63 = vsub.f32 %v322_v30, %v325_v55  ;;  %v516_v30 = vld [vmem:[#allocation8 + $0x2a0] sm:$0xff]  ;;  %v507_v55 = vld [vmem:[#allocation8 + $0x258] sm:$0xff] }
 0x14c   :  { %533 = vmatpush.msrb.mxu1 %v516_v30  ;;  %558 = vmatpush.msrb.mxu2 %v507_v55  ;;  %v635_v30 = vld [vmem:[#allocation8 + $0x3d8] sm:$0xff] }
 0x14d   :  { %v327_v0 = vmul.f32 %v7236_v63, %v7236_v63  ;;  %580 = vmatpush.msrb.mxu3 %v470_v60  ;;  %v659_v55 = vld [vmem:[#allocation8 + $0x498] sm:$0xff]  ;;  %v657_v60 = vld [vmem:[#allocation8 + $0x488] sm:$0xff] }
 0x14e   :  { %534 = vmatpush.msrb.mxu1 %v514_v36  ;;  %559 = vmatpush.msrb.mxu2 %v505_v59  ;;  %v633_v36 = vld [vmem:[#allocation8 + $0x3c8] sm:$0xff] }
 0x14f   :  { %328 = vadd.xlane.f32.xlu2 %v327_v0  ;;  %v503_v0 = vld [vmem:[#allocation8 + $0x238] sm:$0xff]  ;;  %581 = vmatpush.msrb.mxu3 %v468_v1  ;;  %v625_v59 = vld [vmem:[#allocation8 + $0x388] sm:$0xff] }
 0x150   :  { %560 = vmatpush.msrb.mxu2 %v503_v0  ;;  %v623_v0 = vld [vmem:[#allocation8 + $0x378] sm:$0xff] }
 0x152   :  { %561 = vmatpush.msrb.mxu2 %v501_v4  ;;  %v652_v4 = vld [vmem:[#allocation8 + $0x460] sm:$0xff] }
 0x160   :  { %v426_v6 = vpop.xlane.xlu1 %425 }
 0x161   :  { %v434_v7 = vmul.f32 %v7240_v5, %v426_v6  ;;  %v466_v6 = vld [vmem:[#allocation8 + $0x110] sm:$0xff] }
 0x162   :  { %582 = vmatpush.msrb.mxu3 %v466_v6  ;;  %v621_v6 = vld [vmem:[#allocation8 + $0x368] sm:$0xff] }
 0x163   :  { %v7243_v8 = vsub.f32 %v422_v39, %v434_v7  ;;  %v7245_v9 = vsub.f32 %v423_v40, %v434_v7  ;;  %v481_v39 = vld [vmem:[#allocation8 + $0x188] sm:$0xff]  ;;  %v512_v40 = vld [vmem:[#allocation8 + $0x280] sm:$0xff]  ;;  %v467_v7 = vld [vmem:[#allocation8 + $0x118] sm:$0xff] }
 0x164   :  { %595 = vmatpush.msra.mxu0 %v481_v39  ;;  %535 = vmatpush.msrb.mxu1 %v512_v40  ;;  %v662_v39 = vld [vmem:[#allocation8 + $0x4b0] sm:$0xff]  ;;  %v631_v40 = vld [vmem:[#allocation8 + $0x3b8] sm:$0xff] }
 0x165   :  { %v437_v10 = vmul.f32 %v7243_v8, %v7243_v8  ;;  %v438_v11 = vmul.f32 %v7245_v9, %v7245_v9 }
 0x166   :  { %596 = vmatpush.msra.mxu0 %v479_v43  ;;  %536 = vmatpush.msrb.mxu1 %v510_v44  ;;  %v628_v44 = vld [vmem:[#allocation8 + $0x3a0] sm:$0xff] }
 0x167   :  { %v439_v12 = vadd.f32 %v438_v11, %v437_v10  ;;  %v498_v10 = vld [vmem:[#allocation8 + $0x210] sm:$0xff]  ;;  %v499_v11 = vld [vmem:[#allocation8 + $0x218] sm:$0xff] }
 0x168   :  { %597 = vmatpush.msra.mxu0 %v477_v47  ;;  %537 = vmatpush.msrb.mxu1 %v508_v49  ;;  %v661_v47 = vld [vmem:[#allocation8 + $0x4a8] sm:$0xff] }
 0x169   :  { %440 = vadd.xlane.f32.xlu2 %v439_v12  ;;  %v464_v12 = vld [vmem:[#allocation8 + $0x100] sm:$0xff]  ;;  %562 = vmatpush.msrb.mxu2 %v499_v11 }
 0x16a   :  { %598 = vmatpush.msra.mxu0 %v475_v53  ;;  %538 = vmatpush.msrb.mxu1 %v506_v54  ;;  %v658_v53 = vld [vmem:[#allocation8 + $0x490] sm:$0xff]  ;;  %v627_v54 = vld [vmem:[#allocation8 + $0x398] sm:$0xff] }
 0x16b   :  { %583 = vmatpush.msrb.mxu3 %v464_v12  ;;  %563 = vmatpush.msrb.mxu2 %v497_v15  ;;  %v618_v12 = vld [vmem:[#allocation8 + $0x350] sm:$0xff] }
 0x16c   :  { %599 = vmatpush.msra.mxu0 %v473_v57  ;;  %539 = vmatpush.msrb.mxu1 %v504_v58  ;;  %v656_v57 = vld [vmem:[#allocation8 + $0x480] sm:$0xff] }
 0x16d   :  { %692 = vmatpush.msra.mxu2 %v670_v17  ;;  %712 = vmatpush.msra.mxu3 %v639_v18  ;;  %v651_v17 = vld [vmem:[#allocation8 + $0x458] sm:$0xff]  ;;  %v280_v18 = vperm.slane %v7218_v20, 1 }
 0x16e   :  { %600 = vmatpush.msra.mxu0 %v471_v61  ;;  %540 = vmatpush.msrb.mxu1 %v502_v62  ;;  %v622_v61 = vld [vmem:[#allocation8 + $0x370] sm:$0xff] }
 0x16f   :  { %693 = vmatpush.msra.mxu2 %v668_v23  ;;  %713 = vmatpush.msra.mxu3 %v637_v24  ;;  %v654_v62 = vld [vmem:[#allocation8 + $0x470] sm:$0xff]  ;;  %v617_v24 = vld [vmem:[#allocation8 + $0x348] sm:$0xff] }
 0x170   :  { %601 = vmatpush.msra.mxu0 %v469_v2  ;;  %541 = vmatpush.msrb.mxu1 %v500_v3  ;;  %v655_v2 = vld [vmem:[#allocation8 + $0x478] sm:$0xff]  ;;  %v620_v3 = vld [vmem:[#allocation8 + $0x360] sm:$0xff] }
 0x171   :  { %694 = vmatpush.msra.mxu2 %v666_v29  ;;  %714 = vmatpush.msra.mxu3 %v635_v30  ;;  %v646_v29 = vld [vmem:[#allocation8 + $0x430] sm:$0xff]  ;;  %v615_v30 = vld [vmem:[#allocation8 + $0x338] sm:$0xff] }
 0x172   :  { %602 = vmatpush.msra.mxu0 %v467_v7  ;;  %542 = vmatpush.msrb.mxu1 %v498_v10  ;;  %v653_v10 = vld [vmem:[#allocation8 + $0x468] sm:$0xff] }
 0x173   :  { %695 = vmatpush.msra.mxu2 %v664_v35  ;;  %715 = vmatpush.msra.mxu3 %v633_v36  ;;  %v612_v36 = vld [vmem:[#allocation8 + $0x320] sm:$0xff] }
 0x174   :  { %603 = vmatpush.msra.mxu0 %v465_v13  ;;  %543 = vmatpush.msrb.mxu1 %v496_v14  ;;  %v650_v13 = vld [vmem:[#allocation8 + $0x450] sm:$0xff]  ;;  %v619_v14 = vld [vmem:[#allocation8 + $0x358] sm:$0xff] }
 0x175   :  { %696 = vmatpush.msra.mxu2 %v662_v39  ;;  %716 = vmatpush.msra.mxu3 %v631_v40  ;;  %v610_v40 = vld [vmem:[#allocation8 + $0x310] sm:$0xff] }
 0x176   :  { %672 = vmatpush.msra.mxu1 %v638_v16  ;;  %732 = vmatpush.msrb.mxu0 %v671_v19  ;;  %v616_v19 = vld [vmem:[#allocation8 + $0x340] sm:$0xff] }
 0x177   :  { %697 = vmatpush.msra.mxu2 %v660_v45  ;;  %717 = vmatpush.msra.mxu3 %v629_v46  ;;  %v608_v46 = vld [vmem:[#allocation8 + $0x300] sm:$0xff] }
 0x178   :  { %673 = vmatpush.msra.mxu1 %v636_v22  ;;  %733 = vmatpush.msrb.mxu0 %v669_v26 }
 0x179   :  { %698 = vmatpush.msra.mxu2 %v658_v53  ;;  %718 = vmatpush.msra.mxu3 %v627_v54  ;;  %v641_v53 = vld [vmem:[#allocation8 + $0x408] sm:$0xff] }
 0x17a   :  { %674 = vmatpush.msra.mxu1 %v634_v28  ;;  %734 = vmatpush.msrb.mxu0 %v667_v32  ;;  %v614_v28 = vld [vmem:[#allocation8 + $0x330] sm:$0xff] }
 0x17b   :  { %699 = vmatpush.msra.mxu2 %v656_v57  ;;  %719 = vmatpush.msra.mxu3 %v625_v59 }
 0x17c   :  { %675 = vmatpush.msra.mxu1 %v632_v33  ;;  %735 = vmatpush.msrb.mxu0 %v665_v37  ;;  %v647_v33 = vld [vmem:[#allocation8 + $0x438] sm:$0xff]  ;;  %v644_v37 = vld [vmem:[#allocation8 + $0x420] sm:$0xff] }
 0x17d   :  { %700 = vmatpush.msra.mxu2 %v654_v62  ;;  %720 = vmatpush.msra.mxu3 %v623_v0 }
 0x17e   :  { %676 = vmatpush.msra.mxu1 %v630_v38  ;;  %736 = vmatpush.msrb.mxu0 %v663_v42  ;;  %v613_v38 = vld [vmem:[#allocation8 + $0x328] sm:$0xff] }
 0x17f   :  { %701 = vmatpush.msra.mxu2 %v652_v4  ;;  %721 = vmatpush.msra.mxu3 %v621_v6 }
 0x180   :  { %677 = vmatpush.msra.mxu1 %v628_v44  ;;  %737 = vmatpush.msrb.mxu0 %v661_v47  ;;  %v643_v44 = vld [vmem:[#allocation8 + $0x418] sm:$0xff]  ;;  %v640_v47 = vld [vmem:[#allocation8 + $0x400] sm:$0xff] }
 0x181   :  { %702 = vmatpush.msra.mxu2 %v650_v13  ;;  %722 = vmatpush.msra.mxu3 %v619_v14 }
 0x182   :  { %678 = vmatpush.msra.mxu1 %v626_v52  ;;  %738 = vmatpush.msrb.mxu0 %v659_v55  ;;  %v609_v52 = vld [vmem:[#allocation8 + $0x308] sm:$0xff] }
 0x183   :  { %723 = vmatpush.msra.mxu3 %v617_v24  ;;  %v782_v24 = vld [vmem:[#allocation8 + $0x5c0] sm:$0xff] }
 0x184   :  { %679 = vmatpush.msra.mxu1 %v624_v56  ;;  %739 = vmatpush.msrb.mxu0 %v657_v60 }
 0x185   :  { %724 = vmatpush.msra.mxu3 %v615_v30  ;;  %v781_v30 = vld [vmem:[#allocation8 + $0x5b8] sm:$0xff] }
 0x186   :  { %680 = vmatpush.msra.mxu1 %v622_v61  ;;  %740 = vmatpush.msrb.mxu0 %v655_v2  ;;  %v457_v2 = vperm.slane %v7225_v34, 1 }
 0x187   :  { %725 = vmatpush.msra.mxu3 %v613_v38  ;;  %v776_v38 = vld [vmem:[#allocation8 + $0x590] sm:$0xff] }
 0x188   :  { %681 = vmatpush.msra.mxu1 %v620_v3  ;;  %741 = vmatpush.msrb.mxu0 %v653_v10  ;;  %v461_v10 = vperm.slane %v7225_v34, 2  ;;  %v819_v34 = vld [vmem:[#allocation8 + $0x6e8] sm:$0xff] }
 0x18a   :  { %682 = vmatpush.msra.mxu1 %v618_v12  ;;  %742 = vmatpush.msrb.mxu0 %v651_v17  ;;  %v789_v17 = vld [vmem:[#allocation8 + $0x5f8] sm:$0xff] }
 0x18c   :  { %683 = vmatpush.msra.mxu1 %v616_v19  ;;  %v784_v19 = vld [vmem:[#allocation8 + $0x5d0] sm:$0xff] }
 0x18e   :  { %684 = vmatpush.msra.mxu1 %v614_v28  ;;  %v780_v28 = vld [vmem:[#allocation8 + $0x5b0] sm:$0xff] }
 0x190   :  { %685 = vmatpush.msra.mxu1 %v612_v36  ;;  %v779_v36 = vld [vmem:[#allocation8 + $0x5a8] sm:$0xff] }
 0x192   :  { %686 = vmatpush.msra.mxu1 %v610_v40  ;;  %v809_v40 = vld [vmem:[#allocation8 + $0x698] sm:$0xff] }
 0x194   :  { %687 = vmatpush.msra.mxu1 %v608_v46  ;;  %v804_v46 = vld [vmem:[#allocation8 + $0x670] sm:$0xff] }
 0x1ba   :  { %v266_v21 = vpop.xlane.xlu1 %265 }
 0x1bb   :  { %v267_v25 = vmul.f32 %v266_v21, %v7228_v48  ;;  %v648_v21 = vld [vmem:[#allocation8 + $0x440] sm:$0xff] }
 0x1bc   :  { %703 = vmatpush.msra.mxu2 %v648_v21  ;;  %v816_v21 = vld [vmem:[#allocation8 + $0x6d0] sm:$0xff] }
 0x1bd   :  { %v7252_v27 = vadd.f32 1e-05, %v267_v25  ;;  %v649_v25 = vld [vmem:[#allocation8 + $0x448] sm:$0xff] }
 0x1be   :  { %743 = vmatpush.msrb.mxu0 %v649_v25  ;;  %704 = vmatpush.msra.mxu2 %v646_v29  ;;  %v814_v25 = vld [vmem:[#allocation8 + $0x6c0] sm:$0xff]  ;;  %v812_v29 = vld [vmem:[#allocation8 + $0x6b0] sm:$0xff] }
 0x1bf   :  { %5609 = vrsqrt.f32 %v7252_v27  ;;  %vm275_vm3 = vweird.f32 %v7252_v27 }
 0x1c0   :  { %744 = vmatpush.msrb.mxu0 %v647_v33  ;;  %705 = vmatpush.msra.mxu2 %v644_v37  ;;  %v778_v33 = vld [vmem:[#allocation8 + $0x5a0] sm:$0xff]  ;;  %v811_v37 = vld [vmem:[#allocation8 + $0x6a8] sm:$0xff] }
 0x1c2   :  { %v329_v41 = vpop.xlane.xlu2 %328 }
 0x1c3   :  { %v330_v43 = vmul.f32 %v329_v41, %v7228_v48  ;;  %v642_v41 = vld [vmem:[#allocation8 + $0x410] sm:$0xff] }
 0x1c4   :  { %706 = vmatpush.msra.mxu2 %v642_v41  ;;  %v774_v41 = vld [vmem:[#allocation8 + $0x580] sm:$0xff] }
 0x1c5   :  { %v7256_v49 = vpop.eup %5609  ;;  %v7258_v50 = vadd.f32 1e-05, %v330_v43  ;;  %v611_v43 = vld [vmem:[#allocation8 + $0x318] sm:$0xff] }
 0x1c6   :  { %v270_v48 = vmul.f32 %v7256_v49, %v7252_v27  ;;  %vm276_vm2 = vweird.f32 %v7256_v49  ;;  %v282_v27 = vperm.slane %v7218_v20, 2  ;;  %726 = vmatpush.msra.mxu3 %v611_v43  ;;  %707 = vmatpush.msra.mxu2 %v640_v47  ;;  %v775_v43 = vld [vmem:[#allocation8 + $0x588] sm:$0xff]  ;;  %v773_v47 = vld [vmem:[#allocation8 + $0x578] sm:$0xff] }
 0x1c7   :  { %5611 = vrsqrt.f32 %v7258_v50  ;;  %vm277_vm4 = vmor %vm275_vm3, %vm276_vm2  ;;  %vm338_vm6 = vweird.f32 %v7258_v50 }
 0x1c8   :  { %v271_v58 = vmul.f32 %v7256_v49, %v270_v48  ;;  %727 = vmatpush.msra.mxu3 %v609_v52  ;;  %v770_v52 = vld [vmem:[#allocation8 + $0x560] sm:$0xff] }
 0x1ca   :  { %v272_v1 = vmul.f32 0.5, %v271_v58 }
 0x1cc   :  { %v273_v7 = vsub.f32 1.5, %v272_v1  ;;  %v456_v1 = vperm.slane %v7222_v31, 1 }
 0x1cd   :  { %v7265_v11 = vpop.eup %5611 }
 0x1ce   :  { %v274_v15 = vmul.f32 %v7256_v49, %v273_v7  ;;  %v333_v16 = vmul.f32 %v7265_v11, %v7258_v50  ;;  %vm339_vm5 = vweird.f32 %v7265_v11  ;;  %v345_v50 = vperm.slane %v7218_v20, 5 }
 0x1cf   :  { %vm340_vm7 = vmor %vm338_vm6, %vm339_vm5  ;;  %v460_v7 = vperm.slane %v7222_v31, 2  ;;  %v787_v31 = vld [vmem:[#allocation8 + $0x5e8] sm:$0xff] }
 0x1d0   :  { %v278_v22 = vsel %vm277_vm4, %v7256_v49, %v274_v15  ;;  %v334_v23 = vmul.f32 %v7265_v11, %v333_v16  ;;  %v343_v49 = vperm.slane %v7218_v20, 4  ;;  %v788_v15 = vld [vmem:[#allocation8 + $0x5f0] sm:$0xff] }
 0x1d1   :  { %v279_v26 = vmul.f32 %v278_v22, %v7231_v51  ;;  %v645_v51 = vld [vmem:[#allocation8 + $0x428] sm:$0xff]  ;;  %v820_v16 = vld [vmem:[#allocation8 + $0x6f0] sm:$0xff]  ;;  %v785_v22 = vld [vmem:[#allocation8 + $0x5d8] sm:$0xff] }
 0x1d2   :  { %v335_v32 = vmul.f32 0.5, %v334_v23  ;;  %745 = vmatpush.msrb.mxu0 %v645_v51  ;;  %v817_v23 = vld [vmem:[#allocation8 + $0x6d8] sm:$0xff] }
 0x1d3   :  { %v281_v35 = vmul.f32 %v280_v18, %v279_v26  ;;  %v786_v18 = vld [vmem:[#allocation8 + $0x5e0] sm:$0xff]  ;;  %v783_v26 = vld [vmem:[#allocation8 + $0x5c8] sm:$0xff]  ;;  %v777_v51 = vld [vmem:[#allocation8 + $0x598] sm:$0xff] }
 0x1d4   :  { %v336_v39 = vsub.f32 1.5, %v335_v32  ;;  %746 = vmatpush.msrb.mxu0 %v643_v44  ;;  %v813_v32 = vld [vmem:[#allocation8 + $0x6b8] sm:$0xff]  ;;  %v807_v44 = vld [vmem:[#allocation8 + $0x688] sm:$0xff] }
 0x1d5   :  { %v283_v42 = vadd.f32 %v282_v27, %v281_v35  ;;  %v815_v27 = vld [vmem:[#allocation8 + $0x6c8] sm:$0xff]  ;;  %v810_v35 = vld [vmem:[#allocation8 + $0x6a0] sm:$0xff] }
 0x1d6   :  { %v337_v45 = vmul.f32 %v7265_v11, %v336_v39  ;;  %747 = vmatpush.msrb.mxu0 %v641_v53  ;;  %v808_v39 = vld [vmem:[#allocation8 + $0x690] sm:$0xff]  ;;  %v802_v53 = vld [vmem:[#allocation8 + $0x660] sm:$0xff] }
 0x1d7   :  { %584 = vmatmul.f32.vlgmr.msrb.gmra.mxu3 %v283_v42  ;;  %604 = vmatmul.f32.vlgmr.msra.gmra.mxu0 %v283_v42  ;;  %v806_v42 = vld [vmem:[#allocation8 + $0x680] sm:$0xff] }
 0x1d8   :  { %v341_v54 = vsel %vm340_vm7, %v7265_v11, %v337_v45  ;;  %864 = vmatpush.msrb.mxu3 %v789_v17  ;;  %v772_v45 = vld [vmem:[#allocation8 + $0x570] sm:$0xff]  ;;  %v935_v17 = vld [vmem:[#allocation8 + $0x7f8] sm:$0xff] }
 0x1d9   :  { %v342_v48 = vmul.f32 %v341_v54, %v7236_v63  ;;  %v771_v54 = vld [vmem:[#allocation8 + $0x568] sm:$0xff] }
 0x1da   :  { %865 = vmatpush.msrb.mxu3 %v787_v31  ;;  %v967_v31 = vld [vmem:[#allocation8 + $0x8f8] sm:$0xff] }
 0x1db   :  { %v344_v55 = vmul.f32 %v343_v49, %v342_v48  ;;  %v805_v49 = vld [vmem:[#allocation8 + $0x678] sm:$0xff]  ;;  %v803_v48 = vld [vmem:[#allocation8 + $0x668] sm:$0xff] }
 0x1dc   :  { %v441_v56 = vpop.xlane.xlu2 %440  ;;  %866 = vmatpush.msrb.mxu3 %v785_v22  ;;  %v965_v22 = vld [vmem:[#allocation8 + $0x8e8] sm:$0xff] }
 0x1dd   :  { %v442_v57 = vmul.f32 %v441_v56, %v7240_v5  ;;  %v346_v58 = vadd.f32 %v345_v50, %v344_v55  ;;  %v768_v50 = vld [vmem:[#allocation8 + $0x550] sm:$0xff]  ;;  %v769_v56 = vld [vmem:[#allocation8 + $0x558] sm:$0xff] }
 0x1de   :  { %867 = vmatpush.msrb.mxu3 %v783_v26  ;;  %v800_v55 = vld [vmem:[#allocation8 + $0x650] sm:$0xff]  ;;  %v963_v26 = vld [vmem:[#allocation8 + $0x8d8] sm:$0xff] }
 0x1df   :  { %v443_v59 = vadd.f32 1e-05, %v442_v57  ;;  %544 = vmatmul.f32.vlgmr.msrb.gmra.mxu1 %v346_v58  ;;  %564 = vmatmul.f32.vlgmr.msrb.gmra.mxu2 %v346_v58  ;;  %v801_v57 = vld [vmem:[#allocation8 + $0x658] sm:$0xff]  ;;  %v766_v58 = vld [vmem:[#allocation8 + $0x540] sm:$0xff] }
 0x1e0   :  { %824 = vmatpush.msrb.mxu1 %v788_v15  ;;  %844 = vmatpush.msrb.mxu2 %v820_v16  ;;  %v791_v15 = vld [vmem:[#allocation8 + $0x608] sm:$0xff]  ;;  %v934_v16 = vld [vmem:[#allocation8 + $0x7f0] sm:$0xff] }
 0x1e1   :  { %5613 = vrsqrt.f32 %v443_v59  ;;  %vm450_vm9 = vweird.f32 %v443_v59  ;;  %868 = vmatpush.msrb.mxu3 %v781_v30  ;;  %v927_v30 = vld [vmem:[#allocation8 + $0x7b8] sm:$0xff] }
 0x1e2   :  { %825 = vmatpush.msrb.mxu1 %v786_v18  ;;  %v966_v18 = vld [vmem:[#allocation8 + $0x8f0] sm:$0xff] }
 0x1e3   :  { %869 = vmatpush.msrb.mxu3 %v779_v36  ;;  %v925_v36 = vld [vmem:[#allocation8 + $0x7a8] sm:$0xff] }
 0x1e4   :  { %826 = vmatpush.msrb.mxu1 %v784_v19  ;;  %v964_v19 = vld [vmem:[#allocation8 + $0x8e0] sm:$0xff] }
 0x1e5   :  { %870 = vmatpush.msrb.mxu3 %v777_v51  ;;  %v923_v51 = vld [vmem:[#allocation8 + $0x798] sm:$0xff] }
 0x1e6   :  { %827 = vmatpush.msrb.mxu1 %v782_v24  ;;  %v928_v24 = vld [vmem:[#allocation8 + $0x7c0] sm:$0xff] }
 0x1e7   :  { %v5614_v60 = vpop.eup %5613  ;;  %871 = vmatpush.msrb.mxu3 %v775_v43  ;;  %v921_v43 = vld [vmem:[#allocation8 + $0x788] sm:$0xff] }
 0x1e8   :  { %v445_v61 = vmul.f32 %v5614_v60, %v443_v59  ;;  %vm451_vm8 = vweird.f32 %v5614_v60  ;;  %828 = vmatpush.msrb.mxu1 %v780_v28  ;;  %v798_v59 = vld [vmem:[#allocation8 + $0x640] sm:$0xff]  ;;  %v961_v28 = vld [vmem:[#allocation8 + $0x8c8] sm:$0xff] }
 0x1e9   :  { %vm452_vm10 = vmor %vm450_vm9, %vm451_vm8  ;;  %872 = vmatpush.msrb.mxu3 %v773_v47  ;;  %v919_v47 = vld [vmem:[#allocation8 + $0x778] sm:$0xff] }
 0x1ea   :  { %v446_v62 = vmul.f32 %v5614_v60, %v445_v61  ;;  %829 = vmatpush.msrb.mxu1 %v778_v33  ;;  %v799_v61 = vld [vmem:[#allocation8 + $0x648] sm:$0xff]  ;;  %v959_v33 = vld [vmem:[#allocation8 + $0x8b8] sm:$0xff] }
 0x1eb   :  { %873 = vmatpush.msrb.mxu3 %v771_v54 }
 0x1ec   :  { %v447_v0 = vmul.f32 0.5, %v446_v62  ;;  %830 = vmatpush.msrb.mxu1 %v776_v38  ;;  %v764_v62 = vld [vmem:[#allocation8 + $0x530] sm:$0xff]  ;;  %v957_v38 = vld [vmem:[#allocation8 + $0x8a8] sm:$0xff] }
 0x1ed   :  { %874 = vmatpush.msrb.mxu3 %v769_v56 }
 0x1ee   :  { %v448_v63 = vsub.f32 1.5, %v447_v0  ;;  %831 = vmatpush.msrb.mxu1 %v774_v41  ;;  %v796_v0 = vld [vmem:[#allocation8 + $0x630] sm:$0xff]  ;;  %v955_v41 = vld [vmem:[#allocation8 + $0x898] sm:$0xff] }
 0x1f0   :  { %v449_v20 = vmul.f32 %v5614_v60, %v448_v63  ;;  %832 = vmatpush.msrb.mxu1 %v772_v45  ;;  %v765_v63 = vld [vmem:[#allocation8 + $0x538] sm:$0xff]  ;;  %v953_v45 = vld [vmem:[#allocation8 + $0x888] sm:$0xff] }
 0x1f2   :  { %v453_v3 = vsel %vm452_vm10, %v5614_v60, %v449_v20  ;;  %833 = vmatpush.msrb.mxu1 %v770_v52  ;;  %v767_v60 = vld [vmem:[#allocation8 + $0x548] sm:$0xff]  ;;  %v797_v20 = vld [vmem:[#allocation8 + $0x638] sm:$0xff] }
 0x1f3   :  { %v454_v4 = vmul.f32 %v453_v3, %v7243_v8  ;;  %v455_v6 = vmul.f32 %v453_v3, %v7245_v9  ;;  %v821_v8 = vld [vmem:[#allocation8 + $0x6f8] sm:$0xff]  ;;  %v818_v9 = vld [vmem:[#allocation8 + $0x6e0] sm:$0xff]  ;;  %875 = vmatpush.msrb.mxu3 %v767_v60  ;;  %v763_v3 = vld [vmem:[#allocation8 + $0x528] sm:$0xff] }
 0x1f4   :  { %884 = vmatpush.msra.mxu0 %v821_v8  ;;  %845 = vmatpush.msrb.mxu2 %v818_v9  ;;  %v932_v8 = vld [vmem:[#allocation8 + $0x7e0] sm:$0xff]  ;;  %v933_v9 = vld [vmem:[#allocation8 + $0x7e8] sm:$0xff]  ;;  %v951_v52 = vld [vmem:[#allocation8 + $0x878] sm:$0xff] }
 0x1f5   :  { %v458_v11 = vmul.f32 %v456_v1, %v454_v4  ;;  %v459_v12 = vmul.f32 %v457_v2, %v455_v6  ;;  %834 = vmatpush.msrb.mxu1 %v768_v50  ;;  %876 = vmatpush.msrb.mxu3 %v765_v63  ;;  %v762_v1 = vld [vmem:[#allocation8 + $0x520] sm:$0xff]  ;;  %v795_v4 = vld [vmem:[#allocation8 + $0x628] sm:$0xff]  ;;  %v760_v6 = vld [vmem:[#allocation8 + $0x510] sm:$0xff] }
 0x1f6   :  { %885 = vmatpush.msra.mxu0 %v819_v34  ;;  %846 = vmatpush.msrb.mxu2 %v816_v21  ;;  %v794_v2 = vld [vmem:[#allocation8 + $0x620] sm:$0xff]  ;;  %v930_v34 = vld [vmem:[#allocation8 + $0x7d0] sm:$0xff]  ;;  %v931_v21 = vld [vmem:[#allocation8 + $0x7d8] sm:$0xff] }
 0x1f7   :  { %v462_v13 = vadd.f32 %v460_v7, %v458_v11  ;;  %v463_v14 = vadd.f32 %v461_v10, %v459_v12  ;;  %835 = vmatpush.msrb.mxu1 %v766_v58  ;;  %877 = vmatpush.msrb.mxu3 %v763_v3  ;;  %v792_v7 = vld [vmem:[#allocation8 + $0x610] sm:$0xff]  ;;  %v761_v10 = vld [vmem:[#allocation8 + $0x518] sm:$0xff]  ;;  %v758_v12 = vld [vmem:[#allocation8 + $0x500] sm:$0xff] }
 0x1f8   :  { %886 = vmatpush.msra.mxu0 %v817_v23  ;;  %847 = vmatpush.msrb.mxu2 %v814_v25  ;;  %v793_v11 = vld [vmem:[#allocation8 + $0x618] sm:$0xff]  ;;  %v962_v23 = vld [vmem:[#allocation8 + $0x8d0] sm:$0xff]  ;;  %v929_v25 = vld [vmem:[#allocation8 + $0x7c8] sm:$0xff] }
 0x1f9   :  { %688 = vmatmul.f32.vlgmr.msra.gmra.mxu1 %v462_v13  ;;  %708 = vmatmul.f32.vlgmr.msra.gmra.mxu2 %v463_v14  ;;  %v917_v50 = vld [vmem:[#allocation8 + $0x768] sm:$0xff]  ;;  %v915_v60 = vld [vmem:[#allocation8 + $0x758] sm:$0xff] }
 0x1fa   :  { %728 = vmatmul.f32.vlgmr.msra.gmra.mxu3 %v462_v13  ;;  %748 = vmatmul.f32.vlgmr.msrb.gmra.mxu0 %v463_v14  ;;  %v790_v13 = vld [vmem:[#allocation8 + $0x600] sm:$0xff]  ;;  %v759_v14 = vld [vmem:[#allocation8 + $0x508] sm:$0xff] }
 0x1fb   :  { %887 = vmatpush.msra.mxu0 %v815_v27  ;;  %848 = vmatpush.msrb.mxu2 %v812_v29  ;;  %v960_v27 = vld [vmem:[#allocation8 + $0x8c0] sm:$0xff]  ;;  %v926_v29 = vld [vmem:[#allocation8 + $0x7b0] sm:$0xff]  ;;  %v949_v58 = vld [vmem:[#allocation8 + $0x868] sm:$0xff] }
 0x1fc   :  { %836 = vmatpush.msrb.mxu1 %v764_v62  ;;  %878 = vmatpush.msrb.mxu3 %v761_v10 }
 0x1fd   :  { %888 = vmatpush.msra.mxu0 %v813_v32  ;;  %849 = vmatpush.msrb.mxu2 %v810_v35  ;;  %v958_v32 = vld [vmem:[#allocation8 + $0x8b0] sm:$0xff]  ;;  %v924_v35 = vld [vmem:[#allocation8 + $0x7a0] sm:$0xff] }
 0x1fe   :  { %837 = vmatpush.msrb.mxu1 %v762_v1  ;;  %879 = vmatpush.msrb.mxu3 %v759_v14  ;;  %v7294_v1 = vld [vmem:[#allocation13] sm:$0xff] }
 0x1ff   :  { %889 = vmatpush.msra.mxu0 %v811_v37  ;;  %850 = vmatpush.msrb.mxu2 %v808_v39  ;;  %v956_v37 = vld [vmem:[#allocation8 + $0x8a0] sm:$0xff]  ;;  %v922_v39 = vld [vmem:[#allocation8 + $0x790] sm:$0xff] }
 0x200   :  { %838 = vmatpush.msrb.mxu1 %v760_v6  ;;  %1010 = vmatpush.msra.mxu3 %v935_v17  ;;  %v913_v17 = vld [vmem:[#allocation8 + $0x748] sm:$0xff] }
 0x201   :  { %890 = vmatpush.msra.mxu0 %v809_v40  ;;  %851 = vmatpush.msrb.mxu2 %v806_v42  ;;  %v954_v40 = vld [vmem:[#allocation8 + $0x890] sm:$0xff]  ;;  %v920_v42 = vld [vmem:[#allocation8 + $0x780] sm:$0xff] }
 0x202   :  { %839 = vmatpush.msrb.mxu1 %v758_v12  ;;  %1011 = vmatpush.msra.mxu3 %v933_v9  ;;  %v944_v9 = vld [vmem:[#allocation8 + $0x840] sm:$0xff] }
 0x203   :  { %891 = vmatpush.msra.mxu0 %v807_v44  ;;  %852 = vmatpush.msrb.mxu2 %v804_v46  ;;  %v952_v44 = vld [vmem:[#allocation8 + $0x880] sm:$0xff]  ;;  %v918_v46 = vld [vmem:[#allocation8 + $0x770] sm:$0xff] }
 0x204   :  { %970 = vmatpush.msra.mxu1 %v934_v16  ;;  %1012 = vmatpush.msra.mxu3 %v931_v21  ;;  %v946_v16 = vld [vmem:[#allocation8 + $0x850] sm:$0xff] }
 0x205   :  { %892 = vmatpush.msra.mxu0 %v805_v49  ;;  %853 = vmatpush.msrb.mxu2 %v802_v53  ;;  %v950_v49 = vld [vmem:[#allocation8 + $0x870] sm:$0xff] }
 0x206   :  { %971 = vmatpush.msra.mxu1 %v932_v8  ;;  %1013 = vmatpush.msra.mxu3 %v929_v25  ;;  %v947_v8 = vld [vmem:[#allocation8 + $0x858] sm:$0xff]  ;;  %v942_v21 = vld [vmem:[#allocation8 + $0x830] sm:$0xff]  ;;  %v940_v25 = vld [vmem:[#allocation8 + $0x820] sm:$0xff] }
 0x207   :  { %893 = vmatpush.msra.mxu0 %v803_v48  ;;  %854 = vmatpush.msrb.mxu2 %v800_v55  ;;  %v916_v48 = vld [vmem:[#allocation8 + $0x760] sm:$0xff] }
 0x208   :  { %972 = vmatpush.msra.mxu1 %v930_v34  ;;  %1014 = vmatpush.msra.mxu3 %v927_v30  ;;  %v945_v34 = vld [vmem:[#allocation8 + $0x848] sm:$0xff] }
 0x209   :  { %894 = vmatpush.msra.mxu0 %v801_v57  ;;  %855 = vmatpush.msrb.mxu2 %v798_v59  ;;  %v948_v57 = vld [vmem:[#allocation8 + $0x860] sm:$0xff]  ;;  %v914_v59 = vld [vmem:[#allocation8 + $0x750] sm:$0xff]  ;;  %v905_v30 = vld [vmem:[#allocation8 + $0x708] sm:$0xff] }
 0x20a   :  { %973 = vmatpush.msra.mxu1 %v928_v24  ;;  %1015 = vmatpush.msra.mxu3 %v925_v36  ;;  %v906_v24 = vld [vmem:[#allocation8 + $0x710] sm:$0xff] }
 0x20b   :  { %895 = vmatpush.msra.mxu0 %v799_v61  ;;  %856 = vmatpush.msrb.mxu2 %v796_v0  ;;  %v1090_v36 = vld [vmem:[#allocation8 + $0x9f0] sm:$0xff] }
 0x20c   :  { %974 = vmatpush.msra.mxu1 %v926_v29  ;;  %1016 = vmatpush.msra.mxu3 %v923_v51  ;;  %v938_v29 = vld [vmem:[#allocation8 + $0x810] sm:$0xff]  ;;  %v1088_v51 = vld [vmem:[#allocation8 + $0x9e0] sm:$0xff] }
 0x20d   :  { %896 = vmatpush.msra.mxu0 %v797_v20  ;;  %857 = vmatpush.msrb.mxu2 %v794_v2  ;;  %v754_v2 = vperm.slane %v7294_v1, 3 }
 0x20e   :  { %975 = vmatpush.msra.mxu1 %v924_v35  ;;  %1017 = vmatpush.msra.mxu3 %v921_v43  ;;  %v937_v35 = vld [vmem:[#allocation8 + $0x808] sm:$0xff]  ;;  %v1086_v43 = vld [vmem:[#allocation8 + $0x9d0] sm:$0xff] }
 0x20f   :  { %897 = vmatpush.msra.mxu0 %v795_v4  ;;  %858 = vmatpush.msrb.mxu2 %v792_v7  ;;  %v7297_v7 = vld [vmem:[#allocation13 + $0x8] sm:$0xff] }
 0x210   :  { %976 = vmatpush.msra.mxu1 %v922_v39  ;;  %1018 = vmatpush.msra.mxu3 %v919_v47  ;;  %v755_v10 = vperm.slane %v7297_v7, 3  ;;  %v1123_v39 = vld [vmem:[#allocation8 + $0xaf8] sm:$0xff]  ;;  %v1084_v47 = vld [vmem:[#allocation8 + $0x9c0] sm:$0xff] }
 0x211   :  { %898 = vmatpush.msra.mxu0 %v793_v11  ;;  %859 = vmatpush.msrb.mxu2 %v790_v13 }
 0x212   :  { %977 = vmatpush.msra.mxu1 %v920_v42  ;;  %1019 = vmatpush.msra.mxu3 %v917_v50  ;;  %v1121_v42 = vld [vmem:[#allocation8 + $0xae8] sm:$0xff]  ;;  %v1083_v50 = vld [vmem:[#allocation8 + $0x9b8] sm:$0xff] }
 0x213   :  { %899 = vmatpush.msra.mxu0 %v791_v15  ;;  %990 = vmatpush.msra.mxu2 %v966_v18  ;;  %v912_v15 = vld [vmem:[#allocation8 + $0x740] sm:$0xff]  ;;  %v910_v18 = vld [vmem:[#allocation8 + $0x730] sm:$0xff] }
 0x214   :  { %978 = vmatpush.msra.mxu1 %v918_v46  ;;  %1020 = vmatpush.msra.mxu3 %v915_v60  ;;  %v1119_v46 = vld [vmem:[#allocation8 + $0xad8] sm:$0xff]  ;;  %v1078_v60 = vld [vmem:[#allocation8 + $0x990] sm:$0xff] }
 0x215   :  { %1030 = vmatpush.msrb.mxu0 %v967_v31  ;;  %991 = vmatpush.msra.mxu2 %v964_v19  ;;  %v911_v31 = vld [vmem:[#allocation8 + $0x738] sm:$0xff]  ;;  %v908_v19 = vld [vmem:[#allocation8 + $0x720] sm:$0xff] }
 0x216   :  { %979 = vmatpush.msra.mxu1 %v916_v48  ;;  %1021 = vmatpush.msra.mxu3 %v913_v17  ;;  %v1114_v48 = vld [vmem:[#allocation8 + $0xab0] sm:$0xff] }
 0x217   :  { %1031 = vmatpush.msrb.mxu0 %v965_v22  ;;  %992 = vmatpush.msra.mxu2 %v962_v23  ;;  %v909_v22 = vld [vmem:[#allocation8 + $0x728] sm:$0xff]  ;;  %v943_v23 = vld [vmem:[#allocation8 + $0x838] sm:$0xff] }
 0x218   :  { %980 = vmatpush.msra.mxu1 %v914_v59  ;;  %1022 = vmatpush.msra.mxu3 %v911_v31  ;;  %v1113_v59 = vld [vmem:[#allocation8 + $0xaa8] sm:$0xff] }
 0x219   :  { %1032 = vmatpush.msrb.mxu0 %v963_v26  ;;  %993 = vmatpush.msra.mxu2 %v960_v27  ;;  %v907_v26 = vld [vmem:[#allocation8 + $0x718] sm:$0xff]  ;;  %v941_v27 = vld [vmem:[#allocation8 + $0x828] sm:$0xff] }
 0x21a   :  { %981 = vmatpush.msra.mxu1 %v912_v15  ;;  %1023 = vmatpush.msra.mxu3 %v909_v22  ;;  %v1105_v22 = vld [vmem:[#allocation8 + $0xa68] sm:$0xff] }
 0x21b   :  { %1033 = vmatpush.msrb.mxu0 %v961_v28  ;;  %994 = vmatpush.msra.mxu2 %v958_v32  ;;  %v904_v28 = vld [vmem:[#allocation8 + $0x700] sm:$0xff]  ;;  %v939_v32 = vld [vmem:[#allocation8 + $0x818] sm:$0xff] }
 0x21c   :  { %982 = vmatpush.msra.mxu1 %v910_v18  ;;  %1024 = vmatpush.msra.mxu3 %v907_v26  ;;  %v1103_v26 = vld [vmem:[#allocation8 + $0xa58] sm:$0xff] }
 0x21d   :  { %1034 = vmatpush.msrb.mxu0 %v959_v33  ;;  %995 = vmatpush.msra.mxu2 %v956_v37  ;;  %v936_v33 = vld [vmem:[#allocation8 + $0x800] sm:$0xff]  ;;  %v1122_v37 = vld [vmem:[#allocation8 + $0xaf0] sm:$0xff] }
 0x21e   :  { %983 = vmatpush.msra.mxu1 %v908_v19  ;;  %1025 = vmatpush.msra.mxu3 %v905_v30  ;;  %v1104_v19 = vld [vmem:[#allocation8 + $0xa60] sm:$0xff]  ;;  %v1101_v30 = vld [vmem:[#allocation8 + $0xa48] sm:$0xff] }
 0x21f   :  { %1035 = vmatpush.msrb.mxu0 %v957_v38  ;;  %996 = vmatpush.msra.mxu2 %v954_v40  ;;  %v1091_v38 = vld [vmem:[#allocation8 + $0x9f8] sm:$0xff]  ;;  %v1120_v40 = vld [vmem:[#allocation8 + $0xae0] sm:$0xff] }
 0x220   :  { %984 = vmatpush.msra.mxu1 %v906_v24  ;;  %v1102_v24 = vld [vmem:[#allocation8 + $0xa50] sm:$0xff] }
 0x221   :  { %1036 = vmatpush.msrb.mxu0 %v955_v41  ;;  %997 = vmatpush.msra.mxu2 %v952_v44  ;;  %v1089_v41 = vld [vmem:[#allocation8 + $0x9e8] sm:$0xff]  ;;  %v1118_v44 = vld [vmem:[#allocation8 + $0xad0] sm:$0xff] }
 0x222   :  { %985 = vmatpush.msra.mxu1 %v904_v28  ;;  %v1100_v28 = vld [vmem:[#allocation8 + $0xa40] sm:$0xff] }
 0x223   :  { %1037 = vmatpush.msrb.mxu0 %v953_v45  ;;  %998 = vmatpush.msra.mxu2 %v950_v49  ;;  %v1087_v45 = vld [vmem:[#allocation8 + $0x9d8] sm:$0xff]  ;;  %v1116_v49 = vld [vmem:[#allocation8 + $0xac0] sm:$0xff] }
 0x225   :  { %1038 = vmatpush.msrb.mxu0 %v951_v52  ;;  %999 = vmatpush.msra.mxu2 %v948_v57  ;;  %v1085_v52 = vld [vmem:[#allocation8 + $0x9c8] sm:$0xff]  ;;  %v1112_v57 = vld [vmem:[#allocation8 + $0xaa0] sm:$0xff] }
 0x227   :  { %1039 = vmatpush.msrb.mxu0 %v949_v58  ;;  %1000 = vmatpush.msra.mxu2 %v946_v16  ;;  %v1081_v58 = vld [vmem:[#allocation8 + $0x9a8] sm:$0xff] }
 0x229   :  { %1040 = vmatpush.msrb.mxu0 %v947_v8  ;;  %1001 = vmatpush.msra.mxu2 %v944_v9 }
 0x22b   :  { %1041 = vmatpush.msrb.mxu0 %v945_v34  ;;  %1002 = vmatpush.msra.mxu2 %v942_v21  ;;  %v1072_v34 = vld [vmem:[#allocation8 + $0x960] sm:$0xff]  ;;  %v1073_v21 = vld [vmem:[#allocation8 + $0x968] sm:$0xff] }
 0x22d   :  { %1042 = vmatpush.msrb.mxu0 %v943_v23  ;;  %1003 = vmatpush.msra.mxu2 %v940_v25  ;;  %v1070_v23 = vld [vmem:[#allocation8 + $0x950] sm:$0xff]  ;;  %v1071_v25 = vld [vmem:[#allocation8 + $0x958] sm:$0xff] }
 0x22f   :  { %1043 = vmatpush.msrb.mxu0 %v941_v27  ;;  %1004 = vmatpush.msra.mxu2 %v938_v29  ;;  %v1068_v27 = vld [vmem:[#allocation8 + $0x940] sm:$0xff]  ;;  %v1069_v29 = vld [vmem:[#allocation8 + $0x948] sm:$0xff] }
 0x231   :  { %1044 = vmatpush.msrb.mxu0 %v939_v32  ;;  %1005 = vmatpush.msra.mxu2 %v936_v33  ;;  %v1066_v32 = vld [vmem:[#allocation8 + $0x930] sm:$0xff] }
 0x232   :  { %v1098_v33 = vld [vmem:[#allocation8 + $0xa30] sm:$0xff] }
 0x233   :  { %1045 = vmatpush.msrb.mxu0 %v937_v35  ;;  %v1067_v35 = vld [vmem:[#allocation8 + $0x938] sm:$0xff] }
 0x254   :  { %v605_v55 = vpop.f32.mrf.mxu0 }
 0x25a   :  { %v585_v56 = vpop.f32.mrf.mxu3 }
 0x25c   :  { %v545_v53 = vpop.f32.mrf.mxu1 }
 0x25d   :  { %v586_v0 = vadd.f32 %v585_v56, %v545_v53  ;;  %v1117_v53 = vld [vmem:[#allocation8 + $0xac8] sm:$0xff]  ;;  %v1080_v56 = vld [vmem:[#allocation8 + $0x9a0] sm:$0xff] }
 0x262   :  { %v565_v54 = vpop.f32.mrf.mxu2 }
 0x263   :  { %v606_v4 = vadd.f32 %v605_v55, %v565_v54  ;;  %v1082_v54 = vld [vmem:[#allocation8 + $0x9b0] sm:$0xff]  ;;  %v1115_v55 = vld [vmem:[#allocation8 + $0xab8] sm:$0xff] }
 0x276   :  { %v689_v61 = vpop.f32.mrf.mxu1 }
 0x277   :  { %v749_v63 = vpop.f32.mrf.mxu0 }
 0x27c   :  { %v709_v62 = vpop.f32.mrf.mxu2 }
 0x27d   :  { %v710_v20 = vadd.f32 %v709_v62, %v689_v61  ;;  %v729_v3 = vpop.f32.mrf.mxu3  ;;  %v1110_v61 = vld [vmem:[#allocation8 + $0xa90] sm:$0xff]  ;;  %v1079_v62 = vld [vmem:[#allocation8 + $0x998] sm:$0xff] }
 0x27e   :  { %v750_v6 = vadd.f32 %v749_v63, %v729_v3  ;;  %v1076_v63 = vld [vmem:[#allocation8 + $0x980] sm:$0xff]  ;;  %v1109_v3 = vld [vmem:[#allocation8 + $0xa88] sm:$0xff] }
 0x27f   :  { %v752_v11 = vadd.f32 %v710_v20, %v586_v0  ;;  %v1111_v0 = vld [vmem:[#allocation8 + $0xa98] sm:$0xff]  ;;  %v1108_v20 = vld [vmem:[#allocation8 + $0xa80] sm:$0xff] }
 0x280   :  { %v753_v12 = vadd.f32 %v750_v6, %v606_v4  ;;  %v1074_v4 = vld [vmem:[#allocation8 + $0x970] sm:$0xff] }
 0x281   :  { %v756_v13 = vadd.f32 %v754_v2, %v752_v11  ;;  %v1077_v2 = vld [vmem:[#allocation8 + $0x988] sm:$0xff]  ;;  %v1106_v6 = vld [vmem:[#allocation8 + $0xa70] sm:$0xff]  ;;  %v1107_v11 = vld [vmem:[#allocation8 + $0xa78] sm:$0xff] }
 0x282   :  { %v757_v14 = vadd.f32 %v755_v10, %v753_v12  ;;  %v1075_v10 = vld [vmem:[#allocation8 + $0x978] sm:$0xff]  ;;  %v822_v12 = vperm.slane %v7294_v1, 4 }
 0x283   :  { %840 = vmatmul.f32.vlgmr.msrb.gmra.mxu1 %v756_v13  ;;  %880 = vmatmul.f32.vlgmr.msrb.gmra.mxu3 %v756_v13 }
 0x284   :  { %860 = vmatmul.f32.vlgmr.msrb.gmra.mxu2 %v757_v14  ;;  %900 = vmatmul.f32.vlgmr.msra.gmra.mxu0 %v757_v14  ;;  %v823_v14 = vperm.slane %v7297_v7, 4 }
 0x285   :  { %1126 = vmatpush.msrb.mxu1 %v1090_v36  ;;  %1146 = vmatpush.msrb.mxu2 %v1122_v37  ;;  %v1099_v36 = vld [vmem:[#allocation8 + $0xa38] sm:$0xff]  ;;  %v1064_v37 = vld [vmem:[#allocation8 + $0x920] sm:$0xff] }
 0x286   :  { %1166 = vmatpush.msrb.mxu3 %v1091_v38  ;;  %1186 = vmatpush.msra.mxu0 %v1123_v39  ;;  %v1096_v38 = vld [vmem:[#allocation8 + $0xa20] sm:$0xff]  ;;  %v1065_v39 = vld [vmem:[#allocation8 + $0x928] sm:$0xff] }
 0x287   :  { %1127 = vmatpush.msrb.mxu1 %v1088_v51  ;;  %1147 = vmatpush.msrb.mxu2 %v1120_v40  ;;  %v1097_v51 = vld [vmem:[#allocation8 + $0xa28] sm:$0xff]  ;;  %v1062_v40 = vld [vmem:[#allocation8 + $0x910] sm:$0xff] }
 0x288   :  { %1167 = vmatpush.msrb.mxu3 %v1089_v41  ;;  %1187 = vmatpush.msra.mxu0 %v1121_v42  ;;  %v1094_v41 = vld [vmem:[#allocation8 + $0xa10] sm:$0xff]  ;;  %v1063_v42 = vld [vmem:[#allocation8 + $0x918] sm:$0xff] }
 0x289   :  { %1128 = vmatpush.msrb.mxu1 %v1086_v43  ;;  %1148 = vmatpush.msrb.mxu2 %v1118_v44  ;;  %v1095_v43 = vld [vmem:[#allocation8 + $0xa18] sm:$0xff]  ;;  %v1060_v44 = vld [vmem:[#allocation8 + $0x900] sm:$0xff] }
 0x28a   :  { %1168 = vmatpush.msrb.mxu3 %v1087_v45  ;;  %1188 = vmatpush.msra.mxu0 %v1119_v46  ;;  %v1092_v45 = vld [vmem:[#allocation8 + $0xa00] sm:$0xff]  ;;  %v1061_v46 = vld [vmem:[#allocation8 + $0x908] sm:$0xff] }
 0x28b   :  { %1129 = vmatpush.msrb.mxu1 %v1084_v47  ;;  %1149 = vmatpush.msrb.mxu2 %v1116_v49  ;;  %v1093_v47 = vld [vmem:[#allocation8 + $0xa08] sm:$0xff]  ;;  %v1236_v49 = vld [vmem:[#allocation8 + $0xbf0] sm:$0xff] }
 0x28c   :  { %1169 = vmatpush.msrb.mxu3 %v1085_v52  ;;  %1189 = vmatpush.msra.mxu0 %v1117_v53  ;;  %v1237_v52 = vld [vmem:[#allocation8 + $0xbf8] sm:$0xff]  ;;  %v1234_v53 = vld [vmem:[#allocation8 + $0xbe0] sm:$0xff] }
 0x28d   :  { %1130 = vmatpush.msrb.mxu1 %v1082_v54  ;;  %1150 = vmatpush.msrb.mxu2 %v1114_v48  ;;  %v1268_v54 = vld [vmem:[#allocation8 + $0xcf0] sm:$0xff]  ;;  %v1235_v48 = vld [vmem:[#allocation8 + $0xbe8] sm:$0xff] }
 0x28e   :  { %1170 = vmatpush.msrb.mxu3 %v1083_v50  ;;  %1190 = vmatpush.msra.mxu0 %v1115_v55  ;;  %v1269_v50 = vld [vmem:[#allocation8 + $0xcf8] sm:$0xff]  ;;  %v1232_v55 = vld [vmem:[#allocation8 + $0xbd0] sm:$0xff] }
 0x28f   :  { %1131 = vmatpush.msrb.mxu1 %v1080_v56  ;;  %1151 = vmatpush.msrb.mxu2 %v1112_v57  ;;  %v1266_v56 = vld [vmem:[#allocation8 + $0xce0] sm:$0xff]  ;;  %v1233_v57 = vld [vmem:[#allocation8 + $0xbd8] sm:$0xff] }
 0x290   :  { %1171 = vmatpush.msrb.mxu3 %v1081_v58  ;;  %1191 = vmatpush.msra.mxu0 %v1113_v59  ;;  %v1267_v58 = vld [vmem:[#allocation8 + $0xce8] sm:$0xff]  ;;  %v1264_v59 = vld [vmem:[#allocation8 + $0xcd0] sm:$0xff] }
 0x291   :  { %1132 = vmatpush.msrb.mxu1 %v1078_v60  ;;  %1152 = vmatpush.msrb.mxu2 %v1110_v61  ;;  %v1230_v60 = vld [vmem:[#allocation8 + $0xbc0] sm:$0xff]  ;;  %v1231_v61 = vld [vmem:[#allocation8 + $0xbc8] sm:$0xff] }
 0x292   :  { %1172 = vmatpush.msrb.mxu3 %v1079_v62  ;;  %1192 = vmatpush.msra.mxu0 %v1111_v0  ;;  %v1265_v62 = vld [vmem:[#allocation8 + $0xcd8] sm:$0xff]  ;;  %v1262_v0 = vld [vmem:[#allocation8 + $0xcc0] sm:$0xff] }
 0x293   :  { %1133 = vmatpush.msrb.mxu1 %v1076_v63  ;;  %1153 = vmatpush.msrb.mxu2 %v1108_v20  ;;  %v1263_v63 = vld [vmem:[#allocation8 + $0xcc8] sm:$0xff]  ;;  %v1228_v20 = vld [vmem:[#allocation8 + $0xbb0] sm:$0xff] }
 0x294   :  { %1173 = vmatpush.msrb.mxu3 %v1077_v2  ;;  %1193 = vmatpush.msra.mxu0 %v1109_v3  ;;  %v1229_v2 = vld [vmem:[#allocation8 + $0xbb8] sm:$0xff]  ;;  %v1260_v3 = vld [vmem:[#allocation8 + $0xcb0] sm:$0xff] }
 0x295   :  { %1134 = vmatpush.msrb.mxu1 %v1074_v4  ;;  %1154 = vmatpush.msrb.mxu2 %v1106_v6  ;;  %v1261_v4 = vld [vmem:[#allocation8 + $0xcb8] sm:$0xff]  ;;  %v1226_v6 = vld [vmem:[#allocation8 + $0xba0] sm:$0xff] }
 0x296   :  { %1174 = vmatpush.msrb.mxu3 %v1075_v10  ;;  %1194 = vmatpush.msra.mxu0 %v1107_v11  ;;  %v1227_v10 = vld [vmem:[#allocation8 + $0xba8] sm:$0xff]  ;;  %v1258_v11 = vld [vmem:[#allocation8 + $0xca0] sm:$0xff] }
 0x297   :  { %1135 = vmatpush.msrb.mxu1 %v1072_v34  ;;  %1155 = vmatpush.msrb.mxu2 %v1104_v19  ;;  %v1221_v34 = vld [vmem:[#allocation8 + $0xb78] sm:$0xff]  ;;  %v1252_v19 = vld [vmem:[#allocation8 + $0xc70] sm:$0xff] }
 0x298   :  { %1175 = vmatpush.msrb.mxu3 %v1073_v21  ;;  %1195 = vmatpush.msra.mxu0 %v1105_v22  ;;  %v1253_v21 = vld [vmem:[#allocation8 + $0xc78] sm:$0xff]  ;;  %v1218_v22 = vld [vmem:[#allocation8 + $0xb60] sm:$0xff] }
 0x299   :  { %1136 = vmatpush.msrb.mxu1 %v1070_v23  ;;  %1156 = vmatpush.msrb.mxu2 %v1102_v24  ;;  %v1219_v23 = vld [vmem:[#allocation8 + $0xb68] sm:$0xff]  ;;  %v1250_v24 = vld [vmem:[#allocation8 + $0xc60] sm:$0xff] }
 0x29a   :  { %1176 = vmatpush.msrb.mxu3 %v1071_v25  ;;  %1196 = vmatpush.msra.mxu0 %v1103_v26  ;;  %v1251_v25 = vld [vmem:[#allocation8 + $0xc68] sm:$0xff]  ;;  %v1216_v26 = vld [vmem:[#allocation8 + $0xb50] sm:$0xff] }
 0x29b   :  { %1137 = vmatpush.msrb.mxu1 %v1068_v27  ;;  %1157 = vmatpush.msrb.mxu2 %v1100_v28  ;;  %v1217_v27 = vld [vmem:[#allocation8 + $0xb58] sm:$0xff]  ;;  %v968_v28 = vperm.slane %v7294_v1, 5 }
 0x29c   :  { %1177 = vmatpush.msrb.mxu3 %v1069_v29  ;;  %1197 = vmatpush.msra.mxu0 %v1101_v30  ;;  %v969_v30 = vperm.slane %v7297_v7, 5 }
 0x29d   :  { %1138 = vmatpush.msrb.mxu1 %v1066_v32  ;;  %1158 = vmatpush.msrb.mxu2 %v1098_v33  ;;  %v1050_v32 = vld [vmem:[%s7745_s3] sm:$0x3]  ;;  %s7112_s3 = smov [#allocation18]  }
 0x29e   :  { %1178 = vmatpush.msrb.mxu3 %v1067_v35  ;;  %1198 = vmatpush.msra.mxu0 %v1099_v36  ;;  %v1052_v36 = vperm.slane %v1050_v32, 0  ;;  %s5545_s18 = sshll.u32 %s7112_s3, 4  ;;  %s5546_s18 = int_to_ptr.vmem [resolvable:$true] %s5545_s18 }
 0x29f   :  { %1139 = vmatpush.msrb.mxu1 %v1064_v37  ;;  %1159 = vmatpush.msrb.mxu2 %v1096_v38  ;;  %v1053_v38 = vperm.slane %v1050_v32, 1  ;;  %v1444_v32 = vld [vmem:[#allocation11 + $0x1c8] sm:$0xff] }
 0x2a0   :  { %1179 = vmatpush.msrb.mxu3 %v1065_v39  ;;  %1199 = vmatpush.msra.mxu0 %v1097_v51 }
 0x2a1   :  { %1140 = vmatpush.msrb.mxu1 %v1062_v40  ;;  %1160 = vmatpush.msrb.mxu2 %v1094_v41 }
 0x2a2   :  { %1180 = vmatpush.msrb.mxu3 %v1063_v42  ;;  %1200 = vmatpush.msra.mxu0 %v1095_v43 }
 0x2a3   :  { %1141 = vmatpush.msrb.mxu1 %v1060_v44  ;;  %1161 = vmatpush.msrb.mxu2 %v1092_v45  ;;  %v1214_v44 = vld [vmem:[#allocation8 + $0xb40] sm:$0xff]  ;;  %v1248_v45 = vld [vmem:[#allocation8 + $0xc50] sm:$0xff] }
 0x2a4   :  { %1181 = vmatpush.msrb.mxu3 %v1061_v46  ;;  %1201 = vmatpush.msra.mxu0 %v1093_v47  ;;  %v1215_v46 = vld [vmem:[#allocation8 + $0xb48] sm:$0xff]  ;;  %v1249_v47 = vld [vmem:[#allocation8 + $0xc58] sm:$0xff] }
 0x300   :  { %v841_v13 = vpop.f32.mrf.mxu1 }
 0x301   :  { %v842_v15 = vadd.f32 %v841_v13, %v822_v12  ;;  %v901_v18 = vpop.f32.mrf.mxu0  ;;  %v1259_v12 = vld [vmem:[#allocation8 + $0xca8] sm:$0xff]  ;;  %v1224_v13 = vld [vmem:[#allocation8 + $0xb90] sm:$0xff] }
 0x306   :  { %v881_v16 = vpop.f32.mrf.mxu3 }
 0x307   :  { %v861_v17 = vpop.f32.mrf.mxu2  ;;  %v882_v8 = vadd.f32 %v881_v16, %v823_v14  ;;  %v1225_v14 = vld [vmem:[#allocation8 + $0xb98] sm:$0xff] }
 0x308   :  { %v862_v9 = vadd.f32 %v861_v17, %v842_v15  ;;  %v1256_v15 = vld [vmem:[#allocation8 + $0xc90] sm:$0xff]  ;;  %v1257_v16 = vld [vmem:[#allocation8 + $0xc98] sm:$0xff]  ;;  %v1222_v17 = vld [vmem:[#allocation8 + $0xb80] sm:$0xff] }
 0x309   :  { %v902_v31 = vadd.f32 %v901_v18, %v882_v8  ;;  %v1223_v8 = vld [vmem:[#allocation8 + $0xb88] sm:$0xff]  ;;  %v1254_v18 = vld [vmem:[#allocation8 + $0xc80] sm:$0xff] }
 0x30a   :  { %986 = vmatmul.f32.vlgmr.msra.gmra.mxu1 %v862_v9  ;;  %1026 = vmatmul.f32.vlgmr.msra.gmra.mxu3 %v862_v9  ;;  %v1255_v9 = vld [vmem:[#allocation8 + $0xc88] sm:$0xff] }
 0x30b   :  { %1006 = vmatmul.f32.vlgmr.msra.gmra.mxu2 %v902_v31  ;;  %1046 = vmatmul.f32.vlgmr.msrb.gmra.mxu0 %v902_v31  ;;  %v1220_v31 = vld [vmem:[#allocation8 + $0xb70] sm:$0xff] }
 0x30c   :  { %1272 = vmatpush.msra.mxu1 %v1236_v49  ;;  %1312 = vmatpush.msra.mxu3 %v1237_v52  ;;  %v1212_v49 = vld [vmem:[#allocation8 + $0xb30] sm:$0xff]  ;;  %v1246_v52 = vld [vmem:[#allocation8 + $0xc40] sm:$0xff] }
 0x30d   :  { %1292 = vmatpush.msra.mxu2 %v1268_v54  ;;  %1332 = vmatpush.msrb.mxu0 %v1269_v50  ;;  %v1247_v54 = vld [vmem:[#allocation8 + $0xc48] sm:$0xff]  ;;  %v1244_v50 = vld [vmem:[#allocation8 + $0xc30] sm:$0xff] }
 0x30e   :  { %1273 = vmatpush.msra.mxu1 %v1234_v53  ;;  %1313 = vmatpush.msra.mxu3 %v1235_v48  ;;  %v1213_v53 = vld [vmem:[#allocation8 + $0xb38] sm:$0xff]  ;;  %v1210_v48 = vld [vmem:[#allocation8 + $0xb20] sm:$0xff] }
 0x30f   :  { %1293 = vmatpush.msra.mxu2 %v1266_v56  ;;  %1333 = vmatpush.msrb.mxu0 %v1267_v58  ;;  %v1245_v56 = vld [vmem:[#allocation8 + $0xc38] sm:$0xff]  ;;  %v1242_v58 = vld [vmem:[#allocation8 + $0xc20] sm:$0xff] }
 0x310   :  { %1274 = vmatpush.msra.mxu1 %v1232_v55  ;;  %1314 = vmatpush.msra.mxu3 %v1233_v57  ;;  %v1211_v55 = vld [vmem:[#allocation8 + $0xb28] sm:$0xff]  ;;  %v1208_v57 = vld [vmem:[#allocation8 + $0xb10] sm:$0xff] }
 0x311   :  { %1294 = vmatpush.msra.mxu2 %v1264_v59  ;;  %1334 = vmatpush.msrb.mxu0 %v1265_v62  ;;  %v1209_v59 = vld [vmem:[#allocation8 + $0xb18] sm:$0xff]  ;;  %v1240_v62 = vld [vmem:[#allocation8 + $0xc10] sm:$0xff] }
 0x312   :  { %1275 = vmatpush.msra.mxu1 %v1230_v60  ;;  %1315 = vmatpush.msra.mxu3 %v1231_v61  ;;  %v1243_v60 = vld [vmem:[#allocation8 + $0xc28] sm:$0xff]  ;;  %v1206_v61 = vld [vmem:[#allocation8 + $0xb00] sm:$0xff] }
 0x313   :  { %1295 = vmatpush.msra.mxu2 %v1262_v0  ;;  %1335 = vmatpush.msrb.mxu0 %v1263_v63  ;;  %v1207_v0 = vld [vmem:[#allocation8 + $0xb08] sm:$0xff]  ;;  %v1241_v63 = vld [vmem:[#allocation8 + $0xc18] sm:$0xff] }
 0x314   :  { %1276 = vmatpush.msra.mxu1 %v1228_v20  ;;  %1316 = vmatpush.msra.mxu3 %v1229_v2  ;;  %v1238_v20 = vld [vmem:[#allocation8 + $0xc00] sm:$0xff]  ;;  %v1239_v2 = vld [vmem:[#allocation8 + $0xc08] sm:$0xff] }
 0x315   :  { %1296 = vmatpush.msra.mxu2 %v1260_v3  ;;  %1336 = vmatpush.msrb.mxu0 %v1261_v4  ;;  %v7318_v3 = vperm.slane %v7294_v1, 6 }
 0x316   :  { %1277 = vmatpush.msra.mxu1 %v1226_v6  ;;  %1317 = vmatpush.msra.mxu3 %v1227_v10  ;;  %v7321_v6 = vperm.slane %v7297_v7, 6 }
 0x317   :  { %1297 = vmatpush.msra.mxu2 %v1258_v11  ;;  %1337 = vmatpush.msrb.mxu0 %v1259_v12 }
 0x318   :  { %1278 = vmatpush.msra.mxu1 %v1224_v13  ;;  %1318 = vmatpush.msra.mxu3 %v1225_v14 }
 0x319   :  { %1298 = vmatpush.msra.mxu2 %v1256_v15  ;;  %1338 = vmatpush.msrb.mxu0 %v1257_v16 }
 0x31a   :  { %1279 = vmatpush.msra.mxu1 %v1222_v17  ;;  %1319 = vmatpush.msra.mxu3 %v1223_v8  ;;  %v7326_v17 = vperm.slane %v7294_v1, 7 }
 0x31b   :  { %1299 = vmatpush.msra.mxu2 %v1254_v18  ;;  %1339 = vmatpush.msrb.mxu0 %v1255_v9  ;;  %v7329_v18 = vperm.slane %v7297_v7, 7  ;;  %v1447_v7 = vld [vmem:[#allocation11 + $0x1e0] sm:$0xff] }
 0x31c   :  { %1280 = vmatpush.msra.mxu1 %v1220_v31  ;;  %1320 = vmatpush.msra.mxu3 %v1221_v34 }
 0x31d   :  { %1300 = vmatpush.msra.mxu2 %v1252_v19  ;;  %1340 = vmatpush.msrb.mxu0 %v1253_v21 }
 0x31e   :  { %1281 = vmatpush.msra.mxu1 %v1218_v22  ;;  %1321 = vmatpush.msra.mxu3 %v1219_v23 }
 0x31f   :  { %1301 = vmatpush.msra.mxu2 %v1250_v24  ;;  %1341 = vmatpush.msrb.mxu0 %v1251_v25 }
 0x320   :  { %1282 = vmatpush.msra.mxu1 %v1216_v26  ;;  %1322 = vmatpush.msra.mxu3 %v1217_v27  ;;  %v1511_v26 = vld [vmem:[#allocation11 + $0x3e0] sm:$0xff]  ;;  %v1448_v27 = vld [vmem:[#allocation11 + $0x1e8] sm:$0xff] }
 0x321   :  { %1302 = vmatpush.msra.mxu2 %v1248_v45  ;;  %1342 = vmatpush.msrb.mxu0 %v1249_v47  ;;  %v1496_v45 = vld [vmem:[#allocation11 + $0x368] sm:$0xff]  ;;  %v1491_v47 = vld [vmem:[#allocation11 + $0x340] sm:$0xff] }
 0x322   :  { %1283 = vmatpush.msra.mxu1 %v1214_v44  ;;  %1323 = vmatpush.msra.mxu3 %v1215_v46  ;;  %v1432_v44 = vld [vmem:[#allocation11 + $0x168] sm:$0xff]  ;;  %v1427_v46 = vld [vmem:[#allocation11 + $0x140] sm:$0xff] }
 0x323   :  { %1303 = vmatpush.msra.mxu2 %v1246_v52  ;;  %1343 = vmatpush.msrb.mxu0 %v1247_v54  ;;  %v1492_v52 = vld [vmem:[#allocation11 + $0x348] sm:$0xff]  ;;  %v1487_v54 = vld [vmem:[#allocation11 + $0x320] sm:$0xff] }
 0x324   :  { %1284 = vmatpush.msra.mxu1 %v1212_v49  ;;  %1324 = vmatpush.msra.mxu3 %v1213_v53  ;;  %v1428_v49 = vld [vmem:[#allocation11 + $0x148] sm:$0xff]  ;;  %v1423_v53 = vld [vmem:[#allocation11 + $0x120] sm:$0xff] }
 0x325   :  { %1304 = vmatpush.msra.mxu2 %v1244_v50  ;;  %1344 = vmatpush.msrb.mxu0 %v1245_v56  ;;  %v1488_v50 = vld [vmem:[#allocation11 + $0x328] sm:$0xff]  ;;  %v1483_v56 = vld [vmem:[#allocation11 + $0x300] sm:$0xff] }
 0x326   :  { %1285 = vmatpush.msra.mxu1 %v1210_v48  ;;  %1325 = vmatpush.msra.mxu3 %v1211_v55  ;;  %v1424_v48 = vld [vmem:[#allocation11 + $0x128] sm:$0xff]  ;;  %v1419_v55 = vld [vmem:[#allocation11 + $0x100] sm:$0xff] }
 0x327   :  { %1305 = vmatpush.msra.mxu2 %v1242_v58  ;;  %1345 = vmatpush.msrb.mxu0 %v1243_v60  ;;  %v1484_v58 = vld [vmem:[#allocation11 + $0x308] sm:$0xff]  ;;  %v1479_v60 = vld [vmem:[#allocation11 + $0x2e0] sm:$0xff] }
 0x328   :  { %1286 = vmatpush.msra.mxu1 %v1208_v57  ;;  %1326 = vmatpush.msra.mxu3 %v1209_v59  ;;  %v1420_v57 = vld [vmem:[#allocation11 + $0x108] sm:$0xff]  ;;  %v1415_v59 = vld [vmem:[#allocation11 + $0xe0] sm:$0xff] }
 0x329   :  { %1306 = vmatpush.msra.mxu2 %v1240_v62  ;;  %1346 = vmatpush.msrb.mxu0 %v1241_v63  ;;  %v1480_v62 = vld [vmem:[#allocation11 + $0x2e8] sm:$0xff]  ;;  %v1475_v63 = vld [vmem:[#allocation11 + $0x2c0] sm:$0xff] }
 0x32a   :  { %1287 = vmatpush.msra.mxu1 %v1206_v61  ;;  %1327 = vmatpush.msra.mxu3 %v1207_v0  ;;  %v1416_v61 = vld [vmem:[#allocation11 + $0xe8] sm:$0xff]  ;;  %v1411_v0 = vld [vmem:[#allocation11 + $0xc0] sm:$0xff] }
 0x32b   :  { %1307 = vmatpush.msra.mxu2 %v1238_v20  ;;  %1347 = vmatpush.msrb.mxu0 %v1239_v2  ;;  %v1412_v20 = vld [vmem:[#allocation11 + $0xc8] sm:$0xff] }
 0x32c   :  { %v1476_v2 = vld [vmem:[#allocation11 + $0x2c8] sm:$0xff] }
 0x387   :  { %v987_v29 = vpop.f32.mrf.mxu1 }
 0x388   :  { %v988_v33 = vadd.f32 %v987_v29, %v968_v28  ;;  %v1047_v51 = vpop.f32.mrf.mxu0  ;;  %v1512_v28 = vld [vmem:[#allocation11 + $0x3e8] sm:$0xff]  ;;  %v1443_v29 = vld [vmem:[#allocation11 + $0x1c0] sm:$0xff] }
 0x38d   :  { %v1027_v35 = vpop.f32.mrf.mxu3 }
 0x38e   :  { %v1028_v37 = vadd.f32 %v1027_v35, %v969_v30  ;;  %v1007_v39 = vpop.f32.mrf.mxu2  ;;  %v1507_v30 = vld [vmem:[#allocation11 + $0x3c0] sm:$0xff] }
 0x38f   :  { %v1008_v40 = vadd.f32 %v1007_v39, %v988_v33  ;;  %v1508_v33 = vld [vmem:[#allocation11 + $0x3c8] sm:$0xff]  ;;  %v1439_v35 = vld [vmem:[#allocation11 + $0x1a0] sm:$0xff] }
 0x390   :  { %v1048_v41 = vadd.f32 %v1047_v51, %v1028_v37  ;;  %v1440_v37 = vld [vmem:[#allocation11 + $0x1a8] sm:$0xff]  ;;  %v1435_v39 = vld [vmem:[#allocation11 + $0x180] sm:$0xff] }
 0x391   :  { %v7307_v42 = vadd.f32 %v1052_v36, %v1008_v40  ;;  %v1503_v36 = vld [vmem:[#allocation11 + $0x3a0] sm:$0xff]  ;;  %v1436_v40 = vld [vmem:[#allocation11 + $0x188] sm:$0xff] }
 0x392   :  { %v7309_v43 = vadd.f32 %v1053_v38, %v1048_v41  ;;  %v1504_v38 = vld [vmem:[#allocation11 + $0x3a8] sm:$0xff]  ;;  %v1499_v51 = vld [vmem:[#allocation11 + $0x380] sm:$0xff] }
 0x393   :  { %1058 = vst [vmem:[#allocation17] sm:$0xff] %v7307_v42  ;;  %1142 = vmatmul.f32.vlgmr.msrb.gmra.mxu1 %v7307_v42  ;;  %1182 = vmatmul.f32.vlgmr.msrb.gmra.mxu3 %v7307_v42  ;;  %v1500_v41 = vld [vmem:[#allocation11 + $0x388] sm:$0xff] }
 0x394   :  { %1059 = vst [vmem:[#allocation17 + $0x8] sm:$0xff] %v7309_v43  ;;  %1162 = vmatmul.f32.vlgmr.msrb.gmra.mxu2 %v7309_v43  ;;  %1202 = vmatmul.f32.vlgmr.msra.gmra.mxu0 %v7309_v43 }
 0x395   :  { %1524 = vmatpush.msrb.mxu1 %v1447_v7  ;;  %1544 = vmatpush.msrb.mxu2 %v1511_v26  ;;  %5539 = dma.vmem_to_hbm [thread:$0]  %s5535_s23, 256, %s5537_s21, [#allocation4]  }
 0x396   :  { %1564 = vmatpush.msrb.mxu3 %v1448_v27  ;;  %1584 = vmatpush.msra.mxu0 %v1512_v28  ;;  %v1395_v27 = vld [vmem:[#allocation11 + $0x40] sm:$0xff] }
 0x397   :  { %1525 = vmatpush.msrb.mxu1 %v1443_v29  ;;  %1545 = vmatpush.msrb.mxu2 %v1507_v30  ;;  %v1459_v28 = vld [vmem:[#allocation11 + $0x240] sm:$0xff]  ;;  %v1396_v29 = vld [vmem:[#allocation11 + $0x48] sm:$0xff] }
 0x398   :  { %1565 = vmatpush.msrb.mxu3 %v1444_v32  ;;  %1585 = vmatpush.msra.mxu0 %v1508_v33  ;;  %v1455_v30 = vld [vmem:[#allocation11 + $0x220] sm:$0xff]  ;;  %v1392_v32 = vld [vmem:[#allocation11 + $0x28] sm:$0xff] }
 0x399   :  { %1526 = vmatpush.msrb.mxu1 %v1439_v35  ;;  %1546 = vmatpush.msrb.mxu2 %v1503_v36  ;;  %v1456_v33 = vld [vmem:[#allocation11 + $0x228] sm:$0xff]  ;;  %v1387_v35 = vld [vmem:[#allocation11] sm:$0xff] }
 0x39a   :  { %1566 = vmatpush.msrb.mxu3 %v1440_v37  ;;  %1586 = vmatpush.msra.mxu0 %v1504_v38  ;;  %v1451_v36 = vld [vmem:[#allocation11 + $0x200] sm:$0xff]  ;;  %v1388_v37 = vld [vmem:[#allocation11 + $0x8] sm:$0xff] }
 0x39b   :  { %1527 = vmatpush.msrb.mxu1 %v1435_v39  ;;  %1547 = vmatpush.msrb.mxu2 %v1499_v51  ;;  %v1452_v38 = vld [vmem:[#allocation11 + $0x208] sm:$0xff]  ;;  %v1449_v39 = vld [vmem:[#allocation11 + $0x1f0] sm:$0xff] }
 0x39c   :  { %1567 = vmatpush.msrb.mxu3 %v1436_v40  ;;  %1587 = vmatpush.msra.mxu0 %v1500_v41  ;;  %v1513_v51 = vld [vmem:[#allocation11 + $0x3f0] sm:$0xff]  ;;  %v1450_v40 = vld [vmem:[#allocation11 + $0x1f8] sm:$0xff] }
 0x39d   :  { %v1514_v41 = vld [vmem:[#allocation11 + $0x3f8] sm:$0xff] }
 0x39e   :  { %1568 = vmatpush.msrb.mxu3 %v1432_v44  ;;  %1588 = vmatpush.msra.mxu0 %v1496_v45  ;;  %v1446_v44 = vld [vmem:[#allocation11 + $0x1d8] sm:$0xff] }
 0x39f   :  { %v1510_v45 = vld [vmem:[#allocation11 + $0x3d8] sm:$0xff] }
 0x3a0   :  { %1569 = vmatpush.msrb.mxu3 %v1428_v49  ;;  %1589 = vmatpush.msra.mxu0 %v1492_v52  ;;  %v1442_v49 = vld [vmem:[#allocation11 + $0x1b8] sm:$0xff] }
 0x3a1   :  { %v1506_v52 = vld [vmem:[#allocation11 + $0x3b8] sm:$0xff] }
 0x3a2   :  { %1570 = vmatpush.msrb.mxu3 %v1424_v48  ;;  %1590 = vmatpush.msra.mxu0 %v1488_v50  ;;  %v1438_v48 = vld [vmem:[#allocation11 + $0x198] sm:$0xff] }
 0x3a3   :  { %v1502_v50 = vld [vmem:[#allocation11 + $0x398] sm:$0xff] }
 0x3a4   :  { %1571 = vmatpush.msrb.mxu3 %v1420_v57  ;;  %1591 = vmatpush.msra.mxu0 %v1484_v58  ;;  %v1434_v57 = vld [vmem:[#allocation11 + $0x178] sm:$0xff] }
 0x3a5   :  { %v1498_v58 = vld [vmem:[#allocation11 + $0x378] sm:$0xff] }
 0x3a6   :  { %1572 = vmatpush.msrb.mxu3 %v1416_v61  ;;  %1592 = vmatpush.msra.mxu0 %v1480_v62  ;;  %v1430_v61 = vld [vmem:[#allocation11 + $0x158] sm:$0xff] }
 0x3a7   :  { %v1494_v62 = vld [vmem:[#allocation11 + $0x358] sm:$0xff] }
 0x3a8   :  { %1573 = vmatpush.msrb.mxu3 %v1412_v20  ;;  %1593 = vmatpush.msra.mxu0 %v1476_v2  ;;  %v1426_v20 = vld [vmem:[#allocation11 + $0x138] sm:$0xff] }
 0x3a9   :  { %v1490_v2 = vld [vmem:[#allocation11 + $0x338] sm:$0xff] }
 0x410   :  { %v1143_v4 = vpop.f32.mrf.mxu1 }
 0x411   :  { %v1144_v10 = vadd.f32 %v1143_v4, %v7318_v3  ;;  %v1203_v14 = vpop.f32.mrf.mxu0  ;;  %v1407_v4 = vld [vmem:[#allocation11 + $0xa0] sm:$0xff] }
 0x416   :  { %v1183_v11 = vpop.f32.mrf.mxu3 }
 0x417   :  { %v1163_v12 = vpop.f32.mrf.mxu2  ;;  %v1184_v13 = vadd.f32 %v1183_v11, %v7321_v6  ;;  %v1408_v11 = vld [vmem:[#allocation11 + $0xa8] sm:$0xff] }
 0x418   :  { %v1164_v15 = vadd.f32 %v1163_v12, %v1144_v10  ;;  %v1471_v10 = vld [vmem:[#allocation11 + $0x2a0] sm:$0xff]  ;;  %v1472_v12 = vld [vmem:[#allocation11 + $0x2a8] sm:$0xff]  ;;  %1574 = vmatpush.msrb.mxu3 %v1408_v11  ;;  %v1422_v11 = vld [vmem:[#allocation11 + $0x118] sm:$0xff] }
 0x419   :  { %v1204_v16 = vadd.f32 %v1203_v14, %v1184_v13  ;;  %v1403_v13 = vld [vmem:[#allocation11 + $0x80] sm:$0xff]  ;;  %1594 = vmatpush.msra.mxu0 %v1472_v12  ;;  %v1486_v12 = vld [vmem:[#allocation11 + $0x318] sm:$0xff] }
 0x41a   :  { %1288 = vmatmul.f32.vlgmr.msra.gmra.mxu1 %v1164_v15  ;;  %1328 = vmatmul.f32.vlgmr.msra.gmra.mxu3 %v1164_v15  ;;  %v1467_v14 = vld [vmem:[#allocation11 + $0x280] sm:$0xff]  ;;  %v1404_v15 = vld [vmem:[#allocation11 + $0x88] sm:$0xff] }
 0x41b   :  { %1308 = vmatmul.f32.vlgmr.msra.gmra.mxu2 %v1204_v16  ;;  %1348 = vmatmul.f32.vlgmr.msrb.gmra.mxu0 %v1204_v16  ;;  %v1468_v16 = vld [vmem:[#allocation11 + $0x288] sm:$0xff] }
 0x41c   :  { %1575 = vmatpush.msrb.mxu3 %v1404_v15  ;;  %1595 = vmatpush.msra.mxu0 %v1468_v16  ;;  %v1418_v15 = vld [vmem:[#allocation11 + $0xf8] sm:$0xff] }
 0x41d   :  { %v1482_v16 = vld [vmem:[#allocation11 + $0x2f8] sm:$0xff] }
 0x497   :  { %v1289_v8 = vpop.f32.mrf.mxu1 }
 0x498   :  { %v1290_v9 = vadd.f32 %v1289_v8, %v7326_v17  ;;  %v1349_v21 = vpop.f32.mrf.mxu0  ;;  %v1399_v8 = vld [vmem:[#allocation11 + $0x60] sm:$0xff] }
 0x49d   :  { %v1329_v31 = vpop.f32.mrf.mxu3 }
 0x49e   :  { %v1330_v34 = vadd.f32 %v1329_v31, %v7329_v18  ;;  %v1309_v19 = vpop.f32.mrf.mxu2 }
 0x49f   :  { %v1310_v22 = vadd.f32 %v1309_v19, %v1290_v9  ;;  %v1463_v9 = vld [vmem:[#allocation11 + $0x260] sm:$0xff]  ;;  %v1464_v19 = vld [vmem:[#allocation11 + $0x268] sm:$0xff] }
 0x4a0   :  { %v1350_v23 = vadd.f32 %v1349_v21, %v1330_v34  ;;  %v1400_v34 = vld [vmem:[#allocation11 + $0x68] sm:$0xff]  ;;  %1596 = vmatpush.msra.mxu0 %v1464_v19  ;;  %v1409_v19 = vld [vmem:[#allocation11 + $0xb0] sm:$0xff] }
 0x4a1   :  { %v7334_v24 = vadd.f32 %v1310_v22, %v7307_v42  ;;  %v1431_v42 = vld [vmem:[#allocation11 + $0x160] sm:$0xff]  ;;  %1576 = vmatpush.msrb.mxu3 %v1400_v34  ;;  %v1478_v34 = vld [vmem:[#allocation11 + $0x2d8] sm:$0xff] }
 0x4a2   :  { %v7337_v25 = vadd.f32 %v1350_v23, %v7309_v43  ;;  %v1495_v43 = vld [vmem:[#allocation11 + $0x360] sm:$0xff]  ;;  %1528 = vmatpush.msrb.mxu1 %v1431_v42  ;;  %v1445_v42 = vld [vmem:[#allocation11 + $0x1d0] sm:$0xff] }
 0x4a3   :  { %1548 = vmatpush.msrb.mxu2 %v1495_v43  ;;  %1577 = vmatpush.msrb.mxu3 %v1396_v29  ;;  %v1509_v43 = vld [vmem:[#allocation11 + $0x3d0] sm:$0xff]  ;;  %v1470_v29 = vld [vmem:[#allocation11 + $0x298] sm:$0xff] }
 0x4a4   :  { %v1354_v1 = vadd.f32 %v7337_v25, %v7334_v24  ;;  %1529 = vmatpush.msrb.mxu1 %v1427_v46  ;;  %v1441_v46 = vld [vmem:[#allocation11 + $0x1b0] sm:$0xff] }
 0x4a5   :  { %1549 = vmatpush.msrb.mxu2 %v1491_v47  ;;  %1578 = vmatpush.msrb.mxu3 %v1392_v32  ;;  %v1505_v47 = vld [vmem:[#allocation11 + $0x3b0] sm:$0xff]  ;;  %v1466_v32 = vld [vmem:[#allocation11 + $0x278] sm:$0xff] }
 0x4a6   :  { %1355 = vadd.xlane.f32.xlu0 %v1354_v1  ;;  %1530 = vmatpush.msrb.mxu1 %v1423_v53  ;;  %v1437_v53 = vld [vmem:[#allocation11 + $0x190] sm:$0xff] }
 0x4a7   :  { %1550 = vmatpush.msrb.mxu2 %v1487_v54  ;;  %1579 = vmatpush.msrb.mxu3 %v1388_v37  ;;  %v1501_v54 = vld [vmem:[#allocation11 + $0x390] sm:$0xff]  ;;  %v1398_v37 = vld [vmem:[#allocation11 + $0x58] sm:$0xff] }
 0x4a8   :  { %1531 = vmatpush.msrb.mxu1 %v1419_v55  ;;  %v1433_v55 = vld [vmem:[#allocation11 + $0x170] sm:$0xff] }
 0x4a9   :  { %1551 = vmatpush.msrb.mxu2 %v1483_v56  ;;  %1644 = vmatpush.msra.mxu3 %v1450_v40  ;;  %v1497_v56 = vld [vmem:[#allocation11 + $0x370] sm:$0xff] }
 0x4aa   :  { %1532 = vmatpush.msrb.mxu1 %v1415_v59  ;;  %v1429_v59 = vld [vmem:[#allocation11 + $0x150] sm:$0xff] }
 0x4ab   :  { %1552 = vmatpush.msrb.mxu2 %v1479_v60  ;;  %1645 = vmatpush.msra.mxu3 %v1446_v44  ;;  %v1493_v60 = vld [vmem:[#allocation11 + $0x350] sm:$0xff] }
 0x4ac   :  { %1533 = vmatpush.msrb.mxu1 %v1411_v0  ;;  %v1425_v0 = vld [vmem:[#allocation11 + $0x130] sm:$0xff] }
 0x4ad   :  { %1553 = vmatpush.msrb.mxu2 %v1475_v63  ;;  %1646 = vmatpush.msra.mxu3 %v1442_v49  ;;  %v1489_v63 = vld [vmem:[#allocation11 + $0x330] sm:$0xff] }
 0x4ae   :  { %1534 = vmatpush.msrb.mxu1 %v1407_v4  ;;  %v1421_v4 = vld [vmem:[#allocation11 + $0x110] sm:$0xff] }
 0x4af   :  { %1554 = vmatpush.msrb.mxu2 %v1471_v10  ;;  %1647 = vmatpush.msra.mxu3 %v1438_v48  ;;  %v1485_v10 = vld [vmem:[#allocation11 + $0x310] sm:$0xff] }
 0x4b0   :  { %1535 = vmatpush.msrb.mxu1 %v1403_v13  ;;  %v1417_v13 = vld [vmem:[#allocation11 + $0xf0] sm:$0xff] }
 0x4b1   :  { %1555 = vmatpush.msrb.mxu2 %v1467_v14  ;;  %1648 = vmatpush.msra.mxu3 %v1434_v57  ;;  %v1481_v14 = vld [vmem:[#allocation11 + $0x2f0] sm:$0xff] }
 0x4b2   :  { %1536 = vmatpush.msrb.mxu1 %v1399_v8  ;;  %v1413_v8 = vld [vmem:[#allocation11 + $0xd0] sm:$0xff] }
 0x4b3   :  { %1556 = vmatpush.msrb.mxu2 %v1463_v9  ;;  %1649 = vmatpush.msra.mxu3 %v1430_v61  ;;  %v1477_v9 = vld [vmem:[#allocation11 + $0x2d0] sm:$0xff] }
 0x4b4   :  { %1537 = vmatpush.msrb.mxu1 %v1395_v27  ;;  %v1469_v27 = vld [vmem:[#allocation11 + $0x290] sm:$0xff] }
 0x4b5   :  { %1557 = vmatpush.msrb.mxu2 %v1459_v28  ;;  %1650 = vmatpush.msra.mxu3 %v1426_v20  ;;  %v1406_v28 = vld [vmem:[#allocation11 + $0x98] sm:$0xff]  ;;  %v1457_v40 = vld [vmem:[#allocation11 + $0x230] sm:$0xff] }
 0x4b6   :  { %v1453_v44 = vld [vmem:[#allocation11 + $0x210] sm:$0xff] }
 0x4b7   :  { %1558 = vmatpush.msrb.mxu2 %v1455_v30  ;;  %1651 = vmatpush.msra.mxu3 %v1422_v11  ;;  %v1402_v30 = vld [vmem:[#allocation11 + $0x78] sm:$0xff]  ;;  %v7353_v48 = vld [vmem:[#allocation13 + $0x10] sm:$0x1f] }
 0x4b8   :  { %v7358_v57 = vperm.slane %v7353_v48, 1  ;;  %v1814_v11 = vld [vmem:[#allocation8 + $0x10f0] sm:$0xff] }
 0x4b9   :  { %1559 = vmatpush.msrb.mxu2 %v1451_v36  ;;  %1652 = vmatpush.msra.mxu3 %v1418_v15  ;;  %v1812_v15 = vld [vmem:[#allocation8 + $0x10e0] sm:$0xff] }
 0x4bb   :  { %1624 = vmatpush.msra.mxu2 %v1513_v51 }
 0x4bd   :  { %1625 = vmatpush.msra.mxu2 %v1509_v43  ;;  %v1389_v43 = vld [vmem:[#allocation11 + $0x10] sm:$0xff] }
 0x4bf   :  { %1626 = vmatpush.msra.mxu2 %v1505_v47  ;;  %v1454_v47 = vld [vmem:[#allocation11 + $0x218] sm:$0xff] }
 0x4c1   :  { %1627 = vmatpush.msra.mxu2 %v1501_v54 }
 0x4c3   :  { %1628 = vmatpush.msra.mxu2 %v1497_v56 }
 0x4c5   :  { %1629 = vmatpush.msra.mxu2 %v1493_v60 }
 0x4c7   :  { %1630 = vmatpush.msra.mxu2 %v1489_v63 }
 0x4c9   :  { %1631 = vmatpush.msra.mxu2 %v1485_v10  ;;  %v1718_v10 = vld [vmem:[#allocation8 + $0xdf0] sm:$0xff] }
 0x4cb   :  { %1632 = vmatpush.msra.mxu2 %v1481_v14  ;;  %v1780_v14 = vld [vmem:[#allocation8 + $0xfe0] sm:$0xff] }
 0x4cd   :  { %1633 = vmatpush.msra.mxu2 %v1477_v9  ;;  %v1778_v9 = vld [vmem:[#allocation8 + $0xfd0] sm:$0xff] }
 0x519   :  { %v1356_v31 = vpop.xlane.xlu0 %1355 }
 0x51a   :  { %v1357_v21 = vmul.f32 %v1356_v31, %v7240_v5  ;;  %v1414_v31 = vld [vmem:[#allocation11 + $0xd8] sm:$0xff] }
 0x51b   :  { %1653 = vmatpush.msra.mxu3 %v1414_v31  ;;  %v1810_v31 = vld [vmem:[#allocation8 + $0x10d0] sm:$0xff] }
 0x51c   :  { %v7343_v22 = vsub.f32 %v7334_v24, %v1357_v21  ;;  %v7346_v23 = vsub.f32 %v7337_v25, %v1357_v21  ;;  %v1460_v24 = vld [vmem:[#allocation11 + $0x248] sm:$0xff]  ;;  %v1391_v25 = vld [vmem:[#allocation11 + $0x20] sm:$0xff]  ;;  %v1473_v21 = vld [vmem:[#allocation11 + $0x2b0] sm:$0xff] }
 0x51d   :  { %1597 = vmatpush.msra.mxu0 %v1460_v24  ;;  %1538 = vmatpush.msrb.mxu1 %v1391_v25  ;;  %v1401_v24 = vld [vmem:[#allocation11 + $0x70] sm:$0xff] }
 0x51e   :  { %v1360_v1 = vmul.f32 %v7343_v22, %v7343_v22  ;;  %v1361_v7 = vmul.f32 %v7346_v23, %v7346_v23  ;;  %1634 = vmatpush.msra.mxu2 %v1473_v21  ;;  %v1465_v25 = vld [vmem:[#allocation11 + $0x270] sm:$0xff]  ;;  %v1776_v21 = vld [vmem:[#allocation8 + $0xfc0] sm:$0xff] }
 0x51f   :  { %1598 = vmatpush.msra.mxu0 %v1456_v33  ;;  %1539 = vmatpush.msrb.mxu1 %v1387_v35  ;;  %v1397_v33 = vld [vmem:[#allocation11 + $0x50] sm:$0xff] }
 0x520   :  { %v1362_v26 = vadd.f32 %v1361_v7, %v1360_v1  ;;  %v1410_v1 = vld [vmem:[#allocation11 + $0xb8] sm:$0xff]  ;;  %1635 = vmatpush.msra.mxu2 %v1469_v27  ;;  %v1461_v35 = vld [vmem:[#allocation11 + $0x250] sm:$0xff] }
 0x521   :  { %1599 = vmatpush.msra.mxu0 %v1452_v38  ;;  %1604 = vmatpush.msra.mxu1 %v1449_v39  ;;  %v1474_v7 = vld [vmem:[#allocation11 + $0x2b8] sm:$0xff]  ;;  %v1393_v39 = vld [vmem:[#allocation11 + $0x30] sm:$0xff] }
 0x522   :  { %1363 = vadd.xlane.f32.xlu1 %v1362_v26  ;;  %v1405_v26 = vld [vmem:[#allocation11 + $0x90] sm:$0xff]  ;;  %1654 = vmatpush.msra.mxu3 %v1410_v1  ;;  %v1462_v38 = vld [vmem:[#allocation11 + $0x258] sm:$0xff]  ;;  %v1808_v1 = vld [vmem:[#allocation8 + $0x10c0] sm:$0xff] }
 0x523   :  { %1664 = vmatpush.msrb.mxu0 %v1514_v41  ;;  %1605 = vmatpush.msra.mxu1 %v1445_v42  ;;  %v1394_v41 = vld [vmem:[#allocation11 + $0x38] sm:$0xff]  ;;  %v1774_v27 = vld [vmem:[#allocation8 + $0xfb0] sm:$0xff] }
 0x524   :  { %1655 = vmatpush.msra.mxu3 %v1406_v28  ;;  %1636 = vmatpush.msra.mxu2 %v1465_v25  ;;  %v1458_v42 = vld [vmem:[#allocation11 + $0x238] sm:$0xff]  ;;  %v1806_v28 = vld [vmem:[#allocation8 + $0x10b0] sm:$0xff]  ;;  %v1772_v25 = vld [vmem:[#allocation8 + $0xfa0] sm:$0xff] }
 0x525   :  { %1665 = vmatpush.msrb.mxu0 %v1510_v45  ;;  %1606 = vmatpush.msra.mxu1 %v1441_v46  ;;  %v1390_v46 = vld [vmem:[#allocation11 + $0x18] sm:$0xff] }
 0x526   :  { %1656 = vmatpush.msra.mxu3 %v1402_v30  ;;  %1637 = vmatpush.msra.mxu2 %v1461_v35  ;;  %v1804_v30 = vld [vmem:[#allocation8 + $0x10a0] sm:$0xff]  ;;  %v1770_v35 = vld [vmem:[#allocation8 + $0xf90] sm:$0xff] }
 0x527   :  { %1666 = vmatpush.msrb.mxu0 %v1506_v52  ;;  %1607 = vmatpush.msra.mxu1 %v1437_v53 }
 0x528   :  { %1657 = vmatpush.msra.mxu3 %v1398_v37  ;;  %1638 = vmatpush.msra.mxu2 %v1457_v40  ;;  %v1704_v37 = vld [vmem:[#allocation8 + $0xd80] sm:$0xff]  ;;  %v1702_v40 = vld [vmem:[#allocation8 + $0xd70] sm:$0xff] }
 0x529   :  { %1667 = vmatpush.msrb.mxu0 %v1502_v50  ;;  %1608 = vmatpush.msra.mxu1 %v1433_v55  ;;  %v7355_v50 = vld [vmem:[#allocation13 + $0x18] sm:$0x1f] }
 0x52a   :  { %1658 = vmatpush.msra.mxu3 %v1394_v41  ;;  %1639 = vmatpush.msra.mxu2 %v1453_v44  ;;  %v1734_v41 = vld [vmem:[#allocation8 + $0xe70] sm:$0xff]  ;;  %v1700_v44 = vld [vmem:[#allocation8 + $0xd60] sm:$0xff] }
 0x52b   :  { %1668 = vmatpush.msrb.mxu0 %v1498_v58  ;;  %1609 = vmatpush.msra.mxu1 %v1429_v59  ;;  %v7361_v58 = vperm.slane %v7355_v50, 1 }
 0x52c   :  { %1659 = vmatpush.msra.mxu3 %v1390_v46  ;;  %v1764_v46 = vld [vmem:[#allocation8 + $0xf60] sm:$0xff] }
 0x52d   :  { %1669 = vmatpush.msrb.mxu0 %v1494_v62  ;;  %1610 = vmatpush.msra.mxu1 %v1425_v0  ;;  %v7366_v62 = vperm.slane %v7353_v48, 2  ;;  %v7369_v0 = vperm.slane %v7355_v50, 2 }
 0x52f   :  { %1670 = vmatpush.msrb.mxu0 %v1490_v2  ;;  %1611 = vmatpush.msra.mxu1 %v1421_v4 }
 0x531   :  { %1671 = vmatpush.msrb.mxu0 %v1486_v12  ;;  %1612 = vmatpush.msra.mxu1 %v1417_v13  ;;  %v1716_v12 = vld [vmem:[#allocation8 + $0xde0] sm:$0xff] }
 0x532   :  { %v1748_v13 = vld [vmem:[#allocation8 + $0xee0] sm:$0xff] }
 0x533   :  { %1672 = vmatpush.msrb.mxu0 %v1482_v16  ;;  %1613 = vmatpush.msra.mxu1 %v1413_v8  ;;  %v1714_v16 = vld [vmem:[#allocation8 + $0xdd0] sm:$0xff] }
 0x534   :  { %v1746_v8 = vld [vmem:[#allocation8 + $0xed0] sm:$0xff] }
 0x535   :  { %1673 = vmatpush.msrb.mxu0 %v1478_v34  ;;  %1614 = vmatpush.msra.mxu1 %v1409_v19  ;;  %v1712_v34 = vld [vmem:[#allocation8 + $0xdc0] sm:$0xff] }
 0x536   :  { %v1744_v19 = vld [vmem:[#allocation8 + $0xec0] sm:$0xff] }
 0x537   :  { %1674 = vmatpush.msrb.mxu0 %v1474_v7  ;;  %1615 = vmatpush.msra.mxu1 %v1405_v26  ;;  %v1710_v7 = vld [vmem:[#allocation8 + $0xdb0] sm:$0xff] }
 0x538   :  { %v1742_v26 = vld [vmem:[#allocation8 + $0xeb0] sm:$0xff] }
 0x539   :  { %1675 = vmatpush.msrb.mxu0 %v1470_v29  ;;  %1616 = vmatpush.msra.mxu1 %v1401_v24  ;;  %v1708_v29 = vld [vmem:[#allocation8 + $0xda0] sm:$0xff] }
 0x53a   :  { %v1740_v24 = vld [vmem:[#allocation8 + $0xea0] sm:$0xff] }
 0x53b   :  { %1676 = vmatpush.msrb.mxu0 %v1466_v32  ;;  %1617 = vmatpush.msra.mxu1 %v1397_v33  ;;  %v1706_v32 = vld [vmem:[#allocation8 + $0xd90] sm:$0xff] }
 0x53c   :  { %v1738_v33 = vld [vmem:[#allocation8 + $0xe90] sm:$0xff] }
 0x53d   :  { %1677 = vmatpush.msrb.mxu0 %v1462_v38  ;;  %1618 = vmatpush.msra.mxu1 %v1393_v39  ;;  %v1736_v38 = vld [vmem:[#allocation8 + $0xe80] sm:$0xff] }
 0x53e   :  { %v1768_v39 = vld [vmem:[#allocation8 + $0xf80] sm:$0xff] }
 0x53f   :  { %1678 = vmatpush.msrb.mxu0 %v1458_v42  ;;  %1619 = vmatpush.msra.mxu1 %v1389_v43  ;;  %v1766_v42 = vld [vmem:[#allocation8 + $0xf70] sm:$0xff] }
 0x540   :  { %v1798_v43 = vld [vmem:[#allocation8 + $0x1070] sm:$0xff] }
 0x541   :  { %1679 = vmatpush.msrb.mxu0 %v1454_v47  ;;  %v1796_v47 = vld [vmem:[#allocation8 + $0x1060] sm:$0xff] }
 0x595   :  { %v1364_v36 = vpop.xlane.xlu1 %1363 }
 0x596   :  { %v1365_v51 = vmul.f32 %v1364_v36, %v7240_v5  ;;  %v1802_v36 = vld [vmem:[#allocation8 + $0x1090] sm:$0xff] }
 0x598   :  { %v1366_v45 = vadd.f32 1e-05, %v1365_v51  ;;  %v1800_v51 = vld [vmem:[#allocation8 + $0x1080] sm:$0xff] }
 0x59a   :  { %5615 = vrsqrt.f32 %v1366_v45  ;;  %vm1373_vm12 = vweird.f32 %v1366_v45 }
 0x5a0   :  { %v5616_v49 = vpop.eup %5615 }
 0x5a1   :  { %v1368_v52 = vmul.f32 %v5616_v49, %v1366_v45  ;;  %vm1374_vm11 = vweird.f32 %v5616_v49  ;;  %v1732_v45 = vld [vmem:[#allocation8 + $0xe60] sm:$0xff] }
 0x5a2   :  { %vm1375_vm13 = vmor %vm1373_vm12, %vm1374_vm11 }
 0x5a3   :  { %v1369_v53 = vmul.f32 %v5616_v49, %v1368_v52  ;;  %v1730_v52 = vld [vmem:[#allocation8 + $0xe50] sm:$0xff] }
 0x5a5   :  { %v1370_v54 = vmul.f32 0.5, %v1369_v53  ;;  %v1762_v53 = vld [vmem:[#allocation8 + $0xf50] sm:$0xff] }
 0x5a7   :  { %v1371_v55 = vsub.f32 1.5, %v1370_v54  ;;  %v1794_v54 = vld [vmem:[#allocation8 + $0x1050] sm:$0xff] }
 0x5a9   :  { %v1372_v56 = vmul.f32 %v5616_v49, %v1371_v55  ;;  %v1696_v55 = vld [vmem:[#allocation8 + $0xd40] sm:$0xff] }
 0x5ab   :  { %v1376_v59 = vsel %vm1375_vm13, %v5616_v49, %v1372_v56  ;;  %v1698_v49 = vld [vmem:[#allocation8 + $0xd50] sm:$0xff]  ;;  %v1728_v56 = vld [vmem:[#allocation8 + $0xe40] sm:$0xff] }
 0x5ac   :  { %v1377_v60 = vmul.f32 %v1376_v59, %v7343_v22  ;;  %v1378_v61 = vmul.f32 %v1376_v59, %v7346_v23  ;;  %v1750_v22 = vld [vmem:[#allocation8 + $0xef0] sm:$0xff]  ;;  %v1760_v59 = vld [vmem:[#allocation8 + $0xf40] sm:$0xff] }
 0x5ad   :  { %v1782_v23 = vld [vmem:[#allocation8 + $0xff0] sm:$0xff] }
 0x5ae   :  { %v1381_v63 = vmul.f32 %v7358_v57, %v1377_v60  ;;  %v1382_v20 = vmul.f32 %v7361_v58, %v1378_v61  ;;  %v1792_v60 = vld [vmem:[#allocation8 + $0x1040] sm:$0xff]  ;;  %v1694_v61 = vld [vmem:[#allocation8 + $0xd30] sm:$0xff] }
 0x5b0   :  { %v7374_v2 = vadd.f32 %v7366_v62, %v1381_v63  ;;  %v7377_v4 = vadd.f32 %v7369_v0, %v1382_v20  ;;  %v1726_v63 = vld [vmem:[#allocation8 + $0xe30] sm:$0xff] }
 0x5b1   :  { %v1758_v20 = vld [vmem:[#allocation8 + $0xf30] sm:$0xff] }
 0x5b2   :  { %1540 = vmatmul.f32.vlgmr.msrb.gmra.mxu1 %v7374_v2  ;;  %1560 = vmatmul.f32.vlgmr.msrb.gmra.mxu2 %v7377_v4 }
 0x5b3   :  { %1580 = vmatmul.f32.vlgmr.msrb.gmra.mxu3 %v7374_v2  ;;  %1600 = vmatmul.f32.vlgmr.msra.gmra.mxu0 %v7377_v4 }
 0x5b4   :  { %1816 = vmatpush.msrb.mxu1 %v1718_v10  ;;  %1836 = vmatpush.msrb.mxu2 %v1750_v22  ;;  %v1790_v10 = vld [vmem:[#allocation8 + $0x1030] sm:$0xff]  ;;  %v1692_v22 = vld [vmem:[#allocation8 + $0xd20] sm:$0xff] }
 0x5b5   :  { %1856 = vmatpush.msrb.mxu3 %v1782_v23  ;;  %1876 = vmatpush.msra.mxu0 %v1814_v11  ;;  %v1724_v23 = vld [vmem:[#allocation8 + $0xe20] sm:$0xff] }
 0x5b6   :  { %1817 = vmatpush.msrb.mxu1 %v1716_v12  ;;  %1837 = vmatpush.msrb.mxu2 %v1748_v13  ;;  %v1756_v11 = vld [vmem:[#allocation8 + $0xf20] sm:$0xff]  ;;  %v1690_v13 = vld [vmem:[#allocation8 + $0xd10] sm:$0xff] }
 0x5b7   :  { %1857 = vmatpush.msrb.mxu3 %v1780_v14  ;;  %1877 = vmatpush.msra.mxu0 %v1812_v15  ;;  %v1788_v12 = vld [vmem:[#allocation8 + $0x1020] sm:$0xff]  ;;  %v1722_v14 = vld [vmem:[#allocation8 + $0xe10] sm:$0xff] }
 0x5b8   :  { %1818 = vmatpush.msrb.mxu1 %v1714_v16  ;;  %1838 = vmatpush.msrb.mxu2 %v1746_v8  ;;  %v1754_v15 = vld [vmem:[#allocation8 + $0xf10] sm:$0xff]  ;;  %v1688_v8 = vld [vmem:[#allocation8 + $0xd00] sm:$0xff] }
 0x5b9   :  { %1858 = vmatpush.msrb.mxu3 %v1778_v9  ;;  %1878 = vmatpush.msra.mxu0 %v1810_v31  ;;  %v1786_v16 = vld [vmem:[#allocation8 + $0x1010] sm:$0xff]  ;;  %v1720_v9 = vld [vmem:[#allocation8 + $0xe00] sm:$0xff]  ;;  %v1719_v31 = vld [vmem:[#allocation8 + $0xdf8] sm:$0xff] }
 0x5ba   :  { %1620 = vmatmul.f32.vlgmr.msra.gmra.mxu1 %v7374_v2  ;;  %1640 = vmatmul.f32.vlgmr.msra.gmra.mxu2 %v7377_v4 }
 0x5bb   :  { %1660 = vmatmul.f32.vlgmr.msra.gmra.mxu3 %v7374_v2  ;;  %1680 = vmatmul.f32.vlgmr.msrb.gmra.mxu0 %v7377_v4 }
 0x5bc   :  { %1819 = vmatpush.msrb.mxu1 %v1712_v34  ;;  %1839 = vmatpush.msrb.mxu2 %v1744_v19  ;;  %v1751_v34 = vld [vmem:[#allocation8 + $0xef8] sm:$0xff]  ;;  %v1752_v19 = vld [vmem:[#allocation8 + $0xf00] sm:$0xff] }
 0x5bd   :  { %1859 = vmatpush.msrb.mxu3 %v1776_v21  ;;  %1879 = vmatpush.msra.mxu0 %v1808_v1  ;;  %v1784_v21 = vld [vmem:[#allocation8 + $0x1000] sm:$0xff]  ;;  %v1717_v1 = vld [vmem:[#allocation8 + $0xde8] sm:$0xff] }
 0x5be   :  { %1820 = vmatpush.msrb.mxu1 %v1710_v7  ;;  %1840 = vmatpush.msrb.mxu2 %v1742_v26  ;;  %v1749_v7 = vld [vmem:[#allocation8 + $0xee8] sm:$0xff]  ;;  %v1783_v26 = vld [vmem:[#allocation8 + $0xff8] sm:$0xff] }
 0x5bf   :  { %1860 = vmatpush.msrb.mxu3 %v1774_v27  ;;  %1880 = vmatpush.msra.mxu0 %v1806_v28  ;;  %v1815_v27 = vld [vmem:[#allocation8 + $0x10f8] sm:$0xff] }
 0x5c0   :  { %1821 = vmatpush.msrb.mxu1 %v1708_v29  ;;  %1841 = vmatpush.msrb.mxu2 %v1740_v24  ;;  %v1715_v28 = vld [vmem:[#allocation8 + $0xdd8] sm:$0xff]  ;;  %v1781_v24 = vld [vmem:[#allocation8 + $0xfe8] sm:$0xff] }
 0x5c1   :  { %1861 = vmatpush.msrb.mxu3 %v1772_v25  ;;  %1881 = vmatpush.msra.mxu0 %v1804_v30  ;;  %v1747_v29 = vld [vmem:[#allocation8 + $0xed8] sm:$0xff]  ;;  %v1713_v25 = vld [vmem:[#allocation8 + $0xdc8] sm:$0xff] }
 0x5c2   :  { %1822 = vmatpush.msrb.mxu1 %v1706_v32  ;;  %1842 = vmatpush.msrb.mxu2 %v1738_v33  ;;  %v1745_v30 = vld [vmem:[#allocation8 + $0xec8] sm:$0xff]  ;;  %v1711_v32 = vld [vmem:[#allocation8 + $0xdb8] sm:$0xff] }
 0x5c3   :  { %1862 = vmatpush.msrb.mxu3 %v1770_v35  ;;  %1882 = vmatpush.msra.mxu0 %v1802_v36  ;;  %v1743_v33 = vld [vmem:[#allocation8 + $0xeb8] sm:$0xff]  ;;  %v1709_v35 = vld [vmem:[#allocation8 + $0xda8] sm:$0xff] }
 0x5c4   :  { %1823 = vmatpush.msrb.mxu1 %v1704_v37  ;;  %1843 = vmatpush.msrb.mxu2 %v1736_v38  ;;  %v1707_v36 = vld [vmem:[#allocation8 + $0xd98] sm:$0xff]  ;;  %v1741_v37 = vld [vmem:[#allocation8 + $0xea8] sm:$0xff] }
 0x5c5   :  { %1863 = vmatpush.msrb.mxu3 %v1768_v39  ;;  %1883 = vmatpush.msra.mxu0 %v1800_v51  ;;  %v1779_v38 = vld [vmem:[#allocation8 + $0xfd8] sm:$0xff]  ;;  %v1813_v39 = vld [vmem:[#allocation8 + $0x10e8] sm:$0xff] }
 0x5c6   :  { %1824 = vmatpush.msrb.mxu1 %v1702_v40  ;;  %1844 = vmatpush.msrb.mxu2 %v1734_v41  ;;  %v1705_v51 = vld [vmem:[#allocation8 + $0xd88] sm:$0xff]  ;;  %v1739_v40 = vld [vmem:[#allocation8 + $0xe98] sm:$0xff] }
 0x5c7   :  { %1864 = vmatpush.msrb.mxu3 %v1766_v42  ;;  %1884 = vmatpush.msra.mxu0 %v1798_v43  ;;  %v1777_v41 = vld [vmem:[#allocation8 + $0xfc8] sm:$0xff]  ;;  %v1811_v42 = vld [vmem:[#allocation8 + $0x10d8] sm:$0xff] }
 0x5c8   :  { %1825 = vmatpush.msrb.mxu1 %v1700_v44  ;;  %1845 = vmatpush.msrb.mxu2 %v1732_v45  ;;  %v1703_v43 = vld [vmem:[#allocation8 + $0xd78] sm:$0xff]  ;;  %v1737_v44 = vld [vmem:[#allocation8 + $0xe88] sm:$0xff] }
 0x5c9   :  { %1865 = vmatpush.msrb.mxu3 %v1764_v46  ;;  %1885 = vmatpush.msra.mxu0 %v1796_v47  ;;  %v1775_v45 = vld [vmem:[#allocation8 + $0xfb8] sm:$0xff]  ;;  %v1809_v46 = vld [vmem:[#allocation8 + $0x10c8] sm:$0xff] }
 0x5ca   :  { %1826 = vmatpush.msrb.mxu1 %v1698_v49  ;;  %1846 = vmatpush.msrb.mxu2 %v1730_v52  ;;  %v1701_v47 = vld [vmem:[#allocation8 + $0xd68] sm:$0xff]  ;;  %v1735_v49 = vld [vmem:[#allocation8 + $0xe78] sm:$0xff] }
 0x5cb   :  { %1866 = vmatpush.msrb.mxu3 %v1762_v53  ;;  %1886 = vmatpush.msra.mxu0 %v1794_v54  ;;  %v1773_v52 = vld [vmem:[#allocation8 + $0xfa8] sm:$0xff]  ;;  %v1807_v53 = vld [vmem:[#allocation8 + $0x10b8] sm:$0xff] }
 0x5cc   :  { %1827 = vmatpush.msrb.mxu1 %v1696_v55  ;;  %1847 = vmatpush.msrb.mxu2 %v1728_v56  ;;  %v1699_v54 = vld [vmem:[#allocation8 + $0xd58] sm:$0xff]  ;;  %v1733_v55 = vld [vmem:[#allocation8 + $0xe68] sm:$0xff] }
 0x5cd   :  { %1867 = vmatpush.msrb.mxu3 %v1760_v59  ;;  %1887 = vmatpush.msra.mxu0 %v1792_v60  ;;  %v1771_v56 = vld [vmem:[#allocation8 + $0xf98] sm:$0xff]  ;;  %v1805_v59 = vld [vmem:[#allocation8 + $0x10a8] sm:$0xff] }
 0x5ce   :  { %1828 = vmatpush.msrb.mxu1 %v1694_v61  ;;  %1848 = vmatpush.msrb.mxu2 %v1726_v63  ;;  %v1697_v60 = vld [vmem:[#allocation8 + $0xd48] sm:$0xff]  ;;  %v1731_v61 = vld [vmem:[#allocation8 + $0xe58] sm:$0xff] }
 0x5cf   :  { %1868 = vmatpush.msrb.mxu3 %v1758_v20  ;;  %1888 = vmatpush.msra.mxu0 %v1790_v10  ;;  %v1769_v63 = vld [vmem:[#allocation8 + $0xf88] sm:$0xff]  ;;  %v1803_v20 = vld [vmem:[#allocation8 + $0x1098] sm:$0xff] }
 0x5d0   :  { %1829 = vmatpush.msrb.mxu1 %v1692_v22  ;;  %1849 = vmatpush.msrb.mxu2 %v1724_v23  ;;  %v1695_v10 = vld [vmem:[#allocation8 + $0xd38] sm:$0xff]  ;;  %v1729_v22 = vld [vmem:[#allocation8 + $0xe48] sm:$0xff] }
 0x5d1   :  { %1869 = vmatpush.msrb.mxu3 %v1756_v11  ;;  %1889 = vmatpush.msra.mxu0 %v1788_v12  ;;  %v1767_v23 = vld [vmem:[#allocation8 + $0xf78] sm:$0xff]  ;;  %v1801_v11 = vld [vmem:[#allocation8 + $0x1088] sm:$0xff] }
 0x5d2   :  { %1830 = vmatpush.msrb.mxu1 %v1690_v13  ;;  %1850 = vmatpush.msrb.mxu2 %v1722_v14  ;;  %v1693_v12 = vld [vmem:[#allocation8 + $0xd28] sm:$0xff]  ;;  %v1727_v13 = vld [vmem:[#allocation8 + $0xe38] sm:$0xff] }
 0x5d3   :  { %1870 = vmatpush.msrb.mxu3 %v1754_v15  ;;  %1890 = vmatpush.msra.mxu0 %v1786_v16  ;;  %v1765_v14 = vld [vmem:[#allocation8 + $0xf68] sm:$0xff]  ;;  %v1799_v15 = vld [vmem:[#allocation8 + $0x1078] sm:$0xff] }
 0x5d4   :  { %1831 = vmatpush.msrb.mxu1 %v1688_v8  ;;  %1851 = vmatpush.msrb.mxu2 %v1720_v9  ;;  %v1691_v16 = vld [vmem:[#allocation8 + $0xd18] sm:$0xff]  ;;  %v1725_v8 = vld [vmem:[#allocation8 + $0xe28] sm:$0xff] }
 0x5d5   :  { %1871 = vmatpush.msrb.mxu3 %v1752_v19  ;;  %1891 = vmatpush.msra.mxu0 %v1784_v21  ;;  %v1763_v9 = vld [vmem:[#allocation8 + $0xf58] sm:$0xff]  ;;  %v1761_v21 = vld [vmem:[#allocation8 + $0xf48] sm:$0xff] }
 0x5d6   :  { %1896 = vmatpush.msra.mxu1 %v1719_v31  ;;  %1916 = vmatpush.msra.mxu2 %v1751_v34  ;;  %v1797_v31 = vld [vmem:[#allocation8 + $0x1068] sm:$0xff]  ;;  %v1723_v19 = vld [vmem:[#allocation8 + $0xe18] sm:$0xff] }
 0x5d7   :  { %1936 = vmatpush.msra.mxu3 %v1783_v26  ;;  %1956 = vmatpush.msrb.mxu0 %v1815_v27  ;;  %v1689_v34 = vld [vmem:[#allocation8 + $0xd08] sm:$0xff]  ;;  %v1759_v26 = vld [vmem:[#allocation8 + $0xf38] sm:$0xff] }
 0x5d8   :  { %1897 = vmatpush.msra.mxu1 %v1717_v1  ;;  %1917 = vmatpush.msra.mxu2 %v1749_v7  ;;  %v1795_v1 = vld [vmem:[#allocation8 + $0x1058] sm:$0xff]  ;;  %v1721_v7 = vld [vmem:[#allocation8 + $0xe08] sm:$0xff] }
 0x5d9   :  { %1937 = vmatpush.msra.mxu3 %v1781_v24  ;;  %1957 = vmatpush.msrb.mxu0 %v1813_v39  ;;  %v1793_v27 = vld [vmem:[#allocation8 + $0x1048] sm:$0xff]  ;;  %v1755_v24 = vld [vmem:[#allocation8 + $0xf18] sm:$0xff] }
 0x5da   :  { %1898 = vmatpush.msra.mxu1 %v1715_v28  ;;  %1918 = vmatpush.msra.mxu2 %v1747_v29  ;;  %v1757_v28 = vld [vmem:[#allocation8 + $0xf28] sm:$0xff]  ;;  %v1791_v29 = vld [vmem:[#allocation8 + $0x1038] sm:$0xff] }
 0x5db   :  { %1938 = vmatpush.msra.mxu3 %v1779_v38  ;;  %1958 = vmatpush.msrb.mxu0 %v1811_v42 }
 0x5dc   :  { %1899 = vmatpush.msra.mxu1 %v1713_v25  ;;  %1919 = vmatpush.msra.mxu2 %v1745_v30  ;;  %v1789_v25 = vld [vmem:[#allocation8 + $0x1028] sm:$0xff] }
 0x5dd   :  { %1939 = vmatpush.msra.mxu3 %v1777_v41  ;;  %1959 = vmatpush.msrb.mxu0 %v1809_v46  ;;  %v1753_v30 = vld [vmem:[#allocation8 + $0xf08] sm:$0xff] }
 0x5de   :  { %1900 = vmatpush.msra.mxu1 %v1711_v32  ;;  %1920 = vmatpush.msra.mxu2 %v1743_v33  ;;  %v1787_v32 = vld [vmem:[#allocation8 + $0x1018] sm:$0xff]  ;;  %v1785_v33 = vld [vmem:[#allocation8 + $0x1008] sm:$0xff] }
 0x5df   :  { %1940 = vmatpush.msra.mxu3 %v1775_v45  ;;  %1960 = vmatpush.msrb.mxu0 %v1807_v53  ;;  %v5641_v53 = vld [vmem:[#allocation8 + $0x9f0] sm:$0xff] }
 0x5e0   :  { %1901 = vmatpush.msra.mxu1 %v1709_v35  ;;  %1921 = vmatpush.msra.mxu2 %v1741_v37  ;;  %v176_v35 = vld [vmem:[#allocation16] sm:$0xf] }
 0x5e1   :  { %1941 = vmatpush.msra.mxu3 %v1773_v52  ;;  %1961 = vmatpush.msrb.mxu0 %v1805_v59  ;;  %v7387_v37 = vperm.slane %v176_v35, 0  ;;  %v7389_v38 = vperm.slane %v176_v35, 1  ;;  %v7393_v45 = vperm.slane %v176_v35, 2  ;;  %v7395_v52 = vperm.slane %v176_v35, 3  ;;  %v5667_v35 = vld [vmem:[#allocation8 + $0x970] sm:$0xff] }
 0x5e2   :  { %1902 = vmatpush.msra.mxu1 %v1707_v36  ;;  %1922 = vmatpush.msra.mxu2 %v1739_v40 }
 0x5e3   :  { %1942 = vmatpush.msra.mxu3 %v1771_v56  ;;  %1962 = vmatpush.msrb.mxu0 %v1803_v20  ;;  %v5642_v56 = vld [vmem:[#allocation8 + $0x9e0] sm:$0xff]  ;;  %v5644_v20 = vld [vmem:[#allocation8 + $0x9d0] sm:$0xff] }
 0x5e4   :  { %1903 = vmatpush.msra.mxu1 %v1705_v51  ;;  %1923 = vmatpush.msra.mxu2 %v1737_v44 }
 0x5e5   :  { %1943 = vmatpush.msra.mxu3 %v1769_v63  ;;  %1963 = vmatpush.msrb.mxu0 %v1801_v11 }
 0x5e6   :  { %1904 = vmatpush.msra.mxu1 %v1703_v43  ;;  %1924 = vmatpush.msra.mxu2 %v1735_v49 }
 0x5e7   :  { %1944 = vmatpush.msra.mxu3 %v1767_v23  ;;  %1964 = vmatpush.msrb.mxu0 %v1799_v15  ;;  %v5645_v23 = vld [vmem:[#allocation8 + $0xae0] sm:$0xff]  ;;  %v5648_v15 = vld [vmem:[#allocation8 + $0xad0] sm:$0xff] }
 0x5e8   :  { %1905 = vmatpush.msra.mxu1 %v1701_v47  ;;  %1925 = vmatpush.msra.mxu2 %v1733_v55 }
 0x5e9   :  { %1945 = vmatpush.msra.mxu3 %v1765_v14  ;;  %1965 = vmatpush.msrb.mxu0 %v1797_v31  ;;  %v5647_v14 = vld [vmem:[#allocation8 + $0x9f8] sm:$0xff]  ;;  %v5652_v31 = vld [vmem:[#allocation8 + $0xac0] sm:$0xff] }
 0x5ea   :  { %1906 = vmatpush.msra.mxu1 %v1699_v54  ;;  %1926 = vmatpush.msra.mxu2 %v1731_v61  ;;  %v5643_v61 = vld [vmem:[#allocation8 + $0xaf0] sm:$0xff] }
 0x5eb   :  { %1946 = vmatpush.msra.mxu3 %v1763_v9  ;;  %1966 = vmatpush.msrb.mxu0 %v1795_v1  ;;  %v5651_v9 = vld [vmem:[#allocation8 + $0x9e8] sm:$0xff]  ;;  %v5656_v1 = vld [vmem:[#allocation8 + $0xab0] sm:$0xff] }
 0x5ec   :  { %1907 = vmatpush.msra.mxu1 %v1697_v60  ;;  %1927 = vmatpush.msra.mxu2 %v1729_v22 }
 0x5ed   :  { %1947 = vmatpush.msra.mxu3 %v1761_v21  ;;  %1967 = vmatpush.msrb.mxu0 %v1793_v27  ;;  %v5655_v21 = vld [vmem:[#allocation8 + $0x9d8] sm:$0xff]  ;;  %v5659_v27 = vld [vmem:[#allocation8 + $0x9c8] sm:$0xff] }
 0x5ee   :  { %1908 = vmatpush.msra.mxu1 %v1695_v10  ;;  %1928 = vmatpush.msra.mxu2 %v1727_v13 }
 0x5ef   :  { %1948 = vmatpush.msra.mxu3 %v1759_v26  ;;  %1968 = vmatpush.msrb.mxu0 %v1791_v29  ;;  %v5658_v26 = vld [vmem:[#allocation8 + $0xad8] sm:$0xff]  ;;  %v5661_v29 = vld [vmem:[#allocation8 + $0xac8] sm:$0xff] }
 0x5f0   :  { %1909 = vmatpush.msra.mxu1 %v1693_v12  ;;  %1929 = vmatpush.msra.mxu2 %v1725_v8  ;;  %v5646_v12 = vld [vmem:[#allocation8 + $0x9c0] sm:$0xff]  ;;  %v5650_v8 = vld [vmem:[#allocation8 + $0xaf8] sm:$0xff] }
 0x5f1   :  { %1949 = vmatpush.msra.mxu3 %v1757_v28  ;;  %1969 = vmatpush.msrb.mxu0 %v1789_v25  ;;  %v5660_v28 = vld [vmem:[#allocation8 + $0xaa0] sm:$0xff]  ;;  %v5663_v25 = vld [vmem:[#allocation8 + $0x9b8] sm:$0xff] }
 0x5f2   :  { %1910 = vmatpush.msra.mxu1 %v1691_v16  ;;  %1930 = vmatpush.msra.mxu2 %v1723_v19  ;;  %v5649_v16 = vld [vmem:[#allocation8 + $0x9b0] sm:$0xff]  ;;  %v5654_v19 = vld [vmem:[#allocation8 + $0xae8] sm:$0xff] }
 0x5f3   :  { %1950 = vmatpush.msra.mxu3 %v1755_v24  ;;  %1970 = vmatpush.msrb.mxu0 %v1787_v32  ;;  %v5662_v24 = vld [vmem:[#allocation8 + $0x980] sm:$0xff]  ;;  %v5665_v32 = vld [vmem:[#allocation8 + $0xa90] sm:$0xff] }
 0x5f4   :  { %1911 = vmatpush.msra.mxu1 %v1689_v34  ;;  %1931 = vmatpush.msra.mxu2 %v1721_v7  ;;  %v5653_v34 = vld [vmem:[#allocation8 + $0x9a0] sm:$0xff]  ;;  %v5657_v7 = vld [vmem:[#allocation8 + $0x990] sm:$0xff] }
 0x5f5   :  { %1951 = vmatpush.msra.mxu3 %v1753_v30  ;;  %1971 = vmatpush.msrb.mxu0 %v1785_v33  ;;  %v5664_v30 = vld [vmem:[#allocation8 + $0xab8] sm:$0xff]  ;;  %v5666_v33 = vld [vmem:[#allocation8 + $0x9a8] sm:$0xff] }
 0x62f   :  { %v1541_v36 = vpop.f32.mrf.mxu1 }
 0x630   :  { %v1542_v39 = vadd.f32 %v1541_v36, %v7387_v37  ;;  %v1601_v40 = vpop.f32.mrf.mxu0  ;;  %v5668_v36 = vld [vmem:[#allocation8 + $0xaa8] sm:$0xff] }
 0x635   :  { %v1561_v51 = vpop.f32.mrf.mxu2 }
 0x636   :  { %v1562_v41 = vadd.f32 %v1561_v51, %v1542_v39  ;;  %v1581_v42 = vpop.f32.mrf.mxu3  ;;  %v5669_v39 = vld [vmem:[#allocation8 + $0xa80] sm:$0xff]  ;;  %v5670_v51 = vld [vmem:[#allocation8 + $0x998] sm:$0xff] }
 0x637   :  { %v1582_v43 = vadd.f32 %v1581_v42, %v7389_v38  ;;  %v1621_v47 = vpop.f32.mrf.mxu1  ;;  %v5673_v42 = vld [vmem:[#allocation8 + $0xa70] sm:$0xff] }
 0x638   :  { %v1684_v44 = vmax.f32 %v1562_v41, 0.0  ;;  %v1622_v54 = vadd.f32 %v1621_v47, %v7393_v45  ;;  %v1681_v10 = vpop.f32.mrf.mxu0  ;;  %v5672_v41 = vld [vmem:[#allocation8 + $0xa98] sm:$0xff]  ;;  %v5677_v47 = vld [vmem:[#allocation8 + $0xa60] sm:$0xff] }
 0x639   :  { %v1602_v46 = vadd.f32 %v1601_v40, %v1582_v43  ;;  %v5671_v40 = vld [vmem:[#allocation8 + $0x960] sm:$0xff]  ;;  %v5674_v43 = vld [vmem:[#allocation8 + $0x988] sm:$0xff] }
 0x63a   :  { %1832 = vmatmul.f32.vlgmr.msrb.gmra.mxu1 %v1684_v44 }
 0x63b   :  { %v1685_v49 = vmax.f32 %v1602_v46, 0.0  ;;  %2015 = vmatpush.msrb.mxu1 %v5641_v53  ;;  %v5676_v46 = vld [vmem:[#allocation8 + $0xa88] sm:$0xff]  ;;  %v5679_v53 = vld [vmem:[#allocation8 + $0x940] sm:$0xff] }
 0x63d   :  { %1852 = vmatmul.f32.vlgmr.msrb.gmra.mxu2 %v1685_v49  ;;  %v1641_v55 = vpop.f32.mrf.mxu2  ;;  %2016 = vmatpush.msrb.mxu1 %v5642_v56  ;;  %v5682_v56 = vld [vmem:[#allocation8 + $0x968] sm:$0xff] }
 0x63e   :  { %v1642_v59 = vadd.f32 %v1641_v55, %v1622_v54  ;;  %v1661_v60 = vpop.f32.mrf.mxu3  ;;  %2035 = vmatpush.msrb.mxu2 %v5643_v61  ;;  %v5680_v54 = vld [vmem:[#allocation8 + $0xa78] sm:$0xff]  ;;  %v5681_v55 = vld [vmem:[#allocation8 + $0xa50] sm:$0xff]  ;;  %v5685_v61 = vld [vmem:[#allocation8 + $0xa40] sm:$0xff] }
 0x63f   :  { %v1662_v63 = vadd.f32 %v1661_v60, %v7395_v52  ;;  %2017 = vmatpush.msrb.mxu1 %v5644_v20  ;;  %v5684_v60 = vld [vmem:[#allocation8 + $0xa68] sm:$0xff]  ;;  %v5687_v20 = vld [vmem:[#allocation8 + $0x920] sm:$0xff] }
 0x640   :  { %v1686_v22 = vmax.f32 %v1642_v59, 0.0  ;;  %2036 = vmatpush.msrb.mxu2 %v5645_v23  ;;  %v5683_v59 = vld [vmem:[#allocation8 + $0x930] sm:$0xff]  ;;  %v5690_v23 = vld [vmem:[#allocation8 + $0x948] sm:$0xff] }
 0x641   :  { %v1682_v11 = vadd.f32 %v1681_v10, %v1662_v63  ;;  %2018 = vmatpush.msrb.mxu1 %v5646_v12  ;;  %v5686_v63 = vld [vmem:[#allocation8 + $0x958] sm:$0xff]  ;;  %v5692_v12 = vld [vmem:[#allocation8 + $0xa48] sm:$0xff] }
 0x642   :  { %1872 = vmatmul.f32.vlgmr.msrb.gmra.mxu3 %v1686_v22  ;;  %1912 = vmatmul.f32.vlgmr.msra.gmra.mxu1 %v1684_v44  ;;  %v5675_v44 = vld [vmem:[#allocation8 + $0x950] sm:$0xff]  ;;  %v5688_v10 = vld [vmem:[#allocation8 + $0xa58] sm:$0xff] }
 0x643   :  { %v1687_v13 = vmax.f32 %v1682_v11, 0.0  ;;  %2055 = vmatpush.msrb.mxu3 %v5647_v14  ;;  %2037 = vmatpush.msrb.mxu2 %v5648_v15  ;;  %v5691_v11 = vld [vmem:[#allocation8 + $0x910] sm:$0xff]  ;;  %v5694_v14 = vld [vmem:[#allocation8 + $0x938] sm:$0xff]  ;;  %v5695_v15 = vld [vmem:[#allocation8 + $0x900] sm:$0xff] }
 0x644   :  { %2019 = vmatpush.msrb.mxu1 %v5649_v16  ;;  %v5696_v16 = vld [vmem:[#allocation8 + $0xa38] sm:$0xff] }
 0x645   :  { %1892 = vmatmul.f32.vlgmr.msra.gmra.mxu0 %v1687_v13  ;;  %1932 = vmatmul.f32.vlgmr.msra.gmra.mxu2 %v1685_v49  ;;  %v5678_v49 = vld [vmem:[#allocation8 + $0x978] sm:$0xff] }
 0x646   :  { %2075 = vmatpush.msra.mxu0 %v5650_v8  ;;  %2056 = vmatpush.msrb.mxu3 %v5651_v9  ;;  %v5697_v8 = vld [vmem:[#allocation8 + $0xa10] sm:$0xff]  ;;  %v5698_v9 = vld [vmem:[#allocation8 + $0x928] sm:$0xff] }
 0x647   :  { %2038 = vmatpush.msrb.mxu2 %v5652_v31  ;;  %2020 = vmatpush.msrb.mxu1 %v5653_v34  ;;  %v5699_v31 = vld [vmem:[#allocation8 + $0xbf0] sm:$0xff]  ;;  %v5700_v34 = vld [vmem:[#allocation8 + $0xa28] sm:$0xff] }
 0x648   :  { %2076 = vmatpush.msra.mxu0 %v5654_v19  ;;  %2057 = vmatpush.msrb.mxu3 %v5655_v21  ;;  %v5701_v19 = vld [vmem:[#allocation8 + $0xa00] sm:$0xff]  ;;  %v5702_v21 = vld [vmem:[#allocation8 + $0x918] sm:$0xff] }
 0x649   :  { %2039 = vmatpush.msrb.mxu2 %v5656_v1  ;;  %2021 = vmatpush.msrb.mxu1 %v5657_v7  ;;  %v5703_v1 = vld [vmem:[#allocation8 + $0xbe0] sm:$0xff]  ;;  %v5704_v7 = vld [vmem:[#allocation8 + $0xa18] sm:$0xff] }
 0x64a   :  { %1952 = vmatmul.f32.vlgmr.msra.gmra.mxu3 %v1686_v22  ;;  %2077 = vmatpush.msra.mxu0 %v5658_v26  ;;  %v5689_v22 = vld [vmem:[#allocation8 + $0xa30] sm:$0xff] }
 0x64b   :  { %2058 = vmatpush.msrb.mxu3 %v5659_v27  ;;  %2040 = vmatpush.msrb.mxu2 %v5660_v28  ;;  %v5705_v26 = vld [vmem:[#allocation8 + $0xcf0] sm:$0xff]  ;;  %v5706_v27 = vld [vmem:[#allocation8 + $0x908] sm:$0xff] }
 0x64c   :  { %2078 = vmatpush.msra.mxu0 %v5661_v29  ;;  %2022 = vmatpush.msrb.mxu1 %v5662_v24  ;;  %v5707_v28 = vld [vmem:[#allocation8 + $0xbd0] sm:$0xff]  ;;  %v5708_v29 = vld [vmem:[#allocation8 + $0xa08] sm:$0xff]  ;;  %v5709_v24 = vld [vmem:[#allocation8 + $0xbf8] sm:$0xff] }
 0x64d   :  { %1972 = vmatmul.f32.vlgmr.msrb.gmra.mxu0 %v1687_v13  ;;  %2059 = vmatpush.msrb.mxu3 %v5663_v25  ;;  %v5693_v13 = vld [vmem:[#allocation8 + $0xa20] sm:$0xff]  ;;  %v5710_v25 = vld [vmem:[#allocation8 + $0xcf8] sm:$0xff] }
 0x64e   :  { %2079 = vmatpush.msra.mxu0 %v5664_v30  ;;  %2041 = vmatpush.msrb.mxu2 %v5665_v32  ;;  %v5711_v30 = vld [vmem:[#allocation8 + $0xce0] sm:$0xff]  ;;  %v5712_v32 = vld [vmem:[#allocation8 + $0xbe8] sm:$0xff] }
 0x64f   :  { %2060 = vmatpush.msrb.mxu3 %v5666_v33  ;;  %2023 = vmatpush.msrb.mxu1 %v5667_v35  ;;  %v5713_v33 = vld [vmem:[#allocation8 + $0xbc0] sm:$0xff]  ;;  %v5714_v35 = vld [vmem:[#allocation8 + $0xce8] sm:$0xff] }
 0x650   :  { %2080 = vmatpush.msra.mxu0 %v5668_v36  ;;  %2042 = vmatpush.msrb.mxu2 %v5669_v39  ;;  %v5715_v36 = vld [vmem:[#allocation8 + $0xcd0] sm:$0xff]  ;;  %v5716_v39 = vld [vmem:[#allocation8 + $0xbd8] sm:$0xff] }
 0x651   :  { %2061 = vmatpush.msrb.mxu3 %v5670_v51  ;;  %2024 = vmatpush.msrb.mxu1 %v5671_v40  ;;  %v5717_v51 = vld [vmem:[#allocation8 + $0xbb0] sm:$0xff]  ;;  %v5718_v40 = vld [vmem:[#allocation8 + $0xcd8] sm:$0xff] }
 0x652   :  { %2081 = vmatpush.msra.mxu0 %v5672_v41  ;;  %2043 = vmatpush.msrb.mxu2 %v5673_v42  ;;  %v5719_v41 = vld [vmem:[#allocation8 + $0xcc0] sm:$0xff]  ;;  %v5720_v42 = vld [vmem:[#allocation8 + $0xbc8] sm:$0xff] }
 0x653   :  { %2062 = vmatpush.msrb.mxu3 %v5674_v43  ;;  %2025 = vmatpush.msrb.mxu1 %v5675_v44  ;;  %v5721_v43 = vld [vmem:[#allocation8 + $0xba0] sm:$0xff]  ;;  %v5722_v44 = vld [vmem:[#allocation8 + $0xcc8] sm:$0xff] }
 0x654   :  { %2082 = vmatpush.msra.mxu0 %v5676_v46  ;;  %2044 = vmatpush.msrb.mxu2 %v5677_v47  ;;  %v5723_v46 = vld [vmem:[#allocation8 + $0xcb0] sm:$0xff]  ;;  %v5724_v47 = vld [vmem:[#allocation8 + $0xbb8] sm:$0xff] }
 0x655   :  { %2063 = vmatpush.msrb.mxu3 %v5678_v49  ;;  %2026 = vmatpush.msrb.mxu1 %v5679_v53  ;;  %v5725_v49 = vld [vmem:[#allocation8 + $0xb90] sm:$0xff]  ;;  %v5726_v53 = vld [vmem:[#allocation8 + $0xcb8] sm:$0xff] }
 0x656   :  { %2083 = vmatpush.msra.mxu0 %v5680_v54  ;;  %2045 = vmatpush.msrb.mxu2 %v5681_v55  ;;  %v5727_v54 = vld [vmem:[#allocation8 + $0xca0] sm:$0xff]  ;;  %v5728_v55 = vld [vmem:[#allocation8 + $0xba8] sm:$0xff] }
 0x657   :  { %2064 = vmatpush.msrb.mxu3 %v5682_v56  ;;  %2027 = vmatpush.msrb.mxu1 %v5683_v59  ;;  %v5729_v56 = vld [vmem:[#allocation8 + $0xb80] sm:$0xff]  ;;  %v5730_v59 = vld [vmem:[#allocation8 + $0xca8] sm:$0xff] }
 0x658   :  { %2084 = vmatpush.msra.mxu0 %v5684_v60  ;;  %2046 = vmatpush.msrb.mxu2 %v5685_v61  ;;  %v5731_v60 = vld [vmem:[#allocation8 + $0xc90] sm:$0xff]  ;;  %v5732_v61 = vld [vmem:[#allocation8 + $0xb98] sm:$0xff] }
 0x659   :  { %2065 = vmatpush.msrb.mxu3 %v5686_v63  ;;  %2028 = vmatpush.msrb.mxu1 %v5687_v20  ;;  %v5733_v63 = vld [vmem:[#allocation8 + $0xb70] sm:$0xff]  ;;  %v5734_v20 = vld [vmem:[#allocation8 + $0xc98] sm:$0xff] }
 0x65a   :  { %2085 = vmatpush.msra.mxu0 %v5688_v10  ;;  %2047 = vmatpush.msrb.mxu2 %v5689_v22  ;;  %v5735_v10 = vld [vmem:[#allocation8 + $0xc80] sm:$0xff]  ;;  %v5736_v22 = vld [vmem:[#allocation8 + $0xb88] sm:$0xff] }
 0x65b   :  { %2066 = vmatpush.msrb.mxu3 %v5690_v23  ;;  %2029 = vmatpush.msrb.mxu1 %v5691_v11  ;;  %v5737_v23 = vld [vmem:[#allocation8 + $0xb60] sm:$0xff]  ;;  %v5738_v11 = vld [vmem:[#allocation8 + $0xc88] sm:$0xff] }
 0x65c   :  { %2086 = vmatpush.msra.mxu0 %v5692_v12  ;;  %2048 = vmatpush.msrb.mxu2 %v5693_v13  ;;  %v5739_v12 = vld [vmem:[#allocation8 + $0xc70] sm:$0xff]  ;;  %v5740_v13 = vld [vmem:[#allocation8 + $0xb78] sm:$0xff] }
 0x65d   :  { %2067 = vmatpush.msrb.mxu3 %v5694_v14  ;;  %2030 = vmatpush.msrb.mxu1 %v5695_v15  ;;  %v5741_v14 = vld [vmem:[#allocation8 + $0xb50] sm:$0xff]  ;;  %v5742_v15 = vld [vmem:[#allocation8 + $0xc78] sm:$0xff] }
 0x65e   :  { %2087 = vmatpush.msra.mxu0 %v5696_v16  ;;  %2049 = vmatpush.msrb.mxu2 %v5697_v8  ;;  %v5743_v16 = vld [vmem:[#allocation8 + $0xc60] sm:$0xff]  ;;  %v5744_v8 = vld [vmem:[#allocation8 + $0xb68] sm:$0xff] }
 0x65f   :  { %2068 = vmatpush.msrb.mxu3 %v5698_v9  ;;  %2095 = vmatpush.msra.mxu1 %v5699_v31  ;;  %v5745_v9 = vld [vmem:[#allocation8 + $0xb40] sm:$0xff]  ;;  %v5746_v31 = vld [vmem:[#allocation8 + $0xc68] sm:$0xff] }
 0x660   :  { %2088 = vmatpush.msra.mxu0 %v5700_v34  ;;  %2050 = vmatpush.msrb.mxu2 %v5701_v19  ;;  %v5747_v34 = vld [vmem:[#allocation8 + $0xc50] sm:$0xff]  ;;  %v5748_v19 = vld [vmem:[#allocation8 + $0xb58] sm:$0xff] }
 0x661   :  { %2069 = vmatpush.msrb.mxu3 %v5702_v21  ;;  %2096 = vmatpush.msra.mxu1 %v5703_v1  ;;  %v5749_v21 = vld [vmem:[#allocation8 + $0xb30] sm:$0xff]  ;;  %v5750_v1 = vld [vmem:[#allocation8 + $0xc58] sm:$0xff] }
 0x662   :  { %2089 = vmatpush.msra.mxu0 %v5704_v7  ;;  %2115 = vmatpush.msra.mxu2 %v5705_v26  ;;  %v5751_v7 = vld [vmem:[#allocation8 + $0xc40] sm:$0xff]  ;;  %v5752_v26 = vld [vmem:[#allocation8 + $0xb48] sm:$0xff] }
 0x663   :  { %2070 = vmatpush.msrb.mxu3 %v5706_v27  ;;  %2097 = vmatpush.msra.mxu1 %v5707_v28  ;;  %v5753_v27 = vld [vmem:[#allocation8 + $0xb20] sm:$0xff]  ;;  %v5754_v28 = vld [vmem:[#allocation8 + $0xc48] sm:$0xff] }
 0x664   :  { %2090 = vmatpush.msra.mxu0 %v5708_v29  ;;  %2116 = vmatpush.msra.mxu2 %v5711_v30  ;;  %v5755_v29 = vld [vmem:[#allocation8 + $0xc30] sm:$0xff]  ;;  %v5758_v30 = vld [vmem:[#allocation8 + $0xc38] sm:$0xff] }
 0x665   :  { %2135 = vmatpush.msra.mxu3 %v5709_v24  ;;  %2098 = vmatpush.msra.mxu1 %v5713_v33  ;;  %v5756_v24 = vld [vmem:[#allocation8 + $0xb38] sm:$0xff]  ;;  %v5760_v33 = vld [vmem:[#allocation8 + $0xb28] sm:$0xff] }
 0x666   :  { %2155 = vmatpush.msrb.mxu0 %v5710_v25  ;;  %2117 = vmatpush.msra.mxu2 %v5715_v36  ;;  %v5757_v25 = vld [vmem:[#allocation8 + $0xb10] sm:$0xff]  ;;  %v5762_v36 = vld [vmem:[#allocation8 + $0xc28] sm:$0xff] }
 0x667   :  { %2136 = vmatpush.msra.mxu3 %v5712_v32  ;;  %2099 = vmatpush.msra.mxu1 %v5717_v51  ;;  %v5759_v32 = vld [vmem:[#allocation8 + $0xc20] sm:$0xff]  ;;  %v5764_v51 = vld [vmem:[#allocation8 + $0xb18] sm:$0xff] }
 0x668   :  { %2156 = vmatpush.msrb.mxu0 %v5714_v35  ;;  %2118 = vmatpush.msra.mxu2 %v5719_v41  ;;  %v5761_v35 = vld [vmem:[#allocation8 + $0xb00] sm:$0xff] }
 0x669   :  { %2137 = vmatpush.msra.mxu3 %v5716_v39  ;;  %2100 = vmatpush.msra.mxu1 %v5721_v43  ;;  %v5763_v39 = vld [vmem:[#allocation8 + $0xc10] sm:$0xff]  ;;  %v5766_v41 = vld [vmem:[#allocation8 + $0xc00] sm:$0xff]  ;;  %v5768_v43 = vld [vmem:[#allocation8 + $0xc08] sm:$0xff] }
 0x66a   :  { %2157 = vmatpush.msrb.mxu0 %v5718_v40  ;;  %2119 = vmatpush.msra.mxu2 %v5723_v46  ;;  %v5765_v40 = vld [vmem:[#allocation8 + $0xc18] sm:$0xff] }
 0x66b   :  { %2138 = vmatpush.msra.mxu3 %v5720_v42  ;;  %2101 = vmatpush.msra.mxu1 %v5725_v49  ;;  %v5767_v42 = vld [vmem:[#allocation8 + $0xb08] sm:$0xff] }
 0x66c   :  { %2158 = vmatpush.msrb.mxu0 %v5722_v44  ;;  %2120 = vmatpush.msra.mxu2 %v5727_v54 }
 0x66d   :  { %2139 = vmatpush.msra.mxu3 %v5724_v47  ;;  %2102 = vmatpush.msra.mxu1 %v5729_v56 }
 0x66e   :  { %2159 = vmatpush.msrb.mxu0 %v5726_v53  ;;  %2121 = vmatpush.msra.mxu2 %v5731_v60 }
 0x66f   :  { %2140 = vmatpush.msra.mxu3 %v5728_v55  ;;  %2103 = vmatpush.msra.mxu1 %v5733_v63 }
 0x670   :  { %2160 = vmatpush.msrb.mxu0 %v5730_v59  ;;  %2122 = vmatpush.msra.mxu2 %v5735_v10 }
 0x671   :  { %2141 = vmatpush.msra.mxu3 %v5732_v61  ;;  %2104 = vmatpush.msra.mxu1 %v5737_v23  ;;  %v7401_v23 = vperm.slane %v7353_v48, 0 }
 0x672   :  { %2161 = vmatpush.msrb.mxu0 %v5734_v20  ;;  %2123 = vmatpush.msra.mxu2 %v5739_v12 }
 0x673   :  { %2142 = vmatpush.msra.mxu3 %v5736_v22  ;;  %2105 = vmatpush.msra.mxu1 %v5741_v14 }
 0x674   :  { %2162 = vmatpush.msrb.mxu0 %v5738_v11  ;;  %2124 = vmatpush.msra.mxu2 %v5743_v16  ;;  %v7404_v11 = vperm.slane %v7355_v50, 0 }
 0x675   :  { %2143 = vmatpush.msra.mxu3 %v5740_v13  ;;  %2106 = vmatpush.msra.mxu1 %v5745_v9 }
 0x676   :  { %2163 = vmatpush.msrb.mxu0 %v5742_v15  ;;  %2125 = vmatpush.msra.mxu2 %v5747_v34 }
 0x677   :  { %2144 = vmatpush.msra.mxu3 %v5744_v8  ;;  %2107 = vmatpush.msra.mxu1 %v5749_v21 }
 0x678   :  { %2164 = vmatpush.msrb.mxu0 %v5746_v31  ;;  %2126 = vmatpush.msra.mxu2 %v5751_v7 }
 0x679   :  { %2145 = vmatpush.msra.mxu3 %v5748_v19  ;;  %2108 = vmatpush.msra.mxu1 %v5753_v27 }
 0x67a   :  { %2165 = vmatpush.msrb.mxu0 %v5750_v1  ;;  %2127 = vmatpush.msra.mxu2 %v5755_v29 }
 0x67b   :  { %2146 = vmatpush.msra.mxu3 %v5752_v26  ;;  %2109 = vmatpush.msra.mxu1 %v5757_v25  ;;  %v7412_v25 = vperm.slane %v7353_v48, 3 }
 0x67c   :  { %2166 = vmatpush.msrb.mxu0 %v5754_v28  ;;  %2128 = vmatpush.msra.mxu2 %v5759_v32 }
 0x67d   :  { %2147 = vmatpush.msra.mxu3 %v5756_v24  ;;  %2110 = vmatpush.msra.mxu1 %v5761_v35 }
 0x67e   :  { %2167 = vmatpush.msrb.mxu0 %v5758_v30  ;;  %2129 = vmatpush.msra.mxu2 %v5763_v39  ;;  %v7415_v30 = vperm.slane %v7355_v50, 3  ;;  %v7421_v39 = vperm.slane %v7355_v50, 4  ;;  %v5770_v50 = vld [vmem:[#allocation11 + $0x3e0] sm:$0xff] }
 0x67f   :  { %2148 = vmatpush.msra.mxu3 %v5760_v33 }
 0x680   :  { %2168 = vmatpush.msrb.mxu0 %v5762_v36  ;;  %2130 = vmatpush.msra.mxu2 %v5766_v41  ;;  %v7418_v36 = vperm.slane %v7353_v48, 4  ;;  %v5769_v48 = vld [vmem:[#allocation11 + $0x1e0] sm:$0xff] }
 0x681   :  { %2149 = vmatpush.msra.mxu3 %v5764_v51 }
 0x682   :  { %2169 = vmatpush.msrb.mxu0 %v5765_v40 }
 0x683   :  { %2150 = vmatpush.msra.mxu3 %v5767_v42 }
 0x684   :  { %2170 = vmatpush.msrb.mxu0 %v5768_v43  ;;  %v5771_v43 = vld [vmem:[#allocation11 + $0x1e8] sm:$0xff] }
 0x6b7   :  { %v1833_v46 = vpop.f32.mrf.mxu1 }
 0x6bf   :  { %v1913_v56 = vpop.f32.mrf.mxu1 }
 0x6c0   :  { %v1853_v44 = vpop.f32.mrf.mxu2 }
 0x6c1   :  { %v1854_v53 = vadd.f32 %v1853_v44, %v1833_v46  ;;  %v5772_v44 = vld [vmem:[#allocation11 + $0x3e8] sm:$0xff]  ;;  %v5773_v46 = vld [vmem:[#allocation11 + $0x1c0] sm:$0xff] }
 0x6c2   :  { %v1893_v47 = vpop.f32.mrf.mxu0 }
 0x6c5   :  { %v1873_v49 = vpop.f32.mrf.mxu3 }
 0x6c6   :  { %v1874_v54 = vadd.f32 %v1873_v49, %v1854_v53  ;;  %v5775_v49 = vld [vmem:[#allocation11 + $0x1c8] sm:$0xff] }
 0x6c7   :  { %v5776_v53 = vld [vmem:[#allocation11 + $0x3c8] sm:$0xff] }
 0x6c8   :  { %v1933_v55 = vpop.f32.mrf.mxu2  ;;  %v1894_v59 = vadd.f32 %v1893_v47, %v1874_v54  ;;  %v5774_v47 = vld [vmem:[#allocation11 + $0x3c0] sm:$0xff] }
 0x6c9   :  { %v1934_v60 = vadd.f32 %v1933_v55, %v1913_v56  ;;  %v5777_v54 = vld [vmem:[#allocation11 + $0x1a0] sm:$0xff]  ;;  %v5779_v56 = vld [vmem:[#allocation11 + $0x1a8] sm:$0xff] }
 0x6ca   :  { %v1973_v20 = vpop.f32.mrf.mxu0  ;;  %v1976_v22 = vadd.f32 %v1894_v59, %v7374_v2  ;;  %v5778_v55 = vld [vmem:[#allocation11 + $0x3a0] sm:$0xff]  ;;  %v5780_v59 = vld [vmem:[#allocation11 + $0x3a8] sm:$0xff] }
 0x6cc   :  { %v1980_v13 = vadd.f32 %v7401_v23, %v1976_v22  ;;  %v5786_v22 = vld [vmem:[#allocation11 + $0x360] sm:$0xff] }
 0x6cd   :  { %v1953_v61 = vpop.f32.mrf.mxu3 }
 0x6ce   :  { %v1954_v63 = vadd.f32 %v1953_v61, %v1934_v60  ;;  %v5781_v60 = vld [vmem:[#allocation11 + $0x180] sm:$0xff] }
 0x6cf   :  { %v5782_v61 = vld [vmem:[#allocation11 + $0x380] sm:$0xff] }
 0x6d0   :  { %v1974_v10 = vadd.f32 %v1973_v20, %v1954_v63  ;;  %v5783_v63 = vld [vmem:[#allocation11 + $0x188] sm:$0xff] }
 0x6d1   :  { %v5784_v20 = vld [vmem:[#allocation11 + $0x388] sm:$0xff] }
 0x6d2   :  { %v1977_v12 = vadd.f32 %v1974_v10, %v7377_v4  ;;  %v5785_v10 = vld [vmem:[#allocation11 + $0x160] sm:$0xff] }
 0x6d4   :  { %v1981_v14 = vadd.f32 %v7404_v11, %v1977_v12  ;;  %v5787_v12 = vld [vmem:[#allocation11 + $0x168] sm:$0xff] }
 0x6d6   :  { %v1982_v15 = vadd.f32 %v1981_v14, %v1980_v13 }
 0x6d8   :  { %1983 = vadd.xlane.f32.xlu2 %v1982_v15  ;;  %v5790_v15 = vld [vmem:[#allocation11 + $0x340] sm:$0xff] }
 0x74b   :  { %v1984_v16 = vpop.xlane.xlu2 %1983 }
 0x74c   :  { %v1985_v8 = vmul.f32 %v1984_v16, %v7240_v5  ;;  %v5791_v16 = vld [vmem:[#allocation11 + $0x148] sm:$0xff] }
 0x74e   :  { %v1986_v9 = vsub.f32 %v1980_v13, %v1985_v8  ;;  %v1987_v31 = vsub.f32 %v1981_v14, %v1985_v8  ;;  %v5788_v13 = vld [vmem:[#allocation11 + $0x368] sm:$0xff]  ;;  %v5789_v14 = vld [vmem:[#allocation11 + $0x140] sm:$0xff] }
 0x74f   :  { %v5792_v8 = vld [vmem:[#allocation11 + $0x348] sm:$0xff] }
 0x750   :  { %v1988_v2 = vmul.f32 %v1986_v9, %v1986_v9  ;;  %v1989_v34 = vmul.f32 %v1987_v31, %v1987_v31 }
 0x752   :  { %v1990_v19 = vadd.f32 %v1989_v34, %v1988_v2  ;;  %v5795_v2 = vld [vmem:[#allocation11 + $0x128] sm:$0xff] }
 0x753   :  { %v5796_v34 = vld [vmem:[#allocation11 + $0x328] sm:$0xff] }
 0x754   :  { %1991 = vadd.xlane.f32.xlu0 %v1990_v19  ;;  %v5797_v19 = vld [vmem:[#allocation11 + $0x100] sm:$0xff] }
 0x7c7   :  { %v1992_v21 = vpop.xlane.xlu0 %1991 }
 0x7c8   :  { %v1993_v1 = vmul.f32 %v1992_v21, %v7240_v5  ;;  %v5798_v21 = vld [vmem:[#allocation11 + $0x300] sm:$0xff] }
 0x7ca   :  { %v1994_v7 = vadd.f32 1e-05, %v1993_v1  ;;  %v5799_v1 = vld [vmem:[#allocation11 + $0x108] sm:$0xff] }
 0x7cc   :  { %5617 = vrsqrt.f32 %v1994_v7  ;;  %vm2001_vm15 = vweird.f32 %v1994_v7 }
 0x7d2   :  { %v5618_v4 = vpop.eup %5617 }
 0x7d3   :  { %v1996_v26 = vmul.f32 %v5618_v4, %v1994_v7  ;;  %vm2002_vm14 = vweird.f32 %v5618_v4  ;;  %v5800_v7 = vld [vmem:[#allocation11 + $0x308] sm:$0xff] }
 0x7d4   :  { %vm2003_vm0 = vmor %vm2001_vm15, %vm2002_vm14 }
 0x7d5   :  { %v1997_v27 = vmul.f32 %v5618_v4, %v1996_v26  ;;  %v5802_v26 = vld [vmem:[#allocation11 + $0x2e0] sm:$0xff] }
 0x7d7   :  { %v1998_v28 = vmul.f32 0.5, %v1997_v27  ;;  %v5803_v27 = vld [vmem:[#allocation11 + $0xe8] sm:$0xff] }
 0x7d9   :  { %v1999_v29 = vsub.f32 1.5, %v1998_v28  ;;  %v5804_v28 = vld [vmem:[#allocation11 + $0x2e8] sm:$0xff] }
 0x7db   :  { %v2000_v24 = vmul.f32 %v5618_v4, %v1999_v29  ;;  %v5805_v29 = vld [vmem:[#allocation11 + $0xc0] sm:$0xff] }
 0x7dd   :  { %v2004_v32 = vsel %vm2003_vm0, %v5618_v4, %v2000_v24  ;;  %v5801_v4 = vld [vmem:[#allocation11 + $0xe0] sm:$0xff] }
 0x7de   :  { %v2005_v33 = vmul.f32 %v2004_v32, %v1986_v9  ;;  %v2006_v35 = vmul.f32 %v2004_v32, %v1987_v31  ;;  %v5793_v9 = vld [vmem:[#allocation11 + $0x120] sm:$0xff]  ;;  %v5807_v32 = vld [vmem:[#allocation11 + $0xc8] sm:$0xff] }
 0x7df   :  { %v5794_v31 = vld [vmem:[#allocation11 + $0x320] sm:$0xff] }
 0x7e0   :  { %v2009_v51 = vmul.f32 %v7412_v25, %v2005_v33  ;;  %v2010_v40 = vmul.f32 %v7415_v30, %v2006_v35  ;;  %v5806_v24 = vld [vmem:[#allocation11 + $0x2c0] sm:$0xff]  ;;  %v5808_v33 = vld [vmem:[#allocation11 + $0x2c8] sm:$0xff] }
 0x7e1   :  { %v5809_v35 = vld [vmem:[#allocation11 + $0xa0] sm:$0xff] }
 0x7e2   :  { %v7426_v41 = vadd.f32 %v7418_v36, %v2009_v51  ;;  %v7429_v42 = vadd.f32 %v7421_v39, %v2010_v40  ;;  %v5810_v51 = vld [vmem:[#allocation11 + $0x2a0] sm:$0xff]  ;;  %v5811_v40 = vld [vmem:[#allocation11 + $0xa8] sm:$0xff] }
 0x7e4   :  { %2031 = vmatmul.f32.vlgmr.msrb.gmra.mxu1 %v7426_v41  ;;  %2051 = vmatmul.f32.vlgmr.msrb.gmra.mxu2 %v7429_v42 }
 0x7e5   :  { %2071 = vmatmul.f32.vlgmr.msrb.gmra.mxu3 %v7426_v41  ;;  %2091 = vmatmul.f32.vlgmr.msra.gmra.mxu0 %v7429_v42 }
 0x7e6   :  { %2206 = vmatpush.msrb.mxu1 %v5769_v48  ;;  %2226 = vmatpush.msrb.mxu2 %v5770_v50  ;;  %v5812_v48 = vld [vmem:[#allocation11 + $0x2a8] sm:$0xff]  ;;  %v5813_v50 = vld [vmem:[#allocation11 + $0x80] sm:$0xff] }
 0x7e7   :  { %2246 = vmatpush.msrb.mxu3 %v5771_v43  ;;  %2266 = vmatpush.msra.mxu0 %v5772_v44  ;;  %v5814_v43 = vld [vmem:[#allocation11 + $0x280] sm:$0xff]  ;;  %v5815_v44 = vld [vmem:[#allocation11 + $0x88] sm:$0xff] }
 0x7e8   :  { %2207 = vmatpush.msrb.mxu1 %v5773_v46  ;;  %2227 = vmatpush.msrb.mxu2 %v5774_v47  ;;  %v5816_v46 = vld [vmem:[#allocation11 + $0x288] sm:$0xff]  ;;  %v5817_v47 = vld [vmem:[#allocation11 + $0x60] sm:$0xff] }
 0x7e9   :  { %2247 = vmatpush.msrb.mxu3 %v5775_v49  ;;  %2267 = vmatpush.msra.mxu0 %v5776_v53  ;;  %v5818_v49 = vld [vmem:[#allocation11 + $0x260] sm:$0xff]  ;;  %v5819_v53 = vld [vmem:[#allocation11 + $0x68] sm:$0xff] }
 0x7ea   :  { %2208 = vmatpush.msrb.mxu1 %v5777_v54  ;;  %2228 = vmatpush.msrb.mxu2 %v5778_v55  ;;  %v5820_v54 = vld [vmem:[#allocation11 + $0x268] sm:$0xff]  ;;  %v5821_v55 = vld [vmem:[#allocation11 + $0x40] sm:$0xff] }
 0x7eb   :  { %2248 = vmatpush.msrb.mxu3 %v5779_v56  ;;  %2268 = vmatpush.msra.mxu0 %v5780_v59  ;;  %v5822_v56 = vld [vmem:[#allocation11 + $0x240] sm:$0xff]  ;;  %v5823_v59 = vld [vmem:[#allocation11 + $0x48] sm:$0xff] }
 0x7ec   :  { %2209 = vmatpush.msrb.mxu1 %v5781_v60  ;;  %2229 = vmatpush.msrb.mxu2 %v5782_v61  ;;  %v5824_v60 = vld [vmem:[#allocation11 + $0x248] sm:$0xff]  ;;  %v5825_v61 = vld [vmem:[#allocation11 + $0x20] sm:$0xff] }
 0x7ed   :  { %2249 = vmatpush.msrb.mxu3 %v5783_v63  ;;  %2269 = vmatpush.msra.mxu0 %v5784_v20  ;;  %v5826_v63 = vld [vmem:[#allocation11 + $0x220] sm:$0xff]  ;;  %v5827_v20 = vld [vmem:[#allocation11 + $0x28] sm:$0xff] }
 0x7ee   :  { %2210 = vmatpush.msrb.mxu1 %v5785_v10  ;;  %2230 = vmatpush.msrb.mxu2 %v5786_v22  ;;  %v5828_v10 = vld [vmem:[#allocation11 + $0x228] sm:$0xff]  ;;  %v5829_v22 = vld [vmem:[#allocation11] sm:$0xff] }
 0x7ef   :  { %2250 = vmatpush.msrb.mxu3 %v5787_v12  ;;  %2270 = vmatpush.msra.mxu0 %v5788_v13  ;;  %v5830_v12 = vld [vmem:[#allocation11 + $0x200] sm:$0xff]  ;;  %v5831_v13 = vld [vmem:[#allocation11 + $0x8] sm:$0xff] }
 0x7f0   :  { %2211 = vmatpush.msrb.mxu1 %v5789_v14  ;;  %2231 = vmatpush.msrb.mxu2 %v5790_v15  ;;  %v5832_v14 = vld [vmem:[#allocation11 + $0x208] sm:$0xff] }
 0x7f1   :  { %2251 = vmatpush.msrb.mxu3 %v5791_v16  ;;  %2271 = vmatpush.msra.mxu0 %v5792_v8 }
 0x7f2   :  { %2212 = vmatpush.msrb.mxu1 %v5793_v9  ;;  %2232 = vmatpush.msrb.mxu2 %v5794_v31 }
 0x7f3   :  { %2252 = vmatpush.msrb.mxu3 %v5795_v2  ;;  %2272 = vmatpush.msra.mxu0 %v5796_v34 }
 0x7f4   :  { %2213 = vmatpush.msrb.mxu1 %v5797_v19  ;;  %2233 = vmatpush.msrb.mxu2 %v5798_v21  ;;  %v5833_v21 = vld [vmem:[#allocation11 + $0x1f0] sm:$0xff] }
 0x7f5   :  { %2253 = vmatpush.msrb.mxu3 %v5799_v1  ;;  %2273 = vmatpush.msra.mxu0 %v5800_v7  ;;  %v5834_v1 = vld [vmem:[#allocation11 + $0x1f8] sm:$0xff]  ;;  %v5835_v7 = vld [vmem:[#allocation11 + $0x3f0] sm:$0xff] }
 0x7f6   :  { %2214 = vmatpush.msrb.mxu1 %v5801_v4  ;;  %2234 = vmatpush.msrb.mxu2 %v5802_v26  ;;  %v5836_v4 = vld [vmem:[#allocation11 + $0x3f8] sm:$0xff]  ;;  %v5837_v26 = vld [vmem:[#allocation11 + $0x1d0] sm:$0xff] }
 0x7f7   :  { %2254 = vmatpush.msrb.mxu3 %v5803_v27  ;;  %2274 = vmatpush.msra.mxu0 %v5804_v28  ;;  %v5838_v27 = vld [vmem:[#allocation11 + $0x1d8] sm:$0xff]  ;;  %v5839_v28 = vld [vmem:[#allocation11 + $0x3d0] sm:$0xff] }
 0x7f8   :  { %2215 = vmatpush.msrb.mxu1 %v5805_v29  ;;  %2235 = vmatpush.msrb.mxu2 %v5806_v24  ;;  %v5840_v29 = vld [vmem:[#allocation11 + $0x3d8] sm:$0xff]  ;;  %v5841_v24 = vld [vmem:[#allocation11 + $0x1b0] sm:$0xff] }
 0x7f9   :  { %2255 = vmatpush.msrb.mxu3 %v5807_v32  ;;  %2275 = vmatpush.msra.mxu0 %v5808_v33  ;;  %v5842_v32 = vld [vmem:[#allocation11 + $0x1b8] sm:$0xff]  ;;  %v5843_v33 = vld [vmem:[#allocation11 + $0x3b0] sm:$0xff] }
 0x7fa   :  { %2216 = vmatpush.msrb.mxu1 %v5809_v35  ;;  %2236 = vmatpush.msrb.mxu2 %v5810_v51  ;;  %v5844_v35 = vld [vmem:[#allocation11 + $0x3b8] sm:$0xff]  ;;  %v5845_v51 = vld [vmem:[#allocation11 + $0x190] sm:$0xff] }
 0x7fb   :  { %2256 = vmatpush.msrb.mxu3 %v5811_v40  ;;  %2276 = vmatpush.msra.mxu0 %v5812_v48  ;;  %v5846_v40 = vld [vmem:[#allocation11 + $0x198] sm:$0xff]  ;;  %v5847_v48 = vld [vmem:[#allocation11 + $0x390] sm:$0xff] }
 0x7fc   :  { %2217 = vmatpush.msrb.mxu1 %v5813_v50  ;;  %2237 = vmatpush.msrb.mxu2 %v5814_v43  ;;  %v5848_v50 = vld [vmem:[#allocation11 + $0x398] sm:$0xff]  ;;  %v5849_v43 = vld [vmem:[#allocation11 + $0x170] sm:$0xff] }
 0x7fd   :  { %2257 = vmatpush.msrb.mxu3 %v5815_v44  ;;  %2277 = vmatpush.msra.mxu0 %v5816_v46  ;;  %v5850_v44 = vld [vmem:[#allocation11 + $0x178] sm:$0xff]  ;;  %v5851_v46 = vld [vmem:[#allocation11 + $0x370] sm:$0xff] }
 0x7fe   :  { %2218 = vmatpush.msrb.mxu1 %v5817_v47  ;;  %2238 = vmatpush.msrb.mxu2 %v5818_v49  ;;  %v5852_v47 = vld [vmem:[#allocation11 + $0x378] sm:$0xff]  ;;  %v5853_v49 = vld [vmem:[#allocation11 + $0x150] sm:$0xff] }
 0x7ff   :  { %2258 = vmatpush.msrb.mxu3 %v5819_v53  ;;  %2278 = vmatpush.msra.mxu0 %v5820_v54  ;;  %v5854_v53 = vld [vmem:[#allocation11 + $0x158] sm:$0xff]  ;;  %v5855_v54 = vld [vmem:[#allocation11 + $0x350] sm:$0xff] }
 0x800   :  { %2219 = vmatpush.msrb.mxu1 %v5821_v55  ;;  %2239 = vmatpush.msrb.mxu2 %v5822_v56  ;;  %v5856_v55 = vld [vmem:[#allocation11 + $0x358] sm:$0xff]  ;;  %v5857_v56 = vld [vmem:[#allocation11 + $0x130] sm:$0xff] }
 0x801   :  { %2259 = vmatpush.msrb.mxu3 %v5823_v59  ;;  %2279 = vmatpush.msra.mxu0 %v5824_v60  ;;  %v5858_v59 = vld [vmem:[#allocation11 + $0x138] sm:$0xff]  ;;  %v5859_v60 = vld [vmem:[#allocation11 + $0x330] sm:$0xff] }
 0x802   :  { %2220 = vmatpush.msrb.mxu1 %v5825_v61  ;;  %2240 = vmatpush.msrb.mxu2 %v5826_v63  ;;  %v5860_v61 = vld [vmem:[#allocation11 + $0x338] sm:$0xff]  ;;  %v5861_v63 = vld [vmem:[#allocation11 + $0x110] sm:$0xff] }
 0x803   :  { %2260 = vmatpush.msrb.mxu3 %v5827_v20  ;;  %2280 = vmatpush.msra.mxu0 %v5828_v10  ;;  %v5862_v20 = vld [vmem:[#allocation11 + $0x118] sm:$0xff]  ;;  %v5863_v10 = vld [vmem:[#allocation11 + $0x310] sm:$0xff] }
 0x804   :  { %2221 = vmatpush.msrb.mxu1 %v5829_v22  ;;  %2241 = vmatpush.msrb.mxu2 %v5830_v12  ;;  %v5864_v22 = vld [vmem:[#allocation11 + $0x318] sm:$0xff]  ;;  %v5865_v12 = vld [vmem:[#allocation11 + $0xf0] sm:$0xff] }
 0x805   :  { %2261 = vmatpush.msrb.mxu3 %v5831_v13  ;;  %2281 = vmatpush.msra.mxu0 %v5832_v14  ;;  %v5866_v13 = vld [vmem:[#allocation11 + $0xf8] sm:$0xff]  ;;  %v5867_v14 = vld [vmem:[#allocation11 + $0x2f0] sm:$0xff] }
 0x861   :  { %v2032_v15 = vpop.f32.mrf.mxu1 }
 0x862   :  { %v2033_v16 = vadd.f32 %v2032_v15, %v7318_v3  ;;  %v2092_v34 = vpop.f32.mrf.mxu0  ;;  %v5868_v15 = vld [vmem:[#allocation11 + $0x2f8] sm:$0xff] }
 0x867   :  { %v2052_v8 = vpop.f32.mrf.mxu2 }
 0x868   :  { %v2053_v9 = vadd.f32 %v2052_v8, %v2033_v16  ;;  %v2072_v31 = vpop.f32.mrf.mxu3  ;;  %v5869_v16 = vld [vmem:[#allocation11 + $0xd0] sm:$0xff]  ;;  %v5870_v8 = vld [vmem:[#allocation11 + $0xd8] sm:$0xff] }
 0x869   :  { %v2073_v2 = vadd.f32 %v2072_v31, %v7321_v6  ;;  %v5872_v31 = vld [vmem:[#allocation11 + $0x2d8] sm:$0xff] }
 0x86a   :  { %2111 = vmatmul.f32.vlgmr.msra.gmra.mxu1 %v2053_v9  ;;  %2151 = vmatmul.f32.vlgmr.msra.gmra.mxu3 %v2053_v9  ;;  %v5871_v9 = vld [vmem:[#allocation11 + $0x2d0] sm:$0xff] }
 0x86b   :  { %v2093_v19 = vadd.f32 %v2092_v34, %v2073_v2  ;;  %2286 = vmatpush.msra.mxu1 %v5833_v21  ;;  %2326 = vmatpush.msra.mxu3 %v5834_v1  ;;  %v5873_v2 = vld [vmem:[#allocation11 + $0xb0] sm:$0xff]  ;;  %v5874_v34 = vld [vmem:[#allocation11 + $0xb8] sm:$0xff] }
 0x86c   :  { %v5876_v21 = vld [vmem:[#allocation11 + $0x2b8] sm:$0xff]  ;;  %v5877_v1 = vld [vmem:[#allocation11 + $0x90] sm:$0xff] }
 0x86d   :  { %2131 = vmatmul.f32.vlgmr.msra.gmra.mxu2 %v2093_v19  ;;  %2171 = vmatmul.f32.vlgmr.msrb.gmra.mxu0 %v2093_v19  ;;  %v5875_v19 = vld [vmem:[#allocation11 + $0x2b0] sm:$0xff] }
 0x86e   :  { %2306 = vmatpush.msra.mxu2 %v5835_v7  ;;  %2346 = vmatpush.msrb.mxu0 %v5836_v4  ;;  %v5878_v7 = vld [vmem:[#allocation11 + $0x98] sm:$0xff]  ;;  %v5879_v4 = vld [vmem:[#allocation11 + $0x290] sm:$0xff] }
 0x86f   :  { %2287 = vmatpush.msra.mxu1 %v5837_v26  ;;  %2327 = vmatpush.msra.mxu3 %v5838_v27  ;;  %v5880_v26 = vld [vmem:[#allocation11 + $0x298] sm:$0xff]  ;;  %v5881_v27 = vld [vmem:[#allocation11 + $0x70] sm:$0xff] }
 0x870   :  { %2307 = vmatpush.msra.mxu2 %v5839_v28  ;;  %2347 = vmatpush.msrb.mxu0 %v5840_v29  ;;  %v5882_v28 = vld [vmem:[#allocation11 + $0x78] sm:$0xff]  ;;  %v5883_v29 = vld [vmem:[#allocation11 + $0x270] sm:$0xff] }
 0x871   :  { %2288 = vmatpush.msra.mxu1 %v5841_v24  ;;  %2328 = vmatpush.msra.mxu3 %v5842_v32  ;;  %v5884_v24 = vld [vmem:[#allocation11 + $0x278] sm:$0xff]  ;;  %v5885_v32 = vld [vmem:[#allocation11 + $0x50] sm:$0xff] }
 0x872   :  { %2308 = vmatpush.msra.mxu2 %v5843_v33  ;;  %2348 = vmatpush.msrb.mxu0 %v5844_v35  ;;  %v5886_v33 = vld [vmem:[#allocation11 + $0x58] sm:$0xff]  ;;  %v5887_v35 = vld [vmem:[#allocation11 + $0x250] sm:$0xff] }
 0x873   :  { %2289 = vmatpush.msra.mxu1 %v5845_v51  ;;  %2329 = vmatpush.msra.mxu3 %v5846_v40  ;;  %v5888_v51 = vld [vmem:[#allocation11 + $0x258] sm:$0xff]  ;;  %v5889_v40 = vld [vmem:[#allocation11 + $0x30] sm:$0xff] }
 0x874   :  { %2309 = vmatpush.msra.mxu2 %v5847_v48  ;;  %2349 = vmatpush.msrb.mxu0 %v5848_v50  ;;  %v5890_v48 = vld [vmem:[#allocation11 + $0x38] sm:$0xff]  ;;  %v5891_v50 = vld [vmem:[#allocation11 + $0x230] sm:$0xff] }
 0x875   :  { %2290 = vmatpush.msra.mxu1 %v5849_v43  ;;  %2330 = vmatpush.msra.mxu3 %v5850_v44  ;;  %v5892_v43 = vld [vmem:[#allocation11 + $0x238] sm:$0xff]  ;;  %v5893_v44 = vld [vmem:[#allocation11 + $0x10] sm:$0xff] }
 0x876   :  { %2310 = vmatpush.msra.mxu2 %v5851_v46  ;;  %2350 = vmatpush.msrb.mxu0 %v5852_v47  ;;  %v5894_v46 = vld [vmem:[#allocation11 + $0x18] sm:$0xff]  ;;  %v5895_v47 = vld [vmem:[#allocation11 + $0x210] sm:$0xff] }
 0x877   :  { %2291 = vmatpush.msra.mxu1 %v5853_v49  ;;  %2331 = vmatpush.msra.mxu3 %v5854_v53  ;;  %v5896_v49 = vld [vmem:[#allocation11 + $0x218] sm:$0xff] }
 0x878   :  { %2311 = vmatpush.msra.mxu2 %v5855_v54  ;;  %2351 = vmatpush.msrb.mxu0 %v5856_v55 }
 0x879   :  { %2292 = vmatpush.msra.mxu1 %v5857_v56  ;;  %2332 = vmatpush.msra.mxu3 %v5858_v59 }
 0x87a   :  { %2312 = vmatpush.msra.mxu2 %v5859_v60  ;;  %2352 = vmatpush.msrb.mxu0 %v5860_v61 }
 0x87b   :  { %2293 = vmatpush.msra.mxu1 %v5861_v63  ;;  %2333 = vmatpush.msra.mxu3 %v5862_v20 }
 0x87c   :  { %2313 = vmatpush.msra.mxu2 %v5863_v10  ;;  %2353 = vmatpush.msrb.mxu0 %v5864_v22 }
 0x87d   :  { %2294 = vmatpush.msra.mxu1 %v5865_v12  ;;  %2334 = vmatpush.msra.mxu3 %v5866_v13 }
 0x87e   :  { %2314 = vmatpush.msra.mxu2 %v5867_v14  ;;  %2354 = vmatpush.msrb.mxu0 %v5868_v15 }
 0x87f   :  { %2295 = vmatpush.msra.mxu1 %v5869_v16  ;;  %2335 = vmatpush.msra.mxu3 %v5870_v8 }
 0x880   :  { %2315 = vmatpush.msra.mxu2 %v5871_v9  ;;  %2355 = vmatpush.msrb.mxu0 %v5872_v31 }
 0x881   :  { %2296 = vmatpush.msra.mxu1 %v5873_v2  ;;  %2336 = vmatpush.msra.mxu3 %v5874_v34 }
 0x882   :  { %2316 = vmatpush.msra.mxu2 %v5875_v19  ;;  %2356 = vmatpush.msrb.mxu0 %v5876_v21 }
 0x883   :  { %2297 = vmatpush.msra.mxu1 %v5877_v1  ;;  %2337 = vmatpush.msra.mxu3 %v5878_v7 }
 0x884   :  { %2317 = vmatpush.msra.mxu2 %v5879_v4  ;;  %2357 = vmatpush.msrb.mxu0 %v5880_v26 }
 0x885   :  { %2298 = vmatpush.msra.mxu1 %v5881_v27  ;;  %2338 = vmatpush.msra.mxu3 %v5882_v28 }
 0x886   :  { %2318 = vmatpush.msra.mxu2 %v5883_v29  ;;  %2358 = vmatpush.msrb.mxu0 %v5884_v24 }
 0x887   :  { %2299 = vmatpush.msra.mxu1 %v5885_v32  ;;  %2339 = vmatpush.msra.mxu3 %v5886_v33  ;;  %v5897_v33 = vld [vmem:[#allocation8 + $0xdf0] sm:$0xff] }
 0x888   :  { %2319 = vmatpush.msra.mxu2 %v5887_v35  ;;  %2359 = vmatpush.msrb.mxu0 %v5888_v51  ;;  %v5898_v35 = vld [vmem:[#allocation8 + $0xef0] sm:$0xff] }
 0x889   :  { %2300 = vmatpush.msra.mxu1 %v5889_v40  ;;  %2340 = vmatpush.msra.mxu3 %v5890_v48  ;;  %v5899_v51 = vld [vmem:[#allocation8 + $0xff0] sm:$0xff]  ;;  %v5901_v48 = vld [vmem:[#allocation8 + $0xde0] sm:$0xff] }
 0x88a   :  { %2320 = vmatpush.msra.mxu2 %v5891_v50  ;;  %2360 = vmatpush.msrb.mxu0 %v5892_v43  ;;  %v5900_v40 = vld [vmem:[#allocation8 + $0x10f0] sm:$0xff]  ;;  %v5902_v50 = vld [vmem:[#allocation8 + $0xee0] sm:$0xff] }
 0x88b   :  { %2301 = vmatpush.msra.mxu1 %v5893_v44  ;;  %2341 = vmatpush.msra.mxu3 %v5894_v46  ;;  %v5903_v43 = vld [vmem:[#allocation8 + $0xfe0] sm:$0xff]  ;;  %v5905_v46 = vld [vmem:[#allocation8 + $0xdd0] sm:$0xff] }
 0x88c   :  { %2321 = vmatpush.msra.mxu2 %v5895_v47  ;;  %2361 = vmatpush.msrb.mxu0 %v5896_v49  ;;  %v5904_v44 = vld [vmem:[#allocation8 + $0x10e0] sm:$0xff]  ;;  %v5906_v47 = vld [vmem:[#allocation8 + $0xed0] sm:$0xff] }
 0x88d   :  { %v5907_v49 = vld [vmem:[#allocation8 + $0xfd0] sm:$0xff] }
 0x8e7   :  { %v2112_v53 = vpop.f32.mrf.mxu1 }
 0x8e8   :  { %v2113_v56 = vadd.f32 %v2112_v53, %v7326_v17  ;;  %v5908_v53 = vld [vmem:[#allocation8 + $0x10d0] sm:$0xff] }
 0x8ea   :  { %v2172_v59 = vpop.f32.mrf.mxu0 }
 0x8ed   :  { %v2152_v54 = vpop.f32.mrf.mxu3 }
 0x8ee   :  { %v2153_v55 = vadd.f32 %v2152_v54, %v7329_v18  ;;  %v5909_v54 = vld [vmem:[#allocation8 + $0xdc0] sm:$0xff] }
 0x8f0   :  { %v2173_v60 = vadd.f32 %v2172_v59, %v2153_v55  ;;  %v2132_v61 = vpop.f32.mrf.mxu2  ;;  %v5910_v55 = vld [vmem:[#allocation8 + $0xec0] sm:$0xff] }
 0x8f1   :  { %v2133_v63 = vadd.f32 %v2132_v61, %v2113_v56  ;;  %v5911_v56 = vld [vmem:[#allocation8 + $0xfc0] sm:$0xff]  ;;  %v5914_v61 = vld [vmem:[#allocation8 + $0xeb0] sm:$0xff] }
 0x8f2   :  { %v2176_v20 = vadd.f32 %v2173_v60, %v7429_v42  ;;  %v5912_v59 = vld [vmem:[#allocation8 + $0x10c0] sm:$0xff]  ;;  %v5913_v60 = vld [vmem:[#allocation8 + $0xdb0] sm:$0xff] }
 0x8f3   :  { %v2175_v10 = vadd.f32 %v2133_v63, %v7426_v41  ;;  %v5915_v63 = vld [vmem:[#allocation8 + $0xfb0] sm:$0xff] }
 0x8f5   :  { %v2177_v22 = vadd.f32 %v2176_v20, %v2175_v10 }
 0x8f7   :  { %2178 = vadd.xlane.f32.xlu1 %v2177_v22  ;;  %v5918_v22 = vld [vmem:[#allocation8 + $0xea0] sm:$0xff] }
 0x96a   :  { %v2179_v12 = vpop.xlane.xlu1 %2178 }
 0x96b   :  { %v2180_v13 = vmul.f32 %v2179_v12, %v7240_v5  ;;  %v5919_v12 = vld [vmem:[#allocation8 + $0xfa0] sm:$0xff] }
 0x96d   :  { %v2181_v14 = vsub.f32 %v2175_v10, %v2180_v13  ;;  %v2182_v15 = vsub.f32 %v2176_v20, %v2180_v13  ;;  %v5916_v20 = vld [vmem:[#allocation8 + $0x10b0] sm:$0xff]  ;;  %v5917_v10 = vld [vmem:[#allocation8 + $0xda0] sm:$0xff] }
 0x96e   :  { %v5920_v13 = vld [vmem:[#allocation8 + $0x10a0] sm:$0xff] }
 0x96f   :  { %v2183_v16 = vmul.f32 %v2181_v14, %v2181_v14  ;;  %v2184_v8 = vmul.f32 %v2182_v15, %v2182_v15 }
 0x971   :  { %v2185_v9 = vadd.f32 %v2184_v8, %v2183_v16  ;;  %v5923_v16 = vld [vmem:[#allocation8 + $0xf90] sm:$0xff] }
 0x972   :  { %v5924_v8 = vld [vmem:[#allocation8 + $0x1090] sm:$0xff] }
 0x973   :  { %2186 = vadd.xlane.f32.xlu2 %v2185_v9  ;;  %v5925_v9 = vld [vmem:[#allocation8 + $0xd80] sm:$0xff] }
 0x9e6   :  { %v2187_v31 = vpop.xlane.xlu2 %2186 }
 0x9e7   :  { %v2188_v2 = vmul.f32 %v2187_v31, %v7240_v5  ;;  %v5926_v31 = vld [vmem:[#allocation8 + $0xe80] sm:$0xff] }
 0x9e9   :  { %v2189_v34 = vadd.f32 1e-05, %v2188_v2  ;;  %v5927_v2 = vld [vmem:[#allocation8 + $0xf80] sm:$0xff] }
 0x9eb   :  { %5619 = vrsqrt.f32 %v2189_v34  ;;  %vm2196_vm2 = vweird.f32 %v2189_v34 }
 0x9f1   :  { %v5620_v19 = vpop.eup %5619 }
 0x9f2   :  { %v2191_v42 = vmul.f32 %v5620_v19, %v2189_v34  ;;  %vm2197_vm1 = vweird.f32 %v5620_v19  ;;  %v5928_v34 = vld [vmem:[#allocation8 + $0x1080] sm:$0xff] }
 0x9f3   :  { %vm2198_vm3 = vmor %vm2196_vm2, %vm2197_vm1 }
 0x9f4   :  { %v2192_v21 = vmul.f32 %v5620_v19, %v2191_v42  ;;  %v5930_v42 = vld [vmem:[#allocation8 + $0xe70] sm:$0xff] }
 0x9f6   :  { %v2193_v41 = vmul.f32 0.5, %v2192_v21  ;;  %v5931_v21 = vld [vmem:[#allocation8 + $0xf70] sm:$0xff] }
 0x9f8   :  { %v2194_v1 = vsub.f32 1.5, %v2193_v41  ;;  %v5932_v41 = vld [vmem:[#allocation8 + $0x1070] sm:$0xff] }
 0x9fa   :  { %v2195_v7 = vmul.f32 %v5620_v19, %v2194_v1  ;;  %v5933_v1 = vld [vmem:[#allocation8 + $0xd60] sm:$0xff] }
 0x9fc   :  { %v2199_v4 = vsel %vm2198_vm3, %v5620_v19, %v2195_v7  ;;  %v5929_v19 = vld [vmem:[#allocation8 + $0xd70] sm:$0xff]  ;;  %v5934_v7 = vld [vmem:[#allocation8 + $0xe60] sm:$0xff] }
 0x9fd   :  { %v2200_v26 = vmul.f32 %v2199_v4, %v2181_v14  ;;  %v2201_v27 = vmul.f32 %v2199_v4, %v2182_v15  ;;  %v5921_v14 = vld [vmem:[#allocation8 + $0xd90] sm:$0xff]  ;;  %v5935_v4 = vld [vmem:[#allocation8 + $0xf60] sm:$0xff] }
 0x9fe   :  { %v5922_v15 = vld [vmem:[#allocation8 + $0xe90] sm:$0xff] }
 0x9ff   :  { %v2202_v28 = vmul.f32 %v2200_v26, %v7358_v57  ;;  %v2203_v29 = vmul.f32 %v2201_v27, %v7361_v58  ;;  %v5936_v26 = vld [vmem:[#allocation8 + $0x1060] sm:$0xff]  ;;  %v5937_v27 = vld [vmem:[#allocation8 + $0xd50] sm:$0xff] }
 0xa01   :  { %v7446_v24 = vadd.f32 %v2202_v28, %v7366_v62  ;;  %v7449_v32 = vadd.f32 %v2203_v29, %v7369_v0  ;;  %v5938_v28 = vld [vmem:[#allocation8 + $0xe50] sm:$0xff] }
 0xa02   :  { %v5939_v29 = vld [vmem:[#allocation8 + $0xf50] sm:$0xff] }
 0xa03   :  { %2222 = vmatmul.f32.vlgmr.msrb.gmra.mxu1 %v7446_v24  ;;  %2242 = vmatmul.f32.vlgmr.msrb.gmra.mxu2 %v7449_v32 }
 0xa04   :  { %2262 = vmatmul.f32.vlgmr.msrb.gmra.mxu3 %v7446_v24  ;;  %2282 = vmatmul.f32.vlgmr.msra.gmra.mxu0 %v7449_v32 }
 0xa05   :  { %2370 = vmatpush.msrb.mxu1 %v5897_v33  ;;  %2390 = vmatpush.msrb.mxu2 %v5898_v35  ;;  %v5940_v33 = vld [vmem:[#allocation8 + $0x1050] sm:$0xff]  ;;  %v5941_v35 = vld [vmem:[#allocation8 + $0xd40] sm:$0xff] }
 0xa06   :  { %2410 = vmatpush.msrb.mxu3 %v5899_v51  ;;  %2430 = vmatpush.msra.mxu0 %v5900_v40  ;;  %v5942_v51 = vld [vmem:[#allocation8 + $0xe40] sm:$0xff] }
 0xa07   :  { %2371 = vmatpush.msrb.mxu1 %v5901_v48  ;;  %2391 = vmatpush.msrb.mxu2 %v5902_v50  ;;  %v5943_v40 = vld [vmem:[#allocation8 + $0xf40] sm:$0xff]  ;;  %v5945_v50 = vld [vmem:[#allocation8 + $0xd30] sm:$0xff] }
 0xa08   :  { %2411 = vmatpush.msrb.mxu3 %v5903_v43  ;;  %2431 = vmatpush.msra.mxu0 %v5904_v44  ;;  %v5944_v48 = vld [vmem:[#allocation8 + $0x1040] sm:$0xff]  ;;  %v5946_v43 = vld [vmem:[#allocation8 + $0xe30] sm:$0xff] }
 0xa09   :  { %2372 = vmatpush.msrb.mxu1 %v5905_v46  ;;  %2392 = vmatpush.msrb.mxu2 %v5906_v47  ;;  %v5947_v44 = vld [vmem:[#allocation8 + $0xf30] sm:$0xff]  ;;  %v5949_v47 = vld [vmem:[#allocation8 + $0xd20] sm:$0xff] }
 0xa0a   :  { %2412 = vmatpush.msrb.mxu3 %v5907_v49  ;;  %2432 = vmatpush.msra.mxu0 %v5908_v53  ;;  %v5948_v46 = vld [vmem:[#allocation8 + $0x1030] sm:$0xff]  ;;  %v5950_v49 = vld [vmem:[#allocation8 + $0xe20] sm:$0xff] }
 0xa0b   :  { %2302 = vmatmul.f32.vlgmr.msra.gmra.mxu1 %v7446_v24  ;;  %2322 = vmatmul.f32.vlgmr.msra.gmra.mxu2 %v7449_v32  ;;  %v5951_v53 = vld [vmem:[#allocation8 + $0xf20] sm:$0xff] }
 0xa0c   :  { %2342 = vmatmul.f32.vlgmr.msra.gmra.mxu3 %v7446_v24  ;;  %2362 = vmatmul.f32.vlgmr.msrb.gmra.mxu0 %v7449_v32 }
 0xa0d   :  { %2373 = vmatpush.msrb.mxu1 %v5909_v54  ;;  %2393 = vmatpush.msrb.mxu2 %v5910_v55  ;;  %v5952_v54 = vld [vmem:[#allocation8 + $0x1020] sm:$0xff]  ;;  %v5953_v55 = vld [vmem:[#allocation8 + $0xd10] sm:$0xff] }
 0xa0e   :  { %2413 = vmatpush.msrb.mxu3 %v5911_v56  ;;  %2433 = vmatpush.msra.mxu0 %v5912_v59  ;;  %v5954_v56 = vld [vmem:[#allocation8 + $0xe10] sm:$0xff] }
 0xa0f   :  { %2374 = vmatpush.msrb.mxu1 %v5913_v60  ;;  %2394 = vmatpush.msrb.mxu2 %v5914_v61  ;;  %v5955_v59 = vld [vmem:[#allocation8 + $0xf10] sm:$0xff]  ;;  %v5957_v61 = vld [vmem:[#allocation8 + $0xd00] sm:$0xff] }
 0xa10   :  { %2414 = vmatpush.msrb.mxu3 %v5915_v63  ;;  %2434 = vmatpush.msra.mxu0 %v5916_v20  ;;  %v5956_v60 = vld [vmem:[#allocation8 + $0x1010] sm:$0xff]  ;;  %v5958_v63 = vld [vmem:[#allocation8 + $0xe00] sm:$0xff]  ;;  %v5959_v20 = vld [vmem:[#allocation8 + $0xdf8] sm:$0xff] }
 0xa11   :  { %2375 = vmatpush.msrb.mxu1 %v5917_v10  ;;  %2395 = vmatpush.msrb.mxu2 %v5918_v22  ;;  %v5960_v10 = vld [vmem:[#allocation8 + $0xef8] sm:$0xff]  ;;  %v5961_v22 = vld [vmem:[#allocation8 + $0xf00] sm:$0xff] }
 0xa12   :  { %2415 = vmatpush.msrb.mxu3 %v5919_v12  ;;  %2435 = vmatpush.msra.mxu0 %v5920_v13  ;;  %v5962_v12 = vld [vmem:[#allocation8 + $0x1000] sm:$0xff]  ;;  %v5963_v13 = vld [vmem:[#allocation8 + $0xde8] sm:$0xff] }
 0xa13   :  { %2376 = vmatpush.msrb.mxu1 %v5921_v14  ;;  %2396 = vmatpush.msrb.mxu2 %v5922_v15  ;;  %v5964_v14 = vld [vmem:[#allocation8 + $0xee8] sm:$0xff]  ;;  %v5965_v15 = vld [vmem:[#allocation8 + $0xff8] sm:$0xff] }
 0xa14   :  { %2416 = vmatpush.msrb.mxu3 %v5923_v16  ;;  %2436 = vmatpush.msra.mxu0 %v5924_v8  ;;  %v5966_v16 = vld [vmem:[#allocation8 + $0x10f8] sm:$0xff] }
 0xa15   :  { %2377 = vmatpush.msrb.mxu1 %v5925_v9  ;;  %2397 = vmatpush.msrb.mxu2 %v5926_v31  ;;  %v5967_v8 = vld [vmem:[#allocation8 + $0xdd8] sm:$0xff]  ;;  %v5969_v31 = vld [vmem:[#allocation8 + $0xfe8] sm:$0xff] }
 0xa16   :  { %2417 = vmatpush.msrb.mxu3 %v5927_v2  ;;  %2437 = vmatpush.msra.mxu0 %v5928_v34  ;;  %v5968_v9 = vld [vmem:[#allocation8 + $0xed8] sm:$0xff]  ;;  %v5970_v2 = vld [vmem:[#allocation8 + $0x10e8] sm:$0xff] }
 0xa17   :  { %2378 = vmatpush.msrb.mxu1 %v5929_v19  ;;  %2398 = vmatpush.msrb.mxu2 %v5930_v42  ;;  %v5971_v34 = vld [vmem:[#allocation8 + $0xdc8] sm:$0xff]  ;;  %v5973_v42 = vld [vmem:[#allocation8 + $0xfd8] sm:$0xff] }
 0xa18   :  { %2418 = vmatpush.msrb.mxu3 %v5931_v21  ;;  %2438 = vmatpush.msra.mxu0 %v5932_v41  ;;  %v5972_v19 = vld [vmem:[#allocation8 + $0xec8] sm:$0xff]  ;;  %v5974_v21 = vld [vmem:[#allocation8 + $0x10d8] sm:$0xff] }
 0xa19   :  { %2379 = vmatpush.msrb.mxu1 %v5933_v1  ;;  %2399 = vmatpush.msrb.mxu2 %v5934_v7  ;;  %v5975_v41 = vld [vmem:[#allocation8 + $0xdb8] sm:$0xff]  ;;  %v5977_v7 = vld [vmem:[#allocation8 + $0xfc8] sm:$0xff] }
 0xa1a   :  { %2419 = vmatpush.msrb.mxu3 %v5935_v4  ;;  %2439 = vmatpush.msra.mxu0 %v5936_v26  ;;  %v5976_v1 = vld [vmem:[#allocation8 + $0xeb8] sm:$0xff]  ;;  %v5978_v4 = vld [vmem:[#allocation8 + $0x10c8] sm:$0xff] }
 0xa1b   :  { %2380 = vmatpush.msrb.mxu1 %v5937_v27  ;;  %2400 = vmatpush.msrb.mxu2 %v5938_v28  ;;  %v5979_v26 = vld [vmem:[#allocation8 + $0xda8] sm:$0xff]  ;;  %v5981_v28 = vld [vmem:[#allocation8 + $0xfb8] sm:$0xff] }
 0xa1c   :  { %2420 = vmatpush.msrb.mxu3 %v5939_v29  ;;  %2440 = vmatpush.msra.mxu0 %v5940_v33  ;;  %v5980_v27 = vld [vmem:[#allocation8 + $0xea8] sm:$0xff]  ;;  %v5982_v29 = vld [vmem:[#allocation8 + $0x10b8] sm:$0xff] }
 0xa1d   :  { %2381 = vmatpush.msrb.mxu1 %v5941_v35  ;;  %2401 = vmatpush.msrb.mxu2 %v5942_v51  ;;  %v5983_v33 = vld [vmem:[#allocation8 + $0xd98] sm:$0xff]  ;;  %v5985_v51 = vld [vmem:[#allocation8 + $0xfa8] sm:$0xff] }
 0xa1e   :  { %2421 = vmatpush.msrb.mxu3 %v5943_v40  ;;  %2441 = vmatpush.msra.mxu0 %v5944_v48  ;;  %v5984_v35 = vld [vmem:[#allocation8 + $0xe98] sm:$0xff]  ;;  %v5986_v40 = vld [vmem:[#allocation8 + $0x10a8] sm:$0xff] }
 0xa1f   :  { %2382 = vmatpush.msrb.mxu1 %v5945_v50  ;;  %2402 = vmatpush.msrb.mxu2 %v5946_v43  ;;  %v5987_v48 = vld [vmem:[#allocation8 + $0xd88] sm:$0xff]  ;;  %v5989_v43 = vld [vmem:[#allocation8 + $0xf98] sm:$0xff] }
 0xa20   :  { %2422 = vmatpush.msrb.mxu3 %v5947_v44  ;;  %2442 = vmatpush.msra.mxu0 %v5948_v46  ;;  %v5988_v50 = vld [vmem:[#allocation8 + $0xe88] sm:$0xff]  ;;  %v5990_v44 = vld [vmem:[#allocation8 + $0x1098] sm:$0xff] }
 0xa21   :  { %2383 = vmatpush.msrb.mxu1 %v5949_v47  ;;  %2403 = vmatpush.msrb.mxu2 %v5950_v49  ;;  %v5991_v46 = vld [vmem:[#allocation8 + $0xd78] sm:$0xff]  ;;  %v5993_v49 = vld [vmem:[#allocation8 + $0xf88] sm:$0xff] }
 0xa22   :  { %2423 = vmatpush.msrb.mxu3 %v5951_v53  ;;  %2443 = vmatpush.msra.mxu0 %v5952_v54  ;;  %v5992_v47 = vld [vmem:[#allocation8 + $0xe78] sm:$0xff]  ;;  %v5994_v53 = vld [vmem:[#allocation8 + $0x1088] sm:$0xff] }
 0xa23   :  { %2384 = vmatpush.msrb.mxu1 %v5953_v55  ;;  %2404 = vmatpush.msrb.mxu2 %v5954_v56  ;;  %v5995_v54 = vld [vmem:[#allocation8 + $0xd68] sm:$0xff]  ;;  %v5997_v56 = vld [vmem:[#allocation8 + $0xf78] sm:$0xff] }
 0xa24   :  { %2424 = vmatpush.msrb.mxu3 %v5955_v59  ;;  %2444 = vmatpush.msra.mxu0 %v5956_v60  ;;  %v5996_v55 = vld [vmem:[#allocation8 + $0xe68] sm:$0xff]  ;;  %v5998_v59 = vld [vmem:[#allocation8 + $0x1078] sm:$0xff] }
 0xa25   :  { %2385 = vmatpush.msrb.mxu1 %v5957_v61  ;;  %2405 = vmatpush.msrb.mxu2 %v5958_v63  ;;  %v5999_v60 = vld [vmem:[#allocation8 + $0xd58] sm:$0xff]  ;;  %v6001_v63 = vld [vmem:[#allocation8 + $0xf68] sm:$0xff] }
 0xa26   :  { %2425 = vmatpush.msrb.mxu3 %v5961_v22  ;;  %2445 = vmatpush.msra.mxu0 %v5962_v12  ;;  %v6000_v61 = vld [vmem:[#allocation8 + $0xe58] sm:$0xff]  ;;  %v6004_v22 = vld [vmem:[#allocation8 + $0xe48] sm:$0xff] }
 0xa27   :  { %2450 = vmatpush.msra.mxu1 %v5959_v20  ;;  %2470 = vmatpush.msra.mxu2 %v5960_v10  ;;  %v6002_v20 = vld [vmem:[#allocation8 + $0x1068] sm:$0xff]  ;;  %v6005_v12 = vld [vmem:[#allocation8 + $0xf58] sm:$0xff] }
 0xa28   :  { %2490 = vmatpush.msra.mxu3 %v5965_v15  ;;  %2510 = vmatpush.msrb.mxu0 %v5966_v16  ;;  %v6003_v10 = vld [vmem:[#allocation8 + $0xd48] sm:$0xff]  ;;  %v6008_v15 = vld [vmem:[#allocation8 + $0xe38] sm:$0xff] }
 0xa29   :  { %2451 = vmatpush.msra.mxu1 %v5963_v13  ;;  %2471 = vmatpush.msra.mxu2 %v5964_v14  ;;  %v6006_v13 = vld [vmem:[#allocation8 + $0x1058] sm:$0xff]  ;;  %v6009_v16 = vld [vmem:[#allocation8 + $0xf48] sm:$0xff] }
 0xa2a   :  { %2491 = vmatpush.msra.mxu3 %v5969_v31  ;;  %2511 = vmatpush.msrb.mxu0 %v5970_v2  ;;  %v6007_v14 = vld [vmem:[#allocation8 + $0xd38] sm:$0xff]  ;;  %v6012_v31 = vld [vmem:[#allocation8 + $0xe28] sm:$0xff] }
 0xa2b   :  { %2452 = vmatpush.msra.mxu1 %v5967_v8  ;;  %2472 = vmatpush.msra.mxu2 %v5968_v9  ;;  %v6010_v8 = vld [vmem:[#allocation8 + $0x1048] sm:$0xff]  ;;  %v6013_v2 = vld [vmem:[#allocation8 + $0xf38] sm:$0xff] }
 0xa2c   :  { %2492 = vmatpush.msra.mxu3 %v5973_v42  ;;  %2512 = vmatpush.msrb.mxu0 %v5974_v21  ;;  %v6011_v9 = vld [vmem:[#allocation8 + $0xd28] sm:$0xff]  ;;  %v6016_v42 = vld [vmem:[#allocation8 + $0xe18] sm:$0xff] }
 0xa2d   :  { %2453 = vmatpush.msra.mxu1 %v5971_v34  ;;  %2473 = vmatpush.msra.mxu2 %v5972_v19  ;;  %v6014_v34 = vld [vmem:[#allocation8 + $0x1038] sm:$0xff]  ;;  %v6017_v21 = vld [vmem:[#allocation8 + $0xf28] sm:$0xff] }
 0xa2e   :  { %2493 = vmatpush.msra.mxu3 %v5977_v7  ;;  %2513 = vmatpush.msrb.mxu0 %v5978_v4  ;;  %v6015_v19 = vld [vmem:[#allocation8 + $0xd18] sm:$0xff]  ;;  %v6020_v7 = vld [vmem:[#allocation8 + $0xe08] sm:$0xff] }
 0xa2f   :  { %2454 = vmatpush.msra.mxu1 %v5975_v41  ;;  %2474 = vmatpush.msra.mxu2 %v5976_v1  ;;  %v6018_v41 = vld [vmem:[#allocation8 + $0x1028] sm:$0xff]  ;;  %v6021_v4 = vld [vmem:[#allocation8 + $0xf18] sm:$0xff] }
 0xa30   :  { %2494 = vmatpush.msra.mxu3 %v5981_v28  ;;  %2514 = vmatpush.msrb.mxu0 %v5982_v29  ;;  %v6019_v1 = vld [vmem:[#allocation8 + $0xd08] sm:$0xff] }
 0xa31   :  { %2455 = vmatpush.msra.mxu1 %v5979_v26  ;;  %2475 = vmatpush.msra.mxu2 %v5980_v27  ;;  %v6022_v26 = vld [vmem:[#allocation8 + $0x1018] sm:$0xff]  ;;  %v6023_v27 = vld [vmem:[#allocation8 + $0xf08] sm:$0xff] }
 0xa32   :  { %2495 = vmatpush.msra.mxu3 %v5985_v51  ;;  %2515 = vmatpush.msrb.mxu0 %v5986_v40  ;;  %v6024_v28 = vld [vmem:[#allocation8 + $0x1008] sm:$0xff] }
 0xa33   :  { %2456 = vmatpush.msra.mxu1 %v5983_v33  ;;  %2476 = vmatpush.msra.mxu2 %v5984_v35 }
 0xa34   :  { %2496 = vmatpush.msra.mxu3 %v5989_v43  ;;  %2516 = vmatpush.msrb.mxu0 %v5990_v44 }
 0xa35   :  { %2457 = vmatpush.msra.mxu1 %v5987_v48  ;;  %2477 = vmatpush.msra.mxu2 %v5988_v50 }
 0xa36   :  { %2497 = vmatpush.msra.mxu3 %v5993_v49  ;;  %2517 = vmatpush.msrb.mxu0 %v5994_v53 }
 0xa37   :  { %2458 = vmatpush.msra.mxu1 %v5991_v46  ;;  %2478 = vmatpush.msra.mxu2 %v5992_v47 }
 0xa38   :  { %2498 = vmatpush.msra.mxu3 %v5997_v56  ;;  %2518 = vmatpush.msrb.mxu0 %v5998_v59 }
 0xa39   :  { %2459 = vmatpush.msra.mxu1 %v5995_v54  ;;  %2479 = vmatpush.msra.mxu2 %v5996_v55 }
 0xa3a   :  { %2499 = vmatpush.msra.mxu3 %v6001_v63  ;;  %2519 = vmatpush.msrb.mxu0 %v6002_v20 }
 0xa3b   :  { %2460 = vmatpush.msra.mxu1 %v5999_v60  ;;  %2480 = vmatpush.msra.mxu2 %v6000_v61 }
 0xa3c   :  { %2500 = vmatpush.msra.mxu3 %v6005_v12  ;;  %2520 = vmatpush.msrb.mxu0 %v6006_v13 }
 0xa3d   :  { %2461 = vmatpush.msra.mxu1 %v6003_v10  ;;  %2481 = vmatpush.msra.mxu2 %v6004_v22 }
 0xa3e   :  { %2501 = vmatpush.msra.mxu3 %v6009_v16  ;;  %2521 = vmatpush.msrb.mxu0 %v6010_v8 }
 0xa3f   :  { %2462 = vmatpush.msra.mxu1 %v6007_v14  ;;  %2482 = vmatpush.msra.mxu2 %v6008_v15 }
 0xa40   :  { %2502 = vmatpush.msra.mxu3 %v6013_v2  ;;  %2522 = vmatpush.msrb.mxu0 %v6014_v34 }
 0xa41   :  { %2463 = vmatpush.msra.mxu1 %v6011_v9  ;;  %2483 = vmatpush.msra.mxu2 %v6012_v31 }
 0xa42   :  { %2503 = vmatpush.msra.mxu3 %v6017_v21  ;;  %2523 = vmatpush.msrb.mxu0 %v6018_v41 }
 0xa43   :  { %2464 = vmatpush.msra.mxu1 %v6015_v19  ;;  %2484 = vmatpush.msra.mxu2 %v6016_v42 }
 0xa44   :  { %2504 = vmatpush.msra.mxu3 %v6021_v4  ;;  %2524 = vmatpush.msrb.mxu0 %v6022_v26  ;;  %v2595_v4 = vld [vmem:[#allocation8 + $0x9f0] sm:$0xff] }
 0xa45   :  { %2465 = vmatpush.msra.mxu1 %v6019_v1  ;;  %2485 = vmatpush.msra.mxu2 %v6020_v7  ;;  %v2627_v26 = vld [vmem:[#allocation8 + $0xaf0] sm:$0xff] }
 0xa46   :  { %2505 = vmatpush.msra.mxu3 %v6023_v27  ;;  %2525 = vmatpush.msrb.mxu0 %v6024_v28  ;;  %v2596_v27 = vld [vmem:[#allocation8 + $0x9f8] sm:$0xff] }
 0xa47   :  { %v2628_v28 = vld [vmem:[#allocation8 + $0xaf8] sm:$0xff] }
 0xa80   :  { %v2223_v29 = vpop.f32.mrf.mxu1 }
 0xa81   :  { %v2224_v33 = vadd.f32 %v2223_v29, %v7387_v37  ;;  %v2283_v51 = vpop.f32.mrf.mxu0  ;;  %v2593_v29 = vld [vmem:[#allocation8 + $0x9e0] sm:$0xff] }
 0xa86   :  { %v2243_v35 = vpop.f32.mrf.mxu2 }
 0xa87   :  { %v2244_v40 = vadd.f32 %v2243_v35, %v2224_v33  ;;  %v2263_v48 = vpop.f32.mrf.mxu3  ;;  %v2625_v33 = vld [vmem:[#allocation8 + $0xae0] sm:$0xff]  ;;  %v2594_v35 = vld [vmem:[#allocation8 + $0x9e8] sm:$0xff] }
 0xa88   :  { %v2264_v50 = vadd.f32 %v2263_v48, %v7389_v38  ;;  %v2303_v46 = vpop.f32.mrf.mxu1 }
 0xa89   :  { %v2366_v43 = vmax.f32 %v2244_v40, 0.0  ;;  %v2304_v49 = vadd.f32 %v2303_v46, %v7393_v45  ;;  %v2363_v59 = vpop.f32.mrf.mxu0  ;;  %v2591_v46 = vld [vmem:[#allocation8 + $0x9d0] sm:$0xff] }
 0xa8a   :  { %v2284_v44 = vadd.f32 %v2283_v51, %v2264_v50 }
 0xa8b   :  { %2386 = vmatmul.f32.vlgmr.msrb.gmra.mxu1 %v2366_v43 }
 0xa8c   :  { %v2367_v47 = vmax.f32 %v2284_v44, 0.0  ;;  %2629 = vmatpush.msrb.mxu1 %v2595_v4  ;;  %v2578_v4 = vld [vmem:[#allocation8 + $0x968] sm:$0xff] }
 0xa8e   :  { %2406 = vmatmul.f32.vlgmr.msrb.gmra.mxu2 %v2367_v47  ;;  %v2323_v53 = vpop.f32.mrf.mxu2  ;;  %2630 = vmatpush.msrb.mxu1 %v2593_v29  ;;  %v2576_v29 = vld [vmem:[#allocation8 + $0x958] sm:$0xff] }
 0xa8f   :  { %v2324_v54 = vadd.f32 %v2323_v53, %v2304_v49  ;;  %v2343_v55 = vpop.f32.mrf.mxu3  ;;  %2649 = vmatpush.msrb.mxu2 %v2627_v26  ;;  %v2592_v49 = vld [vmem:[#allocation8 + $0x9d8] sm:$0xff]  ;;  %v2610_v26 = vld [vmem:[#allocation8 + $0xa68] sm:$0xff] }
 0xa90   :  { %v2344_v56 = vadd.f32 %v2343_v55, %v7395_v52  ;;  %2631 = vmatpush.msrb.mxu1 %v2591_v46  ;;  %v2624_v53 = vld [vmem:[#allocation8 + $0xad8] sm:$0xff]  ;;  %v2621_v55 = vld [vmem:[#allocation8 + $0xac0] sm:$0xff] }
 0xa91   :  { %v2368_v60 = vmax.f32 %v2324_v54, 0.0  ;;  %2650 = vmatpush.msrb.mxu2 %v2625_v33  ;;  %v2589_v54 = vld [vmem:[#allocation8 + $0x9c0] sm:$0xff]  ;;  %v2608_v33 = vld [vmem:[#allocation8 + $0xa58] sm:$0xff] }
 0xa92   :  { %v2364_v61 = vadd.f32 %v2363_v59, %v2344_v56  ;;  %v2590_v56 = vld [vmem:[#allocation8 + $0x9c8] sm:$0xff]  ;;  %2632 = vmatpush.msrb.mxu1 %v2589_v54  ;;  %v2604_v46 = vld [vmem:[#allocation8 + $0xa38] sm:$0xff] }
 0xa93   :  { %2426 = vmatmul.f32.vlgmr.msrb.gmra.mxu3 %v2368_v60  ;;  %2466 = vmatmul.f32.vlgmr.msra.gmra.mxu1 %v2366_v43  ;;  %v2622_v59 = vld [vmem:[#allocation8 + $0xac8] sm:$0xff] }
 0xa94   :  { %v2369_v63 = vmax.f32 %v2364_v61, 0.0  ;;  %2669 = vmatpush.msrb.mxu3 %v2596_v27  ;;  %v2619_v61 = vld [vmem:[#allocation8 + $0xab0] sm:$0xff]  ;;  %v2602_v54 = vld [vmem:[#allocation8 + $0xa28] sm:$0xff] }
 0xa95   :  { %v2575_v27 = vld [vmem:[#allocation8 + $0x950] sm:$0xff] }
 0xa96   :  { %2446 = vmatmul.f32.vlgmr.msra.gmra.mxu0 %v2369_v63  ;;  %2486 = vmatmul.f32.vlgmr.msra.gmra.mxu2 %v2367_v47  ;;  %v2623_v47 = vld [vmem:[#allocation8 + $0xad0] sm:$0xff] }
 0xa97   :  { %2689 = vmatpush.msra.mxu0 %v2628_v28  ;;  %2670 = vmatpush.msrb.mxu3 %v2594_v35  ;;  %v2607_v28 = vld [vmem:[#allocation8 + $0xa50] sm:$0xff]  ;;  %v2573_v35 = vld [vmem:[#allocation8 + $0x940] sm:$0xff] }
 0xa98   :  { %2651 = vmatpush.msrb.mxu2 %v2623_v47  ;;  %v2569_v47 = vld [vmem:[#allocation8 + $0x920] sm:$0xff] }
 0xa99   :  { %2671 = vmatpush.msrb.mxu3 %v2592_v49  ;;  %v2601_v49 = vld [vmem:[#allocation8 + $0xa20] sm:$0xff] }
 0xa9a   :  { %2652 = vmatpush.msrb.mxu2 %v2621_v55  ;;  %v2567_v55 = vld [vmem:[#allocation8 + $0x910] sm:$0xff] }
 0xa9b   :  { %2506 = vmatmul.f32.vlgmr.msra.gmra.mxu3 %v2368_v60  ;;  %v2587_v60 = vld [vmem:[#allocation8 + $0x9b0] sm:$0xff] }
 0xa9c   :  { %2672 = vmatpush.msrb.mxu3 %v2590_v56  ;;  %2633 = vmatpush.msrb.mxu1 %v2587_v60  ;;  %v2599_v56 = vld [vmem:[#allocation8 + $0xa10] sm:$0xff]  ;;  %v2600_v60 = vld [vmem:[#allocation8 + $0xa18] sm:$0xff] }
 0xa9d   :  { %2653 = vmatpush.msrb.mxu2 %v2619_v61  ;;  %v2565_v61 = vld [vmem:[#allocation8 + $0x900] sm:$0xff] }
 0xa9e   :  { %2526 = vmatmul.f32.vlgmr.msrb.gmra.mxu0 %v2369_v63  ;;  %v2588_v63 = vld [vmem:[#allocation8 + $0x9b8] sm:$0xff] }
 0xa9f   :  { %2673 = vmatpush.msrb.mxu3 %v2588_v63  ;;  %v2597_v63 = vld [vmem:[#allocation8 + $0xa00] sm:$0xff] }
 0xb08   :  { %v2387_v10 = vpop.f32.mrf.mxu1 }
 0xb10   :  { %v2467_v16 = vpop.f32.mrf.mxu1 }
 0xb11   :  { %v2407_v20 = vpop.f32.mrf.mxu2 }
 0xb12   :  { %v2408_v13 = vadd.f32 %v2407_v20, %v2387_v10  ;;  %v2620_v20 = vld [vmem:[#allocation8 + $0xab8] sm:$0xff]  ;;  %v2585_v10 = vld [vmem:[#allocation8 + $0x9a0] sm:$0xff] }
 0xb13   :  { %v2447_v22 = vpop.f32.mrf.mxu0  ;;  %2634 = vmatpush.msrb.mxu1 %v2585_v10  ;;  %v2598_v10 = vld [vmem:[#allocation8 + $0xa08] sm:$0xff] }
 0xb16   :  { %v2427_v12 = vpop.f32.mrf.mxu3 }
 0xb17   :  { %v2428_v14 = vadd.f32 %v2427_v12, %v2408_v13  ;;  %v2586_v12 = vld [vmem:[#allocation8 + $0x9a8] sm:$0xff] }
 0xb18   :  { %v2618_v13 = vld [vmem:[#allocation8 + $0xaa8] sm:$0xff]  ;;  %2674 = vmatpush.msrb.mxu3 %v2586_v12  ;;  %v2740_v12 = vld [vmem:[#allocation8 + $0xbf8] sm:$0xff] }
 0xb19   :  { %v2487_v15 = vpop.f32.mrf.mxu2  ;;  %v2448_v8 = vadd.f32 %v2447_v22, %v2428_v14  ;;  %v2617_v22 = vld [vmem:[#allocation8 + $0xaa0] sm:$0xff]  ;;  %v2583_v14 = vld [vmem:[#allocation8 + $0x990] sm:$0xff] }
 0xb1a   :  { %v2488_v9 = vadd.f32 %v2487_v15, %v2467_v16  ;;  %2654 = vmatpush.msrb.mxu2 %v2617_v22  ;;  %v2615_v15 = vld [vmem:[#allocation8 + $0xa90] sm:$0xff]  ;;  %v2584_v16 = vld [vmem:[#allocation8 + $0x998] sm:$0xff]  ;;  %2635 = vmatpush.msrb.mxu1 %v2583_v14 }
 0xb1b   :  { %v2527_v34 = vpop.f32.mrf.mxu0  ;;  %v2530_v42 = vadd.f32 %v2448_v8, %v7446_v24  ;;  %v2626_v24 = vld [vmem:[#allocation8 + $0xae8] sm:$0xff]  ;;  %v2616_v8 = vld [vmem:[#allocation8 + $0xa98] sm:$0xff]  ;;  %2675 = vmatpush.msrb.mxu3 %v2584_v16  ;;  %v2739_v22 = vld [vmem:[#allocation8 + $0xbf0] sm:$0xff] }
 0xb1c   :  { %2690 = vmatpush.msra.mxu0 %v2626_v24  ;;  %2655 = vmatpush.msrb.mxu2 %v2615_v15  ;;  %v2605_v24 = vld [vmem:[#allocation8 + $0xa40] sm:$0xff]  ;;  %v2771_v14 = vld [vmem:[#allocation8 + $0xcf0] sm:$0xff]  ;;  %v2738_v15 = vld [vmem:[#allocation8 + $0xbe8] sm:$0xff] }
 0xb1d   :  { %v2532_v41 = vadd.f32 %v2530_v42, %v7401_v23  ;;  %v2611_v42 = vld [vmem:[#allocation8 + $0xa70] sm:$0xff]  ;;  %v2772_v16 = vld [vmem:[#allocation8 + $0xcf8] sm:$0xff] }
 0xb1e   :  { %v2507_v31 = vpop.f32.mrf.mxu3  ;;  %2691 = vmatpush.msra.mxu0 %v2624_v53  ;;  %v2570_v53 = vld [vmem:[#allocation8 + $0x928] sm:$0xff] }
 0xb1f   :  { %v2508_v2 = vadd.f32 %v2507_v31, %v2488_v9  ;;  %v2581_v9 = vld [vmem:[#allocation8 + $0x980] sm:$0xff] }
 0xb20   :  { %2692 = vmatpush.msra.mxu0 %v2622_v59  ;;  %v2613_v31 = vld [vmem:[#allocation8 + $0xa80] sm:$0xff]  ;;  %2636 = vmatpush.msrb.mxu1 %v2581_v9  ;;  %v2568_v59 = vld [vmem:[#allocation8 + $0x918] sm:$0xff]  ;;  %v2735_v9 = vld [vmem:[#allocation8 + $0xbd0] sm:$0xff] }
 0xb21   :  { %v2528_v19 = vadd.f32 %v2527_v34, %v2508_v2  ;;  %v2582_v2 = vld [vmem:[#allocation8 + $0x988] sm:$0xff]  ;;  %2656 = vmatpush.msrb.mxu2 %v2613_v31  ;;  %v2769_v31 = vld [vmem:[#allocation8 + $0xce0] sm:$0xff] }
 0xb22   :  { %2693 = vmatpush.msra.mxu0 %v2620_v20  ;;  %v2614_v34 = vld [vmem:[#allocation8 + $0xa88] sm:$0xff]  ;;  %2676 = vmatpush.msrb.mxu3 %v2582_v2  ;;  %v2736_v2 = vld [vmem:[#allocation8 + $0xbd8] sm:$0xff] }
 0xb23   :  { %v2531_v21 = vadd.f32 %v2528_v19, %v7449_v32  ;;  %v2579_v19 = vld [vmem:[#allocation8 + $0x970] sm:$0xff]  ;;  %2657 = vmatpush.msrb.mxu2 %v2611_v42  ;;  %v2566_v20 = vld [vmem:[#allocation8 + $0x908] sm:$0xff] }
 0xb24   :  { %2694 = vmatpush.msra.mxu0 %v2618_v13  ;;  %2637 = vmatpush.msrb.mxu1 %v2579_v19  ;;  %v2737_v13 = vld [vmem:[#allocation8 + $0xbe0] sm:$0xff]  ;;  %v2770_v19 = vld [vmem:[#allocation8 + $0xce8] sm:$0xff]  ;;  %v2767_v42 = vld [vmem:[#allocation8 + $0xcd0] sm:$0xff] }
 0xb25   :  { %v2533_v1 = vadd.f32 %v2531_v21, %v7404_v11  ;;  %v2580_v21 = vld [vmem:[#allocation8 + $0x978] sm:$0xff] }
 0xb26   :  { %2695 = vmatpush.msra.mxu0 %v2616_v8  ;;  %2677 = vmatpush.msrb.mxu3 %v2580_v21  ;;  %v2733_v21 = vld [vmem:[#allocation8 + $0xbc0] sm:$0xff] }
 0xb27   :  { %v2534_v7 = vadd.f32 %v2533_v1, %v2532_v41 }
 0xb28   :  { %2696 = vmatpush.msra.mxu0 %v2614_v34  ;;  %2678 = vmatpush.msrb.mxu3 %v2578_v4  ;;  %v2765_v4 = vld [vmem:[#allocation8 + $0xcc0] sm:$0xff] }
 0xb29   :  { %2535 = vadd.xlane.f32.xlu0 %v2534_v7  ;;  %v2609_v7 = vld [vmem:[#allocation8 + $0xa60] sm:$0xff] }
 0xb2a   :  { %2658 = vmatpush.msrb.mxu2 %v2609_v7  ;;  %2679 = vmatpush.msrb.mxu3 %v2576_v29  ;;  %v2763_v29 = vld [vmem:[#allocation8 + $0xcb0] sm:$0xff] }
 0xb2c   :  { %2659 = vmatpush.msrb.mxu2 %v2607_v28  ;;  %v2732_v28 = vld [vmem:[#allocation8 + $0xbb8] sm:$0xff] }
 0xb2e   :  { %2660 = vmatpush.msrb.mxu2 %v2605_v24  ;;  %v2730_v24 = vld [vmem:[#allocation8 + $0xba8] sm:$0xff] }
 0xb9c   :  { %v2536_v32 = vpop.xlane.xlu0 %2535 }
 0xb9d   :  { %v2537_v51 = vmul.f32 %v2536_v32, %v7240_v5  ;;  %v2574_v32 = vld [vmem:[#allocation8 + $0x948] sm:$0xff] }
 0xb9e   :  { %2680 = vmatpush.msrb.mxu3 %v2574_v32  ;;  %v2761_v32 = vld [vmem:[#allocation8 + $0xca0] sm:$0xff] }
 0xb9f   :  { %v7468_v40 = vsub.f32 %v2532_v41, %v2537_v51  ;;  %v7470_v48 = vsub.f32 %v2533_v1, %v2537_v51  ;;  %v2612_v41 = vld [vmem:[#allocation8 + $0xa78] sm:$0xff]  ;;  %v2577_v1 = vld [vmem:[#allocation8 + $0x960] sm:$0xff]  ;;  %v2606_v51 = vld [vmem:[#allocation8 + $0xa48] sm:$0xff] }
 0xba0   :  { %2697 = vmatpush.msra.mxu0 %v2612_v41  ;;  %2638 = vmatpush.msrb.mxu1 %v2577_v1  ;;  %v2734_v41 = vld [vmem:[#allocation8 + $0xbc8] sm:$0xff]  ;;  %v2768_v1 = vld [vmem:[#allocation8 + $0xcd8] sm:$0xff] }
 0xba1   :  { %v2540_v50 = vmul.f32 %v7468_v40, %v7468_v40  ;;  %v2541_v43 = vmul.f32 %v7470_v48, %v7470_v48 }
 0xba2   :  { %2698 = vmatpush.msra.mxu0 %v2610_v26  ;;  %2639 = vmatpush.msrb.mxu1 %v2575_v27  ;;  %v2766_v26 = vld [vmem:[#allocation8 + $0xcc8] sm:$0xff]  ;;  %v2731_v27 = vld [vmem:[#allocation8 + $0xbb0] sm:$0xff] }
 0xba3   :  { %v2542_v44 = vadd.f32 %v2541_v43, %v2540_v50  ;;  %v2571_v50 = vld [vmem:[#allocation8 + $0x930] sm:$0xff] }
 0xba4   :  { %2699 = vmatpush.msra.mxu0 %v2608_v33  ;;  %2640 = vmatpush.msrb.mxu1 %v2573_v35  ;;  %v2603_v43 = vld [vmem:[#allocation8 + $0xa30] sm:$0xff]  ;;  %v2764_v33 = vld [vmem:[#allocation8 + $0xcb8] sm:$0xff]  ;;  %v2729_v35 = vld [vmem:[#allocation8 + $0xba0] sm:$0xff] }
 0xba5   :  { %2543 = vadd.xlane.f32.xlu1 %v2542_v44  ;;  %v2572_v44 = vld [vmem:[#allocation8 + $0x938] sm:$0xff]  ;;  %2661 = vmatpush.msrb.mxu2 %v2603_v43 }
 0xba6   :  { %2700 = vmatpush.msra.mxu0 %v2606_v51  ;;  %2641 = vmatpush.msrb.mxu1 %v2571_v50  ;;  %v2762_v51 = vld [vmem:[#allocation8 + $0xca8] sm:$0xff]  ;;  %v2727_v50 = vld [vmem:[#allocation8 + $0xb90] sm:$0xff]  ;;  %v2728_v43 = vld [vmem:[#allocation8 + $0xb98] sm:$0xff] }
 0xba7   :  { %2681 = vmatpush.msrb.mxu3 %v2572_v44  ;;  %2662 = vmatpush.msrb.mxu2 %v2601_v49  ;;  %v2759_v44 = vld [vmem:[#allocation8 + $0xc90] sm:$0xff]  ;;  %v2726_v49 = vld [vmem:[#allocation8 + $0xb88] sm:$0xff] }
 0xba8   :  { %2701 = vmatpush.msra.mxu0 %v2604_v46  ;;  %2642 = vmatpush.msrb.mxu1 %v2569_v47  ;;  %v2760_v46 = vld [vmem:[#allocation8 + $0xc98] sm:$0xff]  ;;  %v2725_v47 = vld [vmem:[#allocation8 + $0xb80] sm:$0xff] }
 0xba9   :  { %2682 = vmatpush.msrb.mxu3 %v2570_v53  ;;  %2663 = vmatpush.msrb.mxu2 %v2599_v56 }
 0xbaa   :  { %2702 = vmatpush.msra.mxu0 %v2602_v54  ;;  %2643 = vmatpush.msrb.mxu1 %v2567_v55  ;;  %v2757_v54 = vld [vmem:[#allocation8 + $0xc80] sm:$0xff]  ;;  %v2758_v55 = vld [vmem:[#allocation8 + $0xc88] sm:$0xff] }
 0xbab   :  { %2683 = vmatpush.msrb.mxu3 %v2568_v59  ;;  %2664 = vmatpush.msrb.mxu2 %v2597_v63  ;;  %v2723_v59 = vld [vmem:[#allocation8 + $0xb70] sm:$0xff]  ;;  %v2756_v63 = vld [vmem:[#allocation8 + $0xc78] sm:$0xff] }
 0xbac   :  { %2703 = vmatpush.msra.mxu0 %v2600_v60  ;;  %2644 = vmatpush.msrb.mxu1 %v2565_v61  ;;  %v2724_v60 = vld [vmem:[#allocation8 + $0xb78] sm:$0xff]  ;;  %v2755_v61 = vld [vmem:[#allocation8 + $0xc70] sm:$0xff] }
 0xbad   :  { %2684 = vmatpush.msrb.mxu3 %v2566_v20  ;;  %2793 = vmatpush.msra.mxu2 %v2771_v14 }
 0xbae   :  { %2704 = vmatpush.msra.mxu0 %v2598_v10  ;;  %2773 = vmatpush.msra.mxu1 %v2739_v22  ;;  %v2721_v10 = vld [vmem:[#allocation8 + $0xb60] sm:$0xff]  ;;  %v2722_v22 = vld [vmem:[#allocation8 + $0xb68] sm:$0xff] }
 0xbaf   :  { %2813 = vmatpush.msra.mxu3 %v2740_v12  ;;  %2794 = vmatpush.msra.mxu2 %v2769_v31  ;;  %v2753_v12 = vld [vmem:[#allocation8 + $0xc60] sm:$0xff] }
 0xbb0   :  { %2833 = vmatpush.msrb.mxu0 %v2772_v16  ;;  %2774 = vmatpush.msra.mxu1 %v2737_v13  ;;  %v2754_v13 = vld [vmem:[#allocation8 + $0xc68] sm:$0xff]  ;;  %v2720_v16 = vld [vmem:[#allocation8 + $0xb58] sm:$0xff] }
 0xbb1   :  { %2814 = vmatpush.msra.mxu3 %v2738_v15  ;;  %2795 = vmatpush.msra.mxu2 %v2767_v42  ;;  %v2719_v15 = vld [vmem:[#allocation8 + $0xb50] sm:$0xff] }
 0xbb2   :  { %2834 = vmatpush.msrb.mxu0 %v2770_v19  ;;  %2775 = vmatpush.msra.mxu1 %v2735_v9 }
 0xbb3   :  { %2815 = vmatpush.msra.mxu3 %v2736_v2  ;;  %2796 = vmatpush.msra.mxu2 %v2765_v4  ;;  %v2715_v4 = vld [vmem:[#allocation8 + $0xb30] sm:$0xff] }
 0xbb4   :  { %2835 = vmatpush.msrb.mxu0 %v2768_v1  ;;  %2776 = vmatpush.msra.mxu1 %v2733_v21  ;;  %v2718_v1 = vld [vmem:[#allocation8 + $0xb48] sm:$0xff] }
 0xbb5   :  { %2816 = vmatpush.msra.mxu3 %v2734_v41  ;;  %2797 = vmatpush.msra.mxu2 %v2763_v29  ;;  %v2713_v29 = vld [vmem:[#allocation8 + $0xb20] sm:$0xff] }
 0xbb6   :  { %2836 = vmatpush.msrb.mxu0 %v2766_v26  ;;  %2777 = vmatpush.msra.mxu1 %v2731_v27  ;;  %v2749_v26 = vld [vmem:[#allocation8 + $0xc40] sm:$0xff]  ;;  %v2716_v27 = vld [vmem:[#allocation8 + $0xb38] sm:$0xff] }
 0xbb7   :  { %2817 = vmatpush.msra.mxu3 %v2732_v28  ;;  %2798 = vmatpush.msra.mxu2 %v2761_v32  ;;  %v2750_v28 = vld [vmem:[#allocation8 + $0xc48] sm:$0xff]  ;;  %v2711_v32 = vld [vmem:[#allocation8 + $0xb10] sm:$0xff] }
 0xbb8   :  { %2837 = vmatpush.msrb.mxu0 %v2764_v33  ;;  %2778 = vmatpush.msra.mxu1 %v2729_v35  ;;  %v2747_v33 = vld [vmem:[#allocation8 + $0xc30] sm:$0xff]  ;;  %v2714_v35 = vld [vmem:[#allocation8 + $0xb28] sm:$0xff] }
 0xbb9   :  { %2818 = vmatpush.msra.mxu3 %v2730_v24  ;;  %2799 = vmatpush.msra.mxu2 %v2759_v44  ;;  %v2748_v24 = vld [vmem:[#allocation8 + $0xc38] sm:$0xff]  ;;  %v2709_v44 = vld [vmem:[#allocation8 + $0xb00] sm:$0xff] }
 0xbba   :  { %2838 = vmatpush.msrb.mxu0 %v2762_v51  ;;  %2779 = vmatpush.msra.mxu1 %v2727_v50  ;;  %v2745_v51 = vld [vmem:[#allocation8 + $0xc20] sm:$0xff]  ;;  %v2712_v50 = vld [vmem:[#allocation8 + $0xb18] sm:$0xff] }
 0xbbb   :  { %2819 = vmatpush.msra.mxu3 %v2728_v43  ;;  %2800 = vmatpush.msra.mxu2 %v2757_v54  ;;  %v2746_v43 = vld [vmem:[#allocation8 + $0xc28] sm:$0xff] }
 0xbbc   :  { %2839 = vmatpush.msrb.mxu0 %v2760_v46  ;;  %2780 = vmatpush.msra.mxu1 %v2725_v47  ;;  %v2743_v46 = vld [vmem:[#allocation8 + $0xc10] sm:$0xff]  ;;  %v2710_v47 = vld [vmem:[#allocation8 + $0xb08] sm:$0xff] }
 0xbbd   :  { %2820 = vmatpush.msra.mxu3 %v2726_v49  ;;  %2801 = vmatpush.msra.mxu2 %v2755_v61  ;;  %v2744_v49 = vld [vmem:[#allocation8 + $0xc18] sm:$0xff]  ;;  %v2742_v54 = vld [vmem:[#allocation8 + $0xc08] sm:$0xff] }
 0xbbe   :  { %2840 = vmatpush.msrb.mxu0 %v2758_v55  ;;  %2781 = vmatpush.msra.mxu1 %v2723_v59 }
 0xbbf   :  { %2821 = vmatpush.msra.mxu3 %v2724_v60  ;;  %2802 = vmatpush.msra.mxu2 %v2753_v12 }
 0xbc0   :  { %2841 = vmatpush.msrb.mxu0 %v2756_v63  ;;  %2782 = vmatpush.msra.mxu1 %v2721_v10 }
 0xbc1   :  { %2822 = vmatpush.msra.mxu3 %v2722_v22 }
 0xbc2   :  { %2842 = vmatpush.msrb.mxu0 %v2754_v13  ;;  %2783 = vmatpush.msra.mxu1 %v2719_v15 }
 0xbc3   :  { %2823 = vmatpush.msra.mxu3 %v2720_v16 }
 0xbc5   :  { %2824 = vmatpush.msra.mxu3 %v2718_v1  ;;  %v2940_v1 = vld [vmem:[#allocation11 + $0x1c0] sm:$0xff] }
 0xbc7   :  { %2825 = vmatpush.msra.mxu3 %v2716_v27  ;;  %v2937_v27 = vld [vmem:[#allocation11 + $0x1a8] sm:$0xff] }
 0xbc9   :  { %2826 = vmatpush.msra.mxu3 %v2714_v35  ;;  %v2933_v35 = vld [vmem:[#allocation11 + $0x188] sm:$0xff] }
 0xbcb   :  { %2827 = vmatpush.msra.mxu3 %v2712_v50  ;;  %v2929_v50 = vld [vmem:[#allocation11 + $0x168] sm:$0xff] }
 0xbcd   :  { %2828 = vmatpush.msra.mxu3 %v2710_v47  ;;  %v2925_v47 = vld [vmem:[#allocation11 + $0x148] sm:$0xff] }
 0xc18   :  { %v2544_v8 = vpop.xlane.xlu1 %2543 }
 0xc19   :  { %v2545_v34 = vmul.f32 %v2544_v8, %v7240_v5 }
 0xc1b   :  { %v7477_v7 = vadd.f32 1e-05, %v2545_v34 }
 0xc1d   :  { %5621 = vrsqrt.f32 %v7477_v7  ;;  %vm2553_vm5 = vweird.f32 %v7477_v7 }
 0xc23   :  { %v5622_v53 = vpop.eup %5621 }
 0xc24   :  { %v2548_v56 = vmul.f32 %v5622_v53, %v7477_v7  ;;  %vm2554_vm4 = vweird.f32 %v5622_v53  ;;  %v2752_v7 = vld [vmem:[#allocation8 + $0xc58] sm:$0xff] }
 0xc25   :  { %vm2555_vm6 = vmor %vm2553_vm5, %vm2554_vm4  ;;  %2843 = vmatpush.msrb.mxu0 %v2752_v7  ;;  %v3004_v7 = vld [vmem:[#allocation11 + $0x3c0] sm:$0xff] }
 0xc26   :  { %v2549_v20 = vmul.f32 %v5622_v53, %v2548_v56 }
 0xc27   :  { %2844 = vmatpush.msrb.mxu0 %v2750_v28  ;;  %v3001_v28 = vld [vmem:[#allocation11 + $0x3a8] sm:$0xff] }
 0xc28   :  { %v2550_v14 = vmul.f32 0.5, %v2549_v20 }
 0xc29   :  { %2845 = vmatpush.msrb.mxu0 %v2748_v24  ;;  %v2997_v24 = vld [vmem:[#allocation11 + $0x388] sm:$0xff] }
 0xc2a   :  { %v2551_v8 = vsub.f32 1.5, %v2550_v14 }
 0xc2b   :  { %2846 = vmatpush.msrb.mxu0 %v2746_v43  ;;  %v2993_v43 = vld [vmem:[#allocation11 + $0x368] sm:$0xff] }
 0xc2c   :  { %v2552_v9 = vmul.f32 %v5622_v53, %v2551_v8 }
 0xc2d   :  { %2847 = vmatpush.msrb.mxu0 %v2744_v49  ;;  %v2989_v49 = vld [vmem:[#allocation11 + $0x348] sm:$0xff] }
 0xc2e   :  { %v2556_v31 = vsel %vm2555_vm6, %v5622_v53, %v2552_v9  ;;  %v2741_v53 = vld [vmem:[#allocation8 + $0xc00] sm:$0xff] }
 0xc2f   :  { %v2557_v2 = vmul.f32 %v2556_v31, %v7468_v40  ;;  %v2558_v34 = vmul.f32 %v2556_v31, %v7470_v48  ;;  %v2717_v40 = vld [vmem:[#allocation8 + $0xb40] sm:$0xff]  ;;  %v2751_v48 = vld [vmem:[#allocation8 + $0xc50] sm:$0xff]  ;;  %2848 = vmatpush.msrb.mxu0 %v2742_v54 }
 0xc30   :  { %2784 = vmatpush.msra.mxu1 %v2717_v40  ;;  %2803 = vmatpush.msra.mxu2 %v2751_v48  ;;  %v2945_v40 = vld [vmem:[#allocation11 + $0x1e8] sm:$0xff]  ;;  %v2984_v54 = vld [vmem:[#allocation11 + $0x320] sm:$0xff] }
 0xc31   :  { %v2559_v19 = vmul.f32 %v2557_v2, %v7412_v25  ;;  %v2560_v42 = vmul.f32 %v2558_v34, %v7415_v30  ;;  %v3009_v48 = vld [vmem:[#allocation11 + $0x3e8] sm:$0xff] }
 0xc32   :  { %2785 = vmatpush.msra.mxu1 %v2715_v4  ;;  %2804 = vmatpush.msra.mxu2 %v2749_v26  ;;  %v2941_v4 = vld [vmem:[#allocation11 + $0x1c8] sm:$0xff]  ;;  %v2936_v26 = vld [vmem:[#allocation11 + $0x1a0] sm:$0xff] }
 0xc33   :  { %v7487_v21 = vadd.f32 %v2559_v19, %v7418_v36  ;;  %v7490_v41 = vadd.f32 %v2560_v42, %v7421_v39  ;;  %v2944_v19 = vld [vmem:[#allocation11 + $0x1e0] sm:$0xff] }
 0xc34   :  { %2786 = vmatpush.msra.mxu1 %v2713_v29  ;;  %2805 = vmatpush.msra.mxu2 %v2747_v33  ;;  %v3008_v42 = vld [vmem:[#allocation11 + $0x3e0] sm:$0xff] }
 0xc35   :  { %2645 = vmatmul.f32.vlgmr.msrb.gmra.mxu1 %v7487_v21  ;;  %2563 = vst [vmem:[#allocation18] sm:$0xff] %v7487_v21  ;;  %2665 = vmatmul.f32.vlgmr.msrb.gmra.mxu2 %v7490_v41  ;;  %v2932_v29 = vld [vmem:[#allocation11 + $0x180] sm:$0xff] }
 0xc36   :  { %2564 = vst [vmem:[#allocation18 + $0x8] sm:$0xff] %v7490_v41  ;;  %2685 = vmatmul.f32.vlgmr.msrb.gmra.mxu3 %v7487_v21  ;;  %2705 = vmatmul.f32.vlgmr.msra.gmra.mxu0 %v7490_v41  ;;  %v2996_v33 = vld [vmem:[#allocation11 + $0x380] sm:$0xff] }
 0xc37   :  { %2787 = vmatpush.msra.mxu1 %v2711_v32  ;;  %2806 = vmatpush.msra.mxu2 %v2745_v51  ;;  %v2928_v32 = vld [vmem:[#allocation11 + $0x160] sm:$0xff]  ;;  %5550 = dma.vmem_to_hbm [thread:$0]  %s5546_s18, 256, %s5548_s1, [#allocation19]  }
 0xc38   :  { %3052 = vmatpush.msrb.mxu3 %v2945_v40  ;;  %3072 = vmatpush.msra.mxu0 %v3009_v48  ;;  %v2992_v51 = vld [vmem:[#allocation11 + $0x360] sm:$0xff]  ;;  %v2901_v48 = vld [vmem:[#allocation11 + $0x88] sm:$0xff] }
 0xc39   :  { %2788 = vmatpush.msra.mxu1 %v2709_v44  ;;  %2807 = vmatpush.msra.mxu2 %v2743_v46  ;;  %v2924_v44 = vld [vmem:[#allocation11 + $0x140] sm:$0xff] }
 0xc3a   :  { %3053 = vmatpush.msrb.mxu3 %v2941_v4  ;;  %v2988_v46 = vld [vmem:[#allocation11 + $0x340] sm:$0xff] }
 0xc3b   :  { %2808 = vmatpush.msra.mxu2 %v2741_v53  ;;  %3012 = vmatpush.msrb.mxu1 %v2944_v19  ;;  %v2920_v53 = vld [vmem:[#allocation11 + $0x120] sm:$0xff]  ;;  %v2969_v19 = vld [vmem:[#allocation11 + $0x2a8] sm:$0xff] }
 0xc3c   :  { %3054 = vmatpush.msrb.mxu3 %v2937_v27  ;;  %v2964_v40 = vld [vmem:[#allocation11 + $0x280] sm:$0xff] }
 0xc3d   :  { %3032 = vmatpush.msrb.mxu2 %v3008_v42  ;;  %3013 = vmatpush.msrb.mxu1 %v2940_v1  ;;  %v2900_v42 = vld [vmem:[#allocation11 + $0x80] sm:$0xff]  ;;  %v2965_v1 = vld [vmem:[#allocation11 + $0x288] sm:$0xff] }
 0xc3e   :  { %3055 = vmatpush.msrb.mxu3 %v2933_v35  ;;  %v2960_v4 = vld [vmem:[#allocation11 + $0x260] sm:$0xff] }
 0xc3f   :  { %3033 = vmatpush.msrb.mxu2 %v3004_v7  ;;  %3014 = vmatpush.msrb.mxu1 %v2936_v26  ;;  %v2896_v7 = vld [vmem:[#allocation11 + $0x60] sm:$0xff]  ;;  %v2897_v26 = vld [vmem:[#allocation11 + $0x68] sm:$0xff] }
 0xc40   :  { %3056 = vmatpush.msrb.mxu3 %v2929_v50  ;;  %v2893_v50 = vld [vmem:[#allocation11 + $0x48] sm:$0xff] }
 0xc41   :  { %3015 = vmatpush.msrb.mxu1 %v2932_v29 }
 0xc42   :  { %3057 = vmatpush.msrb.mxu3 %v2925_v47  ;;  %v2884_v47 = vld [vmem:[#allocation11] sm:$0xff] }
 0xc43   :  { %3016 = vmatpush.msrb.mxu1 %v2928_v32  ;;  %v2892_v32 = vld [vmem:[#allocation11 + $0x40] sm:$0xff] }
 0xc45   :  { %3017 = vmatpush.msrb.mxu1 %v2924_v44  ;;  %v2889_v44 = vld [vmem:[#allocation11 + $0x28] sm:$0xff] }
 0xc47   :  { %3018 = vmatpush.msrb.mxu1 %v2920_v53  ;;  %v2885_v53 = vld [vmem:[#allocation11 + $0x8] sm:$0xff] }
 0xcb2   :  { %v2646_v55 = vpop.f32.mrf.mxu1 }
 0xcb3   :  { %v2647_v56 = vadd.f32 %v2646_v55, %v7318_v3  ;;  %v2706_v20 = vpop.f32.mrf.mxu0  ;;  %v2921_v55 = vld [vmem:[#allocation11 + $0x128] sm:$0xff] }
 0xcb4   :  { %3058 = vmatpush.msrb.mxu3 %v2921_v55  ;;  %v2946_v55 = vld [vmem:[#allocation11 + $0x1f0] sm:$0xff] }
 0xcb8   :  { %v2666_v59 = vpop.f32.mrf.mxu2 }
 0xcb9   :  { %v2667_v60 = vadd.f32 %v2666_v59, %v2647_v56  ;;  %v2686_v61 = vpop.f32.mrf.mxu3  ;;  %v2985_v56 = vld [vmem:[#allocation11 + $0x328] sm:$0xff]  ;;  %v2916_v59 = vld [vmem:[#allocation11 + $0x100] sm:$0xff] }
 0xcba   :  { %v2687_v63 = vadd.f32 %v2686_v61, %v7321_v6  ;;  %v2917_v61 = vld [vmem:[#allocation11 + $0x108] sm:$0xff]  ;;  %3019 = vmatpush.msrb.mxu1 %v2916_v59  ;;  %v2947_v59 = vld [vmem:[#allocation11 + $0x1f8] sm:$0xff] }
 0xcbb   :  { %2789 = vmatmul.f32.vlgmr.msra.gmra.mxu1 %v2667_v60  ;;  %2829 = vmatmul.f32.vlgmr.msra.gmra.mxu3 %v2667_v60  ;;  %v2980_v60 = vld [vmem:[#allocation11 + $0x300] sm:$0xff] }
 0xcbc   :  { %v2707_v10 = vadd.f32 %v2706_v20, %v2687_v63  ;;  %v2981_v63 = vld [vmem:[#allocation11 + $0x308] sm:$0xff]  ;;  %v2912_v20 = vld [vmem:[#allocation11 + $0xe0] sm:$0xff]  ;;  %3059 = vmatpush.msrb.mxu3 %v2917_v61  ;;  %v2942_v61 = vld [vmem:[#allocation11 + $0x1d0] sm:$0xff] }
 0xcbd   :  { %3020 = vmatpush.msrb.mxu1 %v2912_v20  ;;  %v2943_v20 = vld [vmem:[#allocation11 + $0x1d8] sm:$0xff] }
 0xcbe   :  { %2809 = vmatmul.f32.vlgmr.msra.gmra.mxu2 %v2707_v10  ;;  %2849 = vmatmul.f32.vlgmr.msrb.gmra.mxu0 %v2707_v10  ;;  %v2976_v10 = vld [vmem:[#allocation11 + $0x2e0] sm:$0xff] }
 0xd38   :  { %v2790_v22 = vpop.f32.mrf.mxu1 }
 0xd39   :  { %v2791_v14 = vadd.f32 %v2790_v22, %v7326_v17  ;;  %v2913_v22 = vld [vmem:[#allocation11 + $0xe8] sm:$0xff] }
 0xd3a   :  { %3060 = vmatpush.msrb.mxu3 %v2913_v22  ;;  %v2938_v22 = vld [vmem:[#allocation11 + $0x1b0] sm:$0xff] }
 0xd3b   :  { %v2850_v15 = vpop.f32.mrf.mxu0 }
 0xd3e   :  { %v2830_v12 = vpop.f32.mrf.mxu3 }
 0xd3f   :  { %v2831_v13 = vadd.f32 %v2830_v12, %v7329_v18  ;;  %v2977_v12 = vld [vmem:[#allocation11 + $0x2e8] sm:$0xff] }
 0xd41   :  { %v2851_v16 = vadd.f32 %v2850_v15, %v2831_v13  ;;  %v2810_v8 = vpop.f32.mrf.mxu2  ;;  %v2908_v13 = vld [vmem:[#allocation11 + $0xc0] sm:$0xff]  ;;  %v2909_v15 = vld [vmem:[#allocation11 + $0xc8] sm:$0xff] }
 0xd42   :  { %v2811_v9 = vadd.f32 %v2810_v8, %v2791_v14  ;;  %v2972_v14 = vld [vmem:[#allocation11 + $0x2c0] sm:$0xff]  ;;  %3021 = vmatpush.msrb.mxu1 %v2908_v13  ;;  %3061 = vmatpush.msrb.mxu3 %v2909_v15  ;;  %v2939_v13 = vld [vmem:[#allocation11 + $0x1b8] sm:$0xff]  ;;  %v2934_v15 = vld [vmem:[#allocation11 + $0x190] sm:$0xff] }
 0xd43   :  { %v7503_v31 = vadd.f32 %v2851_v16, %v7490_v41  ;;  %v3005_v41 = vld [vmem:[#allocation11 + $0x3c8] sm:$0xff]  ;;  %v2904_v8 = vld [vmem:[#allocation11 + $0xa0] sm:$0xff] }
 0xd44   :  { %v7506_v2 = vadd.f32 %v2811_v9, %v7487_v21  ;;  %v3000_v21 = vld [vmem:[#allocation11 + $0x3a0] sm:$0xff]  ;;  %3073 = vmatpush.msra.mxu0 %v3005_v41  ;;  %v2973_v16 = vld [vmem:[#allocation11 + $0x2c8] sm:$0xff]  ;;  %3022 = vmatpush.msrb.mxu1 %v2904_v8  ;;  %v2935_v8 = vld [vmem:[#allocation11 + $0x198] sm:$0xff] }
 0xd45   :  { %3034 = vmatpush.msrb.mxu2 %v3000_v21  ;;  %v2968_v9 = vld [vmem:[#allocation11 + $0x2a0] sm:$0xff]  ;;  %v2961_v21 = vld [vmem:[#allocation11 + $0x268] sm:$0xff] }
 0xd46   :  { %v2855_v34 = vadd.f32 %v7503_v31, %v7506_v2  ;;  %3074 = vmatpush.msra.mxu0 %v3001_v28  ;;  %3023 = vmatpush.msrb.mxu1 %v2900_v42  ;;  %v2931_v42 = vld [vmem:[#allocation11 + $0x178] sm:$0xff] }
 0xd47   :  { %3035 = vmatpush.msrb.mxu2 %v2996_v33 }
 0xd48   :  { %2856 = vadd.xlane.f32.xlu2 %v2855_v34  ;;  %3075 = vmatpush.msra.mxu0 %v2997_v24  ;;  %v2905_v34 = vld [vmem:[#allocation11 + $0xa8] sm:$0xff] }
 0xd49   :  { %3036 = vmatpush.msrb.mxu2 %v2992_v51  ;;  %3062 = vmatpush.msrb.mxu3 %v2905_v34  ;;  %v2956_v51 = vld [vmem:[#allocation11 + $0x240] sm:$0xff]  ;;  %v2930_v34 = vld [vmem:[#allocation11 + $0x170] sm:$0xff] }
 0xd4a   :  { %3076 = vmatpush.msra.mxu0 %v2993_v43  ;;  %3024 = vmatpush.msrb.mxu1 %v2896_v7  ;;  %v2952_v43 = vld [vmem:[#allocation11 + $0x220] sm:$0xff]  ;;  %v2927_v7 = vld [vmem:[#allocation11 + $0x158] sm:$0xff] }
 0xd4b   :  { %3037 = vmatpush.msrb.mxu2 %v2988_v46  ;;  %3063 = vmatpush.msrb.mxu3 %v2901_v48  ;;  %v2953_v46 = vld [vmem:[#allocation11 + $0x228] sm:$0xff]  ;;  %v2926_v48 = vld [vmem:[#allocation11 + $0x150] sm:$0xff] }
 0xd4c   :  { %3077 = vmatpush.msra.mxu0 %v2989_v49  ;;  %3025 = vmatpush.msrb.mxu1 %v2892_v32  ;;  %v2948_v49 = vld [vmem:[#allocation11 + $0x200] sm:$0xff]  ;;  %v2983_v32 = vld [vmem:[#allocation11 + $0x318] sm:$0xff] }
 0xd4d   :  { %3038 = vmatpush.msrb.mxu2 %v2984_v54  ;;  %3064 = vmatpush.msrb.mxu3 %v2897_v26  ;;  %v2949_v54 = vld [vmem:[#allocation11 + $0x208] sm:$0xff]  ;;  %v2986_v26 = vld [vmem:[#allocation11 + $0x330] sm:$0xff] }
 0xd4e   :  { %3078 = vmatpush.msra.mxu0 %v2985_v56  ;;  %v3010_v56 = vld [vmem:[#allocation11 + $0x3f0] sm:$0xff] }
 0xd4f   :  { %3039 = vmatpush.msrb.mxu2 %v2980_v60  ;;  %3065 = vmatpush.msrb.mxu3 %v2893_v50  ;;  %v3011_v60 = vld [vmem:[#allocation11 + $0x3f8] sm:$0xff]  ;;  %v2978_v50 = vld [vmem:[#allocation11 + $0x2f0] sm:$0xff] }
 0xd50   :  { %3079 = vmatpush.msra.mxu0 %v2981_v63  ;;  %v3006_v63 = vld [vmem:[#allocation11 + $0x3d0] sm:$0xff] }
 0xd51   :  { %3040 = vmatpush.msrb.mxu2 %v2976_v10  ;;  %3066 = vmatpush.msrb.mxu3 %v2889_v44  ;;  %v3007_v10 = vld [vmem:[#allocation11 + $0x3d8] sm:$0xff]  ;;  %v2974_v44 = vld [vmem:[#allocation11 + $0x2d0] sm:$0xff] }
 0xd52   :  { %3080 = vmatpush.msra.mxu0 %v2977_v12  ;;  %v3002_v12 = vld [vmem:[#allocation11 + $0x3b0] sm:$0xff] }
 0xd53   :  { %3041 = vmatpush.msrb.mxu2 %v2972_v14  ;;  %3067 = vmatpush.msrb.mxu3 %v2885_v53  ;;  %v3003_v14 = vld [vmem:[#allocation11 + $0x3b8] sm:$0xff]  ;;  %v2970_v53 = vld [vmem:[#allocation11 + $0x2b0] sm:$0xff] }
 0xd54   :  { %3081 = vmatpush.msra.mxu0 %v2973_v16  ;;  %v2998_v16 = vld [vmem:[#allocation11 + $0x390] sm:$0xff] }
 0xd55   :  { %3042 = vmatpush.msrb.mxu2 %v2968_v9  ;;  %3132 = vmatpush.msra.mxu3 %v2947_v59  ;;  %v2999_v9 = vld [vmem:[#allocation11 + $0x398] sm:$0xff]  ;;  %v2966_v59 = vld [vmem:[#allocation11 + $0x290] sm:$0xff] }
 0xd56   :  { %3082 = vmatpush.msra.mxu0 %v2969_v19  ;;  %v2994_v19 = vld [vmem:[#allocation11 + $0x370] sm:$0xff] }
 0xd57   :  { %3043 = vmatpush.msrb.mxu2 %v2964_v40  ;;  %3133 = vmatpush.msra.mxu3 %v2943_v20  ;;  %v2995_v40 = vld [vmem:[#allocation11 + $0x378] sm:$0xff]  ;;  %v2962_v20 = vld [vmem:[#allocation11 + $0x270] sm:$0xff] }
 0xd58   :  { %3083 = vmatpush.msra.mxu0 %v2965_v1  ;;  %v2990_v1 = vld [vmem:[#allocation11 + $0x350] sm:$0xff] }
 0xd59   :  { %3044 = vmatpush.msrb.mxu2 %v2960_v4  ;;  %3134 = vmatpush.msra.mxu3 %v2939_v13  ;;  %v2991_v4 = vld [vmem:[#allocation11 + $0x358] sm:$0xff]  ;;  %v2958_v13 = vld [vmem:[#allocation11 + $0x250] sm:$0xff] }
 0xd5a   :  { %3084 = vmatpush.msra.mxu0 %v2961_v21  ;;  %v2923_v21 = vld [vmem:[#allocation11 + $0x138] sm:$0xff] }
 0xd5b   :  { %3045 = vmatpush.msrb.mxu2 %v2956_v51  ;;  %3135 = vmatpush.msra.mxu3 %v2935_v8  ;;  %v2914_v51 = vld [vmem:[#allocation11 + $0xf0] sm:$0xff] }
 0xd5c   :  { %v2890_v8 = vld [vmem:[#allocation11 + $0x30] sm:$0xff] }
 0xd5d   :  { %3046 = vmatpush.msrb.mxu2 %v2952_v43  ;;  %3136 = vmatpush.msra.mxu3 %v2931_v42  ;;  %v2910_v43 = vld [vmem:[#allocation11 + $0xd0] sm:$0xff]  ;;  %v2955_v42 = vld [vmem:[#allocation11 + $0x238] sm:$0xff] }
 0xd5f   :  { %3047 = vmatpush.msrb.mxu2 %v2948_v49  ;;  %3137 = vmatpush.msra.mxu3 %v2927_v7  ;;  %v2906_v49 = vld [vmem:[#allocation11 + $0xb0] sm:$0xff]  ;;  %v2887_v7 = vld [vmem:[#allocation11 + $0x18] sm:$0xff] }
 0xd61   :  { %3112 = vmatpush.msra.mxu2 %v3010_v56  ;;  %3138 = vmatpush.msra.mxu3 %v2923_v21  ;;  %v2902_v56 = vld [vmem:[#allocation11 + $0x90] sm:$0xff] }
 0xd63   :  { %3113 = vmatpush.msra.mxu2 %v3006_v63  ;;  %v2898_v63 = vld [vmem:[#allocation11 + $0x70] sm:$0xff] }
 0xd65   :  { %3114 = vmatpush.msra.mxu2 %v3002_v12  ;;  %v2894_v12 = vld [vmem:[#allocation11 + $0x50] sm:$0xff] }
 0xd67   :  { %3115 = vmatpush.msra.mxu2 %v2998_v16  ;;  %v2959_v16 = vld [vmem:[#allocation11 + $0x258] sm:$0xff] }
 0xd69   :  { %3116 = vmatpush.msra.mxu2 %v2994_v19  ;;  %v2891_v19 = vld [vmem:[#allocation11 + $0x38] sm:$0xff] }
 0xd6b   :  { %3117 = vmatpush.msra.mxu2 %v2990_v1 }
 0xd6d   :  { %3118 = vmatpush.msra.mxu2 %v2986_v26 }
 0xdbb   :  { %v2857_v41 = vpop.xlane.xlu2 %2856 }
 0xdbc   :  { %v2858_v27 = vmul.f32 %v2857_v41, %v7240_v5  ;;  %v2922_v41 = vld [vmem:[#allocation11 + $0x130] sm:$0xff] }
 0xdbe   :  { %v7512_v28 = vsub.f32 %v7506_v2, %v2858_v27  ;;  %v7515_v29 = vsub.f32 %v7503_v31, %v2858_v27  ;;  %v2957_v2 = vld [vmem:[#allocation11 + $0x248] sm:$0xff]  ;;  %v2888_v31 = vld [vmem:[#allocation11 + $0x20] sm:$0xff]  ;;  %v2987_v27 = vld [vmem:[#allocation11 + $0x338] sm:$0xff] }
 0xdbf   :  { %3085 = vmatpush.msra.mxu0 %v2957_v2  ;;  %3026 = vmatpush.msrb.mxu1 %v2888_v31  ;;  %v2915_v2 = vld [vmem:[#allocation11 + $0xf8] sm:$0xff] }
 0xdc0   :  { %v2861_v33 = vmul.f32 %v7512_v28, %v7512_v28  ;;  %v2862_v35 = vmul.f32 %v7515_v29, %v7515_v29  ;;  %v2979_v31 = vld [vmem:[#allocation11 + $0x2f8] sm:$0xff] }
 0xdc1   :  { %3086 = vmatpush.msra.mxu0 %v2953_v46  ;;  %3027 = vmatpush.msrb.mxu1 %v2884_v47  ;;  %v2911_v46 = vld [vmem:[#allocation11 + $0xd8] sm:$0xff] }
 0xdc2   :  { %v2863_v24 = vadd.f32 %v2862_v35, %v2861_v33  ;;  %v2918_v33 = vld [vmem:[#allocation11 + $0x110] sm:$0xff]  ;;  %v2975_v47 = vld [vmem:[#allocation11 + $0x2d8] sm:$0xff] }
 0xdc3   :  { %3087 = vmatpush.msra.mxu0 %v2949_v54  ;;  %3092 = vmatpush.msra.mxu1 %v2946_v55  ;;  %v2982_v35 = vld [vmem:[#allocation11 + $0x310] sm:$0xff]  ;;  %v2907_v54 = vld [vmem:[#allocation11 + $0xb8] sm:$0xff] }
 0xdc4   :  { %2864 = vadd.xlane.f32.xlu0 %v2863_v24  ;;  %v2919_v24 = vld [vmem:[#allocation11 + $0x118] sm:$0xff]  ;;  %3119 = vmatpush.msra.mxu2 %v2982_v35 }
 0xdc5   :  { %3152 = vmatpush.msrb.mxu0 %v3011_v60  ;;  %3093 = vmatpush.msra.mxu1 %v2942_v61  ;;  %v2971_v55 = vld [vmem:[#allocation11 + $0x2b8] sm:$0xff] }
 0xdc6   :  { %3139 = vmatpush.msra.mxu3 %v2919_v24  ;;  %3120 = vmatpush.msra.mxu2 %v2978_v50  ;;  %v2903_v60 = vld [vmem:[#allocation11 + $0x98] sm:$0xff] }
 0xdc7   :  { %3153 = vmatpush.msrb.mxu0 %v3007_v10  ;;  %3094 = vmatpush.msra.mxu1 %v2938_v22  ;;  %v2967_v61 = vld [vmem:[#allocation11 + $0x298] sm:$0xff] }
 0xdc8   :  { %3140 = vmatpush.msra.mxu3 %v2915_v2  ;;  %3121 = vmatpush.msra.mxu2 %v2974_v44  ;;  %v2899_v10 = vld [vmem:[#allocation11 + $0x78] sm:$0xff]  ;;  %v3206_v44 = vld [vmem:[#allocation8 + $0xdf0] sm:$0xff] }
 0xdc9   :  { %3154 = vmatpush.msrb.mxu0 %v3003_v14  ;;  %3095 = vmatpush.msra.mxu1 %v2934_v15  ;;  %v2963_v22 = vld [vmem:[#allocation11 + $0x278] sm:$0xff] }
 0xdca   :  { %3141 = vmatpush.msra.mxu3 %v2911_v46  ;;  %3122 = vmatpush.msra.mxu2 %v2970_v53  ;;  %v2895_v15 = vld [vmem:[#allocation11 + $0x58] sm:$0xff]  ;;  %v3238_v46 = vld [vmem:[#allocation8 + $0xef0] sm:$0xff]  ;;  %v3268_v53 = vld [vmem:[#allocation8 + $0xfe0] sm:$0xff] }
 0xdcb   :  { %3155 = vmatpush.msrb.mxu0 %v2999_v9  ;;  %3096 = vmatpush.msra.mxu1 %v2930_v34  ;;  %v2954_v34 = vld [vmem:[#allocation11 + $0x230] sm:$0xff] }
 0xdcc   :  { %3142 = vmatpush.msra.mxu3 %v2907_v54  ;;  %3123 = vmatpush.msra.mxu2 %v2966_v59  ;;  %v3300_v54 = vld [vmem:[#allocation8 + $0x10e0] sm:$0xff]  ;;  %v3266_v59 = vld [vmem:[#allocation8 + $0xfd0] sm:$0xff] }
 0xdcd   :  { %3156 = vmatpush.msrb.mxu0 %v2995_v40  ;;  %3097 = vmatpush.msra.mxu1 %v2926_v48  ;;  %v2886_v40 = vld [vmem:[#allocation11 + $0x10] sm:$0xff] }
 0xdce   :  { %3143 = vmatpush.msra.mxu3 %v2903_v60  ;;  %3124 = vmatpush.msra.mxu2 %v2962_v20  ;;  %v2950_v48 = vld [vmem:[#allocation11 + $0x210] sm:$0xff]  ;;  %v3264_v20 = vld [vmem:[#allocation8 + $0xfc0] sm:$0xff] }
 0xdcf   :  { %3157 = vmatpush.msrb.mxu0 %v2991_v4  ;;  %3098 = vmatpush.msra.mxu1 %v2922_v41  ;;  %v2951_v4 = vld [vmem:[#allocation11 + $0x218] sm:$0xff]  ;;  %v3298_v60 = vld [vmem:[#allocation8 + $0x10d0] sm:$0xff] }
 0xdd0   :  { %3144 = vmatpush.msra.mxu3 %v2899_v10  ;;  %3125 = vmatpush.msra.mxu2 %v2958_v13  ;;  %v3296_v10 = vld [vmem:[#allocation8 + $0x10c0] sm:$0xff]  ;;  %v3262_v13 = vld [vmem:[#allocation8 + $0xfb0] sm:$0xff] }
 0xdd1   :  { %3158 = vmatpush.msrb.mxu0 %v2987_v27  ;;  %3099 = vmatpush.msra.mxu1 %v2918_v33 }
 0xdd2   :  { %3145 = vmatpush.msra.mxu3 %v2895_v15  ;;  %3126 = vmatpush.msra.mxu2 %v2954_v34  ;;  %v3196_v15 = vld [vmem:[#allocation8 + $0xda0] sm:$0xff]  ;;  %v3194_v34 = vld [vmem:[#allocation8 + $0xd90] sm:$0xff] }
 0xdd3   :  { %3159 = vmatpush.msrb.mxu0 %v2983_v32  ;;  %3100 = vmatpush.msra.mxu1 %v2914_v51 }
 0xdd4   :  { %3146 = vmatpush.msra.mxu3 %v2891_v19  ;;  %3127 = vmatpush.msra.mxu2 %v2950_v48  ;;  %v3226_v19 = vld [vmem:[#allocation8 + $0xe90] sm:$0xff]  ;;  %v3192_v48 = vld [vmem:[#allocation8 + $0xd80] sm:$0xff] }
 0xdd5   :  { %3160 = vmatpush.msrb.mxu0 %v2979_v31  ;;  %3101 = vmatpush.msra.mxu1 %v2910_v43 }
 0xdd6   :  { %3147 = vmatpush.msra.mxu3 %v2887_v7  ;;  %v3256_v7 = vld [vmem:[#allocation8 + $0xf80] sm:$0xff] }
 0xdd7   :  { %3161 = vmatpush.msrb.mxu0 %v2975_v47  ;;  %3102 = vmatpush.msra.mxu1 %v2906_v49  ;;  %v3270_v47 = vld [vmem:[#allocation8 + $0xff0] sm:$0xff]  ;;  %v3236_v49 = vld [vmem:[#allocation8 + $0xee0] sm:$0xff] }
 0xdd9   :  { %3162 = vmatpush.msrb.mxu0 %v2971_v55  ;;  %3103 = vmatpush.msra.mxu1 %v2902_v56  ;;  %v3202_v55 = vld [vmem:[#allocation8 + $0xdd0] sm:$0xff] }
 0xdda   :  { %v3234_v56 = vld [vmem:[#allocation8 + $0xed0] sm:$0xff] }
 0xddb   :  { %3163 = vmatpush.msrb.mxu0 %v2967_v61  ;;  %3104 = vmatpush.msra.mxu1 %v2898_v63  ;;  %v3200_v61 = vld [vmem:[#allocation8 + $0xdc0] sm:$0xff] }
 0xddc   :  { %v3232_v63 = vld [vmem:[#allocation8 + $0xec0] sm:$0xff] }
 0xddd   :  { %3164 = vmatpush.msrb.mxu0 %v2963_v22  ;;  %3105 = vmatpush.msra.mxu1 %v2894_v12  ;;  %v3198_v22 = vld [vmem:[#allocation8 + $0xdb0] sm:$0xff] }
 0xdde   :  { %v3230_v12 = vld [vmem:[#allocation8 + $0xeb0] sm:$0xff] }
 0xddf   :  { %3165 = vmatpush.msrb.mxu0 %v2959_v16  ;;  %3106 = vmatpush.msra.mxu1 %v2890_v8  ;;  %v3228_v16 = vld [vmem:[#allocation8 + $0xea0] sm:$0xff] }
 0xde0   :  { %v3260_v8 = vld [vmem:[#allocation8 + $0xfa0] sm:$0xff] }
 0xde1   :  { %3166 = vmatpush.msrb.mxu0 %v2955_v42  ;;  %3107 = vmatpush.msra.mxu1 %v2886_v40  ;;  %v3258_v42 = vld [vmem:[#allocation8 + $0xf90] sm:$0xff] }
 0xde2   :  { %v3290_v40 = vld [vmem:[#allocation8 + $0x1090] sm:$0xff] }
 0xde3   :  { %3167 = vmatpush.msrb.mxu0 %v2951_v4  ;;  %v3288_v4 = vld [vmem:[#allocation8 + $0x1080] sm:$0xff] }
 0xe37   :  { %v2865_v14 = vpop.xlane.xlu0 %2864 }
 0xe38   :  { %v2866_v9 = vmul.f32 %v2865_v14, %v7240_v5  ;;  %v3294_v14 = vld [vmem:[#allocation8 + $0x10b0] sm:$0xff] }
 0xe3a   :  { %v2867_v1 = vadd.f32 1e-05, %v2866_v9  ;;  %v3292_v9 = vld [vmem:[#allocation8 + $0x10a0] sm:$0xff] }
 0xe3c   :  { %5623 = vrsqrt.f32 %v2867_v1  ;;  %vm2874_vm8 = vweird.f32 %v2867_v1 }
 0xe42   :  { %v5624_v41 = vpop.eup %5623 }
 0xe43   :  { %v2869_v26 = vmul.f32 %v5624_v41, %v2867_v1  ;;  %vm2875_vm7 = vweird.f32 %v5624_v41  ;;  %v3224_v1 = vld [vmem:[#allocation8 + $0xe80] sm:$0xff] }
 0xe44   :  { %vm2876_vm9 = vmor %vm2874_vm8, %vm2875_vm7 }
 0xe45   :  { %v2870_v21 = vmul.f32 %v5624_v41, %v2869_v26  ;;  %v3222_v26 = vld [vmem:[#allocation8 + $0xe70] sm:$0xff] }
 0xe47   :  { %v2871_v27 = vmul.f32 0.5, %v2870_v21  ;;  %v3254_v21 = vld [vmem:[#allocation8 + $0xf70] sm:$0xff] }
 0xe49   :  { %v2872_v33 = vsub.f32 1.5, %v2871_v27  ;;  %v3286_v27 = vld [vmem:[#allocation8 + $0x1070] sm:$0xff] }
 0xe4b   :  { %v2873_v35 = vmul.f32 %v5624_v41, %v2872_v33  ;;  %v3188_v33 = vld [vmem:[#allocation8 + $0xd60] sm:$0xff] }
 0xe4d   :  { %v2877_v24 = vsel %vm2876_vm9, %v5624_v41, %v2873_v35  ;;  %v3190_v41 = vld [vmem:[#allocation8 + $0xd70] sm:$0xff]  ;;  %v3220_v35 = vld [vmem:[#allocation8 + $0xe60] sm:$0xff] }
 0xe4e   :  { %v2878_v32 = vmul.f32 %v2877_v24, %v7512_v28  ;;  %v2879_v51 = vmul.f32 %v2877_v24, %v7515_v29  ;;  %v3302_v28 = vld [vmem:[#allocation8 + $0x10f0] sm:$0xff]  ;;  %v3204_v29 = vld [vmem:[#allocation8 + $0xde0] sm:$0xff] }
 0xe4f   :  { %v3252_v24 = vld [vmem:[#allocation8 + $0xf60] sm:$0xff] }
 0xe50   :  { %v2880_v50 = vmul.f32 %v2878_v32, %v7358_v57  ;;  %v2881_v2 = vmul.f32 %v2879_v51, %v7361_v58  ;;  %v3284_v32 = vld [vmem:[#allocation8 + $0x1060] sm:$0xff]  ;;  %v3186_v51 = vld [vmem:[#allocation8 + $0xd50] sm:$0xff] }
 0xe52   :  { %v7527_v31 = vadd.f32 %v2880_v50, %v7366_v62  ;;  %v7530_v43 = vadd.f32 %v2881_v2, %v7369_v0  ;;  %v3218_v50 = vld [vmem:[#allocation8 + $0xe50] sm:$0xff] }
 0xe53   :  { %v3250_v2 = vld [vmem:[#allocation8 + $0xf50] sm:$0xff] }
 0xe54   :  { %3028 = vmatmul.f32.vlgmr.msrb.gmra.mxu1 %v7527_v31  ;;  %3048 = vmatmul.f32.vlgmr.msrb.gmra.mxu2 %v7530_v43 }
 0xe55   :  { %3068 = vmatmul.f32.vlgmr.msrb.gmra.mxu3 %v7527_v31  ;;  %3088 = vmatmul.f32.vlgmr.msra.gmra.mxu0 %v7530_v43 }
 0xe56   :  { %3304 = vmatpush.msrb.mxu1 %v3206_v44  ;;  %3324 = vmatpush.msrb.mxu2 %v3238_v46  ;;  %v3282_v44 = vld [vmem:[#allocation8 + $0x1050] sm:$0xff]  ;;  %v3184_v46 = vld [vmem:[#allocation8 + $0xd40] sm:$0xff] }
 0xe57   :  { %3344 = vmatpush.msrb.mxu3 %v3270_v47  ;;  %3364 = vmatpush.msra.mxu0 %v3302_v28  ;;  %v3216_v47 = vld [vmem:[#allocation8 + $0xe40] sm:$0xff] }
 0xe58   :  { %3305 = vmatpush.msrb.mxu1 %v3204_v29  ;;  %3325 = vmatpush.msrb.mxu2 %v3236_v49  ;;  %v3248_v28 = vld [vmem:[#allocation8 + $0xf40] sm:$0xff]  ;;  %v3182_v49 = vld [vmem:[#allocation8 + $0xd30] sm:$0xff] }
 0xe59   :  { %3345 = vmatpush.msrb.mxu3 %v3268_v53  ;;  %3365 = vmatpush.msra.mxu0 %v3300_v54  ;;  %v3280_v29 = vld [vmem:[#allocation8 + $0x1040] sm:$0xff]  ;;  %v3214_v53 = vld [vmem:[#allocation8 + $0xe30] sm:$0xff] }
 0xe5a   :  { %3306 = vmatpush.msrb.mxu1 %v3202_v55  ;;  %3326 = vmatpush.msrb.mxu2 %v3234_v56  ;;  %v3246_v54 = vld [vmem:[#allocation8 + $0xf30] sm:$0xff]  ;;  %v3180_v56 = vld [vmem:[#allocation8 + $0xd20] sm:$0xff] }
 0xe5b   :  { %3346 = vmatpush.msrb.mxu3 %v3266_v59  ;;  %3366 = vmatpush.msra.mxu0 %v3298_v60  ;;  %v3278_v55 = vld [vmem:[#allocation8 + $0x1030] sm:$0xff]  ;;  %v3212_v59 = vld [vmem:[#allocation8 + $0xe20] sm:$0xff] }
 0xe5c   :  { %3108 = vmatmul.f32.vlgmr.msra.gmra.mxu1 %v7527_v31  ;;  %3128 = vmatmul.f32.vlgmr.msra.gmra.mxu2 %v7530_v43  ;;  %v3244_v60 = vld [vmem:[#allocation8 + $0xf20] sm:$0xff] }
 0xe5d   :  { %3148 = vmatmul.f32.vlgmr.msra.gmra.mxu3 %v7527_v31  ;;  %3168 = vmatmul.f32.vlgmr.msrb.gmra.mxu0 %v7530_v43 }
 0xe5e   :  { %3307 = vmatpush.msrb.mxu1 %v3200_v61  ;;  %3327 = vmatpush.msrb.mxu2 %v3232_v63  ;;  %v3276_v61 = vld [vmem:[#allocation8 + $0x1020] sm:$0xff]  ;;  %v3178_v63 = vld [vmem:[#allocation8 + $0xd10] sm:$0xff] }
 0xe5f   :  { %3347 = vmatpush.msrb.mxu3 %v3264_v20  ;;  %3367 = vmatpush.msra.mxu0 %v3296_v10  ;;  %v3210_v20 = vld [vmem:[#allocation8 + $0xe10] sm:$0xff] }
 0xe60   :  { %3308 = vmatpush.msrb.mxu1 %v3198_v22  ;;  %3328 = vmatpush.msrb.mxu2 %v3230_v12  ;;  %v3242_v10 = vld [vmem:[#allocation8 + $0xf10] sm:$0xff]  ;;  %v3176_v12 = vld [vmem:[#allocation8 + $0xd00] sm:$0xff] }
 0xe61   :  { %3348 = vmatpush.msrb.mxu3 %v3262_v13  ;;  %3368 = vmatpush.msra.mxu0 %v3294_v14  ;;  %v3274_v22 = vld [vmem:[#allocation8 + $0x1010] sm:$0xff]  ;;  %v3208_v13 = vld [vmem:[#allocation8 + $0xe00] sm:$0xff]  ;;  %v3207_v14 = vld [vmem:[#allocation8 + $0xdf8] sm:$0xff] }
 0xe62   :  { %3309 = vmatpush.msrb.mxu1 %v3196_v15  ;;  %3329 = vmatpush.msrb.mxu2 %v3228_v16  ;;  %v3239_v15 = vld [vmem:[#allocation8 + $0xef8] sm:$0xff]  ;;  %v3240_v16 = vld [vmem:[#allocation8 + $0xf00] sm:$0xff] }
 0xe63   :  { %3349 = vmatpush.msrb.mxu3 %v3260_v8  ;;  %3369 = vmatpush.msra.mxu0 %v3292_v9  ;;  %v3272_v8 = vld [vmem:[#allocation8 + $0x1000] sm:$0xff]  ;;  %v3205_v9 = vld [vmem:[#allocation8 + $0xde8] sm:$0xff] }
 0xe64   :  { %3310 = vmatpush.msrb.mxu1 %v3194_v34  ;;  %3330 = vmatpush.msrb.mxu2 %v3226_v19  ;;  %v3237_v34 = vld [vmem:[#allocation8 + $0xee8] sm:$0xff]  ;;  %v3271_v19 = vld [vmem:[#allocation8 + $0xff8] sm:$0xff] }
 0xe65   :  { %3350 = vmatpush.msrb.mxu3 %v3258_v42  ;;  %3370 = vmatpush.msra.mxu0 %v3290_v40  ;;  %v3303_v42 = vld [vmem:[#allocation8 + $0x10f8] sm:$0xff] }
 0xe66   :  { %3311 = vmatpush.msrb.mxu1 %v3192_v48  ;;  %3331 = vmatpush.msrb.mxu2 %v3224_v1  ;;  %v3203_v40 = vld [vmem:[#allocation8 + $0xdd8] sm:$0xff]  ;;  %v3269_v1 = vld [vmem:[#allocation8 + $0xfe8] sm:$0xff] }
 0xe67   :  { %3351 = vmatpush.msrb.mxu3 %v3256_v7  ;;  %3371 = vmatpush.msra.mxu0 %v3288_v4  ;;  %v3235_v48 = vld [vmem:[#allocation8 + $0xed8] sm:$0xff]  ;;  %v3201_v7 = vld [vmem:[#allocation8 + $0xdc8] sm:$0xff] }
 0xe68   :  { %3312 = vmatpush.msrb.mxu1 %v3190_v41  ;;  %3332 = vmatpush.msrb.mxu2 %v3222_v26  ;;  %v3233_v4 = vld [vmem:[#allocation8 + $0xec8] sm:$0xff]  ;;  %v3199_v41 = vld [vmem:[#allocation8 + $0xdb8] sm:$0xff] }
 0xe69   :  { %3352 = vmatpush.msrb.mxu3 %v3254_v21  ;;  %3372 = vmatpush.msra.mxu0 %v3286_v27  ;;  %v3231_v26 = vld [vmem:[#allocation8 + $0xeb8] sm:$0xff]  ;;  %v3197_v21 = vld [vmem:[#allocation8 + $0xda8] sm:$0xff] }
 0xe6a   :  { %3313 = vmatpush.msrb.mxu1 %v3188_v33  ;;  %3333 = vmatpush.msrb.mxu2 %v3220_v35  ;;  %v3195_v27 = vld [vmem:[#allocation8 + $0xd98] sm:$0xff]  ;;  %v3229_v33 = vld [vmem:[#allocation8 + $0xea8] sm:$0xff] }
 0xe6b   :  { %3353 = vmatpush.msrb.mxu3 %v3252_v24  ;;  %3373 = vmatpush.msra.mxu0 %v3284_v32  ;;  %v3267_v35 = vld [vmem:[#allocation8 + $0xfd8] sm:$0xff]  ;;  %v3301_v24 = vld [vmem:[#allocation8 + $0x10e8] sm:$0xff] }
 0xe6c   :  { %3314 = vmatpush.msrb.mxu1 %v3186_v51  ;;  %3334 = vmatpush.msrb.mxu2 %v3218_v50  ;;  %v3193_v32 = vld [vmem:[#allocation8 + $0xd88] sm:$0xff]  ;;  %v3227_v51 = vld [vmem:[#allocation8 + $0xe98] sm:$0xff] }
 0xe6d   :  { %3354 = vmatpush.msrb.mxu3 %v3250_v2  ;;  %3374 = vmatpush.msra.mxu0 %v3282_v44  ;;  %v3265_v50 = vld [vmem:[#allocation8 + $0xfc8] sm:$0xff]  ;;  %v3299_v2 = vld [vmem:[#allocation8 + $0x10d8] sm:$0xff] }
 0xe6e   :  { %3315 = vmatpush.msrb.mxu1 %v3184_v46  ;;  %3335 = vmatpush.msrb.mxu2 %v3216_v47  ;;  %v3191_v44 = vld [vmem:[#allocation8 + $0xd78] sm:$0xff]  ;;  %v3225_v46 = vld [vmem:[#allocation8 + $0xe88] sm:$0xff] }
 0xe6f   :  { %3355 = vmatpush.msrb.mxu3 %v3248_v28  ;;  %3375 = vmatpush.msra.mxu0 %v3280_v29  ;;  %v3263_v47 = vld [vmem:[#allocation8 + $0xfb8] sm:$0xff]  ;;  %v3297_v28 = vld [vmem:[#allocation8 + $0x10c8] sm:$0xff] }
 0xe70   :  { %3316 = vmatpush.msrb.mxu1 %v3182_v49  ;;  %3336 = vmatpush.msrb.mxu2 %v3214_v53  ;;  %v3189_v29 = vld [vmem:[#allocation8 + $0xd68] sm:$0xff]  ;;  %v3223_v49 = vld [vmem:[#allocation8 + $0xe78] sm:$0xff] }
 0xe71   :  { %3356 = vmatpush.msrb.mxu3 %v3246_v54  ;;  %3376 = vmatpush.msra.mxu0 %v3278_v55  ;;  %v3261_v53 = vld [vmem:[#allocation8 + $0xfa8] sm:$0xff]  ;;  %v3295_v54 = vld [vmem:[#allocation8 + $0x10b8] sm:$0xff] }
 0xe72   :  { %3317 = vmatpush.msrb.mxu1 %v3180_v56  ;;  %3337 = vmatpush.msrb.mxu2 %v3212_v59  ;;  %v3187_v55 = vld [vmem:[#allocation8 + $0xd58] sm:$0xff]  ;;  %v3221_v56 = vld [vmem:[#allocation8 + $0xe68] sm:$0xff] }
 0xe73   :  { %3357 = vmatpush.msrb.mxu3 %v3244_v60  ;;  %3377 = vmatpush.msra.mxu0 %v3276_v61  ;;  %v3259_v59 = vld [vmem:[#allocation8 + $0xf98] sm:$0xff]  ;;  %v3293_v60 = vld [vmem:[#allocation8 + $0x10a8] sm:$0xff] }
 0xe74   :  { %3318 = vmatpush.msrb.mxu1 %v3178_v63  ;;  %3338 = vmatpush.msrb.mxu2 %v3210_v20  ;;  %v3185_v61 = vld [vmem:[#allocation8 + $0xd48] sm:$0xff]  ;;  %v3219_v63 = vld [vmem:[#allocation8 + $0xe58] sm:$0xff] }
 0xe75   :  { %3358 = vmatpush.msrb.mxu3 %v3242_v10  ;;  %3378 = vmatpush.msra.mxu0 %v3274_v22  ;;  %v3257_v20 = vld [vmem:[#allocation8 + $0xf88] sm:$0xff]  ;;  %v3291_v10 = vld [vmem:[#allocation8 + $0x1098] sm:$0xff] }
 0xe76   :  { %3319 = vmatpush.msrb.mxu1 %v3176_v12  ;;  %3339 = vmatpush.msrb.mxu2 %v3208_v13  ;;  %v3183_v22 = vld [vmem:[#allocation8 + $0xd38] sm:$0xff]  ;;  %v3217_v12 = vld [vmem:[#allocation8 + $0xe48] sm:$0xff] }
 0xe77   :  { %3359 = vmatpush.msrb.mxu3 %v3240_v16  ;;  %3379 = vmatpush.msra.mxu0 %v3272_v8  ;;  %v3255_v13 = vld [vmem:[#allocation8 + $0xf78] sm:$0xff]  ;;  %v3253_v8 = vld [vmem:[#allocation8 + $0xf68] sm:$0xff] }
 0xe78   :  { %3384 = vmatpush.msra.mxu1 %v3207_v14  ;;  %3404 = vmatpush.msra.mxu2 %v3239_v15  ;;  %v3289_v14 = vld [vmem:[#allocation8 + $0x1088] sm:$0xff]  ;;  %v3215_v16 = vld [vmem:[#allocation8 + $0xe38] sm:$0xff] }
 0xe79   :  { %3424 = vmatpush.msra.mxu3 %v3271_v19  ;;  %3444 = vmatpush.msrb.mxu0 %v3303_v42  ;;  %v3181_v15 = vld [vmem:[#allocation8 + $0xd28] sm:$0xff]  ;;  %v3251_v42 = vld [vmem:[#allocation8 + $0xf58] sm:$0xff] }
 0xe7a   :  { %3385 = vmatpush.msra.mxu1 %v3205_v9  ;;  %3405 = vmatpush.msra.mxu2 %v3237_v34  ;;  %v3287_v9 = vld [vmem:[#allocation8 + $0x1078] sm:$0xff]  ;;  %v3213_v19 = vld [vmem:[#allocation8 + $0xe28] sm:$0xff] }
 0xe7b   :  { %3425 = vmatpush.msra.mxu3 %v3269_v1  ;;  %3445 = vmatpush.msrb.mxu0 %v3301_v24  ;;  %v3179_v34 = vld [vmem:[#allocation8 + $0xd18] sm:$0xff]  ;;  %v3277_v24 = vld [vmem:[#allocation8 + $0x1028] sm:$0xff] }
 0xe7c   :  { %3386 = vmatpush.msra.mxu1 %v3203_v40  ;;  %3406 = vmatpush.msra.mxu2 %v3235_v48  ;;  %v3285_v40 = vld [vmem:[#allocation8 + $0x1068] sm:$0xff]  ;;  %v3211_v1 = vld [vmem:[#allocation8 + $0xe18] sm:$0xff] }
 0xe7d   :  { %3426 = vmatpush.msra.mxu3 %v3267_v35  ;;  %3446 = vmatpush.msrb.mxu0 %v3299_v2  ;;  %v3177_v48 = vld [vmem:[#allocation8 + $0xd08] sm:$0xff]  ;;  %v3243_v35 = vld [vmem:[#allocation8 + $0xf18] sm:$0xff] }
 0xe7e   :  { %3387 = vmatpush.msra.mxu1 %v3201_v7  ;;  %3407 = vmatpush.msra.mxu2 %v3233_v4  ;;  %v3249_v7 = vld [vmem:[#allocation8 + $0xf48] sm:$0xff]  ;;  %v3283_v4 = vld [vmem:[#allocation8 + $0x1058] sm:$0xff] }
 0xe7f   :  { %3427 = vmatpush.msra.mxu3 %v3265_v50  ;;  %3447 = vmatpush.msrb.mxu0 %v3297_v28  ;;  %v3273_v50 = vld [vmem:[#allocation8 + $0x1008] sm:$0xff] }
 0xe80   :  { %3388 = vmatpush.msra.mxu1 %v3199_v41  ;;  %3408 = vmatpush.msra.mxu2 %v3231_v26  ;;  %v3209_v41 = vld [vmem:[#allocation8 + $0xe08] sm:$0xff]  ;;  %v3247_v26 = vld [vmem:[#allocation8 + $0xf38] sm:$0xff] }
 0xe81   :  { %3428 = vmatpush.msra.mxu3 %v3263_v47  ;;  %3448 = vmatpush.msrb.mxu0 %v3295_v54 }
 0xe82   :  { %3389 = vmatpush.msra.mxu1 %v3197_v21  ;;  %3409 = vmatpush.msra.mxu2 %v3229_v33  ;;  %v3281_v21 = vld [vmem:[#allocation8 + $0x1048] sm:$0xff]  ;;  %v3279_v33 = vld [vmem:[#allocation8 + $0x1038] sm:$0xff] }
 0xe83   :  { %3429 = vmatpush.msra.mxu3 %v3261_v53  ;;  %3449 = vmatpush.msrb.mxu0 %v3293_v60 }
 0xe84   :  { %3390 = vmatpush.msra.mxu1 %v3195_v27  ;;  %3410 = vmatpush.msra.mxu2 %v3227_v51  ;;  %v3245_v27 = vld [vmem:[#allocation8 + $0xf28] sm:$0xff]  ;;  %v3275_v51 = vld [vmem:[#allocation8 + $0x1018] sm:$0xff] }
 0xe85   :  { %3430 = vmatpush.msra.mxu3 %v3259_v59  ;;  %3450 = vmatpush.msrb.mxu0 %v3291_v10  ;;  %v6025_v59 = vld [vmem:[#allocation8 + $0x9f0] sm:$0xff] }
 0xe86   :  { %3391 = vmatpush.msra.mxu1 %v3193_v32  ;;  %3411 = vmatpush.msra.mxu2 %v3225_v46  ;;  %v3241_v32 = vld [vmem:[#allocation8 + $0xf08] sm:$0xff] }
 0xe87   :  { %3431 = vmatpush.msra.mxu3 %v3257_v20  ;;  %3451 = vmatpush.msrb.mxu0 %v3289_v14 }
 0xe88   :  { %3392 = vmatpush.msra.mxu1 %v3191_v44  ;;  %3412 = vmatpush.msra.mxu2 %v3223_v49 }
 0xe89   :  { %3432 = vmatpush.msra.mxu3 %v3255_v13  ;;  %3452 = vmatpush.msrb.mxu0 %v3287_v9  ;;  %v6028_v13 = vld [vmem:[#allocation8 + $0x9d0] sm:$0xff]  ;;  %v6030_v9 = vld [vmem:[#allocation8 + $0x9c0] sm:$0xff] }
 0xe8a   :  { %3393 = vmatpush.msra.mxu1 %v3189_v29  ;;  %3413 = vmatpush.msra.mxu2 %v3221_v56 }
 0xe8b   :  { %3433 = vmatpush.msra.mxu3 %v3253_v8  ;;  %3453 = vmatpush.msrb.mxu0 %v3285_v40  ;;  %v6033_v40 = vld [vmem:[#allocation8 + $0x9b0] sm:$0xff] }
 0xe8c   :  { %3394 = vmatpush.msra.mxu1 %v3187_v55  ;;  %3414 = vmatpush.msra.mxu2 %v3219_v63  ;;  %v6026_v63 = vld [vmem:[#allocation8 + $0x9e0] sm:$0xff] }
 0xe8d   :  { %3434 = vmatpush.msra.mxu3 %v3251_v42  ;;  %3454 = vmatpush.msrb.mxu0 %v3283_v4  ;;  %v6032_v42 = vld [vmem:[#allocation8 + $0xad0] sm:$0xff]  ;;  %v6037_v4 = vld [vmem:[#allocation8 + $0x9a0] sm:$0xff] }
 0xe8e   :  { %3395 = vmatpush.msra.mxu1 %v3185_v61  ;;  %3415 = vmatpush.msra.mxu2 %v3217_v12 }
 0xe8f   :  { %3435 = vmatpush.msra.mxu3 %v3249_v7  ;;  %3455 = vmatpush.msrb.mxu0 %v3281_v21  ;;  %v6036_v7 = vld [vmem:[#allocation8 + $0xac0] sm:$0xff]  ;;  %v6040_v21 = vld [vmem:[#allocation8 + $0xab0] sm:$0xff] }
 0xe90   :  { %3396 = vmatpush.msra.mxu1 %v3183_v22  ;;  %3416 = vmatpush.msra.mxu2 %v3215_v16  ;;  %v6027_v22 = vld [vmem:[#allocation8 + $0xaf0] sm:$0xff]  ;;  %v6029_v16 = vld [vmem:[#allocation8 + $0xae0] sm:$0xff] }
 0xe91   :  { %3436 = vmatpush.msra.mxu3 %v3247_v26  ;;  %3456 = vmatpush.msrb.mxu0 %v3279_v33  ;;  %v6039_v26 = vld [vmem:[#allocation8 + $0x9d8] sm:$0xff] }
 0xe92   :  { %3397 = vmatpush.msra.mxu1 %v3181_v15  ;;  %3417 = vmatpush.msra.mxu2 %v3213_v19  ;;  %v6031_v19 = vld [vmem:[#allocation8 + $0x9f8] sm:$0xff] }
 0xe93   :  { %3437 = vmatpush.msra.mxu3 %v3245_v27  ;;  %3457 = vmatpush.msrb.mxu0 %v3277_v24  ;;  %v6041_v27 = vld [vmem:[#allocation8 + $0x990] sm:$0xff]  ;;  %v6042_v33 = vld [vmem:[#allocation8 + $0xad8] sm:$0xff]  ;;  %v6044_v24 = vld [vmem:[#allocation8 + $0xaa0] sm:$0xff] }
 0xe94   :  { %3398 = vmatpush.msra.mxu1 %v3179_v34  ;;  %3418 = vmatpush.msra.mxu2 %v3211_v1  ;;  %v6035_v1 = vld [vmem:[#allocation8 + $0x9e8] sm:$0xff] }
 0xe95   :  { %3438 = vmatpush.msra.mxu3 %v3243_v35  ;;  %3458 = vmatpush.msrb.mxu0 %v3275_v51  ;;  %v6043_v35 = vld [vmem:[#allocation8 + $0x9c8] sm:$0xff]  ;;  %v6046_v51 = vld [vmem:[#allocation8 + $0x980] sm:$0xff] }
 0xe96   :  { %3399 = vmatpush.msra.mxu1 %v3177_v48  ;;  %3419 = vmatpush.msra.mxu2 %v3209_v41  ;;  %v6034_v48 = vld [vmem:[#allocation8 + $0xaf8] sm:$0xff]  ;;  %v6038_v41 = vld [vmem:[#allocation8 + $0xae8] sm:$0xff] }
 0xe97   :  { %3439 = vmatpush.msra.mxu3 %v3241_v32  ;;  %3459 = vmatpush.msrb.mxu0 %v3273_v50  ;;  %v6045_v32 = vld [vmem:[#allocation8 + $0xac8] sm:$0xff]  ;;  %v6047_v50 = vld [vmem:[#allocation8 + $0x9b8] sm:$0xff] }
 0xed1   :  { %v3029_v2 = vpop.f32.mrf.mxu1 }
 0xed2   :  { %v3030_v44 = vadd.f32 %v3029_v2, %v7387_v37  ;;  %v3089_v47 = vpop.f32.mrf.mxu0  ;;  %v6048_v2 = vld [vmem:[#allocation8 + $0xab8] sm:$0xff] }
 0xed7   :  { %v3049_v46 = vpop.f32.mrf.mxu2 }
 0xed8   :  { %v3050_v28 = vadd.f32 %v3049_v46, %v3030_v44  ;;  %v3069_v29 = vpop.f32.mrf.mxu3  ;;  %v6049_v44 = vld [vmem:[#allocation8 + $0xa90] sm:$0xff]  ;;  %v6050_v46 = vld [vmem:[#allocation8 + $0x9a8] sm:$0xff] }
 0xed9   :  { %v3070_v49 = vadd.f32 %v3069_v29, %v7389_v38  ;;  %v3109_v55 = vpop.f32.mrf.mxu1  ;;  %v6053_v29 = vld [vmem:[#allocation8 + $0xa80] sm:$0xff] }
 0xeda   :  { %v3172_v53 = vmax.f32 %v3050_v28, 0.0  ;;  %v3110_v60 = vadd.f32 %v3109_v55, %v7393_v45  ;;  %v3169_v14 = vpop.f32.mrf.mxu0  ;;  %v6052_v28 = vld [vmem:[#allocation8 + $0xaa8] sm:$0xff]  ;;  %v6057_v55 = vld [vmem:[#allocation8 + $0xa70] sm:$0xff] }
 0xedb   :  { %v3090_v54 = vadd.f32 %v3089_v47, %v3070_v49  ;;  %v6051_v47 = vld [vmem:[#allocation8 + $0x970] sm:$0xff]  ;;  %v6054_v49 = vld [vmem:[#allocation8 + $0x998] sm:$0xff] }
 0xedc   :  { %3320 = vmatmul.f32.vlgmr.msrb.gmra.mxu1 %v3172_v53 }
 0xedd   :  { %v3173_v56 = vmax.f32 %v3090_v54, 0.0  ;;  %3497 = vmatpush.msrb.mxu1 %v6025_v59  ;;  %v6056_v54 = vld [vmem:[#allocation8 + $0xa98] sm:$0xff]  ;;  %v6059_v59 = vld [vmem:[#allocation8 + $0x950] sm:$0xff] }
 0xedf   :  { %3340 = vmatmul.f32.vlgmr.msrb.gmra.mxu2 %v3173_v56  ;;  %v3129_v61 = vpop.f32.mrf.mxu2  ;;  %3498 = vmatpush.msrb.mxu1 %v6026_v63  ;;  %v6062_v63 = vld [vmem:[#allocation8 + $0x978] sm:$0xff] }
 0xee0   :  { %v3130_v20 = vadd.f32 %v3129_v61, %v3110_v60  ;;  %v3149_v10 = vpop.f32.mrf.mxu3  ;;  %3517 = vmatpush.msrb.mxu2 %v6027_v22  ;;  %v6060_v60 = vld [vmem:[#allocation8 + $0xa88] sm:$0xff]  ;;  %v6061_v61 = vld [vmem:[#allocation8 + $0xa60] sm:$0xff]  ;;  %v6065_v22 = vld [vmem:[#allocation8 + $0xa50] sm:$0xff] }
 0xee1   :  { %v3150_v12 = vadd.f32 %v3149_v10, %v7395_v52  ;;  %3499 = vmatpush.msrb.mxu1 %v6028_v13  ;;  %v6064_v10 = vld [vmem:[#allocation8 + $0xa78] sm:$0xff]  ;;  %v6067_v13 = vld [vmem:[#allocation8 + $0x930] sm:$0xff] }
 0xee2   :  { %v3174_v15 = vmax.f32 %v3130_v20, 0.0  ;;  %3518 = vmatpush.msrb.mxu2 %v6029_v16  ;;  %v6063_v20 = vld [vmem:[#allocation8 + $0x940] sm:$0xff]  ;;  %v6070_v16 = vld [vmem:[#allocation8 + $0x958] sm:$0xff] }
 0xee3   :  { %v3170_v8 = vadd.f32 %v3169_v14, %v3150_v12  ;;  %3500 = vmatpush.msrb.mxu1 %v6030_v9  ;;  %v6066_v12 = vld [vmem:[#allocation8 + $0x968] sm:$0xff]  ;;  %v6072_v9 = vld [vmem:[#allocation8 + $0xa58] sm:$0xff] }
 0xee4   :  { %3360 = vmatmul.f32.vlgmr.msrb.gmra.mxu3 %v3174_v15  ;;  %3400 = vmatmul.f32.vlgmr.msra.gmra.mxu1 %v3172_v53  ;;  %v6055_v53 = vld [vmem:[#allocation8 + $0x960] sm:$0xff]  ;;  %v6068_v14 = vld [vmem:[#allocation8 + $0xa68] sm:$0xff] }
 0xee5   :  { %v3175_v34 = vmax.f32 %v3170_v8, 0.0  ;;  %3537 = vmatpush.msrb.mxu3 %v6031_v19  ;;  %3519 = vmatpush.msrb.mxu2 %v6032_v42  ;;  %v6071_v8 = vld [vmem:[#allocation8 + $0x920] sm:$0xff]  ;;  %v6074_v19 = vld [vmem:[#allocation8 + $0x948] sm:$0xff]  ;;  %v6075_v42 = vld [vmem:[#allocation8 + $0x910] sm:$0xff] }
 0xee6   :  { %3501 = vmatpush.msrb.mxu1 %v6033_v40  ;;  %v6076_v40 = vld [vmem:[#allocation8 + $0xa48] sm:$0xff] }
 0xee7   :  { %3380 = vmatmul.f32.vlgmr.msra.gmra.mxu0 %v3175_v34  ;;  %3420 = vmatmul.f32.vlgmr.msra.gmra.mxu2 %v3173_v56  ;;  %v6058_v56 = vld [vmem:[#allocation8 + $0x988] sm:$0xff] }
 0xee8   :  { %3557 = vmatpush.msra.mxu0 %v6034_v48  ;;  %3538 = vmatpush.msrb.mxu3 %v6035_v1  ;;  %v6077_v48 = vld [vmem:[#allocation8 + $0xa20] sm:$0xff]  ;;  %v6078_v1 = vld [vmem:[#allocation8 + $0x938] sm:$0xff] }
 0xee9   :  { %3520 = vmatpush.msrb.mxu2 %v6036_v7  ;;  %3502 = vmatpush.msrb.mxu1 %v6037_v4  ;;  %v6079_v7 = vld [vmem:[#allocation8 + $0x900] sm:$0xff]  ;;  %v6080_v4 = vld [vmem:[#allocation8 + $0xa38] sm:$0xff] }
 0xeea   :  { %3558 = vmatpush.msra.mxu0 %v6038_v41  ;;  %3539 = vmatpush.msrb.mxu3 %v6039_v26  ;;  %v6081_v41 = vld [vmem:[#allocation8 + $0xa10] sm:$0xff]  ;;  %v6082_v26 = vld [vmem:[#allocation8 + $0x928] sm:$0xff] }
 0xeeb   :  { %3521 = vmatpush.msrb.mxu2 %v6040_v21  ;;  %3503 = vmatpush.msrb.mxu1 %v6041_v27  ;;  %v6083_v21 = vld [vmem:[#allocation8 + $0xbf0] sm:$0xff]  ;;  %v6084_v27 = vld [vmem:[#allocation8 + $0xa28] sm:$0xff] }
 0xeec   :  { %3440 = vmatmul.f32.vlgmr.msra.gmra.mxu3 %v3174_v15  ;;  %3559 = vmatpush.msra.mxu0 %v6042_v33  ;;  %v6069_v15 = vld [vmem:[#allocation8 + $0xa40] sm:$0xff] }
 0xeed   :  { %3540 = vmatpush.msrb.mxu3 %v6043_v35  ;;  %3522 = vmatpush.msrb.mxu2 %v6044_v24  ;;  %v6085_v33 = vld [vmem:[#allocation8 + $0xa00] sm:$0xff]  ;;  %v6086_v35 = vld [vmem:[#allocation8 + $0x918] sm:$0xff] }
 0xeee   :  { %3560 = vmatpush.msra.mxu0 %v6045_v32  ;;  %3504 = vmatpush.msrb.mxu1 %v6046_v51  ;;  %v6087_v24 = vld [vmem:[#allocation8 + $0xbe0] sm:$0xff]  ;;  %v6088_v32 = vld [vmem:[#allocation8 + $0xa18] sm:$0xff]  ;;  %v6089_v51 = vld [vmem:[#allocation8 + $0xcf0] sm:$0xff] }
 0xeef   :  { %3460 = vmatmul.f32.vlgmr.msrb.gmra.mxu0 %v3175_v34  ;;  %3541 = vmatpush.msrb.mxu3 %v6047_v50  ;;  %v6073_v34 = vld [vmem:[#allocation8 + $0xa30] sm:$0xff]  ;;  %v6090_v50 = vld [vmem:[#allocation8 + $0x908] sm:$0xff] }
 0xef0   :  { %3561 = vmatpush.msra.mxu0 %v6048_v2  ;;  %3523 = vmatpush.msrb.mxu2 %v6049_v44  ;;  %v6091_v2 = vld [vmem:[#allocation8 + $0xbd0] sm:$0xff]  ;;  %v6092_v44 = vld [vmem:[#allocation8 + $0xa08] sm:$0xff] }
 0xef1   :  { %3542 = vmatpush.msrb.mxu3 %v6050_v46  ;;  %3505 = vmatpush.msrb.mxu1 %v6051_v47  ;;  %v6093_v46 = vld [vmem:[#allocation8 + $0xbf8] sm:$0xff] }
 0xef2   :  { %3562 = vmatpush.msra.mxu0 %v6052_v28  ;;  %3524 = vmatpush.msrb.mxu2 %v6053_v29  ;;  %v6094_v47 = vld [vmem:[#allocation8 + $0xcf8] sm:$0xff]  ;;  %v6095_v28 = vld [vmem:[#allocation8 + $0xce0] sm:$0xff]  ;;  %v6096_v29 = vld [vmem:[#allocation8 + $0xbe8] sm:$0xff] }
 0xef3   :  { %3543 = vmatpush.msrb.mxu3 %v6054_v49  ;;  %3506 = vmatpush.msrb.mxu1 %v6055_v53  ;;  %v6097_v49 = vld [vmem:[#allocation8 + $0xbc0] sm:$0xff]  ;;  %v6098_v53 = vld [vmem:[#allocation8 + $0xce8] sm:$0xff] }
 0xef4   :  { %3563 = vmatpush.msra.mxu0 %v6056_v54  ;;  %3525 = vmatpush.msrb.mxu2 %v6057_v55  ;;  %v6099_v54 = vld [vmem:[#allocation8 + $0xcd0] sm:$0xff]  ;;  %v6100_v55 = vld [vmem:[#allocation8 + $0xbd8] sm:$0xff] }
 0xef5   :  { %3544 = vmatpush.msrb.mxu3 %v6058_v56  ;;  %3507 = vmatpush.msrb.mxu1 %v6059_v59  ;;  %v6101_v56 = vld [vmem:[#allocation8 + $0xbb0] sm:$0xff]  ;;  %v6102_v59 = vld [vmem:[#allocation8 + $0xcd8] sm:$0xff] }
 0xef6   :  { %3564 = vmatpush.msra.mxu0 %v6060_v60  ;;  %3526 = vmatpush.msrb.mxu2 %v6061_v61  ;;  %v6103_v60 = vld [vmem:[#allocation8 + $0xcc0] sm:$0xff]  ;;  %v6104_v61 = vld [vmem:[#allocation8 + $0xbc8] sm:$0xff] }
 0xef7   :  { %3545 = vmatpush.msrb.mxu3 %v6062_v63  ;;  %3508 = vmatpush.msrb.mxu1 %v6063_v20  ;;  %v6105_v63 = vld [vmem:[#allocation8 + $0xba0] sm:$0xff]  ;;  %v6106_v20 = vld [vmem:[#allocation8 + $0xcc8] sm:$0xff] }
 0xef8   :  { %3565 = vmatpush.msra.mxu0 %v6064_v10  ;;  %3527 = vmatpush.msrb.mxu2 %v6065_v22  ;;  %v6107_v10 = vld [vmem:[#allocation8 + $0xcb0] sm:$0xff]  ;;  %v6108_v22 = vld [vmem:[#allocation8 + $0xbb8] sm:$0xff] }
 0xef9   :  { %3546 = vmatpush.msrb.mxu3 %v6066_v12  ;;  %3509 = vmatpush.msrb.mxu1 %v6067_v13  ;;  %v6109_v12 = vld [vmem:[#allocation8 + $0xb90] sm:$0xff]  ;;  %v6110_v13 = vld [vmem:[#allocation8 + $0xcb8] sm:$0xff] }
 0xefa   :  { %3566 = vmatpush.msra.mxu0 %v6068_v14  ;;  %3528 = vmatpush.msrb.mxu2 %v6069_v15  ;;  %v6111_v14 = vld [vmem:[#allocation8 + $0xca0] sm:$0xff]  ;;  %v6112_v15 = vld [vmem:[#allocation8 + $0xba8] sm:$0xff] }
 0xefb   :  { %3547 = vmatpush.msrb.mxu3 %v6070_v16  ;;  %3510 = vmatpush.msrb.mxu1 %v6071_v8  ;;  %v6113_v16 = vld [vmem:[#allocation8 + $0xb80] sm:$0xff]  ;;  %v6114_v8 = vld [vmem:[#allocation8 + $0xca8] sm:$0xff] }
 0xefc   :  { %3567 = vmatpush.msra.mxu0 %v6072_v9  ;;  %3529 = vmatpush.msrb.mxu2 %v6073_v34  ;;  %v6115_v9 = vld [vmem:[#allocation8 + $0xc90] sm:$0xff]  ;;  %v6116_v34 = vld [vmem:[#allocation8 + $0xb98] sm:$0xff] }
 0xefd   :  { %3548 = vmatpush.msrb.mxu3 %v6074_v19  ;;  %3511 = vmatpush.msrb.mxu1 %v6075_v42  ;;  %v6117_v19 = vld [vmem:[#allocation8 + $0xb70] sm:$0xff]  ;;  %v6118_v42 = vld [vmem:[#allocation8 + $0xc98] sm:$0xff] }
 0xefe   :  { %3568 = vmatpush.msra.mxu0 %v6076_v40  ;;  %3530 = vmatpush.msrb.mxu2 %v6077_v48  ;;  %v6119_v40 = vld [vmem:[#allocation8 + $0xc80] sm:$0xff]  ;;  %v6120_v48 = vld [vmem:[#allocation8 + $0xb88] sm:$0xff] }
 0xeff   :  { %3549 = vmatpush.msrb.mxu3 %v6078_v1  ;;  %3512 = vmatpush.msrb.mxu1 %v6079_v7  ;;  %v6121_v1 = vld [vmem:[#allocation8 + $0xb60] sm:$0xff]  ;;  %v6122_v7 = vld [vmem:[#allocation8 + $0xc88] sm:$0xff] }
 0xf00   :  { %3569 = vmatpush.msra.mxu0 %v6080_v4  ;;  %3531 = vmatpush.msrb.mxu2 %v6081_v41  ;;  %v6123_v4 = vld [vmem:[#allocation8 + $0xc70] sm:$0xff]  ;;  %v6124_v41 = vld [vmem:[#allocation8 + $0xb78] sm:$0xff] }
 0xf01   :  { %3550 = vmatpush.msrb.mxu3 %v6082_v26  ;;  %3577 = vmatpush.msra.mxu1 %v6083_v21  ;;  %v6125_v26 = vld [vmem:[#allocation8 + $0xb50] sm:$0xff]  ;;  %v6126_v21 = vld [vmem:[#allocation8 + $0xc78] sm:$0xff] }
 0xf02   :  { %3570 = vmatpush.msra.mxu0 %v6084_v27  ;;  %3532 = vmatpush.msrb.mxu2 %v6085_v33  ;;  %v6127_v27 = vld [vmem:[#allocation8 + $0xc60] sm:$0xff]  ;;  %v6128_v33 = vld [vmem:[#allocation8 + $0xb68] sm:$0xff] }
 0xf03   :  { %3551 = vmatpush.msrb.mxu3 %v6086_v35  ;;  %3578 = vmatpush.msra.mxu1 %v6087_v24  ;;  %v6129_v35 = vld [vmem:[#allocation8 + $0xb40] sm:$0xff]  ;;  %v6130_v24 = vld [vmem:[#allocation8 + $0xc68] sm:$0xff] }
 0xf04   :  { %3571 = vmatpush.msra.mxu0 %v6088_v32  ;;  %3597 = vmatpush.msra.mxu2 %v6089_v51  ;;  %v6131_v32 = vld [vmem:[#allocation8 + $0xc50] sm:$0xff]  ;;  %v6132_v51 = vld [vmem:[#allocation8 + $0xb58] sm:$0xff] }
 0xf05   :  { %3552 = vmatpush.msrb.mxu3 %v6090_v50  ;;  %3579 = vmatpush.msra.mxu1 %v6091_v2  ;;  %v6133_v50 = vld [vmem:[#allocation8 + $0xb30] sm:$0xff]  ;;  %v6134_v2 = vld [vmem:[#allocation8 + $0xc58] sm:$0xff] }
 0xf06   :  { %3572 = vmatpush.msra.mxu0 %v6092_v44  ;;  %3598 = vmatpush.msra.mxu2 %v6095_v28  ;;  %v6135_v44 = vld [vmem:[#allocation8 + $0xc40] sm:$0xff]  ;;  %v6138_v28 = vld [vmem:[#allocation8 + $0xc48] sm:$0xff] }
 0xf07   :  { %3617 = vmatpush.msra.mxu3 %v6093_v46  ;;  %3580 = vmatpush.msra.mxu1 %v6097_v49  ;;  %v6136_v46 = vld [vmem:[#allocation8 + $0xb48] sm:$0xff]  ;;  %v6140_v49 = vld [vmem:[#allocation8 + $0xb38] sm:$0xff] }
 0xf08   :  { %3637 = vmatpush.msrb.mxu0 %v6094_v47  ;;  %3599 = vmatpush.msra.mxu2 %v6099_v54  ;;  %v6137_v47 = vld [vmem:[#allocation8 + $0xb20] sm:$0xff]  ;;  %v6142_v54 = vld [vmem:[#allocation8 + $0xc38] sm:$0xff] }
 0xf09   :  { %3618 = vmatpush.msra.mxu3 %v6096_v29  ;;  %3581 = vmatpush.msra.mxu1 %v6101_v56  ;;  %v6139_v29 = vld [vmem:[#allocation8 + $0xc30] sm:$0xff]  ;;  %v6144_v56 = vld [vmem:[#allocation8 + $0xb28] sm:$0xff] }
 0xf0a   :  { %3638 = vmatpush.msrb.mxu0 %v6098_v53  ;;  %3600 = vmatpush.msra.mxu2 %v6103_v60  ;;  %v6141_v53 = vld [vmem:[#allocation8 + $0xb10] sm:$0xff]  ;;  %v6146_v60 = vld [vmem:[#allocation8 + $0xc28] sm:$0xff] }
 0xf0b   :  { %3619 = vmatpush.msra.mxu3 %v6100_v55  ;;  %3582 = vmatpush.msra.mxu1 %v6105_v63  ;;  %v6143_v55 = vld [vmem:[#allocation8 + $0xc20] sm:$0xff]  ;;  %v6148_v63 = vld [vmem:[#allocation8 + $0xb18] sm:$0xff] }
 0xf0c   :  { %3639 = vmatpush.msrb.mxu0 %v6102_v59  ;;  %3601 = vmatpush.msra.mxu2 %v6107_v10  ;;  %v6145_v59 = vld [vmem:[#allocation8 + $0xb00] sm:$0xff] }
 0xf0d   :  { %3620 = vmatpush.msra.mxu3 %v6104_v61  ;;  %3583 = vmatpush.msra.mxu1 %v6109_v12  ;;  %v6147_v61 = vld [vmem:[#allocation8 + $0xc10] sm:$0xff]  ;;  %v6150_v10 = vld [vmem:[#allocation8 + $0xc00] sm:$0xff]  ;;  %v6152_v12 = vld [vmem:[#allocation8 + $0xc08] sm:$0xff] }
 0xf0e   :  { %3640 = vmatpush.msrb.mxu0 %v6106_v20  ;;  %3602 = vmatpush.msra.mxu2 %v6111_v14  ;;  %v6149_v20 = vld [vmem:[#allocation8 + $0xc18] sm:$0xff] }
 0xf0f   :  { %3621 = vmatpush.msra.mxu3 %v6108_v22  ;;  %3584 = vmatpush.msra.mxu1 %v6113_v16  ;;  %v6151_v22 = vld [vmem:[#allocation8 + $0xb08] sm:$0xff] }
 0xf10   :  { %3641 = vmatpush.msrb.mxu0 %v6110_v13  ;;  %3603 = vmatpush.msra.mxu2 %v6115_v9 }
 0xf11   :  { %3622 = vmatpush.msra.mxu3 %v6112_v15  ;;  %3585 = vmatpush.msra.mxu1 %v6117_v19 }
 0xf12   :  { %3642 = vmatpush.msrb.mxu0 %v6114_v8  ;;  %3604 = vmatpush.msra.mxu2 %v6119_v40 }
 0xf13   :  { %3623 = vmatpush.msra.mxu3 %v6116_v34  ;;  %3586 = vmatpush.msra.mxu1 %v6121_v1 }
 0xf14   :  { %3643 = vmatpush.msrb.mxu0 %v6118_v42  ;;  %3605 = vmatpush.msra.mxu2 %v6123_v4 }
 0xf15   :  { %3624 = vmatpush.msra.mxu3 %v6120_v48  ;;  %3587 = vmatpush.msra.mxu1 %v6125_v26 }
 0xf16   :  { %3644 = vmatpush.msrb.mxu0 %v6122_v7  ;;  %3606 = vmatpush.msra.mxu2 %v6127_v27 }
 0xf17   :  { %3625 = vmatpush.msra.mxu3 %v6124_v41  ;;  %3588 = vmatpush.msra.mxu1 %v6129_v35 }
 0xf18   :  { %3645 = vmatpush.msrb.mxu0 %v6126_v21  ;;  %3607 = vmatpush.msra.mxu2 %v6131_v32 }
 0xf19   :  { %3626 = vmatpush.msra.mxu3 %v6128_v33  ;;  %3589 = vmatpush.msra.mxu1 %v6133_v50 }
 0xf1a   :  { %3646 = vmatpush.msrb.mxu0 %v6130_v24  ;;  %3608 = vmatpush.msra.mxu2 %v6135_v44 }
 0xf1b   :  { %3627 = vmatpush.msra.mxu3 %v6132_v51  ;;  %3590 = vmatpush.msra.mxu1 %v6137_v47 }
 0xf1c   :  { %3647 = vmatpush.msrb.mxu0 %v6134_v2  ;;  %3609 = vmatpush.msra.mxu2 %v6139_v29 }
 0xf1d   :  { %3628 = vmatpush.msra.mxu3 %v6136_v46  ;;  %3591 = vmatpush.msra.mxu1 %v6141_v53 }
 0xf1e   :  { %3648 = vmatpush.msrb.mxu0 %v6138_v28  ;;  %3610 = vmatpush.msra.mxu2 %v6143_v55 }
 0xf1f   :  { %3629 = vmatpush.msra.mxu3 %v6140_v49  ;;  %3592 = vmatpush.msra.mxu1 %v6145_v59 }
 0xf20   :  { %3649 = vmatpush.msrb.mxu0 %v6142_v54  ;;  %3611 = vmatpush.msra.mxu2 %v6147_v61 }
 0xf21   :  { %3630 = vmatpush.msra.mxu3 %v6144_v56 }
 0xf22   :  { %3650 = vmatpush.msrb.mxu0 %v6146_v60  ;;  %3612 = vmatpush.msra.mxu2 %v6150_v10  ;;  %v6153_v10 = vld [vmem:[#allocation11 + $0x1e0] sm:$0xff] }
 0xf23   :  { %3631 = vmatpush.msra.mxu3 %v6148_v63 }
 0xf24   :  { %3651 = vmatpush.msrb.mxu0 %v6149_v20 }
 0xf25   :  { %3632 = vmatpush.msra.mxu3 %v6151_v22  ;;  %v6154_v22 = vld [vmem:[#allocation11 + $0x3e0] sm:$0xff] }
 0xf26   :  { %3652 = vmatpush.msrb.mxu0 %v6152_v12  ;;  %v6155_v12 = vld [vmem:[#allocation11 + $0x1e8] sm:$0xff] }
 0xf59   :  { %v3321_v14 = vpop.f32.mrf.mxu1 }
 0xf61   :  { %v3401_v19 = vpop.f32.mrf.mxu1 }
 0xf62   :  { %v3341_v13 = vpop.f32.mrf.mxu2 }
 0xf63   :  { %v3342_v8 = vadd.f32 %v3341_v13, %v3321_v14  ;;  %v6156_v13 = vld [vmem:[#allocation11 + $0x3e8] sm:$0xff]  ;;  %v6157_v14 = vld [vmem:[#allocation11 + $0x1c0] sm:$0xff] }
 0xf64   :  { %v3381_v15 = vpop.f32.mrf.mxu0 }
 0xf67   :  { %v3361_v16 = vpop.f32.mrf.mxu3 }
 0xf68   :  { %v3362_v9 = vadd.f32 %v3361_v16, %v3342_v8  ;;  %v6159_v16 = vld [vmem:[#allocation11 + $0x1c8] sm:$0xff] }
 0xf69   :  { %v6160_v8 = vld [vmem:[#allocation11 + $0x3c8] sm:$0xff] }
 0xf6a   :  { %v3421_v34 = vpop.f32.mrf.mxu2  ;;  %v3382_v42 = vadd.f32 %v3381_v15, %v3362_v9  ;;  %v6158_v15 = vld [vmem:[#allocation11 + $0x3c0] sm:$0xff] }
 0xf6b   :  { %v3422_v40 = vadd.f32 %v3421_v34, %v3401_v19  ;;  %v6161_v9 = vld [vmem:[#allocation11 + $0x1a0] sm:$0xff]  ;;  %v6163_v19 = vld [vmem:[#allocation11 + $0x1a8] sm:$0xff] }
 0xf6c   :  { %v3461_v7 = vpop.f32.mrf.mxu0  ;;  %v3464_v4 = vadd.f32 %v3382_v42, %v7527_v31  ;;  %v6162_v34 = vld [vmem:[#allocation11 + $0x3a0] sm:$0xff]  ;;  %v6164_v42 = vld [vmem:[#allocation11 + $0x3a8] sm:$0xff] }
 0xf6e   :  { %v3466_v21 = vadd.f32 %v3464_v4, %v7401_v23  ;;  %v6169_v4 = vld [vmem:[#allocation11 + $0x160] sm:$0xff] }
 0xf6f   :  { %v3441_v48 = vpop.f32.mrf.mxu3 }
 0xf70   :  { %v3442_v1 = vadd.f32 %v3441_v48, %v3422_v40  ;;  %v6165_v40 = vld [vmem:[#allocation11 + $0x180] sm:$0xff] }
 0xf71   :  { %v6166_v48 = vld [vmem:[#allocation11 + $0x380] sm:$0xff] }
 0xf72   :  { %v3462_v41 = vadd.f32 %v3461_v7, %v3442_v1  ;;  %v6167_v1 = vld [vmem:[#allocation11 + $0x188] sm:$0xff] }
 0xf73   :  { %v6168_v7 = vld [vmem:[#allocation11 + $0x388] sm:$0xff] }
 0xf74   :  { %v3465_v26 = vadd.f32 %v3462_v41, %v7530_v43  ;;  %v6170_v41 = vld [vmem:[#allocation11 + $0x360] sm:$0xff] }
 0xf76   :  { %v3467_v27 = vadd.f32 %v3465_v26, %v7404_v11  ;;  %v6171_v26 = vld [vmem:[#allocation11 + $0x168] sm:$0xff] }
 0xf78   :  { %v3468_v33 = vadd.f32 %v3467_v27, %v3466_v21 }
 0xf7a   :  { %3469 = vadd.xlane.f32.xlu1 %v3468_v33  ;;  %v6174_v33 = vld [vmem:[#allocation11 + $0x340] sm:$0xff] }
 0xfed   :  { %v3470_v35 = vpop.xlane.xlu1 %3469 }
 0xfee   :  { %v3471_v24 = vmul.f32 %v3470_v35, %v7240_v5  ;;  %v6175_v35 = vld [vmem:[#allocation11 + $0x148] sm:$0xff] }
 0xff0   :  { %v3472_v32 = vsub.f32 %v3466_v21, %v3471_v24  ;;  %v3473_v51 = vsub.f32 %v3467_v27, %v3471_v24  ;;  %v6172_v21 = vld [vmem:[#allocation11 + $0x368] sm:$0xff]  ;;  %v6173_v27 = vld [vmem:[#allocation11 + $0x140] sm:$0xff] }
 0xff1   :  { %v6176_v24 = vld [vmem:[#allocation11 + $0x348] sm:$0xff] }
 0xff2   :  { %v3474_v50 = vmul.f32 %v3472_v32, %v3472_v32  ;;  %v3475_v2 = vmul.f32 %v3473_v51, %v3473_v51 }
 0xff4   :  { %v3476_v44 = vadd.f32 %v3475_v2, %v3474_v50  ;;  %v6179_v50 = vld [vmem:[#allocation11 + $0x128] sm:$0xff] }
 0xff5   :  { %v6180_v2 = vld [vmem:[#allocation11 + $0x328] sm:$0xff] }
 0xff6   :  { %3477 = vadd.xlane.f32.xlu2 %v3476_v44  ;;  %v6181_v44 = vld [vmem:[#allocation11 + $0x100] sm:$0xff] }
0x1069   :  { %v3478_v46 = vpop.xlane.xlu2 %3477 }
0x106a   :  { %v3479_v31 = vmul.f32 %v3478_v46, %v7240_v5  ;;  %v6182_v46 = vld [vmem:[#allocation11 + $0x300] sm:$0xff] }
0x106c   :  { %v3480_v47 = vadd.f32 1e-05, %v3479_v31  ;;  %v6183_v31 = vld [vmem:[#allocation11 + $0x108] sm:$0xff] }
0x106e   :  { %5625 = vrsqrt.f32 %v3480_v47  ;;  %vm3487_vm11 = vweird.f32 %v3480_v47 }
0x1074   :  { %v5626_v43 = vpop.eup %5625 }
0x1075   :  { %v3482_v28 = vmul.f32 %v5626_v43, %v3480_v47  ;;  %vm3488_vm10 = vweird.f32 %v5626_v43  ;;  %v6184_v47 = vld [vmem:[#allocation11 + $0x308] sm:$0xff] }
0x1076   :  { %vm3489_vm12 = vmor %vm3487_vm11, %vm3488_vm10 }
0x1077   :  { %v3483_v29 = vmul.f32 %v5626_v43, %v3482_v28  ;;  %v6186_v28 = vld [vmem:[#allocation11 + $0x2e0] sm:$0xff] }
0x1079   :  { %v3484_v49 = vmul.f32 0.5, %v3483_v29  ;;  %v6187_v29 = vld [vmem:[#allocation11 + $0xe8] sm:$0xff] }
0x107b   :  { %v3485_v53 = vsub.f32 1.5, %v3484_v49  ;;  %v6188_v49 = vld [vmem:[#allocation11 + $0x2e8] sm:$0xff] }
0x107d   :  { %v3486_v54 = vmul.f32 %v5626_v43, %v3485_v53  ;;  %v6189_v53 = vld [vmem:[#allocation11 + $0xc0] sm:$0xff] }
0x107f   :  { %v3490_v55 = vsel %vm3489_vm12, %v5626_v43, %v3486_v54  ;;  %v6185_v43 = vld [vmem:[#allocation11 + $0xe0] sm:$0xff] }
0x1080   :  { %v3491_v56 = vmul.f32 %v3490_v55, %v3472_v32  ;;  %v3492_v59 = vmul.f32 %v3490_v55, %v3473_v51  ;;  %v6177_v32 = vld [vmem:[#allocation11 + $0x120] sm:$0xff]  ;;  %v6191_v55 = vld [vmem:[#allocation11 + $0xc8] sm:$0xff] }
0x1081   :  { %v6178_v51 = vld [vmem:[#allocation11 + $0x320] sm:$0xff] }
0x1082   :  { %v3493_v60 = vmul.f32 %v3491_v56, %v7412_v25  ;;  %v3494_v61 = vmul.f32 %v3492_v59, %v7415_v30  ;;  %v6190_v54 = vld [vmem:[#allocation11 + $0x2c0] sm:$0xff]  ;;  %v6192_v56 = vld [vmem:[#allocation11 + $0x2c8] sm:$0xff] }
0x1083   :  { %v6193_v59 = vld [vmem:[#allocation11 + $0xa0] sm:$0xff] }
0x1084   :  { %v7553_v63 = vadd.f32 %v3493_v60, %v7418_v36  ;;  %v7556_v20 = vadd.f32 %v3494_v61, %v7421_v39  ;;  %v6194_v60 = vld [vmem:[#allocation11 + $0x2a0] sm:$0xff]  ;;  %v6195_v61 = vld [vmem:[#allocation11 + $0xa8] sm:$0xff] }
0x1086   :  { %3513 = vmatmul.f32.vlgmr.msrb.gmra.mxu1 %v7553_v63  ;;  %3533 = vmatmul.f32.vlgmr.msrb.gmra.mxu2 %v7556_v20 }
0x1087   :  { %3553 = vmatmul.f32.vlgmr.msrb.gmra.mxu3 %v7553_v63  ;;  %3573 = vmatmul.f32.vlgmr.msra.gmra.mxu0 %v7556_v20 }
0x1088   :  { %3688 = vmatpush.msrb.mxu1 %v6153_v10  ;;  %3708 = vmatpush.msrb.mxu2 %v6154_v22  ;;  %v6196_v10 = vld [vmem:[#allocation11 + $0x2a8] sm:$0xff]  ;;  %v6197_v22 = vld [vmem:[#allocation11 + $0x80] sm:$0xff] }
0x1089   :  { %3728 = vmatpush.msrb.mxu3 %v6155_v12  ;;  %3748 = vmatpush.msra.mxu0 %v6156_v13  ;;  %v6198_v12 = vld [vmem:[#allocation11 + $0x280] sm:$0xff]  ;;  %v6199_v13 = vld [vmem:[#allocation11 + $0x88] sm:$0xff] }
0x108a   :  { %3689 = vmatpush.msrb.mxu1 %v6157_v14  ;;  %3709 = vmatpush.msrb.mxu2 %v6158_v15  ;;  %v6200_v14 = vld [vmem:[#allocation11 + $0x288] sm:$0xff]  ;;  %v6201_v15 = vld [vmem:[#allocation11 + $0x60] sm:$0xff] }
0x108b   :  { %3729 = vmatpush.msrb.mxu3 %v6159_v16  ;;  %3749 = vmatpush.msra.mxu0 %v6160_v8  ;;  %v6202_v16 = vld [vmem:[#allocation11 + $0x260] sm:$0xff]  ;;  %v6203_v8 = vld [vmem:[#allocation11 + $0x68] sm:$0xff] }
0x108c   :  { %3690 = vmatpush.msrb.mxu1 %v6161_v9  ;;  %3710 = vmatpush.msrb.mxu2 %v6162_v34  ;;  %v6204_v9 = vld [vmem:[#allocation11 + $0x268] sm:$0xff]  ;;  %v6205_v34 = vld [vmem:[#allocation11 + $0x40] sm:$0xff] }
0x108d   :  { %3730 = vmatpush.msrb.mxu3 %v6163_v19  ;;  %3750 = vmatpush.msra.mxu0 %v6164_v42  ;;  %v6206_v19 = vld [vmem:[#allocation11 + $0x240] sm:$0xff]  ;;  %v6207_v42 = vld [vmem:[#allocation11 + $0x48] sm:$0xff] }
0x108e   :  { %3691 = vmatpush.msrb.mxu1 %v6165_v40  ;;  %3711 = vmatpush.msrb.mxu2 %v6166_v48  ;;  %v6208_v40 = vld [vmem:[#allocation11 + $0x248] sm:$0xff]  ;;  %v6209_v48 = vld [vmem:[#allocation11 + $0x20] sm:$0xff] }
0x108f   :  { %3731 = vmatpush.msrb.mxu3 %v6167_v1  ;;  %3751 = vmatpush.msra.mxu0 %v6168_v7  ;;  %v6210_v1 = vld [vmem:[#allocation11 + $0x220] sm:$0xff]  ;;  %v6211_v7 = vld [vmem:[#allocation11 + $0x28] sm:$0xff] }
0x1090   :  { %3692 = vmatpush.msrb.mxu1 %v6169_v4  ;;  %3712 = vmatpush.msrb.mxu2 %v6170_v41  ;;  %v6212_v4 = vld [vmem:[#allocation11 + $0x228] sm:$0xff]  ;;  %v6213_v41 = vld [vmem:[#allocation11] sm:$0xff] }
0x1091   :  { %3732 = vmatpush.msrb.mxu3 %v6171_v26  ;;  %3752 = vmatpush.msra.mxu0 %v6172_v21  ;;  %v6214_v26 = vld [vmem:[#allocation11 + $0x200] sm:$0xff]  ;;  %v6215_v21 = vld [vmem:[#allocation11 + $0x8] sm:$0xff] }
0x1092   :  { %3693 = vmatpush.msrb.mxu1 %v6173_v27  ;;  %3713 = vmatpush.msrb.mxu2 %v6174_v33  ;;  %v6216_v27 = vld [vmem:[#allocation11 + $0x208] sm:$0xff] }
0x1093   :  { %3733 = vmatpush.msrb.mxu3 %v6175_v35  ;;  %3753 = vmatpush.msra.mxu0 %v6176_v24 }
0x1094   :  { %3694 = vmatpush.msrb.mxu1 %v6177_v32  ;;  %3714 = vmatpush.msrb.mxu2 %v6178_v51 }
0x1095   :  { %3734 = vmatpush.msrb.mxu3 %v6179_v50  ;;  %3754 = vmatpush.msra.mxu0 %v6180_v2 }
0x1096   :  { %3695 = vmatpush.msrb.mxu1 %v6181_v44  ;;  %3715 = vmatpush.msrb.mxu2 %v6182_v46  ;;  %v6217_v46 = vld [vmem:[#allocation11 + $0x1f0] sm:$0xff] }
0x1097   :  { %3735 = vmatpush.msrb.mxu3 %v6183_v31  ;;  %3755 = vmatpush.msra.mxu0 %v6184_v47  ;;  %v6218_v31 = vld [vmem:[#allocation11 + $0x1f8] sm:$0xff]  ;;  %v6219_v47 = vld [vmem:[#allocation11 + $0x3f0] sm:$0xff] }
0x1098   :  { %3696 = vmatpush.msrb.mxu1 %v6185_v43  ;;  %3716 = vmatpush.msrb.mxu2 %v6186_v28  ;;  %v6220_v43 = vld [vmem:[#allocation11 + $0x3f8] sm:$0xff]  ;;  %v6221_v28 = vld [vmem:[#allocation11 + $0x1d0] sm:$0xff] }
0x1099   :  { %3736 = vmatpush.msrb.mxu3 %v6187_v29  ;;  %3756 = vmatpush.msra.mxu0 %v6188_v49  ;;  %v6222_v29 = vld [vmem:[#allocation11 + $0x1d8] sm:$0xff]  ;;  %v6223_v49 = vld [vmem:[#allocation11 + $0x3d0] sm:$0xff] }
0x109a   :  { %3697 = vmatpush.msrb.mxu1 %v6189_v53  ;;  %3717 = vmatpush.msrb.mxu2 %v6190_v54  ;;  %v6224_v53 = vld [vmem:[#allocation11 + $0x3d8] sm:$0xff]  ;;  %v6225_v54 = vld [vmem:[#allocation11 + $0x1b0] sm:$0xff] }
0x109b   :  { %3737 = vmatpush.msrb.mxu3 %v6191_v55  ;;  %3757 = vmatpush.msra.mxu0 %v6192_v56  ;;  %v6226_v55 = vld [vmem:[#allocation11 + $0x1b8] sm:$0xff]  ;;  %v6227_v56 = vld [vmem:[#allocation11 + $0x3b0] sm:$0xff] }
0x109c   :  { %3698 = vmatpush.msrb.mxu1 %v6193_v59  ;;  %3718 = vmatpush.msrb.mxu2 %v6194_v60  ;;  %v6228_v59 = vld [vmem:[#allocation11 + $0x3b8] sm:$0xff]  ;;  %v6229_v60 = vld [vmem:[#allocation11 + $0x190] sm:$0xff] }
0x109d   :  { %3738 = vmatpush.msrb.mxu3 %v6195_v61  ;;  %3758 = vmatpush.msra.mxu0 %v6196_v10  ;;  %v6230_v61 = vld [vmem:[#allocation11 + $0x198] sm:$0xff]  ;;  %v6231_v10 = vld [vmem:[#allocation11 + $0x390] sm:$0xff] }
0x109e   :  { %3699 = vmatpush.msrb.mxu1 %v6197_v22  ;;  %3719 = vmatpush.msrb.mxu2 %v6198_v12  ;;  %v6232_v22 = vld [vmem:[#allocation11 + $0x398] sm:$0xff]  ;;  %v6233_v12 = vld [vmem:[#allocation11 + $0x170] sm:$0xff] }
0x109f   :  { %3739 = vmatpush.msrb.mxu3 %v6199_v13  ;;  %3759 = vmatpush.msra.mxu0 %v6200_v14  ;;  %v6234_v13 = vld [vmem:[#allocation11 + $0x178] sm:$0xff]  ;;  %v6235_v14 = vld [vmem:[#allocation11 + $0x370] sm:$0xff] }
0x10a0   :  { %3700 = vmatpush.msrb.mxu1 %v6201_v15  ;;  %3720 = vmatpush.msrb.mxu2 %v6202_v16  ;;  %v6236_v15 = vld [vmem:[#allocation11 + $0x378] sm:$0xff]  ;;  %v6237_v16 = vld [vmem:[#allocation11 + $0x150] sm:$0xff] }
0x10a1   :  { %3740 = vmatpush.msrb.mxu3 %v6203_v8  ;;  %3760 = vmatpush.msra.mxu0 %v6204_v9  ;;  %v6238_v8 = vld [vmem:[#allocation11 + $0x158] sm:$0xff]  ;;  %v6239_v9 = vld [vmem:[#allocation11 + $0x350] sm:$0xff] }
0x10a2   :  { %3701 = vmatpush.msrb.mxu1 %v6205_v34  ;;  %3721 = vmatpush.msrb.mxu2 %v6206_v19  ;;  %v6240_v34 = vld [vmem:[#allocation11 + $0x358] sm:$0xff]  ;;  %v6241_v19 = vld [vmem:[#allocation11 + $0x130] sm:$0xff] }
0x10a3   :  { %3741 = vmatpush.msrb.mxu3 %v6207_v42  ;;  %3761 = vmatpush.msra.mxu0 %v6208_v40  ;;  %v6242_v42 = vld [vmem:[#allocation11 + $0x138] sm:$0xff]  ;;  %v6243_v40 = vld [vmem:[#allocation11 + $0x330] sm:$0xff] }
0x10a4   :  { %3702 = vmatpush.msrb.mxu1 %v6209_v48  ;;  %3722 = vmatpush.msrb.mxu2 %v6210_v1  ;;  %v6244_v48 = vld [vmem:[#allocation11 + $0x338] sm:$0xff]  ;;  %v6245_v1 = vld [vmem:[#allocation11 + $0x110] sm:$0xff] }
0x10a5   :  { %3742 = vmatpush.msrb.mxu3 %v6211_v7  ;;  %3762 = vmatpush.msra.mxu0 %v6212_v4  ;;  %v6246_v7 = vld [vmem:[#allocation11 + $0x118] sm:$0xff]  ;;  %v6247_v4 = vld [vmem:[#allocation11 + $0x310] sm:$0xff] }
0x10a6   :  { %3703 = vmatpush.msrb.mxu1 %v6213_v41  ;;  %3723 = vmatpush.msrb.mxu2 %v6214_v26  ;;  %v6248_v41 = vld [vmem:[#allocation11 + $0x318] sm:$0xff]  ;;  %v6249_v26 = vld [vmem:[#allocation11 + $0xf0] sm:$0xff] }
0x10a7   :  { %3743 = vmatpush.msrb.mxu3 %v6215_v21  ;;  %3763 = vmatpush.msra.mxu0 %v6216_v27  ;;  %v6250_v21 = vld [vmem:[#allocation11 + $0xf8] sm:$0xff]  ;;  %v6251_v27 = vld [vmem:[#allocation11 + $0x2f0] sm:$0xff] }
0x1103   :  { %v3514_v33 = vpop.f32.mrf.mxu1 }
0x1104   :  { %v3515_v35 = vadd.f32 %v3514_v33, %v7318_v3  ;;  %v3574_v2 = vpop.f32.mrf.mxu0  ;;  %v6252_v33 = vld [vmem:[#allocation11 + $0x2f8] sm:$0xff] }
0x1109   :  { %v3534_v24 = vpop.f32.mrf.mxu2 }
0x110a   :  { %v3535_v32 = vadd.f32 %v3534_v24, %v3515_v35  ;;  %v3554_v51 = vpop.f32.mrf.mxu3  ;;  %v6253_v35 = vld [vmem:[#allocation11 + $0xd0] sm:$0xff]  ;;  %v6254_v24 = vld [vmem:[#allocation11 + $0xd8] sm:$0xff] }
0x110b   :  { %v3555_v50 = vadd.f32 %v3554_v51, %v7321_v6  ;;  %v6256_v51 = vld [vmem:[#allocation11 + $0x2d8] sm:$0xff] }
0x110c   :  { %3593 = vmatmul.f32.vlgmr.msra.gmra.mxu1 %v3535_v32  ;;  %3633 = vmatmul.f32.vlgmr.msra.gmra.mxu3 %v3535_v32  ;;  %v6255_v32 = vld [vmem:[#allocation11 + $0x2d0] sm:$0xff] }
0x110d   :  { %v3575_v44 = vadd.f32 %v3574_v2, %v3555_v50  ;;  %3768 = vmatpush.msra.mxu1 %v6217_v46  ;;  %3808 = vmatpush.msra.mxu3 %v6218_v31  ;;  %v6257_v50 = vld [vmem:[#allocation11 + $0xb0] sm:$0xff]  ;;  %v6258_v2 = vld [vmem:[#allocation11 + $0xb8] sm:$0xff] }
0x110e   :  { %v6260_v46 = vld [vmem:[#allocation11 + $0x2b8] sm:$0xff]  ;;  %v6261_v31 = vld [vmem:[#allocation11 + $0x90] sm:$0xff] }
0x110f   :  { %3613 = vmatmul.f32.vlgmr.msra.gmra.mxu2 %v3575_v44  ;;  %3653 = vmatmul.f32.vlgmr.msrb.gmra.mxu0 %v3575_v44  ;;  %v6259_v44 = vld [vmem:[#allocation11 + $0x2b0] sm:$0xff] }
0x1110   :  { %3788 = vmatpush.msra.mxu2 %v6219_v47  ;;  %3828 = vmatpush.msrb.mxu0 %v6220_v43  ;;  %v6262_v47 = vld [vmem:[#allocation11 + $0x98] sm:$0xff]  ;;  %v6263_v43 = vld [vmem:[#allocation11 + $0x290] sm:$0xff] }
0x1111   :  { %3769 = vmatpush.msra.mxu1 %v6221_v28  ;;  %3809 = vmatpush.msra.mxu3 %v6222_v29  ;;  %v6264_v28 = vld [vmem:[#allocation11 + $0x298] sm:$0xff]  ;;  %v6265_v29 = vld [vmem:[#allocation11 + $0x70] sm:$0xff] }
0x1112   :  { %3789 = vmatpush.msra.mxu2 %v6223_v49  ;;  %3829 = vmatpush.msrb.mxu0 %v6224_v53  ;;  %v6266_v49 = vld [vmem:[#allocation11 + $0x78] sm:$0xff]  ;;  %v6267_v53 = vld [vmem:[#allocation11 + $0x270] sm:$0xff] }
0x1113   :  { %3770 = vmatpush.msra.mxu1 %v6225_v54  ;;  %3810 = vmatpush.msra.mxu3 %v6226_v55  ;;  %v6268_v54 = vld [vmem:[#allocation11 + $0x278] sm:$0xff]  ;;  %v6269_v55 = vld [vmem:[#allocation11 + $0x50] sm:$0xff] }
0x1114   :  { %3790 = vmatpush.msra.mxu2 %v6227_v56  ;;  %3830 = vmatpush.msrb.mxu0 %v6228_v59  ;;  %v6270_v56 = vld [vmem:[#allocation11 + $0x58] sm:$0xff]  ;;  %v6271_v59 = vld [vmem:[#allocation11 + $0x250] sm:$0xff] }
0x1115   :  { %3771 = vmatpush.msra.mxu1 %v6229_v60  ;;  %3811 = vmatpush.msra.mxu3 %v6230_v61  ;;  %v6272_v60 = vld [vmem:[#allocation11 + $0x258] sm:$0xff]  ;;  %v6273_v61 = vld [vmem:[#allocation11 + $0x30] sm:$0xff] }
0x1116   :  { %3791 = vmatpush.msra.mxu2 %v6231_v10  ;;  %3831 = vmatpush.msrb.mxu0 %v6232_v22  ;;  %v6274_v10 = vld [vmem:[#allocation11 + $0x38] sm:$0xff]  ;;  %v6275_v22 = vld [vmem:[#allocation11 + $0x230] sm:$0xff] }
0x1117   :  { %3772 = vmatpush.msra.mxu1 %v6233_v12  ;;  %3812 = vmatpush.msra.mxu3 %v6234_v13  ;;  %v6276_v12 = vld [vmem:[#allocation11 + $0x238] sm:$0xff]  ;;  %v6277_v13 = vld [vmem:[#allocation11 + $0x10] sm:$0xff] }
0x1118   :  { %3792 = vmatpush.msra.mxu2 %v6235_v14  ;;  %3832 = vmatpush.msrb.mxu0 %v6236_v15  ;;  %v6278_v14 = vld [vmem:[#allocation11 + $0x18] sm:$0xff]  ;;  %v6279_v15 = vld [vmem:[#allocation11 + $0x210] sm:$0xff] }
0x1119   :  { %3773 = vmatpush.msra.mxu1 %v6237_v16  ;;  %3813 = vmatpush.msra.mxu3 %v6238_v8  ;;  %v6280_v16 = vld [vmem:[#allocation11 + $0x218] sm:$0xff] }
0x111a   :  { %3793 = vmatpush.msra.mxu2 %v6239_v9  ;;  %3833 = vmatpush.msrb.mxu0 %v6240_v34 }
0x111b   :  { %3774 = vmatpush.msra.mxu1 %v6241_v19  ;;  %3814 = vmatpush.msra.mxu3 %v6242_v42 }
0x111c   :  { %3794 = vmatpush.msra.mxu2 %v6243_v40  ;;  %3834 = vmatpush.msrb.mxu0 %v6244_v48 }
0x111d   :  { %3775 = vmatpush.msra.mxu1 %v6245_v1  ;;  %3815 = vmatpush.msra.mxu3 %v6246_v7 }
0x111e   :  { %3795 = vmatpush.msra.mxu2 %v6247_v4  ;;  %3835 = vmatpush.msrb.mxu0 %v6248_v41 }
0x111f   :  { %3776 = vmatpush.msra.mxu1 %v6249_v26  ;;  %3816 = vmatpush.msra.mxu3 %v6250_v21 }
0x1120   :  { %3796 = vmatpush.msra.mxu2 %v6251_v27  ;;  %3836 = vmatpush.msrb.mxu0 %v6252_v33 }
0x1121   :  { %3777 = vmatpush.msra.mxu1 %v6253_v35  ;;  %3817 = vmatpush.msra.mxu3 %v6254_v24 }
0x1122   :  { %3797 = vmatpush.msra.mxu2 %v6255_v32  ;;  %3837 = vmatpush.msrb.mxu0 %v6256_v51 }
0x1123   :  { %3778 = vmatpush.msra.mxu1 %v6257_v50  ;;  %3818 = vmatpush.msra.mxu3 %v6258_v2 }
0x1124   :  { %3798 = vmatpush.msra.mxu2 %v6259_v44  ;;  %3838 = vmatpush.msrb.mxu0 %v6260_v46 }
0x1125   :  { %3779 = vmatpush.msra.mxu1 %v6261_v31  ;;  %3819 = vmatpush.msra.mxu3 %v6262_v47 }
0x1126   :  { %3799 = vmatpush.msra.mxu2 %v6263_v43  ;;  %3839 = vmatpush.msrb.mxu0 %v6264_v28 }
0x1127   :  { %3780 = vmatpush.msra.mxu1 %v6265_v29  ;;  %3820 = vmatpush.msra.mxu3 %v6266_v49 }
0x1128   :  { %3800 = vmatpush.msra.mxu2 %v6267_v53  ;;  %3840 = vmatpush.msrb.mxu0 %v6268_v54 }
0x1129   :  { %3781 = vmatpush.msra.mxu1 %v6269_v55  ;;  %3821 = vmatpush.msra.mxu3 %v6270_v56  ;;  %v6281_v56 = vld [vmem:[#allocation8 + $0xdf0] sm:$0xff] }
0x112a   :  { %3801 = vmatpush.msra.mxu2 %v6271_v59  ;;  %3841 = vmatpush.msrb.mxu0 %v6272_v60  ;;  %v6282_v59 = vld [vmem:[#allocation8 + $0xef0] sm:$0xff] }
0x112b   :  { %3782 = vmatpush.msra.mxu1 %v6273_v61  ;;  %3822 = vmatpush.msra.mxu3 %v6274_v10  ;;  %v6283_v60 = vld [vmem:[#allocation8 + $0xff0] sm:$0xff]  ;;  %v6285_v10 = vld [vmem:[#allocation8 + $0xde0] sm:$0xff] }
0x112c   :  { %3802 = vmatpush.msra.mxu2 %v6275_v22  ;;  %3842 = vmatpush.msrb.mxu0 %v6276_v12  ;;  %v6284_v61 = vld [vmem:[#allocation8 + $0x10f0] sm:$0xff]  ;;  %v6286_v22 = vld [vmem:[#allocation8 + $0xee0] sm:$0xff] }
0x112d   :  { %3783 = vmatpush.msra.mxu1 %v6277_v13  ;;  %3823 = vmatpush.msra.mxu3 %v6278_v14  ;;  %v6287_v12 = vld [vmem:[#allocation8 + $0xfe0] sm:$0xff]  ;;  %v6289_v14 = vld [vmem:[#allocation8 + $0xdd0] sm:$0xff] }
0x112e   :  { %3803 = vmatpush.msra.mxu2 %v6279_v15  ;;  %3843 = vmatpush.msrb.mxu0 %v6280_v16  ;;  %v6288_v13 = vld [vmem:[#allocation8 + $0x10e0] sm:$0xff]  ;;  %v6290_v15 = vld [vmem:[#allocation8 + $0xed0] sm:$0xff] }
0x112f   :  { %v6291_v16 = vld [vmem:[#allocation8 + $0xfd0] sm:$0xff] }
0x1189   :  { %v3594_v8 = vpop.f32.mrf.mxu1 }
0x118a   :  { %v3595_v19 = vadd.f32 %v3594_v8, %v7326_v17  ;;  %v6292_v8 = vld [vmem:[#allocation8 + $0x10d0] sm:$0xff] }
0x118c   :  { %v3654_v42 = vpop.f32.mrf.mxu0 }
0x118f   :  { %v3634_v9 = vpop.f32.mrf.mxu3 }
0x1190   :  { %v3635_v34 = vadd.f32 %v3634_v9, %v7329_v18  ;;  %v6293_v9 = vld [vmem:[#allocation8 + $0xdc0] sm:$0xff] }
0x1192   :  { %v3655_v40 = vadd.f32 %v3654_v42, %v3635_v34  ;;  %v3614_v48 = vpop.f32.mrf.mxu2  ;;  %v6294_v34 = vld [vmem:[#allocation8 + $0xec0] sm:$0xff] }
0x1193   :  { %v3615_v1 = vadd.f32 %v3614_v48, %v3595_v19  ;;  %v6295_v19 = vld [vmem:[#allocation8 + $0xfc0] sm:$0xff]  ;;  %v6298_v48 = vld [vmem:[#allocation8 + $0xeb0] sm:$0xff] }
0x1194   :  { %v3658_v7 = vadd.f32 %v3655_v40, %v7556_v20  ;;  %v6296_v42 = vld [vmem:[#allocation8 + $0x10c0] sm:$0xff]  ;;  %v6297_v40 = vld [vmem:[#allocation8 + $0xdb0] sm:$0xff] }
0x1195   :  { %v3657_v4 = vadd.f32 %v3615_v1, %v7553_v63  ;;  %v6299_v1 = vld [vmem:[#allocation8 + $0xfb0] sm:$0xff] }
0x1197   :  { %v3659_v41 = vadd.f32 %v3658_v7, %v3657_v4 }
0x1199   :  { %3660 = vadd.xlane.f32.xlu0 %v3659_v41  ;;  %v6302_v41 = vld [vmem:[#allocation8 + $0xea0] sm:$0xff] }
0x120c   :  { %v3661_v26 = vpop.xlane.xlu0 %3660 }
0x120d   :  { %v3662_v21 = vmul.f32 %v3661_v26, %v7240_v5  ;;  %v6303_v26 = vld [vmem:[#allocation8 + $0xfa0] sm:$0xff] }
0x120f   :  { %v3663_v27 = vsub.f32 %v3657_v4, %v3662_v21  ;;  %v3664_v33 = vsub.f32 %v3658_v7, %v3662_v21  ;;  %v6300_v7 = vld [vmem:[#allocation8 + $0x10b0] sm:$0xff]  ;;  %v6301_v4 = vld [vmem:[#allocation8 + $0xda0] sm:$0xff] }
0x1210   :  { %v6304_v21 = vld [vmem:[#allocation8 + $0x10a0] sm:$0xff] }
0x1211   :  { %v3665_v35 = vmul.f32 %v3663_v27, %v3663_v27  ;;  %v3666_v24 = vmul.f32 %v3664_v33, %v3664_v33 }
0x1213   :  { %v3667_v32 = vadd.f32 %v3666_v24, %v3665_v35  ;;  %v6307_v35 = vld [vmem:[#allocation8 + $0xf90] sm:$0xff] }
0x1214   :  { %v6308_v24 = vld [vmem:[#allocation8 + $0x1090] sm:$0xff] }
0x1215   :  { %3668 = vadd.xlane.f32.xlu1 %v3667_v32  ;;  %v6309_v32 = vld [vmem:[#allocation8 + $0xd80] sm:$0xff] }
0x1288   :  { %v3669_v51 = vpop.xlane.xlu1 %3668 }
0x1289   :  { %v3670_v50 = vmul.f32 %v3669_v51, %v7240_v5  ;;  %v6310_v51 = vld [vmem:[#allocation8 + $0xe80] sm:$0xff] }
0x128b   :  { %v3671_v2 = vadd.f32 1e-05, %v3670_v50  ;;  %v6311_v50 = vld [vmem:[#allocation8 + $0xf80] sm:$0xff] }
0x128d   :  { %5627 = vrsqrt.f32 %v3671_v2  ;;  %vm3678_vm14 = vweird.f32 %v3671_v2 }
0x1293   :  { %v5628_v44 = vpop.eup %5627 }
0x1294   :  { %v3673_v20 = vmul.f32 %v5628_v44, %v3671_v2  ;;  %vm3679_vm13 = vweird.f32 %v5628_v44  ;;  %v6312_v2 = vld [vmem:[#allocation8 + $0x1080] sm:$0xff] }
0x1295   :  { %vm3680_vm15 = vmor %vm3678_vm14, %vm3679_vm13 }
0x1296   :  { %v3674_v46 = vmul.f32 %v5628_v44, %v3673_v20  ;;  %v6314_v20 = vld [vmem:[#allocation8 + $0xe70] sm:$0xff] }
0x1298   :  { %v3675_v63 = vmul.f32 0.5, %v3674_v46  ;;  %v6315_v46 = vld [vmem:[#allocation8 + $0xf70] sm:$0xff] }
0x129a   :  { %v3676_v31 = vsub.f32 1.5, %v3675_v63  ;;  %v6316_v63 = vld [vmem:[#allocation8 + $0x1070] sm:$0xff] }
0x129c   :  { %v3677_v47 = vmul.f32 %v5628_v44, %v3676_v31  ;;  %v6317_v31 = vld [vmem:[#allocation8 + $0xd60] sm:$0xff] }
0x129e   :  { %v3681_v43 = vsel %vm3680_vm15, %v5628_v44, %v3677_v47  ;;  %v6313_v44 = vld [vmem:[#allocation8 + $0xd70] sm:$0xff]  ;;  %v6318_v47 = vld [vmem:[#allocation8 + $0xe60] sm:$0xff] }
0x129f   :  { %v3682_v28 = vmul.f32 %v3681_v43, %v3663_v27  ;;  %v3683_v29 = vmul.f32 %v3681_v43, %v3664_v33  ;;  %v6305_v27 = vld [vmem:[#allocation8 + $0xd90] sm:$0xff]  ;;  %v6319_v43 = vld [vmem:[#allocation8 + $0xf60] sm:$0xff] }
0x12a0   :  { %v6306_v33 = vld [vmem:[#allocation8 + $0xe90] sm:$0xff] }
0x12a1   :  { %v3684_v49 = vmul.f32 %v3682_v28, %v7358_v57  ;;  %v3685_v53 = vmul.f32 %v3683_v29, %v7361_v58  ;;  %v6320_v28 = vld [vmem:[#allocation8 + $0x1060] sm:$0xff]  ;;  %v6321_v29 = vld [vmem:[#allocation8 + $0xd50] sm:$0xff] }
0x12a3   :  { %v7573_v54 = vadd.f32 %v3684_v49, %v7366_v62  ;;  %v7576_v55 = vadd.f32 %v3685_v53, %v7369_v0  ;;  %v6322_v49 = vld [vmem:[#allocation8 + $0xe50] sm:$0xff] }
0x12a4   :  { %v6323_v53 = vld [vmem:[#allocation8 + $0xf50] sm:$0xff] }
0x12a5   :  { %3704 = vmatmul.f32.vlgmr.msrb.gmra.mxu1 %v7573_v54  ;;  %3724 = vmatmul.f32.vlgmr.msrb.gmra.mxu2 %v7576_v55 }
0x12a6   :  { %3744 = vmatmul.f32.vlgmr.msrb.gmra.mxu3 %v7573_v54  ;;  %3764 = vmatmul.f32.vlgmr.msra.gmra.mxu0 %v7576_v55 }
0x12a7   :  { %3852 = vmatpush.msrb.mxu1 %v6281_v56  ;;  %3872 = vmatpush.msrb.mxu2 %v6282_v59  ;;  %v6324_v56 = vld [vmem:[#allocation8 + $0x1050] sm:$0xff]  ;;  %v6325_v59 = vld [vmem:[#allocation8 + $0xd40] sm:$0xff] }
0x12a8   :  { %3892 = vmatpush.msrb.mxu3 %v6283_v60  ;;  %3912 = vmatpush.msra.mxu0 %v6284_v61  ;;  %v6326_v60 = vld [vmem:[#allocation8 + $0xe40] sm:$0xff] }
0x12a9   :  { %3853 = vmatpush.msrb.mxu1 %v6285_v10  ;;  %3873 = vmatpush.msrb.mxu2 %v6286_v22  ;;  %v6327_v61 = vld [vmem:[#allocation8 + $0xf40] sm:$0xff]  ;;  %v6329_v22 = vld [vmem:[#allocation8 + $0xd30] sm:$0xff] }
0x12aa   :  { %3893 = vmatpush.msrb.mxu3 %v6287_v12  ;;  %3913 = vmatpush.msra.mxu0 %v6288_v13  ;;  %v6328_v10 = vld [vmem:[#allocation8 + $0x1040] sm:$0xff]  ;;  %v6330_v12 = vld [vmem:[#allocation8 + $0xe30] sm:$0xff] }
0x12ab   :  { %3854 = vmatpush.msrb.mxu1 %v6289_v14  ;;  %3874 = vmatpush.msrb.mxu2 %v6290_v15  ;;  %v6331_v13 = vld [vmem:[#allocation8 + $0xf30] sm:$0xff]  ;;  %v6333_v15 = vld [vmem:[#allocation8 + $0xd20] sm:$0xff] }
0x12ac   :  { %3894 = vmatpush.msrb.mxu3 %v6291_v16  ;;  %3914 = vmatpush.msra.mxu0 %v6292_v8  ;;  %v6332_v14 = vld [vmem:[#allocation8 + $0x1030] sm:$0xff]  ;;  %v6334_v16 = vld [vmem:[#allocation8 + $0xe20] sm:$0xff] }
0x12ad   :  { %3784 = vmatmul.f32.vlgmr.msra.gmra.mxu1 %v7573_v54  ;;  %3804 = vmatmul.f32.vlgmr.msra.gmra.mxu2 %v7576_v55  ;;  %v6335_v8 = vld [vmem:[#allocation8 + $0xf20] sm:$0xff] }
0x12ae   :  { %3824 = vmatmul.f32.vlgmr.msra.gmra.mxu3 %v7573_v54  ;;  %3844 = vmatmul.f32.vlgmr.msrb.gmra.mxu0 %v7576_v55 }
0x12af   :  { %3855 = vmatpush.msrb.mxu1 %v6293_v9  ;;  %3875 = vmatpush.msrb.mxu2 %v6294_v34  ;;  %v6336_v9 = vld [vmem:[#allocation8 + $0x1020] sm:$0xff]  ;;  %v6337_v34 = vld [vmem:[#allocation8 + $0xd10] sm:$0xff] }
0x12b0   :  { %3895 = vmatpush.msrb.mxu3 %v6295_v19  ;;  %3915 = vmatpush.msra.mxu0 %v6296_v42  ;;  %v6338_v19 = vld [vmem:[#allocation8 + $0xe10] sm:$0xff] }
0x12b1   :  { %3856 = vmatpush.msrb.mxu1 %v6297_v40  ;;  %3876 = vmatpush.msrb.mxu2 %v6298_v48  ;;  %v6339_v42 = vld [vmem:[#allocation8 + $0xf10] sm:$0xff]  ;;  %v6341_v48 = vld [vmem:[#allocation8 + $0xd00] sm:$0xff] }
0x12b2   :  { %3896 = vmatpush.msrb.mxu3 %v6299_v1  ;;  %3916 = vmatpush.msra.mxu0 %v6300_v7  ;;  %v6340_v40 = vld [vmem:[#allocation8 + $0x1010] sm:$0xff]  ;;  %v6342_v1 = vld [vmem:[#allocation8 + $0xe00] sm:$0xff]  ;;  %v6343_v7 = vld [vmem:[#allocation8 + $0xdf8] sm:$0xff] }
0x12b3   :  { %3857 = vmatpush.msrb.mxu1 %v6301_v4  ;;  %3877 = vmatpush.msrb.mxu2 %v6302_v41  ;;  %v6344_v4 = vld [vmem:[#allocation8 + $0xef8] sm:$0xff]  ;;  %v6345_v41 = vld [vmem:[#allocation8 + $0xf00] sm:$0xff] }
0x12b4   :  { %3897 = vmatpush.msrb.mxu3 %v6303_v26  ;;  %3917 = vmatpush.msra.mxu0 %v6304_v21  ;;  %v6346_v26 = vld [vmem:[#allocation8 + $0x1000] sm:$0xff]  ;;  %v6347_v21 = vld [vmem:[#allocation8 + $0xde8] sm:$0xff] }
0x12b5   :  { %3858 = vmatpush.msrb.mxu1 %v6305_v27  ;;  %3878 = vmatpush.msrb.mxu2 %v6306_v33  ;;  %v6348_v27 = vld [vmem:[#allocation8 + $0xee8] sm:$0xff]  ;;  %v6349_v33 = vld [vmem:[#allocation8 + $0xff8] sm:$0xff] }
0x12b6   :  { %3898 = vmatpush.msrb.mxu3 %v6307_v35  ;;  %3918 = vmatpush.msra.mxu0 %v6308_v24  ;;  %v6350_v35 = vld [vmem:[#allocation8 + $0x10f8] sm:$0xff] }
0x12b7   :  { %3859 = vmatpush.msrb.mxu1 %v6309_v32  ;;  %3879 = vmatpush.msrb.mxu2 %v6310_v51  ;;  %v6351_v24 = vld [vmem:[#allocation8 + $0xdd8] sm:$0xff]  ;;  %v6353_v51 = vld [vmem:[#allocation8 + $0xfe8] sm:$0xff] }
0x12b8   :  { %3899 = vmatpush.msrb.mxu3 %v6311_v50  ;;  %3919 = vmatpush.msra.mxu0 %v6312_v2  ;;  %v6352_v32 = vld [vmem:[#allocation8 + $0xed8] sm:$0xff]  ;;  %v6354_v50 = vld [vmem:[#allocation8 + $0x10e8] sm:$0xff] }
0x12b9   :  { %3860 = vmatpush.msrb.mxu1 %v6313_v44  ;;  %3880 = vmatpush.msrb.mxu2 %v6314_v20  ;;  %v6355_v2 = vld [vmem:[#allocation8 + $0xdc8] sm:$0xff]  ;;  %v6357_v20 = vld [vmem:[#allocation8 + $0xfd8] sm:$0xff] }
0x12ba   :  { %3900 = vmatpush.msrb.mxu3 %v6315_v46  ;;  %3920 = vmatpush.msra.mxu0 %v6316_v63  ;;  %v6356_v44 = vld [vmem:[#allocation8 + $0xec8] sm:$0xff]  ;;  %v6358_v46 = vld [vmem:[#allocation8 + $0x10d8] sm:$0xff] }
0x12bb   :  { %3861 = vmatpush.msrb.mxu1 %v6317_v31  ;;  %3881 = vmatpush.msrb.mxu2 %v6318_v47  ;;  %v6359_v63 = vld [vmem:[#allocation8 + $0xdb8] sm:$0xff]  ;;  %v6361_v47 = vld [vmem:[#allocation8 + $0xfc8] sm:$0xff] }
0x12bc   :  { %3901 = vmatpush.msrb.mxu3 %v6319_v43  ;;  %3921 = vmatpush.msra.mxu0 %v6320_v28  ;;  %v6360_v31 = vld [vmem:[#allocation8 + $0xeb8] sm:$0xff]  ;;  %v6362_v43 = vld [vmem:[#allocation8 + $0x10c8] sm:$0xff] }
0x12bd   :  { %3862 = vmatpush.msrb.mxu1 %v6321_v29  ;;  %3882 = vmatpush.msrb.mxu2 %v6322_v49  ;;  %v6363_v28 = vld [vmem:[#allocation8 + $0xda8] sm:$0xff]  ;;  %v6365_v49 = vld [vmem:[#allocation8 + $0xfb8] sm:$0xff] }
0x12be   :  { %3902 = vmatpush.msrb.mxu3 %v6323_v53  ;;  %3922 = vmatpush.msra.mxu0 %v6324_v56  ;;  %v6364_v29 = vld [vmem:[#allocation8 + $0xea8] sm:$0xff]  ;;  %v6366_v53 = vld [vmem:[#allocation8 + $0x10b8] sm:$0xff] }
0x12bf   :  { %3863 = vmatpush.msrb.mxu1 %v6325_v59  ;;  %3883 = vmatpush.msrb.mxu2 %v6326_v60  ;;  %v6367_v56 = vld [vmem:[#allocation8 + $0xd98] sm:$0xff]  ;;  %v6369_v60 = vld [vmem:[#allocation8 + $0xfa8] sm:$0xff] }
0x12c0   :  { %3903 = vmatpush.msrb.mxu3 %v6327_v61  ;;  %3923 = vmatpush.msra.mxu0 %v6328_v10  ;;  %v6368_v59 = vld [vmem:[#allocation8 + $0xe98] sm:$0xff]  ;;  %v6370_v61 = vld [vmem:[#allocation8 + $0x10a8] sm:$0xff] }
0x12c1   :  { %3864 = vmatpush.msrb.mxu1 %v6329_v22  ;;  %3884 = vmatpush.msrb.mxu2 %v6330_v12  ;;  %v6371_v10 = vld [vmem:[#allocation8 + $0xd88] sm:$0xff]  ;;  %v6373_v12 = vld [vmem:[#allocation8 + $0xf98] sm:$0xff] }
0x12c2   :  { %3904 = vmatpush.msrb.mxu3 %v6331_v13  ;;  %3924 = vmatpush.msra.mxu0 %v6332_v14  ;;  %v6372_v22 = vld [vmem:[#allocation8 + $0xe88] sm:$0xff]  ;;  %v6374_v13 = vld [vmem:[#allocation8 + $0x1098] sm:$0xff] }
0x12c3   :  { %3865 = vmatpush.msrb.mxu1 %v6333_v15  ;;  %3885 = vmatpush.msrb.mxu2 %v6334_v16  ;;  %v6375_v14 = vld [vmem:[#allocation8 + $0xd78] sm:$0xff]  ;;  %v6377_v16 = vld [vmem:[#allocation8 + $0xf88] sm:$0xff] }
0x12c4   :  { %3905 = vmatpush.msrb.mxu3 %v6335_v8  ;;  %3925 = vmatpush.msra.mxu0 %v6336_v9  ;;  %v6376_v15 = vld [vmem:[#allocation8 + $0xe78] sm:$0xff]  ;;  %v6378_v8 = vld [vmem:[#allocation8 + $0x1088] sm:$0xff] }
0x12c5   :  { %3866 = vmatpush.msrb.mxu1 %v6337_v34  ;;  %3886 = vmatpush.msrb.mxu2 %v6338_v19  ;;  %v6379_v9 = vld [vmem:[#allocation8 + $0xd68] sm:$0xff]  ;;  %v6381_v19 = vld [vmem:[#allocation8 + $0xf78] sm:$0xff] }
0x12c6   :  { %3906 = vmatpush.msrb.mxu3 %v6339_v42  ;;  %3926 = vmatpush.msra.mxu0 %v6340_v40  ;;  %v6380_v34 = vld [vmem:[#allocation8 + $0xe68] sm:$0xff]  ;;  %v6382_v42 = vld [vmem:[#allocation8 + $0x1078] sm:$0xff] }
0x12c7   :  { %3867 = vmatpush.msrb.mxu1 %v6341_v48  ;;  %3887 = vmatpush.msrb.mxu2 %v6342_v1  ;;  %v6383_v40 = vld [vmem:[#allocation8 + $0xd58] sm:$0xff]  ;;  %v6385_v1 = vld [vmem:[#allocation8 + $0xf68] sm:$0xff] }
0x12c8   :  { %3907 = vmatpush.msrb.mxu3 %v6345_v41  ;;  %3927 = vmatpush.msra.mxu0 %v6346_v26  ;;  %v6384_v48 = vld [vmem:[#allocation8 + $0xe58] sm:$0xff]  ;;  %v6388_v41 = vld [vmem:[#allocation8 + $0xe48] sm:$0xff] }
0x12c9   :  { %3932 = vmatpush.msra.mxu1 %v6343_v7  ;;  %3952 = vmatpush.msra.mxu2 %v6344_v4  ;;  %v6386_v7 = vld [vmem:[#allocation8 + $0x1068] sm:$0xff]  ;;  %v6389_v26 = vld [vmem:[#allocation8 + $0xf58] sm:$0xff] }
0x12ca   :  { %3972 = vmatpush.msra.mxu3 %v6349_v33  ;;  %3992 = vmatpush.msrb.mxu0 %v6350_v35  ;;  %v6387_v4 = vld [vmem:[#allocation8 + $0xd48] sm:$0xff]  ;;  %v6392_v33 = vld [vmem:[#allocation8 + $0xe38] sm:$0xff] }
0x12cb   :  { %3933 = vmatpush.msra.mxu1 %v6347_v21  ;;  %3953 = vmatpush.msra.mxu2 %v6348_v27  ;;  %v6390_v21 = vld [vmem:[#allocation8 + $0x1058] sm:$0xff]  ;;  %v6393_v35 = vld [vmem:[#allocation8 + $0xf48] sm:$0xff] }
0x12cc   :  { %3973 = vmatpush.msra.mxu3 %v6353_v51  ;;  %3993 = vmatpush.msrb.mxu0 %v6354_v50  ;;  %v6391_v27 = vld [vmem:[#allocation8 + $0xd38] sm:$0xff]  ;;  %v6396_v51 = vld [vmem:[#allocation8 + $0xe28] sm:$0xff] }
0x12cd   :  { %3934 = vmatpush.msra.mxu1 %v6351_v24  ;;  %3954 = vmatpush.msra.mxu2 %v6352_v32  ;;  %v6394_v24 = vld [vmem:[#allocation8 + $0x1048] sm:$0xff]  ;;  %v6397_v50 = vld [vmem:[#allocation8 + $0xf38] sm:$0xff] }
0x12ce   :  { %3974 = vmatpush.msra.mxu3 %v6357_v20  ;;  %3994 = vmatpush.msrb.mxu0 %v6358_v46  ;;  %v6395_v32 = vld [vmem:[#allocation8 + $0xd28] sm:$0xff]  ;;  %v6400_v20 = vld [vmem:[#allocation8 + $0xe18] sm:$0xff] }
0x12cf   :  { %3935 = vmatpush.msra.mxu1 %v6355_v2  ;;  %3955 = vmatpush.msra.mxu2 %v6356_v44  ;;  %v6398_v2 = vld [vmem:[#allocation8 + $0x1038] sm:$0xff]  ;;  %v6401_v46 = vld [vmem:[#allocation8 + $0xf28] sm:$0xff] }
0x12d0   :  { %3975 = vmatpush.msra.mxu3 %v6361_v47  ;;  %3995 = vmatpush.msrb.mxu0 %v6362_v43  ;;  %v6399_v44 = vld [vmem:[#allocation8 + $0xd18] sm:$0xff]  ;;  %v6404_v47 = vld [vmem:[#allocation8 + $0xe08] sm:$0xff] }
0x12d1   :  { %3936 = vmatpush.msra.mxu1 %v6359_v63  ;;  %3956 = vmatpush.msra.mxu2 %v6360_v31  ;;  %v6402_v63 = vld [vmem:[#allocation8 + $0x1028] sm:$0xff]  ;;  %v6405_v43 = vld [vmem:[#allocation8 + $0xf18] sm:$0xff] }
0x12d2   :  { %3976 = vmatpush.msra.mxu3 %v6365_v49  ;;  %3996 = vmatpush.msrb.mxu0 %v6366_v53  ;;  %v6403_v31 = vld [vmem:[#allocation8 + $0xd08] sm:$0xff] }
0x12d3   :  { %3937 = vmatpush.msra.mxu1 %v6363_v28  ;;  %3957 = vmatpush.msra.mxu2 %v6364_v29  ;;  %v6406_v28 = vld [vmem:[#allocation8 + $0x1018] sm:$0xff]  ;;  %v6407_v29 = vld [vmem:[#allocation8 + $0xf08] sm:$0xff] }
0x12d4   :  { %3977 = vmatpush.msra.mxu3 %v6369_v60  ;;  %3997 = vmatpush.msrb.mxu0 %v6370_v61  ;;  %v6408_v49 = vld [vmem:[#allocation8 + $0x1008] sm:$0xff] }
0x12d5   :  { %3938 = vmatpush.msra.mxu1 %v6367_v56  ;;  %3958 = vmatpush.msra.mxu2 %v6368_v59 }
0x12d6   :  { %3978 = vmatpush.msra.mxu3 %v6373_v12  ;;  %3998 = vmatpush.msrb.mxu0 %v6374_v13 }
0x12d7   :  { %3939 = vmatpush.msra.mxu1 %v6371_v10  ;;  %3959 = vmatpush.msra.mxu2 %v6372_v22 }
0x12d8   :  { %3979 = vmatpush.msra.mxu3 %v6377_v16  ;;  %3999 = vmatpush.msrb.mxu0 %v6378_v8 }
0x12d9   :  { %3940 = vmatpush.msra.mxu1 %v6375_v14  ;;  %3960 = vmatpush.msra.mxu2 %v6376_v15 }
0x12da   :  { %3980 = vmatpush.msra.mxu3 %v6381_v19  ;;  %4000 = vmatpush.msrb.mxu0 %v6382_v42 }
0x12db   :  { %3941 = vmatpush.msra.mxu1 %v6379_v9  ;;  %3961 = vmatpush.msra.mxu2 %v6380_v34 }
0x12dc   :  { %3981 = vmatpush.msra.mxu3 %v6385_v1  ;;  %4001 = vmatpush.msrb.mxu0 %v6386_v7 }
0x12dd   :  { %3942 = vmatpush.msra.mxu1 %v6383_v40  ;;  %3962 = vmatpush.msra.mxu2 %v6384_v48 }
0x12de   :  { %3982 = vmatpush.msra.mxu3 %v6389_v26  ;;  %4002 = vmatpush.msrb.mxu0 %v6390_v21 }
0x12df   :  { %3943 = vmatpush.msra.mxu1 %v6387_v4  ;;  %3963 = vmatpush.msra.mxu2 %v6388_v41 }
0x12e0   :  { %3983 = vmatpush.msra.mxu3 %v6393_v35  ;;  %4003 = vmatpush.msrb.mxu0 %v6394_v24 }
0x12e1   :  { %3944 = vmatpush.msra.mxu1 %v6391_v27  ;;  %3964 = vmatpush.msra.mxu2 %v6392_v33 }
0x12e2   :  { %3984 = vmatpush.msra.mxu3 %v6397_v50  ;;  %4004 = vmatpush.msrb.mxu0 %v6398_v2 }
0x12e3   :  { %3945 = vmatpush.msra.mxu1 %v6395_v32  ;;  %3965 = vmatpush.msra.mxu2 %v6396_v51 }
0x12e4   :  { %3985 = vmatpush.msra.mxu3 %v6401_v46  ;;  %4005 = vmatpush.msrb.mxu0 %v6402_v63 }
0x12e5   :  { %3946 = vmatpush.msra.mxu1 %v6399_v44  ;;  %3966 = vmatpush.msra.mxu2 %v6400_v20 }
0x12e6   :  { %3986 = vmatpush.msra.mxu3 %v6405_v43  ;;  %4006 = vmatpush.msrb.mxu0 %v6406_v28  ;;  %v4077_v43 = vld [vmem:[#allocation8 + $0x9f0] sm:$0xff] }
0x12e7   :  { %3947 = vmatpush.msra.mxu1 %v6403_v31  ;;  %3967 = vmatpush.msra.mxu2 %v6404_v47  ;;  %v4109_v28 = vld [vmem:[#allocation8 + $0xaf0] sm:$0xff] }
0x12e8   :  { %3987 = vmatpush.msra.mxu3 %v6407_v29  ;;  %4007 = vmatpush.msrb.mxu0 %v6408_v49  ;;  %v4078_v29 = vld [vmem:[#allocation8 + $0x9f8] sm:$0xff] }
0x12e9   :  { %v4110_v49 = vld [vmem:[#allocation8 + $0xaf8] sm:$0xff] }
0x1322   :  { %v3705_v53 = vpop.f32.mrf.mxu1 }
0x1323   :  { %v3706_v56 = vadd.f32 %v3705_v53, %v7387_v37  ;;  %v3765_v60 = vpop.f32.mrf.mxu0  ;;  %v4075_v53 = vld [vmem:[#allocation8 + $0x9e0] sm:$0xff] }
0x1328   :  { %v3725_v59 = vpop.f32.mrf.mxu2 }
0x1329   :  { %v3726_v61 = vadd.f32 %v3725_v59, %v3706_v56  ;;  %v3745_v10 = vpop.f32.mrf.mxu3  ;;  %v4107_v56 = vld [vmem:[#allocation8 + $0xae0] sm:$0xff]  ;;  %v4108_v59 = vld [vmem:[#allocation8 + $0xae8] sm:$0xff] }
0x132a   :  { %v3746_v22 = vadd.f32 %v3745_v10, %v7389_v38  ;;  %v3785_v14 = vpop.f32.mrf.mxu1 }
0x132b   :  { %v3848_v12 = vmax.f32 %v3726_v61, 0.0  ;;  %v3786_v16 = vadd.f32 %v3785_v14, %v7393_v45  ;;  %v3845_v42 = vpop.f32.mrf.mxu0  ;;  %v4073_v14 = vld [vmem:[#allocation8 + $0x9d0] sm:$0xff] }
0x132c   :  { %v3766_v13 = vadd.f32 %v3765_v60, %v3746_v22 }
0x132d   :  { %3868 = vmatmul.f32.vlgmr.msrb.gmra.mxu1 %v3848_v12 }
0x132e   :  { %v3849_v15 = vmax.f32 %v3766_v13, 0.0  ;;  %4111 = vmatpush.msrb.mxu1 %v4077_v43  ;;  %v4060_v43 = vld [vmem:[#allocation8 + $0x968] sm:$0xff] }
0x1330   :  { %3888 = vmatmul.f32.vlgmr.msrb.gmra.mxu2 %v3849_v15  ;;  %v3805_v8 = vpop.f32.mrf.mxu2  ;;  %4112 = vmatpush.msrb.mxu1 %v4075_v53  ;;  %v4058_v53 = vld [vmem:[#allocation8 + $0x958] sm:$0xff] }
0x1331   :  { %v3806_v9 = vadd.f32 %v3805_v8, %v3786_v16  ;;  %v3825_v34 = vpop.f32.mrf.mxu3  ;;  %4131 = vmatpush.msrb.mxu2 %v4109_v28  ;;  %v4074_v16 = vld [vmem:[#allocation8 + $0x9d8] sm:$0xff]  ;;  %v4092_v28 = vld [vmem:[#allocation8 + $0xa68] sm:$0xff] }
0x1332   :  { %v3826_v19 = vadd.f32 %v3825_v34, %v7395_v52  ;;  %4113 = vmatpush.msrb.mxu1 %v4073_v14  ;;  %v4106_v8 = vld [vmem:[#allocation8 + $0xad8] sm:$0xff]  ;;  %v4103_v34 = vld [vmem:[#allocation8 + $0xac0] sm:$0xff] }
0x1333   :  { %v3850_v40 = vmax.f32 %v3806_v9, 0.0  ;;  %4132 = vmatpush.msrb.mxu2 %v4107_v56  ;;  %v4071_v9 = vld [vmem:[#allocation8 + $0x9c0] sm:$0xff]  ;;  %v4090_v56 = vld [vmem:[#allocation8 + $0xa58] sm:$0xff] }
0x1334   :  { %v3846_v48 = vadd.f32 %v3845_v42, %v3826_v19  ;;  %v4072_v19 = vld [vmem:[#allocation8 + $0x9c8] sm:$0xff]  ;;  %4114 = vmatpush.msrb.mxu1 %v4071_v9  ;;  %v4086_v14 = vld [vmem:[#allocation8 + $0xa38] sm:$0xff] }
0x1335   :  { %3908 = vmatmul.f32.vlgmr.msrb.gmra.mxu3 %v3850_v40  ;;  %3948 = vmatmul.f32.vlgmr.msra.gmra.mxu1 %v3848_v12  ;;  %v4104_v42 = vld [vmem:[#allocation8 + $0xac8] sm:$0xff] }
0x1336   :  { %v3851_v1 = vmax.f32 %v3846_v48, 0.0  ;;  %4151 = vmatpush.msrb.mxu3 %v4078_v29  ;;  %v4101_v48 = vld [vmem:[#allocation8 + $0xab0] sm:$0xff]  ;;  %v4084_v9 = vld [vmem:[#allocation8 + $0xa28] sm:$0xff] }
0x1337   :  { %v4057_v29 = vld [vmem:[#allocation8 + $0x950] sm:$0xff] }
0x1338   :  { %3928 = vmatmul.f32.vlgmr.msra.gmra.mxu0 %v3851_v1  ;;  %3968 = vmatmul.f32.vlgmr.msra.gmra.mxu2 %v3849_v15  ;;  %v4105_v15 = vld [vmem:[#allocation8 + $0xad0] sm:$0xff] }
0x1339   :  { %4171 = vmatpush.msra.mxu0 %v4110_v49  ;;  %4133 = vmatpush.msrb.mxu2 %v4105_v15  ;;  %v4089_v49 = vld [vmem:[#allocation8 + $0xa50] sm:$0xff]  ;;  %v4051_v15 = vld [vmem:[#allocation8 + $0x920] sm:$0xff] }
0x133b   :  { %4172 = vmatpush.msra.mxu0 %v4108_v59  ;;  %4134 = vmatpush.msrb.mxu2 %v4103_v34  ;;  %v4087_v59 = vld [vmem:[#allocation8 + $0xa40] sm:$0xff]  ;;  %v4049_v34 = vld [vmem:[#allocation8 + $0x910] sm:$0xff] }
0x133d   :  { %3988 = vmatmul.f32.vlgmr.msra.gmra.mxu3 %v3850_v40  ;;  %4173 = vmatpush.msra.mxu0 %v4106_v8  ;;  %v4069_v40 = vld [vmem:[#allocation8 + $0x9b0] sm:$0xff]  ;;  %v4052_v8 = vld [vmem:[#allocation8 + $0x928] sm:$0xff] }
0x133e   :  { %4115 = vmatpush.msrb.mxu1 %v4069_v40  ;;  %4135 = vmatpush.msrb.mxu2 %v4101_v48  ;;  %v4082_v40 = vld [vmem:[#allocation8 + $0xa18] sm:$0xff]  ;;  %v4047_v48 = vld [vmem:[#allocation8 + $0x900] sm:$0xff] }
0x133f   :  { %4174 = vmatpush.msra.mxu0 %v4104_v42  ;;  %v4050_v42 = vld [vmem:[#allocation8 + $0x918] sm:$0xff] }
0x1340   :  { %4008 = vmatmul.f32.vlgmr.msrb.gmra.mxu0 %v3851_v1  ;;  %v4070_v1 = vld [vmem:[#allocation8 + $0x9b8] sm:$0xff] }
0x13aa   :  { %v3869_v4 = vpop.f32.mrf.mxu1 }
0x13b2   :  { %v3949_v35 = vpop.f32.mrf.mxu1 }
0x13b3   :  { %v3889_v7 = vpop.f32.mrf.mxu2 }
0x13b4   :  { %v3890_v21 = vadd.f32 %v3889_v7, %v3869_v4  ;;  %v4102_v7 = vld [vmem:[#allocation8 + $0xab8] sm:$0xff]  ;;  %v4067_v4 = vld [vmem:[#allocation8 + $0x9a0] sm:$0xff] }
0x13b5   :  { %v3929_v41 = vpop.f32.mrf.mxu0  ;;  %4175 = vmatpush.msra.mxu0 %v4102_v7  ;;  %4116 = vmatpush.msrb.mxu1 %v4067_v4  ;;  %v4048_v7 = vld [vmem:[#allocation8 + $0x908] sm:$0xff] }
0x13b6   :  { %v4080_v4 = vld [vmem:[#allocation8 + $0xa08] sm:$0xff] }
0x13b8   :  { %v3909_v26 = vpop.f32.mrf.mxu3 }
0x13b9   :  { %v3910_v27 = vadd.f32 %v3909_v26, %v3890_v21  ;;  %v4068_v26 = vld [vmem:[#allocation8 + $0x9a8] sm:$0xff] }
0x13ba   :  { %v4100_v21 = vld [vmem:[#allocation8 + $0xaa8] sm:$0xff] }
0x13bb   :  { %v3969_v33 = vpop.f32.mrf.mxu2  ;;  %v3930_v24 = vadd.f32 %v3929_v41, %v3910_v27  ;;  %v4099_v41 = vld [vmem:[#allocation8 + $0xaa0] sm:$0xff]  ;;  %4176 = vmatpush.msra.mxu0 %v4100_v21  ;;  %v4065_v27 = vld [vmem:[#allocation8 + $0x990] sm:$0xff] }
0x13bc   :  { %v3970_v32 = vadd.f32 %v3969_v33, %v3949_v35  ;;  %4136 = vmatpush.msrb.mxu2 %v4099_v41  ;;  %v4097_v33 = vld [vmem:[#allocation8 + $0xa90] sm:$0xff]  ;;  %v4066_v35 = vld [vmem:[#allocation8 + $0x998] sm:$0xff]  ;;  %4117 = vmatpush.msrb.mxu1 %v4065_v27  ;;  %v4219_v21 = vld [vmem:[#allocation8 + $0xbe0] sm:$0xff] }
0x13bd   :  { %v4009_v2 = vpop.f32.mrf.mxu0  ;;  %v4012_v44 = vadd.f32 %v3930_v24, %v7573_v54  ;;  %v4076_v54 = vld [vmem:[#allocation8 + $0x9e8] sm:$0xff]  ;;  %v4098_v24 = vld [vmem:[#allocation8 + $0xa98] sm:$0xff]  ;;  %v4221_v41 = vld [vmem:[#allocation8 + $0xbf0] sm:$0xff] }
0x13be   :  { %4152 = vmatpush.msrb.mxu3 %v4076_v54  ;;  %4137 = vmatpush.msrb.mxu2 %v4097_v33  ;;  %v4055_v54 = vld [vmem:[#allocation8 + $0x940] sm:$0xff]  ;;  %v4253_v27 = vld [vmem:[#allocation8 + $0xcf0] sm:$0xff]  ;;  %v4220_v33 = vld [vmem:[#allocation8 + $0xbe8] sm:$0xff] }
0x13bf   :  { %v4014_v63 = vadd.f32 %v4012_v44, %v7401_v23  ;;  %4177 = vmatpush.msra.mxu0 %v4098_v24  ;;  %v4061_v44 = vld [vmem:[#allocation8 + $0x970] sm:$0xff] }
0x13c0   :  { %v3989_v51 = vpop.f32.mrf.mxu3  ;;  %4153 = vmatpush.msrb.mxu3 %v4074_v16  ;;  %v4083_v16 = vld [vmem:[#allocation8 + $0xa20] sm:$0xff] }
0x13c1   :  { %v3990_v50 = vadd.f32 %v3989_v51, %v3970_v32  ;;  %v4063_v32 = vld [vmem:[#allocation8 + $0x980] sm:$0xff] }
0x13c2   :  { %4154 = vmatpush.msrb.mxu3 %v4072_v19  ;;  %v4095_v51 = vld [vmem:[#allocation8 + $0xa80] sm:$0xff]  ;;  %4118 = vmatpush.msrb.mxu1 %v4063_v32  ;;  %v4081_v19 = vld [vmem:[#allocation8 + $0xa10] sm:$0xff] }
0x13c3   :  { %v4010_v20 = vadd.f32 %v4009_v2, %v3990_v50  ;;  %v4064_v50 = vld [vmem:[#allocation8 + $0x988] sm:$0xff]  ;;  %4138 = vmatpush.msrb.mxu2 %v4095_v51  ;;  %v4217_v32 = vld [vmem:[#allocation8 + $0xbd0] sm:$0xff]  ;;  %v4251_v51 = vld [vmem:[#allocation8 + $0xce0] sm:$0xff] }
0x13c4   :  { %4155 = vmatpush.msrb.mxu3 %v4070_v1  ;;  %v4096_v2 = vld [vmem:[#allocation8 + $0xa88] sm:$0xff]  ;;  %4119 = vmatpush.msrb.mxu1 %v4061_v44  ;;  %v4079_v1 = vld [vmem:[#allocation8 + $0xa00] sm:$0xff] }
0x13c5   :  { %v4013_v46 = vadd.f32 %v4010_v20, %v7576_v55  ;;  %4178 = vmatpush.msra.mxu0 %v4096_v2  ;;  %v4093_v20 = vld [vmem:[#allocation8 + $0xa70] sm:$0xff]  ;;  %v4252_v44 = vld [vmem:[#allocation8 + $0xce8] sm:$0xff] }
0x13c6   :  { %4156 = vmatpush.msrb.mxu3 %v4068_v26  ;;  %4139 = vmatpush.msrb.mxu2 %v4093_v20  ;;  %v4222_v26 = vld [vmem:[#allocation8 + $0xbf8] sm:$0xff]  ;;  %v4249_v20 = vld [vmem:[#allocation8 + $0xcd0] sm:$0xff] }
0x13c7   :  { %v4015_v31 = vadd.f32 %v4013_v46, %v7404_v11  ;;  %v4062_v46 = vld [vmem:[#allocation8 + $0x978] sm:$0xff] }
0x13c8   :  { %4157 = vmatpush.msrb.mxu3 %v4066_v35  ;;  %v4254_v35 = vld [vmem:[#allocation8 + $0xcf8] sm:$0xff] }
0x13c9   :  { %v4016_v47 = vadd.f32 %v4015_v31, %v4014_v63 }
0x13ca   :  { %4158 = vmatpush.msrb.mxu3 %v4064_v50  ;;  %v4218_v50 = vld [vmem:[#allocation8 + $0xbd8] sm:$0xff] }
0x13cb   :  { %4017 = vadd.xlane.f32.xlu2 %v4016_v47  ;;  %v4091_v47 = vld [vmem:[#allocation8 + $0xa60] sm:$0xff] }
0x13cc   :  { %4159 = vmatpush.msrb.mxu3 %v4062_v46  ;;  %4140 = vmatpush.msrb.mxu2 %v4091_v47  ;;  %v4215_v46 = vld [vmem:[#allocation8 + $0xbc0] sm:$0xff] }
0x13ce   :  { %4160 = vmatpush.msrb.mxu3 %v4060_v43  ;;  %4141 = vmatpush.msrb.mxu2 %v4089_v49  ;;  %v4247_v43 = vld [vmem:[#allocation8 + $0xcc0] sm:$0xff]  ;;  %v4214_v49 = vld [vmem:[#allocation8 + $0xbb8] sm:$0xff] }
0x13d0   :  { %4161 = vmatpush.msrb.mxu3 %v4058_v53  ;;  %4142 = vmatpush.msrb.mxu2 %v4087_v59  ;;  %v4245_v53 = vld [vmem:[#allocation8 + $0xcb0] sm:$0xff]  ;;  %v4212_v59 = vld [vmem:[#allocation8 + $0xba8] sm:$0xff] }
0x143e   :  { %v4018_v55 = vpop.xlane.xlu2 %4017 }
0x143f   :  { %v4019_v60 = vmul.f32 %v4018_v55, %v7240_v5  ;;  %v4056_v55 = vld [vmem:[#allocation8 + $0x948] sm:$0xff] }
0x1440   :  { %4162 = vmatpush.msrb.mxu3 %v4056_v55  ;;  %v4243_v55 = vld [vmem:[#allocation8 + $0xca0] sm:$0xff] }
0x1441   :  { %v7595_v61 = vsub.f32 %v4014_v63, %v4019_v60  ;;  %v7597_v10 = vsub.f32 %v4015_v31, %v4019_v60  ;;  %v4094_v63 = vld [vmem:[#allocation8 + $0xa78] sm:$0xff]  ;;  %v4059_v31 = vld [vmem:[#allocation8 + $0x960] sm:$0xff]  ;;  %v4088_v60 = vld [vmem:[#allocation8 + $0xa48] sm:$0xff] }
0x1442   :  { %4179 = vmatpush.msra.mxu0 %v4094_v63  ;;  %4120 = vmatpush.msrb.mxu1 %v4059_v31  ;;  %v4216_v63 = vld [vmem:[#allocation8 + $0xbc8] sm:$0xff]  ;;  %v4250_v31 = vld [vmem:[#allocation8 + $0xcd8] sm:$0xff] }
0x1443   :  { %v4022_v22 = vmul.f32 %v7595_v61, %v7595_v61  ;;  %v4023_v12 = vmul.f32 %v7597_v10, %v7597_v10 }
0x1444   :  { %4180 = vmatpush.msra.mxu0 %v4092_v28  ;;  %4121 = vmatpush.msrb.mxu1 %v4057_v29  ;;  %v4248_v28 = vld [vmem:[#allocation8 + $0xcc8] sm:$0xff]  ;;  %v4213_v29 = vld [vmem:[#allocation8 + $0xbb0] sm:$0xff] }
0x1445   :  { %v4024_v13 = vadd.f32 %v4023_v12, %v4022_v22  ;;  %v4053_v22 = vld [vmem:[#allocation8 + $0x930] sm:$0xff] }
0x1446   :  { %4181 = vmatpush.msra.mxu0 %v4090_v56  ;;  %4122 = vmatpush.msrb.mxu1 %v4055_v54  ;;  %v4085_v12 = vld [vmem:[#allocation8 + $0xa30] sm:$0xff]  ;;  %v4246_v56 = vld [vmem:[#allocation8 + $0xcb8] sm:$0xff]  ;;  %v4211_v54 = vld [vmem:[#allocation8 + $0xba0] sm:$0xff] }
0x1447   :  { %4025 = vadd.xlane.f32.xlu0 %v4024_v13  ;;  %v4054_v13 = vld [vmem:[#allocation8 + $0x938] sm:$0xff]  ;;  %4143 = vmatpush.msrb.mxu2 %v4085_v12 }
0x1448   :  { %4182 = vmatpush.msra.mxu0 %v4088_v60  ;;  %4123 = vmatpush.msrb.mxu1 %v4053_v22  ;;  %v4244_v60 = vld [vmem:[#allocation8 + $0xca8] sm:$0xff]  ;;  %v4209_v22 = vld [vmem:[#allocation8 + $0xb90] sm:$0xff]  ;;  %v4210_v12 = vld [vmem:[#allocation8 + $0xb98] sm:$0xff] }
0x1449   :  { %4163 = vmatpush.msrb.mxu3 %v4054_v13  ;;  %4144 = vmatpush.msrb.mxu2 %v4083_v16  ;;  %v4241_v13 = vld [vmem:[#allocation8 + $0xc90] sm:$0xff]  ;;  %v4208_v16 = vld [vmem:[#allocation8 + $0xb88] sm:$0xff] }
0x144a   :  { %4183 = vmatpush.msra.mxu0 %v4086_v14  ;;  %4124 = vmatpush.msrb.mxu1 %v4051_v15  ;;  %v4242_v14 = vld [vmem:[#allocation8 + $0xc98] sm:$0xff]  ;;  %v4207_v15 = vld [vmem:[#allocation8 + $0xb80] sm:$0xff] }
0x144b   :  { %4164 = vmatpush.msrb.mxu3 %v4052_v8  ;;  %4145 = vmatpush.msrb.mxu2 %v4081_v19 }
0x144c   :  { %4184 = vmatpush.msra.mxu0 %v4084_v9  ;;  %4125 = vmatpush.msrb.mxu1 %v4049_v34  ;;  %v4239_v9 = vld [vmem:[#allocation8 + $0xc80] sm:$0xff]  ;;  %v4240_v34 = vld [vmem:[#allocation8 + $0xc88] sm:$0xff] }
0x144d   :  { %4165 = vmatpush.msrb.mxu3 %v4050_v42  ;;  %4146 = vmatpush.msrb.mxu2 %v4079_v1  ;;  %v4205_v42 = vld [vmem:[#allocation8 + $0xb70] sm:$0xff]  ;;  %v4238_v1 = vld [vmem:[#allocation8 + $0xc78] sm:$0xff] }
0x144e   :  { %4185 = vmatpush.msra.mxu0 %v4082_v40  ;;  %4126 = vmatpush.msrb.mxu1 %v4047_v48  ;;  %v4206_v40 = vld [vmem:[#allocation8 + $0xb78] sm:$0xff]  ;;  %v4237_v48 = vld [vmem:[#allocation8 + $0xc70] sm:$0xff] }
0x144f   :  { %4166 = vmatpush.msrb.mxu3 %v4048_v7  ;;  %4275 = vmatpush.msra.mxu2 %v4253_v27 }
0x1450   :  { %4186 = vmatpush.msra.mxu0 %v4080_v4  ;;  %4255 = vmatpush.msra.mxu1 %v4221_v41  ;;  %v4203_v4 = vld [vmem:[#allocation8 + $0xb60] sm:$0xff]  ;;  %v4204_v41 = vld [vmem:[#allocation8 + $0xb68] sm:$0xff] }
0x1451   :  { %4295 = vmatpush.msra.mxu3 %v4222_v26  ;;  %4276 = vmatpush.msra.mxu2 %v4251_v51  ;;  %v4235_v26 = vld [vmem:[#allocation8 + $0xc60] sm:$0xff] }
0x1452   :  { %4315 = vmatpush.msrb.mxu0 %v4254_v35  ;;  %4256 = vmatpush.msra.mxu1 %v4219_v21  ;;  %v4236_v21 = vld [vmem:[#allocation8 + $0xc68] sm:$0xff]  ;;  %v4202_v35 = vld [vmem:[#allocation8 + $0xb58] sm:$0xff] }
0x1453   :  { %4296 = vmatpush.msra.mxu3 %v4220_v33  ;;  %4277 = vmatpush.msra.mxu2 %v4249_v20  ;;  %v4201_v33 = vld [vmem:[#allocation8 + $0xb50] sm:$0xff] }
0x1454   :  { %4316 = vmatpush.msrb.mxu0 %v4252_v44  ;;  %4257 = vmatpush.msra.mxu1 %v4217_v32 }
0x1455   :  { %4297 = vmatpush.msra.mxu3 %v4218_v50  ;;  %4278 = vmatpush.msra.mxu2 %v4247_v43  ;;  %v4197_v43 = vld [vmem:[#allocation8 + $0xb30] sm:$0xff] }
0x1456   :  { %4317 = vmatpush.msrb.mxu0 %v4250_v31  ;;  %4258 = vmatpush.msra.mxu1 %v4215_v46  ;;  %v4200_v31 = vld [vmem:[#allocation8 + $0xb48] sm:$0xff] }
0x1457   :  { %4298 = vmatpush.msra.mxu3 %v4216_v63  ;;  %4279 = vmatpush.msra.mxu2 %v4245_v53  ;;  %v4195_v53 = vld [vmem:[#allocation8 + $0xb20] sm:$0xff] }
0x1458   :  { %4318 = vmatpush.msrb.mxu0 %v4248_v28  ;;  %4259 = vmatpush.msra.mxu1 %v4213_v29  ;;  %v4231_v28 = vld [vmem:[#allocation8 + $0xc40] sm:$0xff]  ;;  %v4198_v29 = vld [vmem:[#allocation8 + $0xb38] sm:$0xff] }
0x1459   :  { %4299 = vmatpush.msra.mxu3 %v4214_v49  ;;  %4280 = vmatpush.msra.mxu2 %v4243_v55  ;;  %v4232_v49 = vld [vmem:[#allocation8 + $0xc48] sm:$0xff]  ;;  %v4193_v55 = vld [vmem:[#allocation8 + $0xb10] sm:$0xff] }
0x145a   :  { %4319 = vmatpush.msrb.mxu0 %v4246_v56  ;;  %4260 = vmatpush.msra.mxu1 %v4211_v54  ;;  %v4229_v56 = vld [vmem:[#allocation8 + $0xc30] sm:$0xff]  ;;  %v4196_v54 = vld [vmem:[#allocation8 + $0xb28] sm:$0xff] }
0x145b   :  { %4300 = vmatpush.msra.mxu3 %v4212_v59  ;;  %4281 = vmatpush.msra.mxu2 %v4241_v13  ;;  %v4230_v59 = vld [vmem:[#allocation8 + $0xc38] sm:$0xff]  ;;  %v4191_v13 = vld [vmem:[#allocation8 + $0xb00] sm:$0xff] }
0x145c   :  { %4320 = vmatpush.msrb.mxu0 %v4244_v60  ;;  %4261 = vmatpush.msra.mxu1 %v4209_v22  ;;  %v4227_v60 = vld [vmem:[#allocation8 + $0xc20] sm:$0xff]  ;;  %v4194_v22 = vld [vmem:[#allocation8 + $0xb18] sm:$0xff] }
0x145d   :  { %4301 = vmatpush.msra.mxu3 %v4210_v12  ;;  %4282 = vmatpush.msra.mxu2 %v4239_v9  ;;  %v4228_v12 = vld [vmem:[#allocation8 + $0xc28] sm:$0xff] }
0x145e   :  { %4321 = vmatpush.msrb.mxu0 %v4242_v14  ;;  %4262 = vmatpush.msra.mxu1 %v4207_v15  ;;  %v4225_v14 = vld [vmem:[#allocation8 + $0xc10] sm:$0xff]  ;;  %v4192_v15 = vld [vmem:[#allocation8 + $0xb08] sm:$0xff] }
0x145f   :  { %4302 = vmatpush.msra.mxu3 %v4208_v16  ;;  %4283 = vmatpush.msra.mxu2 %v4237_v48  ;;  %v4226_v16 = vld [vmem:[#allocation8 + $0xc18] sm:$0xff]  ;;  %v4224_v9 = vld [vmem:[#allocation8 + $0xc08] sm:$0xff] }
0x1460   :  { %4322 = vmatpush.msrb.mxu0 %v4240_v34  ;;  %4263 = vmatpush.msra.mxu1 %v4205_v42 }
0x1461   :  { %4303 = vmatpush.msra.mxu3 %v4206_v40  ;;  %4284 = vmatpush.msra.mxu2 %v4235_v26 }
0x1462   :  { %4323 = vmatpush.msrb.mxu0 %v4238_v1  ;;  %4264 = vmatpush.msra.mxu1 %v4203_v4 }
0x1463   :  { %4304 = vmatpush.msra.mxu3 %v4204_v41 }
0x1464   :  { %4324 = vmatpush.msrb.mxu0 %v4236_v21  ;;  %4265 = vmatpush.msra.mxu1 %v4201_v33 }
0x1465   :  { %4305 = vmatpush.msra.mxu3 %v4202_v35 }
0x1467   :  { %4306 = vmatpush.msra.mxu3 %v4200_v31  ;;  %v4422_v31 = vld [vmem:[#allocation11 + $0x1c0] sm:$0xff] }
0x1469   :  { %4307 = vmatpush.msra.mxu3 %v4198_v29  ;;  %v4419_v29 = vld [vmem:[#allocation11 + $0x1a8] sm:$0xff] }
0x146b   :  { %4308 = vmatpush.msra.mxu3 %v4196_v54  ;;  %v4415_v54 = vld [vmem:[#allocation11 + $0x188] sm:$0xff] }
0x146d   :  { %4309 = vmatpush.msra.mxu3 %v4194_v22  ;;  %v4411_v22 = vld [vmem:[#allocation11 + $0x168] sm:$0xff] }
0x146f   :  { %4310 = vmatpush.msra.mxu3 %v4192_v15  ;;  %v4407_v15 = vld [vmem:[#allocation11 + $0x148] sm:$0xff] }
0x14ba   :  { %v4026_v24 = vpop.xlane.xlu0 %4025 }
0x14bb   :  { %v4027_v2 = vmul.f32 %v4026_v24, %v7240_v5 }
0x14bd   :  { %v7604_v47 = vadd.f32 1e-05, %v4027_v2 }
0x14bf   :  { %5629 = vrsqrt.f32 %v7604_v47  ;;  %vm4035_vm1 = vweird.f32 %v7604_v47 }
0x14c5   :  { %v5630_v8 = vpop.eup %5629 }
0x14c6   :  { %v4030_v19 = vmul.f32 %v5630_v8, %v7604_v47  ;;  %vm4036_vm0 = vweird.f32 %v5630_v8  ;;  %v4234_v47 = vld [vmem:[#allocation8 + $0xc58] sm:$0xff] }
0x14c7   :  { %vm4037_vm2 = vmor %vm4035_vm1, %vm4036_vm0  ;;  %4325 = vmatpush.msrb.mxu0 %v4234_v47  ;;  %v4486_v47 = vld [vmem:[#allocation11 + $0x3c0] sm:$0xff] }
0x14c8   :  { %v4031_v7 = vmul.f32 %v5630_v8, %v4030_v19 }
0x14c9   :  { %4326 = vmatpush.msrb.mxu0 %v4232_v49  ;;  %v4483_v49 = vld [vmem:[#allocation11 + $0x3a8] sm:$0xff] }
0x14ca   :  { %v4032_v27 = vmul.f32 0.5, %v4031_v7 }
0x14cb   :  { %4327 = vmatpush.msrb.mxu0 %v4230_v59  ;;  %v4479_v59 = vld [vmem:[#allocation11 + $0x388] sm:$0xff] }
0x14cc   :  { %v4033_v24 = vsub.f32 1.5, %v4032_v27 }
0x14cd   :  { %4328 = vmatpush.msrb.mxu0 %v4228_v12  ;;  %v4475_v12 = vld [vmem:[#allocation11 + $0x368] sm:$0xff] }
0x14ce   :  { %v4034_v32 = vmul.f32 %v5630_v8, %v4033_v24 }
0x14cf   :  { %4329 = vmatpush.msrb.mxu0 %v4226_v16  ;;  %v4471_v16 = vld [vmem:[#allocation11 + $0x348] sm:$0xff] }
0x14d0   :  { %v4038_v51 = vsel %vm4037_vm2, %v5630_v8, %v4034_v32  ;;  %v4223_v8 = vld [vmem:[#allocation8 + $0xc00] sm:$0xff] }
0x14d1   :  { %v4039_v50 = vmul.f32 %v4038_v51, %v7595_v61  ;;  %v4040_v2 = vmul.f32 %v4038_v51, %v7597_v10  ;;  %v4199_v61 = vld [vmem:[#allocation8 + $0xb40] sm:$0xff]  ;;  %v4233_v10 = vld [vmem:[#allocation8 + $0xc50] sm:$0xff]  ;;  %4330 = vmatpush.msrb.mxu0 %v4224_v9 }
0x14d2   :  { %4266 = vmatpush.msra.mxu1 %v4199_v61  ;;  %4285 = vmatpush.msra.mxu2 %v4233_v10  ;;  %v4427_v61 = vld [vmem:[#allocation11 + $0x1e8] sm:$0xff]  ;;  %v4466_v9 = vld [vmem:[#allocation11 + $0x320] sm:$0xff] }
0x14d3   :  { %v4041_v44 = vmul.f32 %v4039_v50, %v7412_v25  ;;  %v4042_v20 = vmul.f32 %v4040_v2, %v7415_v30  ;;  %v4491_v10 = vld [vmem:[#allocation11 + $0x3e8] sm:$0xff] }
0x14d4   :  { %4267 = vmatpush.msra.mxu1 %v4197_v43  ;;  %4286 = vmatpush.msra.mxu2 %v4231_v28  ;;  %v4423_v43 = vld [vmem:[#allocation11 + $0x1c8] sm:$0xff]  ;;  %v4418_v28 = vld [vmem:[#allocation11 + $0x1a0] sm:$0xff] }
0x14d5   :  { %v7614_v46 = vadd.f32 %v4041_v44, %v7418_v36  ;;  %v7617_v63 = vadd.f32 %v4042_v20, %v7421_v39  ;;  %v4426_v44 = vld [vmem:[#allocation11 + $0x1e0] sm:$0xff] }
0x14d6   :  { %4268 = vmatpush.msra.mxu1 %v4195_v53  ;;  %4287 = vmatpush.msra.mxu2 %v4229_v56  ;;  %v4490_v20 = vld [vmem:[#allocation11 + $0x3e0] sm:$0xff] }
0x14d7   :  { %4127 = vmatmul.f32.vlgmr.msrb.gmra.mxu1 %v7614_v46  ;;  %4045 = vst [vmem:[#allocation20] sm:$0xff] %v7614_v46  ;;  %4147 = vmatmul.f32.vlgmr.msrb.gmra.mxu2 %v7617_v63  ;;  %v4414_v53 = vld [vmem:[#allocation11 + $0x180] sm:$0xff] }
0x14d8   :  { %4046 = vst [vmem:[#allocation20 + $0x8] sm:$0xff] %v7617_v63  ;;  %4167 = vmatmul.f32.vlgmr.msrb.gmra.mxu3 %v7614_v46  ;;  %4187 = vmatmul.f32.vlgmr.msra.gmra.mxu0 %v7617_v63  ;;  %v4478_v56 = vld [vmem:[#allocation11 + $0x380] sm:$0xff] }
0x14d9   :  { %4269 = vmatpush.msra.mxu1 %v4193_v55  ;;  %4288 = vmatpush.msra.mxu2 %v4227_v60  ;;  %v4410_v55 = vld [vmem:[#allocation11 + $0x160] sm:$0xff]  ;;  %5561 = dma.vmem_to_hbm [thread:$0]  %s5557_s0, 256, %s5559_s26, [#allocation19]  }
0x14da   :  { %4534 = vmatpush.msrb.mxu3 %v4427_v61  ;;  %4554 = vmatpush.msra.mxu0 %v4491_v10  ;;  %v4474_v60 = vld [vmem:[#allocation11 + $0x360] sm:$0xff]  ;;  %v4383_v10 = vld [vmem:[#allocation11 + $0x88] sm:$0xff] }
0x14db   :  { %4270 = vmatpush.msra.mxu1 %v4191_v13  ;;  %4289 = vmatpush.msra.mxu2 %v4225_v14  ;;  %v4406_v13 = vld [vmem:[#allocation11 + $0x140] sm:$0xff] }
0x14dc   :  { %4535 = vmatpush.msrb.mxu3 %v4423_v43  ;;  %v4470_v14 = vld [vmem:[#allocation11 + $0x340] sm:$0xff] }
0x14dd   :  { %4290 = vmatpush.msra.mxu2 %v4223_v8  ;;  %4494 = vmatpush.msrb.mxu1 %v4426_v44  ;;  %v4402_v8 = vld [vmem:[#allocation11 + $0x120] sm:$0xff]  ;;  %v4451_v44 = vld [vmem:[#allocation11 + $0x2a8] sm:$0xff] }
0x14de   :  { %4536 = vmatpush.msrb.mxu3 %v4419_v29  ;;  %v4446_v61 = vld [vmem:[#allocation11 + $0x280] sm:$0xff] }
0x14df   :  { %4514 = vmatpush.msrb.mxu2 %v4490_v20  ;;  %4495 = vmatpush.msrb.mxu1 %v4422_v31  ;;  %v4382_v20 = vld [vmem:[#allocation11 + $0x80] sm:$0xff]  ;;  %v4447_v31 = vld [vmem:[#allocation11 + $0x288] sm:$0xff] }
0x14e0   :  { %4537 = vmatpush.msrb.mxu3 %v4415_v54  ;;  %v4442_v43 = vld [vmem:[#allocation11 + $0x260] sm:$0xff] }
0x14e1   :  { %4515 = vmatpush.msrb.mxu2 %v4486_v47  ;;  %4496 = vmatpush.msrb.mxu1 %v4418_v28  ;;  %v4378_v47 = vld [vmem:[#allocation11 + $0x60] sm:$0xff]  ;;  %v4379_v28 = vld [vmem:[#allocation11 + $0x68] sm:$0xff] }
0x14e2   :  { %4538 = vmatpush.msrb.mxu3 %v4411_v22  ;;  %v4375_v22 = vld [vmem:[#allocation11 + $0x48] sm:$0xff] }
0x14e3   :  { %4497 = vmatpush.msrb.mxu1 %v4414_v53 }
0x14e4   :  { %4539 = vmatpush.msrb.mxu3 %v4407_v15  ;;  %v4366_v15 = vld [vmem:[#allocation11] sm:$0xff] }
0x14e5   :  { %4498 = vmatpush.msrb.mxu1 %v4410_v55  ;;  %v4374_v55 = vld [vmem:[#allocation11 + $0x40] sm:$0xff] }
0x14e7   :  { %4499 = vmatpush.msrb.mxu1 %v4406_v13  ;;  %v4371_v13 = vld [vmem:[#allocation11 + $0x28] sm:$0xff] }
0x14e9   :  { %4500 = vmatpush.msrb.mxu1 %v4402_v8  ;;  %v4367_v8 = vld [vmem:[#allocation11 + $0x8] sm:$0xff] }
0x1554   :  { %v4128_v34 = vpop.f32.mrf.mxu1 }
0x1555   :  { %v4129_v19 = vadd.f32 %v4128_v34, %v7318_v3  ;;  %v4188_v7 = vpop.f32.mrf.mxu0  ;;  %v4403_v34 = vld [vmem:[#allocation11 + $0x128] sm:$0xff] }
0x1556   :  { %4540 = vmatpush.msrb.mxu3 %v4403_v34  ;;  %v4428_v34 = vld [vmem:[#allocation11 + $0x1f0] sm:$0xff] }
0x155a   :  { %v4148_v42 = vpop.f32.mrf.mxu2 }
0x155b   :  { %v4149_v40 = vadd.f32 %v4148_v42, %v4129_v19  ;;  %v4168_v48 = vpop.f32.mrf.mxu3  ;;  %v4467_v19 = vld [vmem:[#allocation11 + $0x328] sm:$0xff]  ;;  %v4398_v42 = vld [vmem:[#allocation11 + $0x100] sm:$0xff] }
0x155c   :  { %v4169_v1 = vadd.f32 %v4168_v48, %v7321_v6  ;;  %v4399_v48 = vld [vmem:[#allocation11 + $0x108] sm:$0xff]  ;;  %4501 = vmatpush.msrb.mxu1 %v4398_v42  ;;  %v4429_v42 = vld [vmem:[#allocation11 + $0x1f8] sm:$0xff] }
0x155d   :  { %4271 = vmatmul.f32.vlgmr.msra.gmra.mxu1 %v4149_v40  ;;  %4311 = vmatmul.f32.vlgmr.msra.gmra.mxu3 %v4149_v40  ;;  %v4462_v40 = vld [vmem:[#allocation11 + $0x300] sm:$0xff] }
0x155e   :  { %v4189_v4 = vadd.f32 %v4188_v7, %v4169_v1  ;;  %v4463_v1 = vld [vmem:[#allocation11 + $0x308] sm:$0xff]  ;;  %v4394_v7 = vld [vmem:[#allocation11 + $0xe0] sm:$0xff]  ;;  %4541 = vmatpush.msrb.mxu3 %v4399_v48  ;;  %v4424_v48 = vld [vmem:[#allocation11 + $0x1d0] sm:$0xff] }
0x155f   :  { %4502 = vmatpush.msrb.mxu1 %v4394_v7  ;;  %v4425_v7 = vld [vmem:[#allocation11 + $0x1d8] sm:$0xff] }
0x1560   :  { %4291 = vmatmul.f32.vlgmr.msra.gmra.mxu2 %v4189_v4  ;;  %4331 = vmatmul.f32.vlgmr.msrb.gmra.mxu0 %v4189_v4  ;;  %v4458_v4 = vld [vmem:[#allocation11 + $0x2e0] sm:$0xff] }
0x15da   :  { %v4272_v41 = vpop.f32.mrf.mxu1 }
0x15db   :  { %v4273_v27 = vadd.f32 %v4272_v41, %v7326_v17  ;;  %v4395_v41 = vld [vmem:[#allocation11 + $0xe8] sm:$0xff] }
0x15dc   :  { %4542 = vmatpush.msrb.mxu3 %v4395_v41  ;;  %v4420_v41 = vld [vmem:[#allocation11 + $0x1b0] sm:$0xff] }
0x15dd   :  { %v4332_v33 = vpop.f32.mrf.mxu0 }
0x15e0   :  { %v4312_v26 = vpop.f32.mrf.mxu3 }
0x15e1   :  { %v4313_v21 = vadd.f32 %v4312_v26, %v7329_v18  ;;  %v4459_v26 = vld [vmem:[#allocation11 + $0x2e8] sm:$0xff] }
0x15e3   :  { %v4333_v35 = vadd.f32 %v4332_v33, %v4313_v21  ;;  %v4292_v24 = vpop.f32.mrf.mxu2  ;;  %v4390_v21 = vld [vmem:[#allocation11 + $0xc0] sm:$0xff]  ;;  %v4391_v33 = vld [vmem:[#allocation11 + $0xc8] sm:$0xff] }
0x15e4   :  { %v4293_v32 = vadd.f32 %v4292_v24, %v4273_v27  ;;  %v4454_v27 = vld [vmem:[#allocation11 + $0x2c0] sm:$0xff]  ;;  %4503 = vmatpush.msrb.mxu1 %v4390_v21  ;;  %4543 = vmatpush.msrb.mxu3 %v4391_v33  ;;  %v4421_v21 = vld [vmem:[#allocation11 + $0x1b8] sm:$0xff]  ;;  %v4416_v33 = vld [vmem:[#allocation11 + $0x190] sm:$0xff] }
0x15e5   :  { %v7630_v51 = vadd.f32 %v4333_v35, %v7617_v63  ;;  %v4487_v63 = vld [vmem:[#allocation11 + $0x3c8] sm:$0xff]  ;;  %v4386_v24 = vld [vmem:[#allocation11 + $0xa0] sm:$0xff] }
0x15e6   :  { %v7633_v50 = vadd.f32 %v4293_v32, %v7614_v46  ;;  %v4482_v46 = vld [vmem:[#allocation11 + $0x3a0] sm:$0xff]  ;;  %4555 = vmatpush.msra.mxu0 %v4487_v63  ;;  %v4455_v35 = vld [vmem:[#allocation11 + $0x2c8] sm:$0xff]  ;;  %4504 = vmatpush.msrb.mxu1 %v4386_v24  ;;  %v4417_v24 = vld [vmem:[#allocation11 + $0x198] sm:$0xff] }
0x15e7   :  { %4516 = vmatpush.msrb.mxu2 %v4482_v46  ;;  %v4450_v32 = vld [vmem:[#allocation11 + $0x2a0] sm:$0xff]  ;;  %v4443_v46 = vld [vmem:[#allocation11 + $0x268] sm:$0xff] }
0x15e8   :  { %v4337_v2 = vadd.f32 %v7630_v51, %v7633_v50  ;;  %4556 = vmatpush.msra.mxu0 %v4483_v49  ;;  %4505 = vmatpush.msrb.mxu1 %v4382_v20  ;;  %v4413_v20 = vld [vmem:[#allocation11 + $0x178] sm:$0xff] }
0x15e9   :  { %4517 = vmatpush.msrb.mxu2 %v4478_v56 }
0x15ea   :  { %4338 = vadd.xlane.f32.xlu1 %v4337_v2  ;;  %4557 = vmatpush.msra.mxu0 %v4479_v59  ;;  %v4387_v2 = vld [vmem:[#allocation11 + $0xa8] sm:$0xff] }
0x15eb   :  { %4518 = vmatpush.msrb.mxu2 %v4474_v60  ;;  %4544 = vmatpush.msrb.mxu3 %v4387_v2  ;;  %v4438_v60 = vld [vmem:[#allocation11 + $0x240] sm:$0xff]  ;;  %v4412_v2 = vld [vmem:[#allocation11 + $0x170] sm:$0xff] }
0x15ec   :  { %4558 = vmatpush.msra.mxu0 %v4475_v12  ;;  %4506 = vmatpush.msrb.mxu1 %v4378_v47  ;;  %v4434_v12 = vld [vmem:[#allocation11 + $0x220] sm:$0xff]  ;;  %v4409_v47 = vld [vmem:[#allocation11 + $0x158] sm:$0xff] }
0x15ed   :  { %4519 = vmatpush.msrb.mxu2 %v4470_v14  ;;  %4545 = vmatpush.msrb.mxu3 %v4383_v10  ;;  %v4435_v14 = vld [vmem:[#allocation11 + $0x228] sm:$0xff]  ;;  %v4408_v10 = vld [vmem:[#allocation11 + $0x150] sm:$0xff] }
0x15ee   :  { %4559 = vmatpush.msra.mxu0 %v4471_v16  ;;  %4507 = vmatpush.msrb.mxu1 %v4374_v55  ;;  %v4430_v16 = vld [vmem:[#allocation11 + $0x200] sm:$0xff]  ;;  %v4465_v55 = vld [vmem:[#allocation11 + $0x318] sm:$0xff] }
0x15ef   :  { %4520 = vmatpush.msrb.mxu2 %v4466_v9  ;;  %4546 = vmatpush.msrb.mxu3 %v4379_v28  ;;  %v4431_v9 = vld [vmem:[#allocation11 + $0x208] sm:$0xff]  ;;  %v4468_v28 = vld [vmem:[#allocation11 + $0x330] sm:$0xff] }
0x15f0   :  { %4560 = vmatpush.msra.mxu0 %v4467_v19  ;;  %v4492_v19 = vld [vmem:[#allocation11 + $0x3f0] sm:$0xff] }
0x15f1   :  { %4521 = vmatpush.msrb.mxu2 %v4462_v40  ;;  %4547 = vmatpush.msrb.mxu3 %v4375_v22  ;;  %v4493_v40 = vld [vmem:[#allocation11 + $0x3f8] sm:$0xff]  ;;  %v4460_v22 = vld [vmem:[#allocation11 + $0x2f0] sm:$0xff] }
0x15f2   :  { %4561 = vmatpush.msra.mxu0 %v4463_v1  ;;  %v4488_v1 = vld [vmem:[#allocation11 + $0x3d0] sm:$0xff] }
0x15f3   :  { %4522 = vmatpush.msrb.mxu2 %v4458_v4  ;;  %4548 = vmatpush.msrb.mxu3 %v4371_v13  ;;  %v4489_v4 = vld [vmem:[#allocation11 + $0x3d8] sm:$0xff]  ;;  %v4456_v13 = vld [vmem:[#allocation11 + $0x2d0] sm:$0xff] }
0x15f4   :  { %4562 = vmatpush.msra.mxu0 %v4459_v26  ;;  %v4484_v26 = vld [vmem:[#allocation11 + $0x3b0] sm:$0xff] }
0x15f5   :  { %4523 = vmatpush.msrb.mxu2 %v4454_v27  ;;  %4549 = vmatpush.msrb.mxu3 %v4367_v8  ;;  %v4485_v27 = vld [vmem:[#allocation11 + $0x3b8] sm:$0xff]  ;;  %v4452_v8 = vld [vmem:[#allocation11 + $0x2b0] sm:$0xff] }
0x15f6   :  { %4563 = vmatpush.msra.mxu0 %v4455_v35  ;;  %v4480_v35 = vld [vmem:[#allocation11 + $0x390] sm:$0xff] }
0x15f7   :  { %4524 = vmatpush.msrb.mxu2 %v4450_v32  ;;  %4614 = vmatpush.msra.mxu3 %v4429_v42  ;;  %v4481_v32 = vld [vmem:[#allocation11 + $0x398] sm:$0xff]  ;;  %v4448_v42 = vld [vmem:[#allocation11 + $0x290] sm:$0xff] }
0x15f8   :  { %4564 = vmatpush.msra.mxu0 %v4451_v44  ;;  %v4476_v44 = vld [vmem:[#allocation11 + $0x370] sm:$0xff] }
0x15f9   :  { %4525 = vmatpush.msrb.mxu2 %v4446_v61  ;;  %4615 = vmatpush.msra.mxu3 %v4425_v7  ;;  %v4477_v61 = vld [vmem:[#allocation11 + $0x378] sm:$0xff]  ;;  %v4444_v7 = vld [vmem:[#allocation11 + $0x270] sm:$0xff] }
0x15fa   :  { %4565 = vmatpush.msra.mxu0 %v4447_v31  ;;  %v4472_v31 = vld [vmem:[#allocation11 + $0x350] sm:$0xff] }
0x15fb   :  { %4526 = vmatpush.msrb.mxu2 %v4442_v43  ;;  %4616 = vmatpush.msra.mxu3 %v4421_v21  ;;  %v4473_v43 = vld [vmem:[#allocation11 + $0x358] sm:$0xff]  ;;  %v4440_v21 = vld [vmem:[#allocation11 + $0x250] sm:$0xff] }
0x15fc   :  { %4566 = vmatpush.msra.mxu0 %v4443_v46  ;;  %v4405_v46 = vld [vmem:[#allocation11 + $0x138] sm:$0xff] }
0x15fd   :  { %4527 = vmatpush.msrb.mxu2 %v4438_v60  ;;  %4617 = vmatpush.msra.mxu3 %v4417_v24  ;;  %v4396_v60 = vld [vmem:[#allocation11 + $0xf0] sm:$0xff] }
0x15fe   :  { %v4372_v24 = vld [vmem:[#allocation11 + $0x30] sm:$0xff] }
0x15ff   :  { %4528 = vmatpush.msrb.mxu2 %v4434_v12  ;;  %4618 = vmatpush.msra.mxu3 %v4413_v20  ;;  %v4392_v12 = vld [vmem:[#allocation11 + $0xd0] sm:$0xff]  ;;  %v4437_v20 = vld [vmem:[#allocation11 + $0x238] sm:$0xff] }
0x1601   :  { %4529 = vmatpush.msrb.mxu2 %v4430_v16  ;;  %4619 = vmatpush.msra.mxu3 %v4409_v47  ;;  %v4388_v16 = vld [vmem:[#allocation11 + $0xb0] sm:$0xff]  ;;  %v4369_v47 = vld [vmem:[#allocation11 + $0x18] sm:$0xff] }
0x1603   :  { %4594 = vmatpush.msra.mxu2 %v4492_v19  ;;  %4620 = vmatpush.msra.mxu3 %v4405_v46  ;;  %v4384_v19 = vld [vmem:[#allocation11 + $0x90] sm:$0xff] }
0x1605   :  { %4595 = vmatpush.msra.mxu2 %v4488_v1  ;;  %v4380_v1 = vld [vmem:[#allocation11 + $0x70] sm:$0xff] }
0x1607   :  { %4596 = vmatpush.msra.mxu2 %v4484_v26  ;;  %v4376_v26 = vld [vmem:[#allocation11 + $0x50] sm:$0xff] }
0x1609   :  { %4597 = vmatpush.msra.mxu2 %v4480_v35  ;;  %v4441_v35 = vld [vmem:[#allocation11 + $0x258] sm:$0xff] }
0x160b   :  { %4598 = vmatpush.msra.mxu2 %v4476_v44  ;;  %v4373_v44 = vld [vmem:[#allocation11 + $0x38] sm:$0xff] }
0x160d   :  { %4599 = vmatpush.msra.mxu2 %v4472_v31 }
0x160f   :  { %4600 = vmatpush.msra.mxu2 %v4468_v28 }
0x165d   :  { %v4339_v63 = vpop.xlane.xlu1 %4338 }
0x165e   :  { %v4340_v29 = vmul.f32 %v4339_v63, %v7240_v5  ;;  %v4404_v63 = vld [vmem:[#allocation11 + $0x130] sm:$0xff] }
0x1660   :  { %v7639_v49 = vsub.f32 %v7633_v50, %v4340_v29  ;;  %v7642_v53 = vsub.f32 %v7630_v51, %v4340_v29  ;;  %v4439_v50 = vld [vmem:[#allocation11 + $0x248] sm:$0xff]  ;;  %v4370_v51 = vld [vmem:[#allocation11 + $0x20] sm:$0xff]  ;;  %v4469_v29 = vld [vmem:[#allocation11 + $0x338] sm:$0xff] }
0x1661   :  { %4567 = vmatpush.msra.mxu0 %v4439_v50  ;;  %4508 = vmatpush.msrb.mxu1 %v4370_v51  ;;  %v4397_v50 = vld [vmem:[#allocation11 + $0xf8] sm:$0xff] }
0x1662   :  { %v4343_v56 = vmul.f32 %v7639_v49, %v7639_v49  ;;  %v4344_v54 = vmul.f32 %v7642_v53, %v7642_v53  ;;  %v4461_v51 = vld [vmem:[#allocation11 + $0x2f8] sm:$0xff] }
0x1663   :  { %4568 = vmatpush.msra.mxu0 %v4435_v14  ;;  %4509 = vmatpush.msrb.mxu1 %v4366_v15  ;;  %v4393_v14 = vld [vmem:[#allocation11 + $0xd8] sm:$0xff] }
0x1664   :  { %v4345_v59 = vadd.f32 %v4344_v54, %v4343_v56  ;;  %v4400_v56 = vld [vmem:[#allocation11 + $0x110] sm:$0xff]  ;;  %v4457_v15 = vld [vmem:[#allocation11 + $0x2d8] sm:$0xff] }
0x1665   :  { %4569 = vmatpush.msra.mxu0 %v4431_v9  ;;  %4574 = vmatpush.msra.mxu1 %v4428_v34  ;;  %v4464_v54 = vld [vmem:[#allocation11 + $0x310] sm:$0xff]  ;;  %v4389_v9 = vld [vmem:[#allocation11 + $0xb8] sm:$0xff] }
0x1666   :  { %4346 = vadd.xlane.f32.xlu2 %v4345_v59  ;;  %v4401_v59 = vld [vmem:[#allocation11 + $0x118] sm:$0xff]  ;;  %4601 = vmatpush.msra.mxu2 %v4464_v54 }
0x1667   :  { %4634 = vmatpush.msrb.mxu0 %v4493_v40  ;;  %4575 = vmatpush.msra.mxu1 %v4424_v48  ;;  %v4453_v34 = vld [vmem:[#allocation11 + $0x2b8] sm:$0xff] }
0x1668   :  { %4621 = vmatpush.msra.mxu3 %v4401_v59  ;;  %4602 = vmatpush.msra.mxu2 %v4460_v22  ;;  %v4385_v40 = vld [vmem:[#allocation11 + $0x98] sm:$0xff] }
0x1669   :  { %4635 = vmatpush.msrb.mxu0 %v4489_v4  ;;  %4576 = vmatpush.msra.mxu1 %v4420_v41  ;;  %v4449_v48 = vld [vmem:[#allocation11 + $0x298] sm:$0xff] }
0x166a   :  { %4622 = vmatpush.msra.mxu3 %v4397_v50  ;;  %4603 = vmatpush.msra.mxu2 %v4456_v13  ;;  %v4381_v4 = vld [vmem:[#allocation11 + $0x78] sm:$0xff]  ;;  %v4688_v13 = vld [vmem:[#allocation8 + $0xdf0] sm:$0xff] }
0x166b   :  { %4636 = vmatpush.msrb.mxu0 %v4485_v27  ;;  %4577 = vmatpush.msra.mxu1 %v4416_v33  ;;  %v4445_v41 = vld [vmem:[#allocation11 + $0x278] sm:$0xff] }
0x166c   :  { %4623 = vmatpush.msra.mxu3 %v4393_v14  ;;  %4604 = vmatpush.msra.mxu2 %v4452_v8  ;;  %v4377_v33 = vld [vmem:[#allocation11 + $0x58] sm:$0xff]  ;;  %v4720_v14 = vld [vmem:[#allocation8 + $0xef0] sm:$0xff]  ;;  %v4750_v8 = vld [vmem:[#allocation8 + $0xfe0] sm:$0xff] }
0x166d   :  { %4637 = vmatpush.msrb.mxu0 %v4481_v32  ;;  %4578 = vmatpush.msra.mxu1 %v4412_v2  ;;  %v4436_v2 = vld [vmem:[#allocation11 + $0x230] sm:$0xff] }
0x166e   :  { %4624 = vmatpush.msra.mxu3 %v4389_v9  ;;  %4605 = vmatpush.msra.mxu2 %v4448_v42  ;;  %v4782_v9 = vld [vmem:[#allocation8 + $0x10e0] sm:$0xff]  ;;  %v4748_v42 = vld [vmem:[#allocation8 + $0xfd0] sm:$0xff] }
0x166f   :  { %4638 = vmatpush.msrb.mxu0 %v4477_v61  ;;  %4579 = vmatpush.msra.mxu1 %v4408_v10  ;;  %v4368_v61 = vld [vmem:[#allocation11 + $0x10] sm:$0xff] }
0x1670   :  { %4625 = vmatpush.msra.mxu3 %v4385_v40  ;;  %4606 = vmatpush.msra.mxu2 %v4444_v7  ;;  %v4432_v10 = vld [vmem:[#allocation11 + $0x210] sm:$0xff]  ;;  %v4746_v7 = vld [vmem:[#allocation8 + $0xfc0] sm:$0xff] }
0x1671   :  { %4639 = vmatpush.msrb.mxu0 %v4473_v43  ;;  %4580 = vmatpush.msra.mxu1 %v4404_v63  ;;  %v4433_v43 = vld [vmem:[#allocation11 + $0x218] sm:$0xff]  ;;  %v4780_v40 = vld [vmem:[#allocation8 + $0x10d0] sm:$0xff] }
0x1672   :  { %4626 = vmatpush.msra.mxu3 %v4381_v4  ;;  %4607 = vmatpush.msra.mxu2 %v4440_v21  ;;  %v4778_v4 = vld [vmem:[#allocation8 + $0x10c0] sm:$0xff]  ;;  %v4744_v21 = vld [vmem:[#allocation8 + $0xfb0] sm:$0xff] }
0x1673   :  { %4640 = vmatpush.msrb.mxu0 %v4469_v29  ;;  %4581 = vmatpush.msra.mxu1 %v4400_v56 }
0x1674   :  { %4627 = vmatpush.msra.mxu3 %v4377_v33  ;;  %4608 = vmatpush.msra.mxu2 %v4436_v2  ;;  %v4678_v33 = vld [vmem:[#allocation8 + $0xda0] sm:$0xff]  ;;  %v4676_v2 = vld [vmem:[#allocation8 + $0xd90] sm:$0xff] }
0x1675   :  { %4641 = vmatpush.msrb.mxu0 %v4465_v55  ;;  %4582 = vmatpush.msra.mxu1 %v4396_v60 }
0x1676   :  { %4628 = vmatpush.msra.mxu3 %v4373_v44  ;;  %4609 = vmatpush.msra.mxu2 %v4432_v10  ;;  %v4708_v44 = vld [vmem:[#allocation8 + $0xe90] sm:$0xff]  ;;  %v4674_v10 = vld [vmem:[#allocation8 + $0xd80] sm:$0xff] }
0x1677   :  { %4642 = vmatpush.msrb.mxu0 %v4461_v51  ;;  %4583 = vmatpush.msra.mxu1 %v4392_v12 }
0x1678   :  { %4629 = vmatpush.msra.mxu3 %v4369_v47  ;;  %v4738_v47 = vld [vmem:[#allocation8 + $0xf80] sm:$0xff] }
0x1679   :  { %4643 = vmatpush.msrb.mxu0 %v4457_v15  ;;  %4584 = vmatpush.msra.mxu1 %v4388_v16  ;;  %v4752_v15 = vld [vmem:[#allocation8 + $0xff0] sm:$0xff]  ;;  %v4718_v16 = vld [vmem:[#allocation8 + $0xee0] sm:$0xff] }
0x167b   :  { %4644 = vmatpush.msrb.mxu0 %v4453_v34  ;;  %4585 = vmatpush.msra.mxu1 %v4384_v19  ;;  %v4684_v34 = vld [vmem:[#allocation8 + $0xdd0] sm:$0xff] }
0x167c   :  { %v4716_v19 = vld [vmem:[#allocation8 + $0xed0] sm:$0xff] }
0x167d   :  { %4645 = vmatpush.msrb.mxu0 %v4449_v48  ;;  %4586 = vmatpush.msra.mxu1 %v4380_v1  ;;  %v4682_v48 = vld [vmem:[#allocation8 + $0xdc0] sm:$0xff] }
0x167e   :  { %v4714_v1 = vld [vmem:[#allocation8 + $0xec0] sm:$0xff] }
0x167f   :  { %4646 = vmatpush.msrb.mxu0 %v4445_v41  ;;  %4587 = vmatpush.msra.mxu1 %v4376_v26  ;;  %v4680_v41 = vld [vmem:[#allocation8 + $0xdb0] sm:$0xff] }
0x1680   :  { %v4712_v26 = vld [vmem:[#allocation8 + $0xeb0] sm:$0xff] }
0x1681   :  { %4647 = vmatpush.msrb.mxu0 %v4441_v35  ;;  %4588 = vmatpush.msra.mxu1 %v4372_v24  ;;  %v4710_v35 = vld [vmem:[#allocation8 + $0xea0] sm:$0xff] }
0x1682   :  { %v4742_v24 = vld [vmem:[#allocation8 + $0xfa0] sm:$0xff] }
0x1683   :  { %4648 = vmatpush.msrb.mxu0 %v4437_v20  ;;  %4589 = vmatpush.msra.mxu1 %v4368_v61  ;;  %v4740_v20 = vld [vmem:[#allocation8 + $0xf90] sm:$0xff] }
0x1684   :  { %v4772_v61 = vld [vmem:[#allocation8 + $0x1090] sm:$0xff] }
0x1685   :  { %4649 = vmatpush.msrb.mxu0 %v4433_v43  ;;  %v4770_v43 = vld [vmem:[#allocation8 + $0x1080] sm:$0xff] }
0x16d9   :  { %v4347_v27 = vpop.xlane.xlu2 %4346 }
0x16da   :  { %v4348_v32 = vmul.f32 %v4347_v27, %v7240_v5  ;;  %v4776_v27 = vld [vmem:[#allocation8 + $0x10b0] sm:$0xff] }
0x16dc   :  { %v4349_v31 = vadd.f32 1e-05, %v4348_v32  ;;  %v4774_v32 = vld [vmem:[#allocation8 + $0x10a0] sm:$0xff] }
0x16de   :  { %5631 = vrsqrt.f32 %v4349_v31  ;;  %vm4356_vm4 = vweird.f32 %v4349_v31 }
0x16e4   :  { %v5632_v63 = vpop.eup %5631 }
0x16e5   :  { %v4351_v28 = vmul.f32 %v5632_v63, %v4349_v31  ;;  %vm4357_vm3 = vweird.f32 %v5632_v63  ;;  %v4706_v31 = vld [vmem:[#allocation8 + $0xe80] sm:$0xff] }
0x16e6   :  { %vm4358_vm5 = vmor %vm4356_vm4, %vm4357_vm3 }
0x16e7   :  { %v4352_v46 = vmul.f32 %v5632_v63, %v4351_v28  ;;  %v4704_v28 = vld [vmem:[#allocation8 + $0xe70] sm:$0xff] }
0x16e9   :  { %v4353_v29 = vmul.f32 0.5, %v4352_v46  ;;  %v4736_v46 = vld [vmem:[#allocation8 + $0xf70] sm:$0xff] }
0x16eb   :  { %v4354_v56 = vsub.f32 1.5, %v4353_v29  ;;  %v4768_v29 = vld [vmem:[#allocation8 + $0x1070] sm:$0xff] }
0x16ed   :  { %v4355_v54 = vmul.f32 %v5632_v63, %v4354_v56  ;;  %v4670_v56 = vld [vmem:[#allocation8 + $0xd60] sm:$0xff] }
0x16ef   :  { %v4359_v59 = vsel %vm4358_vm5, %v5632_v63, %v4355_v54  ;;  %v4672_v63 = vld [vmem:[#allocation8 + $0xd70] sm:$0xff]  ;;  %v4702_v54 = vld [vmem:[#allocation8 + $0xe60] sm:$0xff] }
0x16f0   :  { %v4360_v55 = vmul.f32 %v4359_v59, %v7639_v49  ;;  %v4361_v60 = vmul.f32 %v4359_v59, %v7642_v53  ;;  %v4784_v49 = vld [vmem:[#allocation8 + $0x10f0] sm:$0xff]  ;;  %v4686_v53 = vld [vmem:[#allocation8 + $0xde0] sm:$0xff] }
0x16f1   :  { %v4734_v59 = vld [vmem:[#allocation8 + $0xf60] sm:$0xff] }
0x16f2   :  { %v4362_v22 = vmul.f32 %v4360_v55, %v7358_v57  ;;  %v4363_v50 = vmul.f32 %v4361_v60, %v7361_v58  ;;  %v4766_v55 = vld [vmem:[#allocation8 + $0x1060] sm:$0xff]  ;;  %v4668_v60 = vld [vmem:[#allocation8 + $0xd50] sm:$0xff] }
0x16f4   :  { %v7654_v51 = vadd.f32 %v4362_v22, %v7366_v62  ;;  %v7657_v12 = vadd.f32 %v4363_v50, %v7369_v0  ;;  %v4700_v22 = vld [vmem:[#allocation8 + $0xe50] sm:$0xff] }
0x16f5   :  { %v4732_v50 = vld [vmem:[#allocation8 + $0xf50] sm:$0xff] }
0x16f6   :  { %4510 = vmatmul.f32.vlgmr.msrb.gmra.mxu1 %v7654_v51  ;;  %4530 = vmatmul.f32.vlgmr.msrb.gmra.mxu2 %v7657_v12 }
0x16f7   :  { %4550 = vmatmul.f32.vlgmr.msrb.gmra.mxu3 %v7654_v51  ;;  %4570 = vmatmul.f32.vlgmr.msra.gmra.mxu0 %v7657_v12 }
0x16f8   :  { %4786 = vmatpush.msrb.mxu1 %v4688_v13  ;;  %4806 = vmatpush.msrb.mxu2 %v4720_v14  ;;  %v4764_v13 = vld [vmem:[#allocation8 + $0x1050] sm:$0xff]  ;;  %v4666_v14 = vld [vmem:[#allocation8 + $0xd40] sm:$0xff] }
0x16f9   :  { %4826 = vmatpush.msrb.mxu3 %v4752_v15  ;;  %4846 = vmatpush.msra.mxu0 %v4784_v49  ;;  %v4698_v15 = vld [vmem:[#allocation8 + $0xe40] sm:$0xff] }
0x16fa   :  { %4787 = vmatpush.msrb.mxu1 %v4686_v53  ;;  %4807 = vmatpush.msrb.mxu2 %v4718_v16  ;;  %v4730_v49 = vld [vmem:[#allocation8 + $0xf40] sm:$0xff]  ;;  %v4664_v16 = vld [vmem:[#allocation8 + $0xd30] sm:$0xff] }
0x16fb   :  { %4827 = vmatpush.msrb.mxu3 %v4750_v8  ;;  %4847 = vmatpush.msra.mxu0 %v4782_v9  ;;  %v4762_v53 = vld [vmem:[#allocation8 + $0x1040] sm:$0xff]  ;;  %v4696_v8 = vld [vmem:[#allocation8 + $0xe30] sm:$0xff] }
0x16fc   :  { %4788 = vmatpush.msrb.mxu1 %v4684_v34  ;;  %4808 = vmatpush.msrb.mxu2 %v4716_v19  ;;  %v4728_v9 = vld [vmem:[#allocation8 + $0xf30] sm:$0xff]  ;;  %v4662_v19 = vld [vmem:[#allocation8 + $0xd20] sm:$0xff] }
0x16fd   :  { %4828 = vmatpush.msrb.mxu3 %v4748_v42  ;;  %4848 = vmatpush.msra.mxu0 %v4780_v40  ;;  %v4760_v34 = vld [vmem:[#allocation8 + $0x1030] sm:$0xff]  ;;  %v4694_v42 = vld [vmem:[#allocation8 + $0xe20] sm:$0xff] }
0x16fe   :  { %4590 = vmatmul.f32.vlgmr.msra.gmra.mxu1 %v7654_v51  ;;  %4610 = vmatmul.f32.vlgmr.msra.gmra.mxu2 %v7657_v12  ;;  %v4726_v40 = vld [vmem:[#allocation8 + $0xf20] sm:$0xff] }
0x16ff   :  { %4630 = vmatmul.f32.vlgmr.msra.gmra.mxu3 %v7654_v51  ;;  %4650 = vmatmul.f32.vlgmr.msrb.gmra.mxu0 %v7657_v12 }
0x1700   :  { %4789 = vmatpush.msrb.mxu1 %v4682_v48  ;;  %4809 = vmatpush.msrb.mxu2 %v4714_v1  ;;  %v4758_v48 = vld [vmem:[#allocation8 + $0x1020] sm:$0xff]  ;;  %v4660_v1 = vld [vmem:[#allocation8 + $0xd10] sm:$0xff] }
0x1701   :  { %4829 = vmatpush.msrb.mxu3 %v4746_v7  ;;  %4849 = vmatpush.msra.mxu0 %v4778_v4  ;;  %v4692_v7 = vld [vmem:[#allocation8 + $0xe10] sm:$0xff] }
0x1702   :  { %4790 = vmatpush.msrb.mxu1 %v4680_v41  ;;  %4810 = vmatpush.msrb.mxu2 %v4712_v26  ;;  %v4724_v4 = vld [vmem:[#allocation8 + $0xf10] sm:$0xff]  ;;  %v4658_v26 = vld [vmem:[#allocation8 + $0xd00] sm:$0xff] }
0x1703   :  { %4830 = vmatpush.msrb.mxu3 %v4744_v21  ;;  %4850 = vmatpush.msra.mxu0 %v4776_v27  ;;  %v4756_v41 = vld [vmem:[#allocation8 + $0x1010] sm:$0xff]  ;;  %v4690_v21 = vld [vmem:[#allocation8 + $0xe00] sm:$0xff]  ;;  %v4689_v27 = vld [vmem:[#allocation8 + $0xdf8] sm:$0xff] }
0x1704   :  { %4791 = vmatpush.msrb.mxu1 %v4678_v33  ;;  %4811 = vmatpush.msrb.mxu2 %v4710_v35  ;;  %v4721_v33 = vld [vmem:[#allocation8 + $0xef8] sm:$0xff]  ;;  %v4722_v35 = vld [vmem:[#allocation8 + $0xf00] sm:$0xff] }
0x1705   :  { %4831 = vmatpush.msrb.mxu3 %v4742_v24  ;;  %4851 = vmatpush.msra.mxu0 %v4774_v32  ;;  %v4754_v24 = vld [vmem:[#allocation8 + $0x1000] sm:$0xff]  ;;  %v4687_v32 = vld [vmem:[#allocation8 + $0xde8] sm:$0xff] }
0x1706   :  { %4792 = vmatpush.msrb.mxu1 %v4676_v2  ;;  %4812 = vmatpush.msrb.mxu2 %v4708_v44  ;;  %v4719_v2 = vld [vmem:[#allocation8 + $0xee8] sm:$0xff]  ;;  %v4753_v44 = vld [vmem:[#allocation8 + $0xff8] sm:$0xff] }
0x1707   :  { %4832 = vmatpush.msrb.mxu3 %v4740_v20  ;;  %4852 = vmatpush.msra.mxu0 %v4772_v61  ;;  %v4785_v20 = vld [vmem:[#allocation8 + $0x10f8] sm:$0xff] }
0x1708   :  { %4793 = vmatpush.msrb.mxu1 %v4674_v10  ;;  %4813 = vmatpush.msrb.mxu2 %v4706_v31  ;;  %v4685_v61 = vld [vmem:[#allocation8 + $0xdd8] sm:$0xff]  ;;  %v4751_v31 = vld [vmem:[#allocation8 + $0xfe8] sm:$0xff] }
0x1709   :  { %4833 = vmatpush.msrb.mxu3 %v4738_v47  ;;  %4853 = vmatpush.msra.mxu0 %v4770_v43  ;;  %v4717_v10 = vld [vmem:[#allocation8 + $0xed8] sm:$0xff]  ;;  %v4683_v47 = vld [vmem:[#allocation8 + $0xdc8] sm:$0xff] }
0x170a   :  { %4794 = vmatpush.msrb.mxu1 %v4672_v63  ;;  %4814 = vmatpush.msrb.mxu2 %v4704_v28  ;;  %v4715_v43 = vld [vmem:[#allocation8 + $0xec8] sm:$0xff]  ;;  %v4681_v63 = vld [vmem:[#allocation8 + $0xdb8] sm:$0xff] }
0x170b   :  { %4834 = vmatpush.msrb.mxu3 %v4736_v46  ;;  %4854 = vmatpush.msra.mxu0 %v4768_v29  ;;  %v4713_v28 = vld [vmem:[#allocation8 + $0xeb8] sm:$0xff]  ;;  %v4679_v46 = vld [vmem:[#allocation8 + $0xda8] sm:$0xff] }
0x170c   :  { %4795 = vmatpush.msrb.mxu1 %v4670_v56  ;;  %4815 = vmatpush.msrb.mxu2 %v4702_v54  ;;  %v4677_v29 = vld [vmem:[#allocation8 + $0xd98] sm:$0xff]  ;;  %v4711_v56 = vld [vmem:[#allocation8 + $0xea8] sm:$0xff] }
0x170d   :  { %4835 = vmatpush.msrb.mxu3 %v4734_v59  ;;  %4855 = vmatpush.msra.mxu0 %v4766_v55  ;;  %v4749_v54 = vld [vmem:[#allocation8 + $0xfd8] sm:$0xff]  ;;  %v4783_v59 = vld [vmem:[#allocation8 + $0x10e8] sm:$0xff] }
0x170e   :  { %4796 = vmatpush.msrb.mxu1 %v4668_v60  ;;  %4816 = vmatpush.msrb.mxu2 %v4700_v22  ;;  %v4675_v55 = vld [vmem:[#allocation8 + $0xd88] sm:$0xff]  ;;  %v4709_v60 = vld [vmem:[#allocation8 + $0xe98] sm:$0xff] }
0x170f   :  { %4836 = vmatpush.msrb.mxu3 %v4732_v50  ;;  %4856 = vmatpush.msra.mxu0 %v4764_v13  ;;  %v4747_v22 = vld [vmem:[#allocation8 + $0xfc8] sm:$0xff]  ;;  %v4781_v50 = vld [vmem:[#allocation8 + $0x10d8] sm:$0xff] }
0x1710   :  { %4797 = vmatpush.msrb.mxu1 %v4666_v14  ;;  %4817 = vmatpush.msrb.mxu2 %v4698_v15  ;;  %v4673_v13 = vld [vmem:[#allocation8 + $0xd78] sm:$0xff]  ;;  %v4707_v14 = vld [vmem:[#allocation8 + $0xe88] sm:$0xff] }
0x1711   :  { %4837 = vmatpush.msrb.mxu3 %v4730_v49  ;;  %4857 = vmatpush.msra.mxu0 %v4762_v53  ;;  %v4745_v15 = vld [vmem:[#allocation8 + $0xfb8] sm:$0xff]  ;;  %v4779_v49 = vld [vmem:[#allocation8 + $0x10c8] sm:$0xff] }
0x1712   :  { %4798 = vmatpush.msrb.mxu1 %v4664_v16  ;;  %4818 = vmatpush.msrb.mxu2 %v4696_v8  ;;  %v4671_v53 = vld [vmem:[#allocation8 + $0xd68] sm:$0xff]  ;;  %v4705_v16 = vld [vmem:[#allocation8 + $0xe78] sm:$0xff] }
0x1713   :  { %4838 = vmatpush.msrb.mxu3 %v4728_v9  ;;  %4858 = vmatpush.msra.mxu0 %v4760_v34  ;;  %v4743_v8 = vld [vmem:[#allocation8 + $0xfa8] sm:$0xff]  ;;  %v4777_v9 = vld [vmem:[#allocation8 + $0x10b8] sm:$0xff] }
0x1714   :  { %4799 = vmatpush.msrb.mxu1 %v4662_v19  ;;  %4819 = vmatpush.msrb.mxu2 %v4694_v42  ;;  %v4669_v34 = vld [vmem:[#allocation8 + $0xd58] sm:$0xff]  ;;  %v4703_v19 = vld [vmem:[#allocation8 + $0xe68] sm:$0xff] }
0x1715   :  { %4839 = vmatpush.msrb.mxu3 %v4726_v40  ;;  %4859 = vmatpush.msra.mxu0 %v4758_v48  ;;  %v4741_v42 = vld [vmem:[#allocation8 + $0xf98] sm:$0xff]  ;;  %v4775_v40 = vld [vmem:[#allocation8 + $0x10a8] sm:$0xff] }
0x1716   :  { %4800 = vmatpush.msrb.mxu1 %v4660_v1  ;;  %4820 = vmatpush.msrb.mxu2 %v4692_v7  ;;  %v4667_v48 = vld [vmem:[#allocation8 + $0xd48] sm:$0xff]  ;;  %v4701_v1 = vld [vmem:[#allocation8 + $0xe58] sm:$0xff] }
0x1717   :  { %4840 = vmatpush.msrb.mxu3 %v4724_v4  ;;  %4860 = vmatpush.msra.mxu0 %v4756_v41  ;;  %v4739_v7 = vld [vmem:[#allocation8 + $0xf88] sm:$0xff]  ;;  %v4773_v4 = vld [vmem:[#allocation8 + $0x1098] sm:$0xff] }
0x1718   :  { %4801 = vmatpush.msrb.mxu1 %v4658_v26  ;;  %4821 = vmatpush.msrb.mxu2 %v4690_v21  ;;  %v4665_v41 = vld [vmem:[#allocation8 + $0xd38] sm:$0xff]  ;;  %v4699_v26 = vld [vmem:[#allocation8 + $0xe48] sm:$0xff] }
0x1719   :  { %4841 = vmatpush.msrb.mxu3 %v4722_v35  ;;  %4861 = vmatpush.msra.mxu0 %v4754_v24  ;;  %v4737_v21 = vld [vmem:[#allocation8 + $0xf78] sm:$0xff]  ;;  %v4735_v24 = vld [vmem:[#allocation8 + $0xf68] sm:$0xff] }
0x171a   :  { %4866 = vmatpush.msra.mxu1 %v4689_v27  ;;  %4886 = vmatpush.msra.mxu2 %v4721_v33  ;;  %v4771_v27 = vld [vmem:[#allocation8 + $0x1088] sm:$0xff]  ;;  %v4697_v35 = vld [vmem:[#allocation8 + $0xe38] sm:$0xff] }
0x171b   :  { %4906 = vmatpush.msra.mxu3 %v4753_v44  ;;  %4926 = vmatpush.msrb.mxu0 %v4785_v20  ;;  %v4663_v33 = vld [vmem:[#allocation8 + $0xd28] sm:$0xff]  ;;  %v4733_v20 = vld [vmem:[#allocation8 + $0xf58] sm:$0xff] }
0x171c   :  { %4867 = vmatpush.msra.mxu1 %v4687_v32  ;;  %4887 = vmatpush.msra.mxu2 %v4719_v2  ;;  %v4769_v32 = vld [vmem:[#allocation8 + $0x1078] sm:$0xff]  ;;  %v4695_v44 = vld [vmem:[#allocation8 + $0xe28] sm:$0xff] }
0x171d   :  { %4907 = vmatpush.msra.mxu3 %v4751_v31  ;;  %4927 = vmatpush.msrb.mxu0 %v4783_v59  ;;  %v4661_v2 = vld [vmem:[#allocation8 + $0xd18] sm:$0xff]  ;;  %v4759_v59 = vld [vmem:[#allocation8 + $0x1028] sm:$0xff] }
0x171e   :  { %4868 = vmatpush.msra.mxu1 %v4685_v61  ;;  %4888 = vmatpush.msra.mxu2 %v4717_v10  ;;  %v4767_v61 = vld [vmem:[#allocation8 + $0x1068] sm:$0xff]  ;;  %v4693_v31 = vld [vmem:[#allocation8 + $0xe18] sm:$0xff] }
0x171f   :  { %4908 = vmatpush.msra.mxu3 %v4749_v54  ;;  %4928 = vmatpush.msrb.mxu0 %v4781_v50  ;;  %v4659_v10 = vld [vmem:[#allocation8 + $0xd08] sm:$0xff]  ;;  %v4725_v54 = vld [vmem:[#allocation8 + $0xf18] sm:$0xff] }
0x1720   :  { %4869 = vmatpush.msra.mxu1 %v4683_v47  ;;  %4889 = vmatpush.msra.mxu2 %v4715_v43  ;;  %v4731_v47 = vld [vmem:[#allocation8 + $0xf48] sm:$0xff]  ;;  %v4765_v43 = vld [vmem:[#allocation8 + $0x1058] sm:$0xff] }
0x1721   :  { %4909 = vmatpush.msra.mxu3 %v4747_v22  ;;  %4929 = vmatpush.msrb.mxu0 %v4779_v49  ;;  %v4755_v22 = vld [vmem:[#allocation8 + $0x1008] sm:$0xff] }
0x1722   :  { %4870 = vmatpush.msra.mxu1 %v4681_v63  ;;  %4890 = vmatpush.msra.mxu2 %v4713_v28  ;;  %v4691_v63 = vld [vmem:[#allocation8 + $0xe08] sm:$0xff]  ;;  %v4729_v28 = vld [vmem:[#allocation8 + $0xf38] sm:$0xff] }
0x1723   :  { %4910 = vmatpush.msra.mxu3 %v4745_v15  ;;  %4930 = vmatpush.msrb.mxu0 %v4777_v9 }
0x1724   :  { %4871 = vmatpush.msra.mxu1 %v4679_v46  ;;  %4891 = vmatpush.msra.mxu2 %v4711_v56  ;;  %v4763_v46 = vld [vmem:[#allocation8 + $0x1048] sm:$0xff]  ;;  %v4761_v56 = vld [vmem:[#allocation8 + $0x1038] sm:$0xff] }
0x1725   :  { %4911 = vmatpush.msra.mxu3 %v4743_v8  ;;  %4931 = vmatpush.msrb.mxu0 %v4775_v40 }
0x1726   :  { %4872 = vmatpush.msra.mxu1 %v4677_v29  ;;  %4892 = vmatpush.msra.mxu2 %v4709_v60  ;;  %v4727_v29 = vld [vmem:[#allocation8 + $0xf28] sm:$0xff]  ;;  %v4757_v60 = vld [vmem:[#allocation8 + $0x1018] sm:$0xff] }
0x1727   :  { %4912 = vmatpush.msra.mxu3 %v4741_v42  ;;  %4932 = vmatpush.msrb.mxu0 %v4773_v4  ;;  %v6409_v42 = vld [vmem:[#allocation8 + $0x9f0] sm:$0xff] }
0x1728   :  { %4873 = vmatpush.msra.mxu1 %v4675_v55  ;;  %4893 = vmatpush.msra.mxu2 %v4707_v14  ;;  %v4723_v55 = vld [vmem:[#allocation8 + $0xf08] sm:$0xff] }
0x1729   :  { %4913 = vmatpush.msra.mxu3 %v4739_v7  ;;  %4933 = vmatpush.msrb.mxu0 %v4771_v27 }
0x172a   :  { %4874 = vmatpush.msra.mxu1 %v4673_v13  ;;  %4894 = vmatpush.msra.mxu2 %v4705_v16 }
0x172b   :  { %4914 = vmatpush.msra.mxu3 %v4737_v21  ;;  %4934 = vmatpush.msrb.mxu0 %v4769_v32  ;;  %v6412_v21 = vld [vmem:[#allocation8 + $0x9d0] sm:$0xff]  ;;  %v6414_v32 = vld [vmem:[#allocation8 + $0x9c0] sm:$0xff] }
0x172c   :  { %4875 = vmatpush.msra.mxu1 %v4671_v53  ;;  %4895 = vmatpush.msra.mxu2 %v4703_v19 }
0x172d   :  { %4915 = vmatpush.msra.mxu3 %v4735_v24  ;;  %4935 = vmatpush.msrb.mxu0 %v4767_v61  ;;  %v6417_v61 = vld [vmem:[#allocation8 + $0x9b0] sm:$0xff] }
0x172e   :  { %4876 = vmatpush.msra.mxu1 %v4669_v34  ;;  %4896 = vmatpush.msra.mxu2 %v4701_v1  ;;  %v6410_v1 = vld [vmem:[#allocation8 + $0x9e0] sm:$0xff] }
0x172f   :  { %4916 = vmatpush.msra.mxu3 %v4733_v20  ;;  %4936 = vmatpush.msrb.mxu0 %v4765_v43  ;;  %v6416_v20 = vld [vmem:[#allocation8 + $0xad0] sm:$0xff]  ;;  %v6421_v43 = vld [vmem:[#allocation8 + $0x9a0] sm:$0xff] }
0x1730   :  { %4877 = vmatpush.msra.mxu1 %v4667_v48  ;;  %4897 = vmatpush.msra.mxu2 %v4699_v26 }
0x1731   :  { %4917 = vmatpush.msra.mxu3 %v4731_v47  ;;  %4937 = vmatpush.msrb.mxu0 %v4763_v46  ;;  %v6420_v47 = vld [vmem:[#allocation8 + $0xac0] sm:$0xff]  ;;  %v6424_v46 = vld [vmem:[#allocation8 + $0xab0] sm:$0xff] }
0x1732   :  { %4878 = vmatpush.msra.mxu1 %v4665_v41  ;;  %4898 = vmatpush.msra.mxu2 %v4697_v35  ;;  %v6411_v41 = vld [vmem:[#allocation8 + $0xaf0] sm:$0xff]  ;;  %v6413_v35 = vld [vmem:[#allocation8 + $0xae0] sm:$0xff] }
0x1733   :  { %4918 = vmatpush.msra.mxu3 %v4729_v28  ;;  %4938 = vmatpush.msrb.mxu0 %v4761_v56  ;;  %v6423_v28 = vld [vmem:[#allocation8 + $0x9d8] sm:$0xff] }
0x1734   :  { %4879 = vmatpush.msra.mxu1 %v4663_v33  ;;  %4899 = vmatpush.msra.mxu2 %v4695_v44  ;;  %v6415_v44 = vld [vmem:[#allocation8 + $0x9f8] sm:$0xff] }
0x1735   :  { %4919 = vmatpush.msra.mxu3 %v4727_v29  ;;  %4939 = vmatpush.msrb.mxu0 %v4759_v59  ;;  %v6425_v29 = vld [vmem:[#allocation8 + $0x990] sm:$0xff]  ;;  %v6426_v56 = vld [vmem:[#allocation8 + $0xad8] sm:$0xff]  ;;  %v6428_v59 = vld [vmem:[#allocation8 + $0xaa0] sm:$0xff] }
0x1736   :  { %4880 = vmatpush.msra.mxu1 %v4661_v2  ;;  %4900 = vmatpush.msra.mxu2 %v4693_v31  ;;  %v6419_v31 = vld [vmem:[#allocation8 + $0x9e8] sm:$0xff] }
0x1737   :  { %4920 = vmatpush.msra.mxu3 %v4725_v54  ;;  %4940 = vmatpush.msrb.mxu0 %v4757_v60  ;;  %v6427_v54 = vld [vmem:[#allocation8 + $0x9c8] sm:$0xff]  ;;  %v6430_v60 = vld [vmem:[#allocation8 + $0x980] sm:$0xff] }
0x1738   :  { %4881 = vmatpush.msra.mxu1 %v4659_v10  ;;  %4901 = vmatpush.msra.mxu2 %v4691_v63  ;;  %v6418_v10 = vld [vmem:[#allocation8 + $0xaf8] sm:$0xff]  ;;  %v6422_v63 = vld [vmem:[#allocation8 + $0xae8] sm:$0xff] }
0x1739   :  { %4921 = vmatpush.msra.mxu3 %v4723_v55  ;;  %4941 = vmatpush.msrb.mxu0 %v4755_v22  ;;  %v6429_v55 = vld [vmem:[#allocation8 + $0xac8] sm:$0xff]  ;;  %v6431_v22 = vld [vmem:[#allocation8 + $0x9b8] sm:$0xff] }
0x1773   :  { %v4511_v50 = vpop.f32.mrf.mxu1 }
0x1774   :  { %v4512_v13 = vadd.f32 %v4511_v50, %v7387_v37  ;;  %v4571_v15 = vpop.f32.mrf.mxu0  ;;  %v6432_v50 = vld [vmem:[#allocation8 + $0xab8] sm:$0xff] }
0x1779   :  { %v4531_v14 = vpop.f32.mrf.mxu2 }
0x177a   :  { %v4532_v49 = vadd.f32 %v4531_v14, %v4512_v13  ;;  %v4551_v53 = vpop.f32.mrf.mxu3  ;;  %v6433_v13 = vld [vmem:[#allocation8 + $0xa90] sm:$0xff]  ;;  %v6434_v14 = vld [vmem:[#allocation8 + $0x9a8] sm:$0xff] }
0x177b   :  { %v4552_v16 = vadd.f32 %v4551_v53, %v7389_v38  ;;  %v4591_v34 = vpop.f32.mrf.mxu1  ;;  %v6437_v53 = vld [vmem:[#allocation8 + $0xa80] sm:$0xff] }
0x177c   :  { %v4654_v8 = vmax.f32 %v4532_v49, 0.0  ;;  %v4592_v40 = vadd.f32 %v4591_v34, %v7393_v45  ;;  %v4651_v27 = vpop.f32.mrf.mxu0  ;;  %v6436_v49 = vld [vmem:[#allocation8 + $0xaa8] sm:$0xff]  ;;  %v6441_v34 = vld [vmem:[#allocation8 + $0xa70] sm:$0xff] }
0x177d   :  { %v4572_v9 = vadd.f32 %v4571_v15, %v4552_v16  ;;  %v6435_v15 = vld [vmem:[#allocation8 + $0x970] sm:$0xff]  ;;  %v6438_v16 = vld [vmem:[#allocation8 + $0x998] sm:$0xff] }
0x177e   :  { %4802 = vmatmul.f32.vlgmr.msrb.gmra.mxu1 %v4654_v8 }
0x177f   :  { %v4655_v19 = vmax.f32 %v4572_v9, 0.0  ;;  %4979 = vmatpush.msrb.mxu1 %v6409_v42  ;;  %v6440_v9 = vld [vmem:[#allocation8 + $0xa98] sm:$0xff]  ;;  %v6443_v42 = vld [vmem:[#allocation8 + $0x950] sm:$0xff] }
0x1781   :  { %4822 = vmatmul.f32.vlgmr.msrb.gmra.mxu2 %v4655_v19  ;;  %v4611_v48 = vpop.f32.mrf.mxu2  ;;  %4980 = vmatpush.msrb.mxu1 %v6410_v1  ;;  %v6446_v1 = vld [vmem:[#allocation8 + $0x978] sm:$0xff] }
0x1782   :  { %v4612_v7 = vadd.f32 %v4611_v48, %v4592_v40  ;;  %v4631_v4 = vpop.f32.mrf.mxu3  ;;  %4999 = vmatpush.msrb.mxu2 %v6411_v41  ;;  %v6444_v40 = vld [vmem:[#allocation8 + $0xa88] sm:$0xff]  ;;  %v6445_v48 = vld [vmem:[#allocation8 + $0xa60] sm:$0xff]  ;;  %v6449_v41 = vld [vmem:[#allocation8 + $0xa50] sm:$0xff] }
0x1783   :  { %v4632_v26 = vadd.f32 %v4631_v4, %v7395_v52  ;;  %4981 = vmatpush.msrb.mxu1 %v6412_v21  ;;  %v6448_v4 = vld [vmem:[#allocation8 + $0xa78] sm:$0xff]  ;;  %v6451_v21 = vld [vmem:[#allocation8 + $0x930] sm:$0xff] }
0x1784   :  { %v4656_v33 = vmax.f32 %v4612_v7, 0.0  ;;  %5000 = vmatpush.msrb.mxu2 %v6413_v35  ;;  %v6447_v7 = vld [vmem:[#allocation8 + $0x940] sm:$0xff]  ;;  %v6454_v35 = vld [vmem:[#allocation8 + $0x958] sm:$0xff] }
0x1785   :  { %v4652_v24 = vadd.f32 %v4651_v27, %v4632_v26  ;;  %4982 = vmatpush.msrb.mxu1 %v6414_v32  ;;  %v6450_v26 = vld [vmem:[#allocation8 + $0x968] sm:$0xff]  ;;  %v6456_v32 = vld [vmem:[#allocation8 + $0xa58] sm:$0xff] }
0x1786   :  { %4842 = vmatmul.f32.vlgmr.msrb.gmra.mxu3 %v4656_v33  ;;  %4882 = vmatmul.f32.vlgmr.msra.gmra.mxu1 %v4654_v8  ;;  %v6439_v8 = vld [vmem:[#allocation8 + $0x960] sm:$0xff]  ;;  %v6452_v27 = vld [vmem:[#allocation8 + $0xa68] sm:$0xff] }
0x1787   :  { %v4657_v2 = vmax.f32 %v4652_v24, 0.0  ;;  %5019 = vmatpush.msrb.mxu3 %v6415_v44  ;;  %5001 = vmatpush.msrb.mxu2 %v6416_v20  ;;  %v6455_v24 = vld [vmem:[#allocation8 + $0x920] sm:$0xff]  ;;  %v6458_v44 = vld [vmem:[#allocation8 + $0x948] sm:$0xff]  ;;  %v6459_v20 = vld [vmem:[#allocation8 + $0x910] sm:$0xff] }
0x1788   :  { %4983 = vmatpush.msrb.mxu1 %v6417_v61  ;;  %v6460_v61 = vld [vmem:[#allocation8 + $0xa48] sm:$0xff] }
0x1789   :  { %4862 = vmatmul.f32.vlgmr.msra.gmra.mxu0 %v4657_v2  ;;  %4902 = vmatmul.f32.vlgmr.msra.gmra.mxu2 %v4655_v19  ;;  %v6442_v19 = vld [vmem:[#allocation8 + $0x988] sm:$0xff] }
0x178a   :  { %5039 = vmatpush.msra.mxu0 %v6418_v10  ;;  %5020 = vmatpush.msrb.mxu3 %v6419_v31  ;;  %v6461_v10 = vld [vmem:[#allocation8 + $0xa20] sm:$0xff]  ;;  %v6462_v31 = vld [vmem:[#allocation8 + $0x938] sm:$0xff] }
0x178b   :  { %5002 = vmatpush.msrb.mxu2 %v6420_v47  ;;  %4984 = vmatpush.msrb.mxu1 %v6421_v43  ;;  %v6463_v47 = vld [vmem:[#allocation8 + $0x900] sm:$0xff]  ;;  %v6464_v43 = vld [vmem:[#allocation8 + $0xa38] sm:$0xff] }
0x178c   :  { %5040 = vmatpush.msra.mxu0 %v6422_v63  ;;  %5021 = vmatpush.msrb.mxu3 %v6423_v28  ;;  %v6465_v63 = vld [vmem:[#allocation8 + $0xa10] sm:$0xff]  ;;  %v6466_v28 = vld [vmem:[#allocation8 + $0x928] sm:$0xff] }
0x178d   :  { %5003 = vmatpush.msrb.mxu2 %v6424_v46  ;;  %4985 = vmatpush.msrb.mxu1 %v6425_v29  ;;  %v6467_v46 = vld [vmem:[#allocation8 + $0xbf0] sm:$0xff]  ;;  %v6468_v29 = vld [vmem:[#allocation8 + $0xa28] sm:$0xff] }
0x178e   :  { %4922 = vmatmul.f32.vlgmr.msra.gmra.mxu3 %v4656_v33  ;;  %5041 = vmatpush.msra.mxu0 %v6426_v56  ;;  %v6453_v33 = vld [vmem:[#allocation8 + $0xa40] sm:$0xff] }
0x178f   :  { %5022 = vmatpush.msrb.mxu3 %v6427_v54  ;;  %5004 = vmatpush.msrb.mxu2 %v6428_v59  ;;  %v6469_v56 = vld [vmem:[#allocation8 + $0xa00] sm:$0xff]  ;;  %v6470_v54 = vld [vmem:[#allocation8 + $0x918] sm:$0xff] }
0x1790   :  { %5042 = vmatpush.msra.mxu0 %v6429_v55  ;;  %4986 = vmatpush.msrb.mxu1 %v6430_v60  ;;  %v6471_v59 = vld [vmem:[#allocation8 + $0xbe0] sm:$0xff]  ;;  %v6472_v55 = vld [vmem:[#allocation8 + $0xa18] sm:$0xff]  ;;  %v6473_v60 = vld [vmem:[#allocation8 + $0xcf0] sm:$0xff] }
0x1791   :  { %4942 = vmatmul.f32.vlgmr.msrb.gmra.mxu0 %v4657_v2  ;;  %5023 = vmatpush.msrb.mxu3 %v6431_v22  ;;  %v6457_v2 = vld [vmem:[#allocation8 + $0xa30] sm:$0xff]  ;;  %v6474_v22 = vld [vmem:[#allocation8 + $0x908] sm:$0xff] }
0x1792   :  { %5043 = vmatpush.msra.mxu0 %v6432_v50  ;;  %5005 = vmatpush.msrb.mxu2 %v6433_v13  ;;  %v6475_v50 = vld [vmem:[#allocation8 + $0xbd0] sm:$0xff]  ;;  %v6476_v13 = vld [vmem:[#allocation8 + $0xa08] sm:$0xff] }
0x1793   :  { %5024 = vmatpush.msrb.mxu3 %v6434_v14  ;;  %4987 = vmatpush.msrb.mxu1 %v6435_v15  ;;  %v6477_v14 = vld [vmem:[#allocation8 + $0xbf8] sm:$0xff] }
0x1794   :  { %5044 = vmatpush.msra.mxu0 %v6436_v49  ;;  %5006 = vmatpush.msrb.mxu2 %v6437_v53  ;;  %v6478_v15 = vld [vmem:[#allocation8 + $0xcf8] sm:$0xff]  ;;  %v6479_v49 = vld [vmem:[#allocation8 + $0xce0] sm:$0xff]  ;;  %v6480_v53 = vld [vmem:[#allocation8 + $0xbe8] sm:$0xff] }
0x1795   :  { %5025 = vmatpush.msrb.mxu3 %v6438_v16  ;;  %4988 = vmatpush.msrb.mxu1 %v6439_v8  ;;  %v6481_v16 = vld [vmem:[#allocation8 + $0xbc0] sm:$0xff]  ;;  %v6482_v8 = vld [vmem:[#allocation8 + $0xce8] sm:$0xff] }
0x1796   :  { %5045 = vmatpush.msra.mxu0 %v6440_v9  ;;  %5007 = vmatpush.msrb.mxu2 %v6441_v34  ;;  %v6483_v9 = vld [vmem:[#allocation8 + $0xcd0] sm:$0xff]  ;;  %v6484_v34 = vld [vmem:[#allocation8 + $0xbd8] sm:$0xff] }
0x1797   :  { %5026 = vmatpush.msrb.mxu3 %v6442_v19  ;;  %4989 = vmatpush.msrb.mxu1 %v6443_v42  ;;  %v6485_v19 = vld [vmem:[#allocation8 + $0xbb0] sm:$0xff]  ;;  %v6486_v42 = vld [vmem:[#allocation8 + $0xcd8] sm:$0xff] }
0x1798   :  { %5046 = vmatpush.msra.mxu0 %v6444_v40  ;;  %5008 = vmatpush.msrb.mxu2 %v6445_v48  ;;  %v6487_v40 = vld [vmem:[#allocation8 + $0xcc0] sm:$0xff]  ;;  %v6488_v48 = vld [vmem:[#allocation8 + $0xbc8] sm:$0xff] }
0x1799   :  { %5027 = vmatpush.msrb.mxu3 %v6446_v1  ;;  %4990 = vmatpush.msrb.mxu1 %v6447_v7  ;;  %v6489_v1 = vld [vmem:[#allocation8 + $0xba0] sm:$0xff]  ;;  %v6490_v7 = vld [vmem:[#allocation8 + $0xcc8] sm:$0xff] }
0x179a   :  { %5047 = vmatpush.msra.mxu0 %v6448_v4  ;;  %5009 = vmatpush.msrb.mxu2 %v6449_v41  ;;  %v6491_v4 = vld [vmem:[#allocation8 + $0xcb0] sm:$0xff]  ;;  %v6492_v41 = vld [vmem:[#allocation8 + $0xbb8] sm:$0xff] }
0x179b   :  { %5028 = vmatpush.msrb.mxu3 %v6450_v26  ;;  %4991 = vmatpush.msrb.mxu1 %v6451_v21  ;;  %v6493_v26 = vld [vmem:[#allocation8 + $0xb90] sm:$0xff]  ;;  %v6494_v21 = vld [vmem:[#allocation8 + $0xcb8] sm:$0xff] }
0x179c   :  { %5048 = vmatpush.msra.mxu0 %v6452_v27  ;;  %5010 = vmatpush.msrb.mxu2 %v6453_v33  ;;  %v6495_v27 = vld [vmem:[#allocation8 + $0xca0] sm:$0xff]  ;;  %v6496_v33 = vld [vmem:[#allocation8 + $0xba8] sm:$0xff] }
0x179d   :  { %5029 = vmatpush.msrb.mxu3 %v6454_v35  ;;  %4992 = vmatpush.msrb.mxu1 %v6455_v24  ;;  %v6497_v35 = vld [vmem:[#allocation8 + $0xb80] sm:$0xff]  ;;  %v6498_v24 = vld [vmem:[#allocation8 + $0xca8] sm:$0xff] }
0x179e   :  { %5049 = vmatpush.msra.mxu0 %v6456_v32  ;;  %5011 = vmatpush.msrb.mxu2 %v6457_v2  ;;  %v6499_v32 = vld [vmem:[#allocation8 + $0xc90] sm:$0xff]  ;;  %v6500_v2 = vld [vmem:[#allocation8 + $0xb98] sm:$0xff] }
0x179f   :  { %5030 = vmatpush.msrb.mxu3 %v6458_v44  ;;  %4993 = vmatpush.msrb.mxu1 %v6459_v20  ;;  %v6501_v44 = vld [vmem:[#allocation8 + $0xb70] sm:$0xff]  ;;  %v6502_v20 = vld [vmem:[#allocation8 + $0xc98] sm:$0xff] }
0x17a0   :  { %5050 = vmatpush.msra.mxu0 %v6460_v61  ;;  %5012 = vmatpush.msrb.mxu2 %v6461_v10  ;;  %v6503_v61 = vld [vmem:[#allocation8 + $0xc80] sm:$0xff]  ;;  %v6504_v10 = vld [vmem:[#allocation8 + $0xb88] sm:$0xff] }
0x17a1   :  { %5031 = vmatpush.msrb.mxu3 %v6462_v31  ;;  %4994 = vmatpush.msrb.mxu1 %v6463_v47  ;;  %v6505_v31 = vld [vmem:[#allocation8 + $0xb60] sm:$0xff]  ;;  %v6506_v47 = vld [vmem:[#allocation8 + $0xc88] sm:$0xff] }
0x17a2   :  { %5051 = vmatpush.msra.mxu0 %v6464_v43  ;;  %5013 = vmatpush.msrb.mxu2 %v6465_v63  ;;  %v6507_v43 = vld [vmem:[#allocation8 + $0xc70] sm:$0xff]  ;;  %v6508_v63 = vld [vmem:[#allocation8 + $0xb78] sm:$0xff] }
0x17a3   :  { %5032 = vmatpush.msrb.mxu3 %v6466_v28  ;;  %5059 = vmatpush.msra.mxu1 %v6467_v46  ;;  %v6509_v28 = vld [vmem:[#allocation8 + $0xb50] sm:$0xff]  ;;  %v6510_v46 = vld [vmem:[#allocation8 + $0xc78] sm:$0xff] }
0x17a4   :  { %5052 = vmatpush.msra.mxu0 %v6468_v29  ;;  %5014 = vmatpush.msrb.mxu2 %v6469_v56  ;;  %v6511_v29 = vld [vmem:[#allocation8 + $0xc60] sm:$0xff]  ;;  %v6512_v56 = vld [vmem:[#allocation8 + $0xb68] sm:$0xff] }
0x17a5   :  { %5033 = vmatpush.msrb.mxu3 %v6470_v54  ;;  %5060 = vmatpush.msra.mxu1 %v6471_v59  ;;  %v6513_v54 = vld [vmem:[#allocation8 + $0xb40] sm:$0xff]  ;;  %v6514_v59 = vld [vmem:[#allocation8 + $0xc68] sm:$0xff] }
0x17a6   :  { %5053 = vmatpush.msra.mxu0 %v6472_v55  ;;  %5079 = vmatpush.msra.mxu2 %v6473_v60  ;;  %v6515_v55 = vld [vmem:[#allocation8 + $0xc50] sm:$0xff]  ;;  %v6516_v60 = vld [vmem:[#allocation8 + $0xb58] sm:$0xff] }
0x17a7   :  { %5034 = vmatpush.msrb.mxu3 %v6474_v22  ;;  %5061 = vmatpush.msra.mxu1 %v6475_v50  ;;  %v6517_v22 = vld [vmem:[#allocation8 + $0xb30] sm:$0xff]  ;;  %v6518_v50 = vld [vmem:[#allocation8 + $0xc58] sm:$0xff] }
0x17a8   :  { %5054 = vmatpush.msra.mxu0 %v6476_v13  ;;  %5080 = vmatpush.msra.mxu2 %v6479_v49  ;;  %v6519_v13 = vld [vmem:[#allocation8 + $0xc40] sm:$0xff]  ;;  %v6522_v49 = vld [vmem:[#allocation8 + $0xc48] sm:$0xff] }
0x17a9   :  { %5099 = vmatpush.msra.mxu3 %v6477_v14  ;;  %5062 = vmatpush.msra.mxu1 %v6481_v16  ;;  %v6520_v14 = vld [vmem:[#allocation8 + $0xb48] sm:$0xff]  ;;  %v6524_v16 = vld [vmem:[#allocation8 + $0xb38] sm:$0xff] }
0x17aa   :  { %5119 = vmatpush.msrb.mxu0 %v6478_v15  ;;  %5081 = vmatpush.msra.mxu2 %v6483_v9  ;;  %v6521_v15 = vld [vmem:[#allocation8 + $0xb20] sm:$0xff]  ;;  %v6526_v9 = vld [vmem:[#allocation8 + $0xc38] sm:$0xff] }
0x17ab   :  { %5100 = vmatpush.msra.mxu3 %v6480_v53  ;;  %5063 = vmatpush.msra.mxu1 %v6485_v19  ;;  %v6523_v53 = vld [vmem:[#allocation8 + $0xc30] sm:$0xff]  ;;  %v6528_v19 = vld [vmem:[#allocation8 + $0xb28] sm:$0xff] }
0x17ac   :  { %5120 = vmatpush.msrb.mxu0 %v6482_v8  ;;  %5082 = vmatpush.msra.mxu2 %v6487_v40  ;;  %v6525_v8 = vld [vmem:[#allocation8 + $0xb10] sm:$0xff]  ;;  %v6530_v40 = vld [vmem:[#allocation8 + $0xc28] sm:$0xff] }
0x17ad   :  { %5101 = vmatpush.msra.mxu3 %v6484_v34  ;;  %5064 = vmatpush.msra.mxu1 %v6489_v1  ;;  %v6527_v34 = vld [vmem:[#allocation8 + $0xc20] sm:$0xff]  ;;  %v6532_v1 = vld [vmem:[#allocation8 + $0xb18] sm:$0xff] }
0x17ae   :  { %5121 = vmatpush.msrb.mxu0 %v6486_v42  ;;  %5083 = vmatpush.msra.mxu2 %v6491_v4  ;;  %v6529_v42 = vld [vmem:[#allocation8 + $0xb00] sm:$0xff] }
0x17af   :  { %5102 = vmatpush.msra.mxu3 %v6488_v48  ;;  %5065 = vmatpush.msra.mxu1 %v6493_v26  ;;  %v6531_v48 = vld [vmem:[#allocation8 + $0xc10] sm:$0xff]  ;;  %v6534_v4 = vld [vmem:[#allocation8 + $0xc00] sm:$0xff]  ;;  %v6536_v26 = vld [vmem:[#allocation8 + $0xc08] sm:$0xff] }
0x17b0   :  { %5122 = vmatpush.msrb.mxu0 %v6490_v7  ;;  %5084 = vmatpush.msra.mxu2 %v6495_v27  ;;  %v6533_v7 = vld [vmem:[#allocation8 + $0xc18] sm:$0xff] }
0x17b1   :  { %5103 = vmatpush.msra.mxu3 %v6492_v41  ;;  %5066 = vmatpush.msra.mxu1 %v6497_v35  ;;  %v6535_v41 = vld [vmem:[#allocation8 + $0xb08] sm:$0xff] }
0x17b2   :  { %5123 = vmatpush.msrb.mxu0 %v6494_v21  ;;  %5085 = vmatpush.msra.mxu2 %v6499_v32 }
0x17b3   :  { %5104 = vmatpush.msra.mxu3 %v6496_v33  ;;  %5067 = vmatpush.msra.mxu1 %v6501_v44 }
0x17b4   :  { %5124 = vmatpush.msrb.mxu0 %v6498_v24  ;;  %5086 = vmatpush.msra.mxu2 %v6503_v61 }
0x17b5   :  { %5105 = vmatpush.msra.mxu3 %v6500_v2  ;;  %5068 = vmatpush.msra.mxu1 %v6505_v31 }
0x17b6   :  { %5125 = vmatpush.msrb.mxu0 %v6502_v20  ;;  %5087 = vmatpush.msra.mxu2 %v6507_v43 }
0x17b7   :  { %5106 = vmatpush.msra.mxu3 %v6504_v10  ;;  %5069 = vmatpush.msra.mxu1 %v6509_v28 }
0x17b8   :  { %5126 = vmatpush.msrb.mxu0 %v6506_v47  ;;  %5088 = vmatpush.msra.mxu2 %v6511_v29 }
0x17b9   :  { %5107 = vmatpush.msra.mxu3 %v6508_v63  ;;  %5070 = vmatpush.msra.mxu1 %v6513_v54 }
0x17ba   :  { %5127 = vmatpush.msrb.mxu0 %v6510_v46  ;;  %5089 = vmatpush.msra.mxu2 %v6515_v55 }
0x17bb   :  { %5108 = vmatpush.msra.mxu3 %v6512_v56  ;;  %5071 = vmatpush.msra.mxu1 %v6517_v22 }
0x17bc   :  { %5128 = vmatpush.msrb.mxu0 %v6514_v59  ;;  %5090 = vmatpush.msra.mxu2 %v6519_v13 }
0x17bd   :  { %5109 = vmatpush.msra.mxu3 %v6516_v60  ;;  %5072 = vmatpush.msra.mxu1 %v6521_v15 }
0x17be   :  { %5129 = vmatpush.msrb.mxu0 %v6518_v50  ;;  %5091 = vmatpush.msra.mxu2 %v6523_v53 }
0x17bf   :  { %5110 = vmatpush.msra.mxu3 %v6520_v14  ;;  %5073 = vmatpush.msra.mxu1 %v6525_v8 }
0x17c0   :  { %5130 = vmatpush.msrb.mxu0 %v6522_v49  ;;  %5092 = vmatpush.msra.mxu2 %v6527_v34 }
0x17c1   :  { %5111 = vmatpush.msra.mxu3 %v6524_v16  ;;  %5074 = vmatpush.msra.mxu1 %v6529_v42 }
0x17c2   :  { %5131 = vmatpush.msrb.mxu0 %v6526_v9  ;;  %5093 = vmatpush.msra.mxu2 %v6531_v48 }
0x17c3   :  { %5112 = vmatpush.msra.mxu3 %v6528_v19 }
0x17c4   :  { %5132 = vmatpush.msrb.mxu0 %v6530_v40  ;;  %5094 = vmatpush.msra.mxu2 %v6534_v4  ;;  %v6537_v4 = vld [vmem:[#allocation11 + $0x1e0] sm:$0xff] }
0x17c5   :  { %5113 = vmatpush.msra.mxu3 %v6532_v1 }
0x17c6   :  { %5133 = vmatpush.msrb.mxu0 %v6533_v7 }
0x17c7   :  { %5114 = vmatpush.msra.mxu3 %v6535_v41  ;;  %v6538_v41 = vld [vmem:[#allocation11 + $0x3e0] sm:$0xff] }
0x17c8   :  { %5134 = vmatpush.msrb.mxu0 %v6536_v26  ;;  %v6539_v26 = vld [vmem:[#allocation11 + $0x1e8] sm:$0xff] }
0x17fb   :  { %v4803_v27 = vpop.f32.mrf.mxu1 }
0x1803   :  { %v4883_v44 = vpop.f32.mrf.mxu1 }
0x1804   :  { %v4823_v21 = vpop.f32.mrf.mxu2 }
0x1805   :  { %v4824_v24 = vadd.f32 %v4823_v21, %v4803_v27  ;;  %v6540_v21 = vld [vmem:[#allocation11 + $0x3e8] sm:$0xff]  ;;  %v6541_v27 = vld [vmem:[#allocation11 + $0x1c0] sm:$0xff] }
0x1806   :  { %v4863_v33 = vpop.f32.mrf.mxu0 }
0x1809   :  { %v4843_v35 = vpop.f32.mrf.mxu3 }
0x180a   :  { %v4844_v32 = vadd.f32 %v4843_v35, %v4824_v24  ;;  %v6543_v35 = vld [vmem:[#allocation11 + $0x1c8] sm:$0xff] }
0x180b   :  { %v6544_v24 = vld [vmem:[#allocation11 + $0x3c8] sm:$0xff] }
0x180c   :  { %v4903_v2 = vpop.f32.mrf.mxu2  ;;  %v4864_v20 = vadd.f32 %v4863_v33, %v4844_v32  ;;  %v6542_v33 = vld [vmem:[#allocation11 + $0x3c0] sm:$0xff] }
0x180d   :  { %v4904_v61 = vadd.f32 %v4903_v2, %v4883_v44  ;;  %v6545_v32 = vld [vmem:[#allocation11 + $0x1a0] sm:$0xff]  ;;  %v6547_v44 = vld [vmem:[#allocation11 + $0x1a8] sm:$0xff] }
0x180e   :  { %v4943_v47 = vpop.f32.mrf.mxu0  ;;  %v4946_v43 = vadd.f32 %v4864_v20, %v7654_v51  ;;  %v6546_v2 = vld [vmem:[#allocation11 + $0x3a0] sm:$0xff]  ;;  %v6548_v20 = vld [vmem:[#allocation11 + $0x3a8] sm:$0xff] }
0x1810   :  { %v4948_v46 = vadd.f32 %v4946_v43, %v7401_v23  ;;  %v6553_v43 = vld [vmem:[#allocation11 + $0x160] sm:$0xff] }
0x1811   :  { %v4923_v10 = vpop.f32.mrf.mxu3 }
0x1812   :  { %v4924_v31 = vadd.f32 %v4923_v10, %v4904_v61  ;;  %v6549_v61 = vld [vmem:[#allocation11 + $0x180] sm:$0xff] }
0x1813   :  { %v6550_v10 = vld [vmem:[#allocation11 + $0x380] sm:$0xff] }
0x1814   :  { %v4944_v63 = vadd.f32 %v4943_v47, %v4924_v31  ;;  %v6551_v31 = vld [vmem:[#allocation11 + $0x188] sm:$0xff] }
0x1815   :  { %v6552_v47 = vld [vmem:[#allocation11 + $0x388] sm:$0xff] }
0x1816   :  { %v4947_v28 = vadd.f32 %v4944_v63, %v7657_v12  ;;  %v6554_v63 = vld [vmem:[#allocation11 + $0x360] sm:$0xff] }
0x1818   :  { %v4949_v29 = vadd.f32 %v4947_v28, %v7404_v11  ;;  %v6555_v28 = vld [vmem:[#allocation11 + $0x168] sm:$0xff] }
0x181a   :  { %v4950_v56 = vadd.f32 %v4949_v29, %v4948_v46 }
0x181c   :  { %4951 = vadd.xlane.f32.xlu0 %v4950_v56  ;;  %v6558_v56 = vld [vmem:[#allocation11 + $0x340] sm:$0xff] }
0x188f   :  { %v4952_v54 = vpop.xlane.xlu0 %4951 }
0x1890   :  { %v4953_v59 = vmul.f32 %v4952_v54, %v7240_v5  ;;  %v6559_v54 = vld [vmem:[#allocation11 + $0x148] sm:$0xff] }
0x1892   :  { %v4954_v55 = vsub.f32 %v4948_v46, %v4953_v59  ;;  %v4955_v60 = vsub.f32 %v4949_v29, %v4953_v59  ;;  %v6556_v46 = vld [vmem:[#allocation11 + $0x368] sm:$0xff]  ;;  %v6557_v29 = vld [vmem:[#allocation11 + $0x140] sm:$0xff] }
0x1893   :  { %v6560_v59 = vld [vmem:[#allocation11 + $0x348] sm:$0xff] }
0x1894   :  { %v4956_v22 = vmul.f32 %v4954_v55, %v4954_v55  ;;  %v4957_v50 = vmul.f32 %v4955_v60, %v4955_v60 }
0x1896   :  { %v4958_v13 = vadd.f32 %v4957_v50, %v4956_v22  ;;  %v6563_v22 = vld [vmem:[#allocation11 + $0x128] sm:$0xff] }
0x1897   :  { %v6564_v50 = vld [vmem:[#allocation11 + $0x328] sm:$0xff] }
0x1898   :  { %4959 = vadd.xlane.f32.xlu1 %v4958_v13  ;;  %v6565_v13 = vld [vmem:[#allocation11 + $0x100] sm:$0xff] }
0x190b   :  { %v4960_v14 = vpop.xlane.xlu1 %4959 }
0x190c   :  { %v4961_v51 = vmul.f32 %v4960_v14, %v7240_v5  ;;  %v6566_v14 = vld [vmem:[#allocation11 + $0x300] sm:$0xff] }
0x190e   :  { %v4962_v15 = vadd.f32 1e-05, %v4961_v51  ;;  %v6567_v51 = vld [vmem:[#allocation11 + $0x108] sm:$0xff] }
0x1910   :  { %5633 = vrsqrt.f32 %v4962_v15  ;;  %vm4969_vm7 = vweird.f32 %v4962_v15 }
0x1916   :  { %v5634_v12 = vpop.eup %5633 }
0x1917   :  { %v4964_v49 = vmul.f32 %v5634_v12, %v4962_v15  ;;  %vm4970_vm6 = vweird.f32 %v5634_v12  ;;  %v6568_v15 = vld [vmem:[#allocation11 + $0x308] sm:$0xff] }
0x1918   :  { %vm4971_vm8 = vmor %vm4969_vm7, %vm4970_vm6 }
0x1919   :  { %v4965_v53 = vmul.f32 %v5634_v12, %v4964_v49  ;;  %v6570_v49 = vld [vmem:[#allocation11 + $0x2e0] sm:$0xff] }
0x191b   :  { %v4966_v16 = vmul.f32 0.5, %v4965_v53  ;;  %v6571_v53 = vld [vmem:[#allocation11 + $0xe8] sm:$0xff] }
0x191d   :  { %v4967_v8 = vsub.f32 1.5, %v4966_v16  ;;  %v6572_v16 = vld [vmem:[#allocation11 + $0x2e8] sm:$0xff] }
0x191f   :  { %v4968_v9 = vmul.f32 %v5634_v12, %v4967_v8  ;;  %v6573_v8 = vld [vmem:[#allocation11 + $0xc0] sm:$0xff] }
0x1921   :  { %v4972_v34 = vsel %vm4971_vm8, %v5634_v12, %v4968_v9  ;;  %v6569_v12 = vld [vmem:[#allocation11 + $0xe0] sm:$0xff] }
0x1922   :  { %v4973_v19 = vmul.f32 %v4972_v34, %v4954_v55  ;;  %v4974_v42 = vmul.f32 %v4972_v34, %v4955_v60  ;;  %v6561_v55 = vld [vmem:[#allocation11 + $0x120] sm:$0xff]  ;;  %v6575_v34 = vld [vmem:[#allocation11 + $0xc8] sm:$0xff] }
0x1923   :  { %v6562_v60 = vld [vmem:[#allocation11 + $0x320] sm:$0xff] }
0x1924   :  { %v4975_v40 = vmul.f32 %v4973_v19, %v7412_v25  ;;  %v4976_v48 = vmul.f32 %v4974_v42, %v7415_v30  ;;  %v6574_v9 = vld [vmem:[#allocation11 + $0x2c0] sm:$0xff]  ;;  %v6576_v19 = vld [vmem:[#allocation11 + $0x2c8] sm:$0xff] }
0x1925   :  { %v6577_v42 = vld [vmem:[#allocation11 + $0xa0] sm:$0xff] }
0x1926   :  { %v7680_v1 = vadd.f32 %v4975_v40, %v7418_v36  ;;  %v7683_v7 = vadd.f32 %v4976_v48, %v7421_v39  ;;  %v6578_v40 = vld [vmem:[#allocation11 + $0x2a0] sm:$0xff]  ;;  %v6579_v48 = vld [vmem:[#allocation11 + $0xa8] sm:$0xff] }
0x1928   :  { %4995 = vmatmul.f32.vlgmr.msrb.gmra.mxu1 %v7680_v1  ;;  %5015 = vmatmul.f32.vlgmr.msrb.gmra.mxu2 %v7683_v7 }
0x1929   :  { %5035 = vmatmul.f32.vlgmr.msrb.gmra.mxu3 %v7680_v1  ;;  %5055 = vmatmul.f32.vlgmr.msra.gmra.mxu0 %v7683_v7 }
0x192a   :  { %5170 = vmatpush.msrb.mxu1 %v6537_v4  ;;  %5190 = vmatpush.msrb.mxu2 %v6538_v41  ;;  %v6580_v4 = vld [vmem:[#allocation11 + $0x2a8] sm:$0xff]  ;;  %v6581_v41 = vld [vmem:[#allocation11 + $0x80] sm:$0xff] }
0x192b   :  { %5210 = vmatpush.msrb.mxu3 %v6539_v26  ;;  %5230 = vmatpush.msra.mxu0 %v6540_v21  ;;  %v6582_v26 = vld [vmem:[#allocation11 + $0x280] sm:$0xff]  ;;  %v6583_v21 = vld [vmem:[#allocation11 + $0x88] sm:$0xff] }
0x192c   :  { %5171 = vmatpush.msrb.mxu1 %v6541_v27  ;;  %5191 = vmatpush.msrb.mxu2 %v6542_v33  ;;  %v6584_v27 = vld [vmem:[#allocation11 + $0x288] sm:$0xff]  ;;  %v6585_v33 = vld [vmem:[#allocation11 + $0x60] sm:$0xff] }
0x192d   :  { %5211 = vmatpush.msrb.mxu3 %v6543_v35  ;;  %5231 = vmatpush.msra.mxu0 %v6544_v24  ;;  %v6586_v35 = vld [vmem:[#allocation11 + $0x260] sm:$0xff]  ;;  %v6587_v24 = vld [vmem:[#allocation11 + $0x68] sm:$0xff] }
0x192e   :  { %5172 = vmatpush.msrb.mxu1 %v6545_v32  ;;  %5192 = vmatpush.msrb.mxu2 %v6546_v2  ;;  %v6588_v32 = vld [vmem:[#allocation11 + $0x268] sm:$0xff]  ;;  %v6589_v2 = vld [vmem:[#allocation11 + $0x40] sm:$0xff] }
0x192f   :  { %5212 = vmatpush.msrb.mxu3 %v6547_v44  ;;  %5232 = vmatpush.msra.mxu0 %v6548_v20  ;;  %v6590_v44 = vld [vmem:[#allocation11 + $0x240] sm:$0xff]  ;;  %v6591_v20 = vld [vmem:[#allocation11 + $0x48] sm:$0xff] }
0x1930   :  { %5173 = vmatpush.msrb.mxu1 %v6549_v61  ;;  %5193 = vmatpush.msrb.mxu2 %v6550_v10  ;;  %v6592_v61 = vld [vmem:[#allocation11 + $0x248] sm:$0xff]  ;;  %v6593_v10 = vld [vmem:[#allocation11 + $0x20] sm:$0xff] }
0x1931   :  { %5213 = vmatpush.msrb.mxu3 %v6551_v31  ;;  %5233 = vmatpush.msra.mxu0 %v6552_v47  ;;  %v6594_v31 = vld [vmem:[#allocation11 + $0x220] sm:$0xff]  ;;  %v6595_v47 = vld [vmem:[#allocation11 + $0x28] sm:$0xff] }
0x1932   :  { %5174 = vmatpush.msrb.mxu1 %v6553_v43  ;;  %5194 = vmatpush.msrb.mxu2 %v6554_v63  ;;  %v6596_v43 = vld [vmem:[#allocation11 + $0x228] sm:$0xff]  ;;  %v6597_v63 = vld [vmem:[#allocation11] sm:$0xff] }
0x1933   :  { %5214 = vmatpush.msrb.mxu3 %v6555_v28  ;;  %5234 = vmatpush.msra.mxu0 %v6556_v46  ;;  %v6598_v28 = vld [vmem:[#allocation11 + $0x200] sm:$0xff]  ;;  %v6599_v46 = vld [vmem:[#allocation11 + $0x8] sm:$0xff] }
0x1934   :  { %5175 = vmatpush.msrb.mxu1 %v6557_v29  ;;  %5195 = vmatpush.msrb.mxu2 %v6558_v56  ;;  %v6600_v29 = vld [vmem:[#allocation11 + $0x208] sm:$0xff] }
0x1935   :  { %5215 = vmatpush.msrb.mxu3 %v6559_v54  ;;  %5235 = vmatpush.msra.mxu0 %v6560_v59 }
0x1936   :  { %5176 = vmatpush.msrb.mxu1 %v6561_v55  ;;  %5196 = vmatpush.msrb.mxu2 %v6562_v60 }
0x1937   :  { %5216 = vmatpush.msrb.mxu3 %v6563_v22  ;;  %5236 = vmatpush.msra.mxu0 %v6564_v50 }
0x1938   :  { %5177 = vmatpush.msrb.mxu1 %v6565_v13  ;;  %5197 = vmatpush.msrb.mxu2 %v6566_v14  ;;  %v6601_v14 = vld [vmem:[#allocation11 + $0x1f0] sm:$0xff] }
0x1939   :  { %5217 = vmatpush.msrb.mxu3 %v6567_v51  ;;  %5237 = vmatpush.msra.mxu0 %v6568_v15  ;;  %v6602_v51 = vld [vmem:[#allocation11 + $0x1f8] sm:$0xff]  ;;  %v6603_v15 = vld [vmem:[#allocation11 + $0x3f0] sm:$0xff] }
0x193a   :  { %5178 = vmatpush.msrb.mxu1 %v6569_v12  ;;  %5198 = vmatpush.msrb.mxu2 %v6570_v49  ;;  %v6604_v12 = vld [vmem:[#allocation11 + $0x3f8] sm:$0xff] }
0x193b   :  { %5218 = vmatpush.msrb.mxu3 %v6571_v53  ;;  %5238 = vmatpush.msra.mxu0 %v6572_v16  ;;  %v6606_v49 = vld [vmem:[#allocation11 + $0x1d8] sm:$0xff]  ;;  %v6607_v53 = vld [vmem:[#allocation11 + $0x3d0] sm:$0xff] }
0x193c   :  { %5179 = vmatpush.msrb.mxu1 %v6573_v8  ;;  %5199 = vmatpush.msrb.mxu2 %v6574_v9  ;;  %v6609_v16 = vld [vmem:[#allocation11 + $0x1b0] sm:$0xff]  ;;  %v6610_v8 = vld [vmem:[#allocation11 + $0x1b8] sm:$0xff] }
0x193d   :  { %5219 = vmatpush.msrb.mxu3 %v6575_v34  ;;  %5239 = vmatpush.msra.mxu0 %v6576_v19  ;;  %v6611_v9 = vld [vmem:[#allocation11 + $0x3b0] sm:$0xff]  ;;  %v6612_v34 = vld [vmem:[#allocation11 + $0x3b8] sm:$0xff] }
0x193e   :  { %5180 = vmatpush.msrb.mxu1 %v6577_v42  ;;  %5200 = vmatpush.msrb.mxu2 %v6578_v40  ;;  %v6613_v19 = vld [vmem:[#allocation11 + $0x190] sm:$0xff]  ;;  %v6614_v42 = vld [vmem:[#allocation11 + $0x198] sm:$0xff] }
0x193f   :  { %5220 = vmatpush.msrb.mxu3 %v6579_v48  ;;  %5240 = vmatpush.msra.mxu0 %v6580_v4  ;;  %v6615_v40 = vld [vmem:[#allocation11 + $0x390] sm:$0xff]  ;;  %v6616_v48 = vld [vmem:[#allocation11 + $0x398] sm:$0xff] }
0x1940   :  { %5181 = vmatpush.msrb.mxu1 %v6581_v41  ;;  %5201 = vmatpush.msrb.mxu2 %v6582_v26  ;;  %v6617_v4 = vld [vmem:[#allocation11 + $0x170] sm:$0xff]  ;;  %v6618_v41 = vld [vmem:[#allocation11 + $0x178] sm:$0xff] }
0x1941   :  { %5221 = vmatpush.msrb.mxu3 %v6583_v21  ;;  %5241 = vmatpush.msra.mxu0 %v6584_v27  ;;  %v6619_v26 = vld [vmem:[#allocation11 + $0x370] sm:$0xff]  ;;  %v6620_v21 = vld [vmem:[#allocation11 + $0x378] sm:$0xff] }
0x1942   :  { %5182 = vmatpush.msrb.mxu1 %v6585_v33  ;;  %5202 = vmatpush.msrb.mxu2 %v6586_v35  ;;  %v6621_v27 = vld [vmem:[#allocation11 + $0x150] sm:$0xff]  ;;  %v6622_v33 = vld [vmem:[#allocation11 + $0x158] sm:$0xff] }
0x1943   :  { %5222 = vmatpush.msrb.mxu3 %v6587_v24  ;;  %5242 = vmatpush.msra.mxu0 %v6588_v32  ;;  %v6623_v35 = vld [vmem:[#allocation11 + $0x350] sm:$0xff]  ;;  %v6624_v24 = vld [vmem:[#allocation11 + $0x358] sm:$0xff] }
0x1944   :  { %5183 = vmatpush.msrb.mxu1 %v6589_v2  ;;  %5203 = vmatpush.msrb.mxu2 %v6590_v44  ;;  %v6625_v32 = vld [vmem:[#allocation11 + $0x130] sm:$0xff]  ;;  %v6626_v2 = vld [vmem:[#allocation11 + $0x138] sm:$0xff] }
0x1945   :  { %5223 = vmatpush.msrb.mxu3 %v6591_v20  ;;  %5243 = vmatpush.msra.mxu0 %v6592_v61  ;;  %v6627_v44 = vld [vmem:[#allocation11 + $0x330] sm:$0xff]  ;;  %v6628_v20 = vld [vmem:[#allocation11 + $0x338] sm:$0xff] }
0x1946   :  { %5184 = vmatpush.msrb.mxu1 %v6593_v10  ;;  %5204 = vmatpush.msrb.mxu2 %v6594_v31  ;;  %v6629_v61 = vld [vmem:[#allocation11 + $0x110] sm:$0xff]  ;;  %v6630_v10 = vld [vmem:[#allocation11 + $0x118] sm:$0xff] }
0x1947   :  { %5224 = vmatpush.msrb.mxu3 %v6595_v47  ;;  %5244 = vmatpush.msra.mxu0 %v6596_v43  ;;  %v6631_v31 = vld [vmem:[#allocation11 + $0x310] sm:$0xff]  ;;  %v6632_v47 = vld [vmem:[#allocation11 + $0x318] sm:$0xff] }
0x1948   :  { %5185 = vmatpush.msrb.mxu1 %v6597_v63  ;;  %5205 = vmatpush.msrb.mxu2 %v6598_v28  ;;  %v6633_v43 = vld [vmem:[#allocation11 + $0xf0] sm:$0xff]  ;;  %v6634_v63 = vld [vmem:[#allocation11 + $0xf8] sm:$0xff] }
0x1949   :  { %5225 = vmatpush.msrb.mxu3 %v6599_v46  ;;  %5245 = vmatpush.msra.mxu0 %v6600_v29  ;;  %v6635_v28 = vld [vmem:[#allocation11 + $0x2f0] sm:$0xff]  ;;  %v6636_v46 = vld [vmem:[#allocation11 + $0x2f8] sm:$0xff] }
0x194a   :  { %v6637_v29 = vld [vmem:[#allocation11 + $0xd0] sm:$0xff] }
0x19a5   :  { %v4996_v56 = vpop.f32.mrf.mxu1 }
0x19a6   :  { %v4997_v54 = vadd.f32 %v4996_v56, %v7318_v3  ;;  %v5056_v50 = vpop.f32.mrf.mxu0  ;;  %v6605_v3 = vld [vmem:[#allocation11 + $0x1d0] sm:$0xff]  ;;  %v6638_v56 = vld [vmem:[#allocation11 + $0xd8] sm:$0xff] }
0x19ab   :  { %v5016_v59 = vpop.f32.mrf.mxu2 }
0x19ac   :  { %v5017_v55 = vadd.f32 %v5016_v59, %v4997_v54  ;;  %v5036_v60 = vpop.f32.mrf.mxu3  ;;  %v6639_v54 = vld [vmem:[#allocation11 + $0x2d0] sm:$0xff]  ;;  %v6640_v59 = vld [vmem:[#allocation11 + $0x2d8] sm:$0xff] }
0x19ad   :  { %v5037_v22 = vadd.f32 %v5036_v60, %v7321_v6  ;;  %v6608_v6 = vld [vmem:[#allocation11 + $0x3d8] sm:$0xff] }
0x19ae   :  { %5075 = vmatmul.f32.vlgmr.msra.gmra.mxu1 %v5017_v55  ;;  %5115 = vmatmul.f32.vlgmr.msra.gmra.mxu3 %v5017_v55  ;;  %v6641_v55 = vld [vmem:[#allocation11 + $0xb0] sm:$0xff]  ;;  %v6642_v60 = vld [vmem:[#allocation11 + $0xb8] sm:$0xff] }
0x19af   :  { %v5057_v13 = vadd.f32 %v5056_v50, %v5037_v22  ;;  %5250 = vmatpush.msra.mxu1 %v6601_v14  ;;  %5290 = vmatpush.msra.mxu3 %v6602_v51  ;;  %v6643_v22 = vld [vmem:[#allocation11 + $0x2b0] sm:$0xff]  ;;  %v6644_v50 = vld [vmem:[#allocation11 + $0x2b8] sm:$0xff] }
0x19b0   :  { %v6646_v14 = vld [vmem:[#allocation11 + $0x98] sm:$0xff]  ;;  %v6647_v51 = vld [vmem:[#allocation11 + $0x290] sm:$0xff] }
0x19b1   :  { %5095 = vmatmul.f32.vlgmr.msra.gmra.mxu2 %v5057_v13  ;;  %5135 = vmatmul.f32.vlgmr.msrb.gmra.mxu0 %v5057_v13  ;;  %v6645_v13 = vld [vmem:[#allocation11 + $0x90] sm:$0xff] }
0x19b2   :  { %5270 = vmatpush.msra.mxu2 %v6603_v15  ;;  %5310 = vmatpush.msrb.mxu0 %v6604_v12  ;;  %v6648_v15 = vld [vmem:[#allocation11 + $0x298] sm:$0xff]  ;;  %v6649_v12 = vld [vmem:[#allocation11 + $0x70] sm:$0xff] }
0x19b3   :  { %5251 = vmatpush.msra.mxu1 %v6605_v3  ;;  %5291 = vmatpush.msra.mxu3 %v6606_v49  ;;  %v6650_v3 = vld [vmem:[#allocation11 + $0x78] sm:$0xff]  ;;  %v6651_v49 = vld [vmem:[#allocation11 + $0x270] sm:$0xff] }
0x19b4   :  { %5271 = vmatpush.msra.mxu2 %v6607_v53  ;;  %5311 = vmatpush.msrb.mxu0 %v6608_v6  ;;  %v6652_v53 = vld [vmem:[#allocation11 + $0x278] sm:$0xff]  ;;  %v6653_v6 = vld [vmem:[#allocation11 + $0x50] sm:$0xff] }
0x19b5   :  { %5252 = vmatpush.msra.mxu1 %v6609_v16  ;;  %5292 = vmatpush.msra.mxu3 %v6610_v8  ;;  %v6654_v16 = vld [vmem:[#allocation11 + $0x58] sm:$0xff]  ;;  %v6655_v8 = vld [vmem:[#allocation11 + $0x250] sm:$0xff] }
0x19b6   :  { %5272 = vmatpush.msra.mxu2 %v6611_v9  ;;  %5312 = vmatpush.msrb.mxu0 %v6612_v34  ;;  %v6656_v9 = vld [vmem:[#allocation11 + $0x258] sm:$0xff]  ;;  %v6657_v34 = vld [vmem:[#allocation11 + $0x30] sm:$0xff] }
0x19b7   :  { %5253 = vmatpush.msra.mxu1 %v6613_v19  ;;  %5293 = vmatpush.msra.mxu3 %v6614_v42  ;;  %v6658_v19 = vld [vmem:[#allocation11 + $0x38] sm:$0xff]  ;;  %v6659_v42 = vld [vmem:[#allocation11 + $0x230] sm:$0xff] }
0x19b8   :  { %5273 = vmatpush.msra.mxu2 %v6615_v40  ;;  %5313 = vmatpush.msrb.mxu0 %v6616_v48  ;;  %v6660_v40 = vld [vmem:[#allocation11 + $0x238] sm:$0xff]  ;;  %v6661_v48 = vld [vmem:[#allocation11 + $0x10] sm:$0xff] }
0x19b9   :  { %5254 = vmatpush.msra.mxu1 %v6617_v4  ;;  %5294 = vmatpush.msra.mxu3 %v6618_v41  ;;  %v6662_v4 = vld [vmem:[#allocation11 + $0x18] sm:$0xff]  ;;  %v6663_v41 = vld [vmem:[#allocation11 + $0x210] sm:$0xff] }
0x19ba   :  { %5274 = vmatpush.msra.mxu2 %v6619_v26  ;;  %5314 = vmatpush.msrb.mxu0 %v6620_v21  ;;  %v6664_v26 = vld [vmem:[#allocation11 + $0x218] sm:$0xff] }
0x19bb   :  { %5255 = vmatpush.msra.mxu1 %v6621_v27  ;;  %5295 = vmatpush.msra.mxu3 %v6622_v33 }
0x19bc   :  { %5275 = vmatpush.msra.mxu2 %v6623_v35  ;;  %5315 = vmatpush.msrb.mxu0 %v6624_v24 }
0x19bd   :  { %5256 = vmatpush.msra.mxu1 %v6625_v32  ;;  %5296 = vmatpush.msra.mxu3 %v6626_v2 }
0x19be   :  { %5276 = vmatpush.msra.mxu2 %v6627_v44  ;;  %5316 = vmatpush.msrb.mxu0 %v6628_v20 }
0x19bf   :  { %5257 = vmatpush.msra.mxu1 %v6629_v61  ;;  %5297 = vmatpush.msra.mxu3 %v6630_v10 }
0x19c0   :  { %5277 = vmatpush.msra.mxu2 %v6631_v31  ;;  %5317 = vmatpush.msrb.mxu0 %v6632_v47 }
0x19c1   :  { %5258 = vmatpush.msra.mxu1 %v6633_v43  ;;  %5298 = vmatpush.msra.mxu3 %v6634_v63 }
0x19c2   :  { %5278 = vmatpush.msra.mxu2 %v6635_v28  ;;  %5318 = vmatpush.msrb.mxu0 %v6636_v46 }
0x19c3   :  { %5259 = vmatpush.msra.mxu1 %v6637_v29  ;;  %5299 = vmatpush.msra.mxu3 %v6638_v56 }
0x19c4   :  { %5279 = vmatpush.msra.mxu2 %v6639_v54  ;;  %5319 = vmatpush.msrb.mxu0 %v6640_v59 }
0x19c5   :  { %5260 = vmatpush.msra.mxu1 %v6641_v55  ;;  %5300 = vmatpush.msra.mxu3 %v6642_v60 }
0x19c6   :  { %5280 = vmatpush.msra.mxu2 %v6643_v22  ;;  %5320 = vmatpush.msrb.mxu0 %v6644_v50 }
0x19c7   :  { %5261 = vmatpush.msra.mxu1 %v6645_v13  ;;  %5301 = vmatpush.msra.mxu3 %v6646_v14 }
0x19c8   :  { %5281 = vmatpush.msra.mxu2 %v6647_v51  ;;  %5321 = vmatpush.msrb.mxu0 %v6648_v15 }
0x19c9   :  { %5262 = vmatpush.msra.mxu1 %v6649_v12  ;;  %5302 = vmatpush.msra.mxu3 %v6650_v3  ;;  %v6665_v3 = vld [vmem:[#allocation8 + $0xdf0] sm:$0xff] }
0x19ca   :  { %5282 = vmatpush.msra.mxu2 %v6651_v49  ;;  %5322 = vmatpush.msrb.mxu0 %v6652_v53  ;;  %v6666_v49 = vld [vmem:[#allocation8 + $0xef0] sm:$0xff]  ;;  %v6671_v53 = vld [vmem:[#allocation8 + $0xfe0] sm:$0xff] }
0x19cb   :  { %5263 = vmatpush.msra.mxu1 %v6653_v6  ;;  %5303 = vmatpush.msra.mxu3 %v6654_v16  ;;  %v6672_v6 = vld [vmem:[#allocation8 + $0x10e0] sm:$0xff]  ;;  %v6673_v16 = vld [vmem:[#allocation8 + $0xdd0] sm:$0xff] }
0x19cc   :  { %5283 = vmatpush.msra.mxu2 %v6655_v8  ;;  %5323 = vmatpush.msrb.mxu0 %v6656_v9  ;;  %v6674_v8 = vld [vmem:[#allocation8 + $0xed0] sm:$0xff] }
0x19cd   :  { %5264 = vmatpush.msra.mxu1 %v6657_v34  ;;  %5304 = vmatpush.msra.mxu3 %v6658_v19  ;;  %v6675_v9 = vld [vmem:[#allocation8 + $0xfd0] sm:$0xff]  ;;  %v6677_v19 = vld [vmem:[#allocation8 + $0xdc0] sm:$0xff] }
0x19ce   :  { %5284 = vmatpush.msra.mxu2 %v6659_v42  ;;  %5324 = vmatpush.msrb.mxu0 %v6660_v40  ;;  %v6676_v34 = vld [vmem:[#allocation8 + $0x10d0] sm:$0xff]  ;;  %v6678_v42 = vld [vmem:[#allocation8 + $0xec0] sm:$0xff] }
0x19cf   :  { %5265 = vmatpush.msra.mxu1 %v6661_v48  ;;  %5305 = vmatpush.msra.mxu3 %v6662_v4  ;;  %v6679_v40 = vld [vmem:[#allocation8 + $0xfc0] sm:$0xff]  ;;  %v6681_v4 = vld [vmem:[#allocation8 + $0xdb0] sm:$0xff] }
0x19d0   :  { %5285 = vmatpush.msra.mxu2 %v6663_v41  ;;  %5325 = vmatpush.msrb.mxu0 %v6664_v26  ;;  %v6680_v48 = vld [vmem:[#allocation8 + $0x10c0] sm:$0xff]  ;;  %v6682_v41 = vld [vmem:[#allocation8 + $0xeb0] sm:$0xff] }
0x19d1   :  { %v6683_v26 = vld [vmem:[#allocation8 + $0xfb0] sm:$0xff] }
0x1a2b   :  { %v5076_v21 = vpop.f32.mrf.mxu1 }
0x1a2c   :  { %v5077_v35 = vadd.f32 %v5076_v21, %v7326_v17  ;;  %v6684_v21 = vld [vmem:[#allocation8 + $0x10b0] sm:$0xff] }
0x1a2e   :  { %v5136_v24 = vpop.f32.mrf.mxu0 }
0x1a31   :  { %v5116_v27 = vpop.f32.mrf.mxu3 }
0x1a32   :  { %v5117_v33 = vadd.f32 %v5116_v27, %v7329_v18  ;;  %v6685_v27 = vld [vmem:[#allocation8 + $0xda0] sm:$0xff] }
0x1a34   :  { %v5137_v32 = vadd.f32 %v5136_v24, %v5117_v33  ;;  %v5096_v2 = vpop.f32.mrf.mxu2  ;;  %v6686_v33 = vld [vmem:[#allocation8 + $0xea0] sm:$0xff] }
0x1a35   :  { %v5097_v44 = vadd.f32 %v5096_v2, %v5077_v35  ;;  %v6687_v35 = vld [vmem:[#allocation8 + $0xfa0] sm:$0xff]  ;;  %v6690_v2 = vld [vmem:[#allocation8 + $0xe90] sm:$0xff] }
0x1a36   :  { %v5140_v20 = vadd.f32 %v5137_v32, %v7683_v7  ;;  %v6688_v24 = vld [vmem:[#allocation8 + $0x10a0] sm:$0xff]  ;;  %v6689_v32 = vld [vmem:[#allocation8 + $0xd90] sm:$0xff] }
0x1a37   :  { %v5139_v61 = vadd.f32 %v5097_v44, %v7680_v1  ;;  %v6691_v44 = vld [vmem:[#allocation8 + $0xf90] sm:$0xff] }
0x1a39   :  { %v5141_v10 = vadd.f32 %v5140_v20, %v5139_v61 }
0x1a3b   :  { %5142 = vadd.xlane.f32.xlu2 %v5141_v10  ;;  %v6694_v10 = vld [vmem:[#allocation8 + $0xe80] sm:$0xff] }
0x1aae   :  { %v5143_v31 = vpop.xlane.xlu2 %5142 }
0x1aaf   :  { %v5144_v47 = vmul.f32 %v5143_v31, %v7240_v5  ;;  %v6695_v31 = vld [vmem:[#allocation8 + $0xf80] sm:$0xff] }
0x1ab1   :  { %v5145_v43 = vsub.f32 %v5139_v61, %v5144_v47  ;;  %v5146_v63 = vsub.f32 %v5140_v20, %v5144_v47  ;;  %v6692_v20 = vld [vmem:[#allocation8 + $0x1090] sm:$0xff]  ;;  %v6693_v61 = vld [vmem:[#allocation8 + $0xd80] sm:$0xff] }
0x1ab2   :  { %v6696_v47 = vld [vmem:[#allocation8 + $0x1080] sm:$0xff] }
0x1ab3   :  { %v5147_v28 = vmul.f32 %v5145_v43, %v5145_v43  ;;  %v5148_v46 = vmul.f32 %v5146_v63, %v5146_v63 }
0x1ab5   :  { %v5149_v18 = vadd.f32 %v5148_v46, %v5147_v28  ;;  %v6699_v28 = vld [vmem:[#allocation8 + $0xf70] sm:$0xff] }
0x1ab6   :  { %v6700_v46 = vld [vmem:[#allocation8 + $0x1070] sm:$0xff] }
0x1ab7   :  { %5150 = vadd.xlane.f32.xlu0 %v5149_v18  ;;  %v6701_v18 = vld [vmem:[#allocation8 + $0xd60] sm:$0xff] }
0x1b2a   :  { %v5151_v17 = vpop.xlane.xlu0 %5150 }
0x1b2b   :  { %v5152_v29 = vmul.f32 %v5151_v17, %v7240_v5  ;;  %v6702_v17 = vld [vmem:[#allocation8 + $0xe60] sm:$0xff] }
0x1b2d   :  { %v5153_v56 = vadd.f32 1e-05, %v5152_v29  ;;  %v6703_v29 = vld [vmem:[#allocation8 + $0xf60] sm:$0xff] }
0x1b2f   :  { %5635 = vrsqrt.f32 %v5153_v56  ;;  %vm5160_vm10 = vweird.f32 %v5153_v56 }
0x1b35   :  { %v5636_v54 = vpop.eup %5635 }
0x1b36   :  { %v5155_v7 = vmul.f32 %v5636_v54, %v5153_v56  ;;  %vm5161_vm9 = vweird.f32 %v5636_v54  ;;  %v6704_v56 = vld [vmem:[#allocation8 + $0x1060] sm:$0xff] }
0x1b37   :  { %vm5162_vm11 = vmor %vm5160_vm10, %vm5161_vm9 }
0x1b38   :  { %v5156_v59 = vmul.f32 %v5636_v54, %v5155_v7  ;;  %v6706_v7 = vld [vmem:[#allocation8 + $0xe50] sm:$0xff] }
0x1b3a   :  { %v5157_v1 = vmul.f32 0.5, %v5156_v59  ;;  %v6707_v59 = vld [vmem:[#allocation8 + $0xf50] sm:$0xff] }
0x1b3c   :  { %v5158_v55 = vsub.f32 1.5, %v5157_v1  ;;  %v6708_v1 = vld [vmem:[#allocation8 + $0x1050] sm:$0xff] }
0x1b3e   :  { %v5159_v60 = vmul.f32 %v5636_v54, %v5158_v55  ;;  %v6709_v55 = vld [vmem:[#allocation8 + $0xd40] sm:$0xff] }
0x1b40   :  { %v5163_v22 = vsel %vm5162_vm11, %v5636_v54, %v5159_v60  ;;  %v6705_v54 = vld [vmem:[#allocation8 + $0xd50] sm:$0xff]  ;;  %v6710_v60 = vld [vmem:[#allocation8 + $0xe40] sm:$0xff] }
0x1b41   :  { %v5164_v50 = vmul.f32 %v5163_v22, %v5145_v43  ;;  %v5165_v13 = vmul.f32 %v5163_v22, %v5146_v63  ;;  %v6697_v43 = vld [vmem:[#allocation8 + $0xd70] sm:$0xff]  ;;  %v6711_v22 = vld [vmem:[#allocation8 + $0xf40] sm:$0xff] }
0x1b42   :  { %v6698_v63 = vld [vmem:[#allocation8 + $0xe70] sm:$0xff] }
0x1b43   :  { %v5166_v14 = vmul.f32 %v5164_v50, %v7358_v57  ;;  %v5167_v51 = vmul.f32 %v5165_v13, %v7361_v58  ;;  %v6667_v57 = vld [vmem:[#allocation8 + $0xff0] sm:$0xff]  ;;  %v6712_v50 = vld [vmem:[#allocation8 + $0x1040] sm:$0xff] }
0x1b44   :  { %v6668_v58 = vld [vmem:[#allocation8 + $0x10f0] sm:$0xff] }
0x1b45   :  { %v7700_v15 = vadd.f32 %v5166_v14, %v7366_v62  ;;  %v7703_v12 = vadd.f32 %v5167_v51, %v7369_v0  ;;  %v6669_v62 = vld [vmem:[#allocation8 + $0xde0] sm:$0xff]  ;;  %v6713_v13 = vld [vmem:[#allocation8 + $0xd30] sm:$0xff] }
0x1b46   :  { %v6670_v0 = vld [vmem:[#allocation8 + $0xee0] sm:$0xff]  ;;  %v6714_v14 = vld [vmem:[#allocation8 + $0xe30] sm:$0xff] }
0x1b47   :  { %5186 = vmatmul.f32.vlgmr.msrb.gmra.mxu1 %v7700_v15  ;;  %5206 = vmatmul.f32.vlgmr.msrb.gmra.mxu2 %v7703_v12  ;;  %v6715_v51 = vld [vmem:[#allocation8 + $0xf30] sm:$0xff] }
0x1b48   :  { %5226 = vmatmul.f32.vlgmr.msrb.gmra.mxu3 %v7700_v15  ;;  %5246 = vmatmul.f32.vlgmr.msra.gmra.mxu0 %v7703_v12 }
0x1b49   :  { %5334 = vmatpush.msrb.mxu1 %v6665_v3  ;;  %5354 = vmatpush.msrb.mxu2 %v6666_v49  ;;  %v6716_v3 = vld [vmem:[#allocation8 + $0x1030] sm:$0xff]  ;;  %v6717_v49 = vld [vmem:[#allocation8 + $0xd20] sm:$0xff] }
0x1b4a   :  { %5374 = vmatpush.msrb.mxu3 %v6667_v57  ;;  %5394 = vmatpush.msra.mxu0 %v6668_v58  ;;  %v6718_v57 = vld [vmem:[#allocation8 + $0xe20] sm:$0xff] }
0x1b4b   :  { %5335 = vmatpush.msrb.mxu1 %v6669_v62  ;;  %5355 = vmatpush.msrb.mxu2 %v6670_v0  ;;  %v6719_v58 = vld [vmem:[#allocation8 + $0xf20] sm:$0xff]  ;;  %v6721_v0 = vld [vmem:[#allocation8 + $0xd10] sm:$0xff] }
0x1b4c   :  { %5375 = vmatpush.msrb.mxu3 %v6671_v53  ;;  %5395 = vmatpush.msra.mxu0 %v6672_v6  ;;  %v6720_v62 = vld [vmem:[#allocation8 + $0x1020] sm:$0xff]  ;;  %v6722_v53 = vld [vmem:[#allocation8 + $0xe10] sm:$0xff] }
0x1b4d   :  { %5336 = vmatpush.msrb.mxu1 %v6673_v16  ;;  %5356 = vmatpush.msrb.mxu2 %v6674_v8  ;;  %v6723_v6 = vld [vmem:[#allocation8 + $0xf10] sm:$0xff]  ;;  %v6725_v8 = vld [vmem:[#allocation8 + $0xd00] sm:$0xff] }
0x1b4e   :  { %5376 = vmatpush.msrb.mxu3 %v6675_v9  ;;  %5396 = vmatpush.msra.mxu0 %v6676_v34  ;;  %v6724_v16 = vld [vmem:[#allocation8 + $0x1010] sm:$0xff]  ;;  %v6726_v9 = vld [vmem:[#allocation8 + $0xe00] sm:$0xff]  ;;  %v6727_v34 = vld [vmem:[#allocation8 + $0xdf8] sm:$0xff] }
0x1b4f   :  { %5266 = vmatmul.f32.vlgmr.msra.gmra.mxu1 %v7700_v15  ;;  %5286 = vmatmul.f32.vlgmr.msra.gmra.mxu2 %v7703_v12 }
0x1b50   :  { %5306 = vmatmul.f32.vlgmr.msra.gmra.mxu3 %v7700_v15  ;;  %5326 = vmatmul.f32.vlgmr.msrb.gmra.mxu0 %v7703_v12 }
0x1b51   :  { %5337 = vmatpush.msrb.mxu1 %v6677_v19  ;;  %5357 = vmatpush.msrb.mxu2 %v6678_v42  ;;  %v6728_v19 = vld [vmem:[#allocation8 + $0xef8] sm:$0xff]  ;;  %v6729_v42 = vld [vmem:[#allocation8 + $0xf00] sm:$0xff] }
0x1b52   :  { %5377 = vmatpush.msrb.mxu3 %v6679_v40  ;;  %5397 = vmatpush.msra.mxu0 %v6680_v48  ;;  %v6730_v40 = vld [vmem:[#allocation8 + $0x1000] sm:$0xff]  ;;  %v6731_v48 = vld [vmem:[#allocation8 + $0xde8] sm:$0xff] }
0x1b53   :  { %5338 = vmatpush.msrb.mxu1 %v6681_v4  ;;  %5358 = vmatpush.msrb.mxu2 %v6682_v41  ;;  %v6732_v4 = vld [vmem:[#allocation8 + $0xee8] sm:$0xff]  ;;  %v6733_v41 = vld [vmem:[#allocation8 + $0xff8] sm:$0xff] }
0x1b54   :  { %5378 = vmatpush.msrb.mxu3 %v6683_v26  ;;  %5398 = vmatpush.msra.mxu0 %v6684_v21  ;;  %v6734_v26 = vld [vmem:[#allocation8 + $0x10f8] sm:$0xff] }
0x1b55   :  { %5339 = vmatpush.msrb.mxu1 %v6685_v27  ;;  %5359 = vmatpush.msrb.mxu2 %v6686_v33  ;;  %v6735_v21 = vld [vmem:[#allocation8 + $0xdd8] sm:$0xff]  ;;  %v6737_v33 = vld [vmem:[#allocation8 + $0xfe8] sm:$0xff] }
0x1b56   :  { %5379 = vmatpush.msrb.mxu3 %v6687_v35  ;;  %5399 = vmatpush.msra.mxu0 %v6688_v24  ;;  %v6736_v27 = vld [vmem:[#allocation8 + $0xed8] sm:$0xff]  ;;  %v6738_v35 = vld [vmem:[#allocation8 + $0x10e8] sm:$0xff] }
0x1b57   :  { %5340 = vmatpush.msrb.mxu1 %v6689_v32  ;;  %5360 = vmatpush.msrb.mxu2 %v6690_v2  ;;  %v6739_v24 = vld [vmem:[#allocation8 + $0xdc8] sm:$0xff]  ;;  %v6741_v2 = vld [vmem:[#allocation8 + $0xfd8] sm:$0xff] }
0x1b58   :  { %5380 = vmatpush.msrb.mxu3 %v6691_v44  ;;  %5400 = vmatpush.msra.mxu0 %v6692_v20  ;;  %v6740_v32 = vld [vmem:[#allocation8 + $0xec8] sm:$0xff]  ;;  %v6742_v44 = vld [vmem:[#allocation8 + $0x10d8] sm:$0xff] }
0x1b59   :  { %5341 = vmatpush.msrb.mxu1 %v6693_v61  ;;  %5361 = vmatpush.msrb.mxu2 %v6694_v10  ;;  %v6743_v20 = vld [vmem:[#allocation8 + $0xdb8] sm:$0xff]  ;;  %v6745_v10 = vld [vmem:[#allocation8 + $0xfc8] sm:$0xff] }
0x1b5a   :  { %5381 = vmatpush.msrb.mxu3 %v6695_v31  ;;  %5401 = vmatpush.msra.mxu0 %v6696_v47  ;;  %v6744_v61 = vld [vmem:[#allocation8 + $0xeb8] sm:$0xff]  ;;  %v6746_v31 = vld [vmem:[#allocation8 + $0x10c8] sm:$0xff] }
0x1b5b   :  { %5342 = vmatpush.msrb.mxu1 %v6697_v43  ;;  %5362 = vmatpush.msrb.mxu2 %v6698_v63  ;;  %v6747_v47 = vld [vmem:[#allocation8 + $0xda8] sm:$0xff]  ;;  %v6749_v63 = vld [vmem:[#allocation8 + $0xfb8] sm:$0xff] }
0x1b5c   :  { %5382 = vmatpush.msrb.mxu3 %v6699_v28  ;;  %5402 = vmatpush.msra.mxu0 %v6700_v46  ;;  %v6748_v43 = vld [vmem:[#allocation8 + $0xea8] sm:$0xff]  ;;  %v6750_v28 = vld [vmem:[#allocation8 + $0x10b8] sm:$0xff] }
0x1b5d   :  { %5343 = vmatpush.msrb.mxu1 %v6701_v18  ;;  %5363 = vmatpush.msrb.mxu2 %v6702_v17  ;;  %v6751_v46 = vld [vmem:[#allocation8 + $0xd98] sm:$0xff]  ;;  %v6753_v17 = vld [vmem:[#allocation8 + $0xfa8] sm:$0xff] }
0x1b5e   :  { %5383 = vmatpush.msrb.mxu3 %v6703_v29  ;;  %5403 = vmatpush.msra.mxu0 %v6704_v56  ;;  %v6752_v18 = vld [vmem:[#allocation8 + $0xe98] sm:$0xff]  ;;  %v6754_v29 = vld [vmem:[#allocation8 + $0x10a8] sm:$0xff] }
0x1b5f   :  { %5344 = vmatpush.msrb.mxu1 %v6705_v54  ;;  %5364 = vmatpush.msrb.mxu2 %v6706_v7  ;;  %v6755_v56 = vld [vmem:[#allocation8 + $0xd88] sm:$0xff]  ;;  %v6757_v7 = vld [vmem:[#allocation8 + $0xf98] sm:$0xff] }
0x1b60   :  { %5384 = vmatpush.msrb.mxu3 %v6707_v59  ;;  %5404 = vmatpush.msra.mxu0 %v6708_v1  ;;  %v6756_v54 = vld [vmem:[#allocation8 + $0xe88] sm:$0xff]  ;;  %v6758_v59 = vld [vmem:[#allocation8 + $0x1098] sm:$0xff] }
0x1b61   :  { %5345 = vmatpush.msrb.mxu1 %v6709_v55  ;;  %5365 = vmatpush.msrb.mxu2 %v6710_v60  ;;  %v6759_v1 = vld [vmem:[#allocation8 + $0xd78] sm:$0xff]  ;;  %v6761_v60 = vld [vmem:[#allocation8 + $0xf88] sm:$0xff] }
0x1b62   :  { %5385 = vmatpush.msrb.mxu3 %v6711_v22  ;;  %5405 = vmatpush.msra.mxu0 %v6712_v50  ;;  %v6760_v55 = vld [vmem:[#allocation8 + $0xe78] sm:$0xff]  ;;  %v6762_v22 = vld [vmem:[#allocation8 + $0x1088] sm:$0xff] }
0x1b63   :  { %5346 = vmatpush.msrb.mxu1 %v6713_v13  ;;  %5366 = vmatpush.msrb.mxu2 %v6714_v14  ;;  %v6763_v50 = vld [vmem:[#allocation8 + $0xd68] sm:$0xff]  ;;  %v6765_v14 = vld [vmem:[#allocation8 + $0xf78] sm:$0xff] }
0x1b64   :  { %5386 = vmatpush.msrb.mxu3 %v6715_v51  ;;  %5406 = vmatpush.msra.mxu0 %v6716_v3  ;;  %v6764_v13 = vld [vmem:[#allocation8 + $0xe68] sm:$0xff]  ;;  %v6766_v51 = vld [vmem:[#allocation8 + $0x1078] sm:$0xff] }
0x1b65   :  { %5347 = vmatpush.msrb.mxu1 %v6717_v49  ;;  %5367 = vmatpush.msrb.mxu2 %v6718_v57  ;;  %v6767_v3 = vld [vmem:[#allocation8 + $0xd58] sm:$0xff]  ;;  %v6769_v57 = vld [vmem:[#allocation8 + $0xf68] sm:$0xff] }
0x1b66   :  { %5387 = vmatpush.msrb.mxu3 %v6719_v58  ;;  %5407 = vmatpush.msra.mxu0 %v6720_v62  ;;  %v6768_v49 = vld [vmem:[#allocation8 + $0xe58] sm:$0xff]  ;;  %v6770_v58 = vld [vmem:[#allocation8 + $0x1068] sm:$0xff] }
0x1b67   :  { %5348 = vmatpush.msrb.mxu1 %v6721_v0  ;;  %5368 = vmatpush.msrb.mxu2 %v6722_v53  ;;  %v6771_v62 = vld [vmem:[#allocation8 + $0xd48] sm:$0xff]  ;;  %v6773_v53 = vld [vmem:[#allocation8 + $0xf58] sm:$0xff] }
0x1b68   :  { %5388 = vmatpush.msrb.mxu3 %v6723_v6  ;;  %5408 = vmatpush.msra.mxu0 %v6724_v16  ;;  %v6772_v0 = vld [vmem:[#allocation8 + $0xe48] sm:$0xff]  ;;  %v6774_v6 = vld [vmem:[#allocation8 + $0x1058] sm:$0xff] }
0x1b69   :  { %5349 = vmatpush.msrb.mxu1 %v6725_v8  ;;  %5369 = vmatpush.msrb.mxu2 %v6726_v9  ;;  %v6775_v16 = vld [vmem:[#allocation8 + $0xd38] sm:$0xff]  ;;  %v6777_v9 = vld [vmem:[#allocation8 + $0xf48] sm:$0xff] }
0x1b6a   :  { %5389 = vmatpush.msrb.mxu3 %v6729_v42  ;;  %5409 = vmatpush.msra.mxu0 %v6730_v40  ;;  %v6776_v8 = vld [vmem:[#allocation8 + $0xe38] sm:$0xff]  ;;  %v6780_v42 = vld [vmem:[#allocation8 + $0xe28] sm:$0xff] }
0x1b6b   :  { %5414 = vmatpush.msra.mxu1 %v6727_v34  ;;  %5434 = vmatpush.msra.mxu2 %v6728_v19  ;;  %v6778_v34 = vld [vmem:[#allocation8 + $0x1048] sm:$0xff]  ;;  %v6781_v40 = vld [vmem:[#allocation8 + $0xf38] sm:$0xff] }
0x1b6c   :  { %5454 = vmatpush.msra.mxu3 %v6733_v41  ;;  %5474 = vmatpush.msrb.mxu0 %v6734_v26  ;;  %v6779_v19 = vld [vmem:[#allocation8 + $0xd28] sm:$0xff]  ;;  %v6784_v41 = vld [vmem:[#allocation8 + $0xe18] sm:$0xff] }
0x1b6d   :  { %5415 = vmatpush.msra.mxu1 %v6731_v48  ;;  %5435 = vmatpush.msra.mxu2 %v6732_v4  ;;  %v6782_v48 = vld [vmem:[#allocation8 + $0x1038] sm:$0xff]  ;;  %v6785_v26 = vld [vmem:[#allocation8 + $0xf28] sm:$0xff] }
0x1b6e   :  { %5455 = vmatpush.msra.mxu3 %v6737_v33  ;;  %5475 = vmatpush.msrb.mxu0 %v6738_v35  ;;  %v6783_v4 = vld [vmem:[#allocation8 + $0xd18] sm:$0xff]  ;;  %v6788_v33 = vld [vmem:[#allocation8 + $0xe08] sm:$0xff] }
0x1b6f   :  { %5416 = vmatpush.msra.mxu1 %v6735_v21  ;;  %5436 = vmatpush.msra.mxu2 %v6736_v27  ;;  %v6786_v21 = vld [vmem:[#allocation8 + $0x1028] sm:$0xff]  ;;  %v6789_v35 = vld [vmem:[#allocation8 + $0xf18] sm:$0xff] }
0x1b70   :  { %5456 = vmatpush.msra.mxu3 %v6741_v2  ;;  %5476 = vmatpush.msrb.mxu0 %v6742_v44  ;;  %v6787_v27 = vld [vmem:[#allocation8 + $0xd08] sm:$0xff] }
0x1b71   :  { %5417 = vmatpush.msra.mxu1 %v6739_v24  ;;  %5437 = vmatpush.msra.mxu2 %v6740_v32  ;;  %v6790_v24 = vld [vmem:[#allocation8 + $0x1018] sm:$0xff]  ;;  %v6791_v32 = vld [vmem:[#allocation8 + $0xf08] sm:$0xff] }
0x1b72   :  { %5457 = vmatpush.msra.mxu3 %v6745_v10  ;;  %5477 = vmatpush.msrb.mxu0 %v6746_v31  ;;  %v6792_v2 = vld [vmem:[#allocation8 + $0x1008] sm:$0xff] }
0x1b73   :  { %5418 = vmatpush.msra.mxu1 %v6743_v20  ;;  %5438 = vmatpush.msra.mxu2 %v6744_v61 }
0x1b74   :  { %5458 = vmatpush.msra.mxu3 %v6749_v63  ;;  %5478 = vmatpush.msrb.mxu0 %v6750_v28 }
0x1b75   :  { %5419 = vmatpush.msra.mxu1 %v6747_v47  ;;  %5439 = vmatpush.msra.mxu2 %v6748_v43 }
0x1b76   :  { %5459 = vmatpush.msra.mxu3 %v6753_v17  ;;  %5479 = vmatpush.msrb.mxu0 %v6754_v29 }
0x1b77   :  { %5420 = vmatpush.msra.mxu1 %v6751_v46  ;;  %5440 = vmatpush.msra.mxu2 %v6752_v18 }
0x1b78   :  { %5460 = vmatpush.msra.mxu3 %v6757_v7  ;;  %5480 = vmatpush.msrb.mxu0 %v6758_v59 }
0x1b79   :  { %5421 = vmatpush.msra.mxu1 %v6755_v56  ;;  %5441 = vmatpush.msra.mxu2 %v6756_v54 }
0x1b7a   :  { %5461 = vmatpush.msra.mxu3 %v6761_v60  ;;  %5481 = vmatpush.msrb.mxu0 %v6762_v22 }
0x1b7b   :  { %5422 = vmatpush.msra.mxu1 %v6759_v1  ;;  %5442 = vmatpush.msra.mxu2 %v6760_v55 }
0x1b7c   :  { %5462 = vmatpush.msra.mxu3 %v6765_v14  ;;  %5482 = vmatpush.msrb.mxu0 %v6766_v51 }
0x1b7d   :  { %5423 = vmatpush.msra.mxu1 %v6763_v50  ;;  %5443 = vmatpush.msra.mxu2 %v6764_v13 }
0x1b7e   :  { %5463 = vmatpush.msra.mxu3 %v6769_v57  ;;  %5483 = vmatpush.msrb.mxu0 %v6770_v58 }
0x1b7f   :  { %5424 = vmatpush.msra.mxu1 %v6767_v3  ;;  %5444 = vmatpush.msra.mxu2 %v6768_v49 }
0x1b80   :  { %5464 = vmatpush.msra.mxu3 %v6773_v53  ;;  %5484 = vmatpush.msrb.mxu0 %v6774_v6 }
0x1b81   :  { %5425 = vmatpush.msra.mxu1 %v6771_v62  ;;  %5445 = vmatpush.msra.mxu2 %v6772_v0 }
0x1b82   :  { %5465 = vmatpush.msra.mxu3 %v6777_v9  ;;  %5485 = vmatpush.msrb.mxu0 %v6778_v34 }
0x1b83   :  { %5426 = vmatpush.msra.mxu1 %v6775_v16  ;;  %5446 = vmatpush.msra.mxu2 %v6776_v8 }
0x1b84   :  { %5466 = vmatpush.msra.mxu3 %v6781_v40  ;;  %5486 = vmatpush.msrb.mxu0 %v6782_v48 }
0x1b85   :  { %5427 = vmatpush.msra.mxu1 %v6779_v19  ;;  %5447 = vmatpush.msra.mxu2 %v6780_v42 }
0x1b86   :  { %5467 = vmatpush.msra.mxu3 %v6785_v26  ;;  %5487 = vmatpush.msrb.mxu0 %v6786_v21 }
0x1b87   :  { %5428 = vmatpush.msra.mxu1 %v6783_v4  ;;  %5448 = vmatpush.msra.mxu2 %v6784_v41 }
0x1b88   :  { %5468 = vmatpush.msra.mxu3 %v6789_v35  ;;  %5488 = vmatpush.msrb.mxu0 %v6790_v24 }
0x1b89   :  { %5429 = vmatpush.msra.mxu1 %v6787_v27  ;;  %5449 = vmatpush.msra.mxu2 %v6788_v33 }
0x1b8a   :  { %5469 = vmatpush.msra.mxu3 %v6791_v32  ;;  %5489 = vmatpush.msrb.mxu0 %v6792_v2 }
0x1bc4   :  { %v5187_v44 = vpop.f32.mrf.mxu1 }
0x1bc5   :  { %v5188_v20 = vadd.f32 %v5187_v44, %v7387_v37  ;;  %v5247_v10 = vpop.f32.mrf.mxu0 }
0x1bca   :  { %v5207_v61 = vpop.f32.mrf.mxu2 }
0x1bcb   :  { %v5208_v31 = vadd.f32 %v5207_v61, %v5188_v20  ;;  %v5227_v47 = vpop.f32.mrf.mxu3 }
0x1bcc   :  { %v5228_v43 = vadd.f32 %v5227_v47, %v7389_v38  ;;  %v5267_v46 = vpop.f32.mrf.mxu1 }
0x1bcd   :  { %v5330_v63 = vmax.f32 %v5208_v31, 0.0  ;;  %v5268_v17 = vadd.f32 %v5267_v46, %v7393_v45  ;;  %v5327_v37 = vpop.f32.mrf.mxu0 }
0x1bce   :  { %v5248_v28 = vadd.f32 %v5247_v10, %v5228_v43 }
0x1bcf   :  { %5350 = vmatmul.f32.vlgmr.msrb.gmra.mxu1 %v5330_v63 }
0x1bd0   :  { %v5331_v18 = vmax.f32 %v5248_v28, 0.0 }
0x1bd2   :  { %5370 = vmatmul.f32.vlgmr.msrb.gmra.mxu2 %v5331_v18  ;;  %v5287_v29 = vpop.f32.mrf.mxu2 }
0x1bd3   :  { %v5288_v56 = vadd.f32 %v5287_v29, %v5268_v17  ;;  %v5307_v54 = vpop.f32.mrf.mxu3 }
0x1bd4   :  { %v5308_v7 = vadd.f32 %v5307_v54, %v7395_v52 }
0x1bd5   :  { %v5332_v59 = vmax.f32 %v5288_v56, 0.0 }
0x1bd6   :  { %v5328_v1 = vadd.f32 %v5327_v37, %v5308_v7 }
0x1bd7   :  { %5390 = vmatmul.f32.vlgmr.msrb.gmra.mxu3 %v5332_v59  ;;  %5430 = vmatmul.f32.vlgmr.msra.gmra.mxu1 %v5330_v63 }
0x1bd8   :  { %v5333_v55 = vmax.f32 %v5328_v1, 0.0 }
0x1bda   :  { %5410 = vmatmul.f32.vlgmr.msra.gmra.mxu0 %v5333_v55  ;;  %5450 = vmatmul.f32.vlgmr.msra.gmra.mxu2 %v5331_v18 }
0x1bdf   :  { %5470 = vmatmul.f32.vlgmr.msra.gmra.mxu3 %v5332_v59 }
0x1be2   :  { %5490 = vmatmul.f32.vlgmr.msrb.gmra.mxu0 %v5333_v55 }
0x1c4c   :  { %v5351_v60 = vpop.f32.mrf.mxu1 }
0x1c54   :  { %v5431_v51 = vpop.f32.mrf.mxu1 }
0x1c55   :  { %v5371_v38 = vpop.f32.mrf.mxu2 }
0x1c56   :  { %v5372_v50 = vadd.f32 %v5371_v38, %v5351_v60 }
0x1c57   :  { %v5411_v22 = vpop.f32.mrf.mxu0 }
0x1c5a   :  { %v5391_v45 = vpop.f32.mrf.mxu3 }
0x1c5b   :  { %v5392_v13 = vadd.f32 %v5391_v45, %v5372_v50 }
0x1c5d   :  { %v5451_v14 = vpop.f32.mrf.mxu2  ;;  %v5412_v3 = vadd.f32 %v5411_v22, %v5392_v13 }
0x1c5e   :  { %v5452_v52 = vadd.f32 %v5451_v14, %v5431_v51 }
0x1c5f   :  { %v5491_v58 = vpop.f32.mrf.mxu0  ;;  %v5494_v62 = vadd.f32 %v5412_v3, %v7700_v15 }
0x1c61   :  { %v5496_v6 = vadd.f32 %v5494_v62, %v7401_v23 }
0x1c62   :  { %v5471_v49 = vpop.f32.mrf.mxu3 }
0x1c63   :  { %v5472_v57 = vadd.f32 %v5471_v49, %v5452_v52 }
0x1c65   :  { %v5492_v0 = vadd.f32 %v5491_v58, %v5472_v57 }
0x1c67   :  { %v5495_v53 = vadd.f32 %v5492_v0, %v7703_v12 }
0x1c69   :  { %v5497_v16 = vadd.f32 %v5495_v53, %v7404_v11 }
0x1c6b   :  { %v5498_v8 = vadd.f32 %v5497_v16, %v5496_v6 }
0x1c6d   :  { %5499 = vadd.xlane.f32.xlu1 %v5498_v8 }
0x1ce0   :  { %v5500_v9 = vpop.xlane.xlu1 %5499 }
0x1ce1   :  { %v5501_v34 = vmul.f32 %v5500_v9, %v7240_v5 }
0x1ce3   :  { %v5502_v19 = vsub.f32 %v5496_v6, %v5501_v34  ;;  %v5503_v42 = vsub.f32 %v5497_v16, %v5501_v34 }
0x1ce5   :  { %v5504_v40 = vmul.f32 %v5502_v19, %v5502_v19  ;;  %v5505_v48 = vmul.f32 %v5503_v42, %v5503_v42 }
0x1ce7   :  { %v5506_v4 = vadd.f32 %v5505_v48, %v5504_v40 }
0x1ce9   :  { %5507 = vadd.xlane.f32.xlu2 %v5506_v4 }
0x1d5c   :  { %v5508_v23 = vpop.xlane.xlu2 %5507 }
0x1d5d   :  { %v5509_v11 = vmul.f32 %v5508_v23, %v7240_v5 }
0x1d5f   :  { %v5510_v15 = vadd.f32 1e-05, %v5509_v11 }
0x1d61   :  { %5637 = vrsqrt.f32 %v5510_v15  ;;  %vm5517_vm13 = vweird.f32 %v5510_v15 }
0x1d67   :  { %v5638_v12 = vpop.eup %5637 }
0x1d68   :  { %v5512_v41 = vmul.f32 %v5638_v12, %v5510_v15  ;;  %vm5518_vm12 = vweird.f32 %v5638_v12 }
0x1d69   :  { %vm5519_vm14 = vmor %vm5517_vm13, %vm5518_vm12 }
0x1d6a   :  { %v5513_v26 = vmul.f32 %v5638_v12, %v5512_v41 }
0x1d6c   :  { %v5514_v21 = vmul.f32 0.5, %v5513_v26 }
0x1d6e   :  { %v5515_v27 = vsub.f32 1.5, %v5514_v21 }
0x1d70   :  { %v5516_v33 = vmul.f32 %v5638_v12, %v5515_v27 }
0x1d72   :  { %v5520_v35 = vsel %vm5519_vm14, %v5638_v12, %v5516_v33 }
0x1d73   :  { %v5521_v24 = vmul.f32 %v5520_v35, %v5502_v19  ;;  %v5522_v32 = vmul.f32 %v5520_v35, %v5503_v42 }
0x1d75   :  { %v5523_v2 = vmul.f32 %v5521_v24, %v7412_v25  ;;  %v5524_v44 = vmul.f32 %v5522_v32, %v7415_v30 }
0x1d77   :  { %v5525_v5 = vadd.f32 %v5523_v2, %v7418_v36  ;;  %v5526_v20 = vadd.f32 %v5524_v44, %v7421_v39 }
0x1d79   :  { %5527 = vst [vmem:[%s7755_s13] sm:$0xff] %v5525_v5 }
0x1d7a   :  { %5528 = vst [vmem:[%s7755_s13 + $0x8] sm:$0xff] %v5526_v20 }
0x1d7b   :  { %7091 = dma.done.wait [#allocation4], 256  }
0x1d7c   :  { %7092 = vsyncadd [#allocation4], 4294967040 }
0x1d7d   :  { %7093 = dma.done.wait [#allocation19], 512  }
0x1d7e   :  { %7094 = vsyncadd [#allocation19], 4294966784 }
0x1d7f   :  { %5578 = vsyncpa [#allocation3], 1 }
0x1d80   :  { %5579 = vsyncpa [#allocation6], 1 }
0x1d81   :  { %5580 = vsyncpa [#allocation9], 1 }
0x1d82   :  { %5581 = vsyncpa [#allocation12], 1 }
0x1d83   :  { %5582 = vsyncpa [#allocation15], 1 }
0x1d84   :  { %5583 = vsyncpa [#allocation4], 1 }
0x1d85   :  { %5584 = vsyncpa [#allocation19], 1 }

</bundles_post_ra>
